<compile_context>
chip_gen: v6e
topology: v6e:2x2x1
jax: 0.10.0
libtpu: 0.0.40
codegen_flags: <defaults>
</compile_context>

<pallas_src>
import jax
import jax.numpy as jnp
import numpy as np
from jax.experimental import pallas as pl
from jax.experimental.pallas import tpu as pltpu

# ---------------- config (small, consistent with the module) ----------------
B = 2
IMAGE_DIM = 16            # input image is (B, 16, 16, 3)
OUT_CH = 64               # ImagePreprocessLayerGroup out_channels
TEXT_DIM = 256            # shrunk from 1024
HIDDEN = TEXT_DIM * 4     # 1024
IMG_OUT = 4               # img_output_shape
DIM_HALF = IMAGE_DIM // 2
PATCH_K = 2 * 2 * 3       # 12 (patchified 2x2 conv input)
CONCAT_DIM = DIM_HALF * DIM_HALF * OUT_CH + TEXT_DIM      # 4096 + 256 = 4352
DEC_DIM = CONCAT_DIM // (IMG_OUT ** 2)                    # 272
EPS = 1e-5


# ---------------- small in-kernel helpers (f32 math) ----------------
def _relu_ln(h, gamma, beta):
    """LayerNorm(relu(h)) in f32; gamma/beta are bf16 (1, N) values."""
    h = jnp.maximum(h, 0.0)
    mu = jnp.mean(h, axis=-1, keepdims=True)
    var = jnp.mean((h - mu) ** 2, axis=-1, keepdims=True)
    y = (h - mu) * jax.lax.rsqrt(var + EPS)
    return y * gamma.astype(jnp.float32) + beta.astype(jnp.float32)


def _batchnorm(h, gamma, beta):
    """BatchNorm over the row axis (all N*H*W positions), biased variance."""
    mu = jnp.mean(h, axis=0, keepdims=True)
    var = jnp.mean((h - mu) ** 2, axis=0, keepdims=True)
    y = (h - mu) * jax.lax.rsqrt(var + EPS)
    return y * gamma.astype(jnp.float32) + beta.astype(jnp.float32)


# ---------------- fused encoder kernel (text path + image path) ----------------
# grid = (5,): one step per streamed (1024,1024) LinearWithActivation weight
# (text layers 1..5).  Text layer 0 (256->1024), the full image path and the
# final text Linear (1024->256) run from resident small weights under pl.when.
def _encoder_kernel(x_ref, w0_ref, b0_ref, g0_ref, bt0_ref,
                    ws_ref, bs_ref, gs_ref, bts_ref,
                    wf_ref, bf_ref,
                    p_ref, iw0_ref, iws_ref, ibs_ref, igs_ref, ibts_ref,
                    t_o_ref, img_o_ref,
                    act_ref):
    l = pl.program_id(0)
    n_l = pl.num_programs(0)

    @pl.when(l == 0)
    def _():
        # ---- image path: conv(2x2/s2) + 4x conv(1x1), ReLU on all but the last,
        # BatchNorm after every conv.  Hidden under the first weight DMA.
        h = jnp.dot(p_ref[...], iw0_ref[...], preferred_element_type=jnp.float32)
        h = jnp.maximum(h + ibs_ref[0].astype(jnp.float32), 0.0)
        h = _batchnorm(h, igs_ref[0], ibts_ref[0])
        n = iws_ref.shape[0]
        for i in range(n):
            h = jnp.dot(h.astype(jnp.bfloat16), iws_ref[i],
                        preferred_element_type=jnp.float32)
            h = h + ibs_ref[i + 1].astype(jnp.float32)
            if i < n - 1:
                h = jnp.maximum(h, 0.0)
            h = _batchnorm(h, igs_ref[i + 1], ibts_ref[i + 1])
        img_o_ref[...] = h.astype(img_o_ref.dtype)

        # ---- text layer 0: Linear(256 -> 1024) + ReLU + LN (bf16 into the MXU)
        h0 = jnp.dot(x_ref[...], w0_ref[...], preferred_element_type=jnp.float32)
        h0 = h0 + b0_ref[...].astype(jnp.float32)
        act_ref[...] = _relu_ln(h0, g0_ref[...], bt0_ref[...]).astype(act_ref.dtype)

    # ---- text layers 1..5: Linear(1024 -> 1024) + ReLU + LN (streamed weight)
    h = jnp.dot(act_ref[...], ws_ref[0], preferred_element_type=jnp.float32)
    h = h + bs_ref[0].astype(jnp.float32)
    act_ref[...] = _relu_ln(h, gs_ref[0], bts_ref[0]).astype(act_ref.dtype)

    @pl.when(l == n_l - 1)
    def _():
        # ---- final text Linear(1024 -> 256), no activation / norm.
        out = jnp.dot(act_ref[...], wf_ref[...], preferred_element_type=jnp.float32)
        out = out + bf_ref[...].astype(jnp.float32)
        t_o_ref[...] = out.astype(t_o_ref.dtype)


def encoder_path(p_text, p_img, text_emb, patches):
    m = text_emb.shape[0]
    rows = patches.shape[0]
    n_stream = p_text["ws"].shape[0]  # 5
    return pl.pallas_call(
        _encoder_kernel,
        out_shape=(jax.ShapeDtypeStruct((m, TEXT_DIM), jnp.bfloat16),
                   jax.ShapeDtypeStruct((rows, OUT_CH), jnp.bfloat16)),
        grid=(n_stream,),
        in_specs=[
            # --- text path ---
            pl.BlockSpec((m, TEXT_DIM), lambda l: (0, 0)),          # x (resident)
            pl.BlockSpec((TEXT_DIM, HIDDEN), lambda l: (0, 0)),     # w0 (resident)
            pl.BlockSpec((1, HIDDEN), lambda l: (0, 0)),            # b0
            pl.BlockSpec((1, HIDDEN), lambda l: (0, 0)),            # g0
            pl.BlockSpec((1, HIDDEN), lambda l: (0, 0)),            # bt0
            pl.BlockSpec((1, HIDDEN, HIDDEN), lambda l: (l, 0, 0)), # streamed W
            pl.BlockSpec((1, 1, HIDDEN), lambda l: (l, 0, 0)),      # streamed b
            pl.BlockSpec((1, 1, HIDDEN), lambda l: (l, 0, 0)),      # streamed gamma
            pl.BlockSpec((1, 1, HIDDEN), lambda l: (l, 0, 0)),      # streamed beta
            pl.BlockSpec((HIDDEN, TEXT_DIM), lambda l: (0, 0)),     # wf (resident)
            pl.BlockSpec((1, TEXT_DIM), lambda l: (0, 0)),          # bf
            # --- image path (all resident, tiny) ---
            pl.BlockSpec((rows, PATCH_K), lambda l: (0, 0)),        # patches
            pl.BlockSpec((PATCH_K, OUT_CH), lambda l: (0, 0)),      # conv0 weight
            pl.BlockSpec((4, OUT_CH, OUT_CH), lambda l: (0, 0, 0)), # 1x1 conv weights
            pl.BlockSpec((5, 1, OUT_CH), lambda l: (0, 0, 0)),      # conv biases
            pl.BlockSpec((5, 1, OUT_CH), lambda l: (0, 0, 0)),      # BN gammas
            pl.BlockSpec((5, 1, OUT_CH), lambda l: (0, 0, 0)),      # BN betas
        ],
        out_specs=(pl.BlockSpec((m, TEXT_DIM), lambda l: (0, 0)),
                   pl.BlockSpec((rows, OUT_CH), lambda l: (0, 0))),
        scratch_shapes=[pltpu.VMEM((m, HIDDEN), jnp.bfloat16)],
        compiler_params=pltpu.CompilerParams(
            dimension_semantics=("arbitrary",)),
    )(text_emb,
      p_text["w0"], p_text["b0"], p_text["g0"], p_text["bt0"],
      p_text["ws"], p_text["bs"], p_text["gs"], p_text["bts"],
      p_text["wf"], p_text["bf"],
      patches,
      p_img["w0"], p_img["ws"], p_img["bs"], p_img["gs"], p_img["bts"])


# ---------------- fused decoder kernel ----------------
# 2x (Linear + ReLU + LN) + Linear(DEC_DIM, 3) in one kernel.
def _decoder_kernel(x_ref, ws_ref, bs_ref, gs_ref, bts_ref, wo_ref, bo_ref, o_ref):
    h = x_ref[...]                                   # (32, 272) bf16
    for i in range(ws_ref.shape[0]):
        hf = jnp.dot(h, ws_ref[i], preferred_element_type=jnp.float32)
        hf = hf + bs_ref[i].astype(jnp.float32)
        hf = _relu_ln(hf, gs_ref[i], bts_ref[i])
        h = hf.astype(jnp.bfloat16)
    out = jnp.dot(h, wo_ref[...], preferred_element_type=jnp.float32)
    out = out + bo_ref[...].astype(jnp.float32)
    o_ref[...] = out.astype(o_ref.dtype)


def decoder_path(p, x):
    m = x.shape[0]
    return pl.pallas_call(
        _decoder_kernel,
        out_shape=jax.ShapeDtypeStruct((m, 3), jnp.bfloat16),
        grid=(1,),
        in_specs=[
            pl.BlockSpec(x.shape, lambda i: (0, 0)),
            pl.BlockSpec(p["ws"].shape, lambda i: (0, 0, 0)),
            pl.BlockSpec(p["bs"].shape, lambda i: (0, 0, 0)),
            pl.BlockSpec(p["gs"].shape, lambda i: (0, 0, 0)),
            pl.BlockSpec(p["bts"].shape, lambda i: (0, 0, 0)),
            pl.BlockSpec(p["wo"].shape, lambda i: (0, 0)),
            pl.BlockSpec(p["bo"].shape, lambda i: (0, 0)),
        ],
        out_specs=pl.BlockSpec((m, 3), lambda i: (0, 0)),
        compiler_params=pltpu.CompilerParams(
            dimension_semantics=("arbitrary",)),
    )(x, p["ws"], p["bs"], p["gs"], p["bts"], p["wo"], p["bo"])


# ---------------- parameter init (deterministic, synthetic) ----------------
def _init_linear(key, in_f, out_f):
    k1, k2 = jax.random.split(key)
    bound = 1.0 / float(np.sqrt(in_f))
    w = jax.random.uniform(k1, (in_f, out_f), jnp.float32, -bound, bound).astype(jnp.bfloat16)
    b = jax.random.uniform(k2, (1, out_f), jnp.float32, -bound, bound).astype(jnp.bfloat16)
    return w, b


def _norm_params(n):
    return jnp.ones((1, n), jnp.bfloat16), jnp.zeros((1, n), jnp.bfloat16)


def init_params(key):
    keys = iter(jax.random.split(key, 64))
    params = {}

    # ---- text path: LWA(256->1024), 5x LWA(1024->1024), Linear(1024->256) ----
    w0, b0 = _init_linear(next(keys), TEXT_DIM, HIDDEN)
    g0, bt0 = _norm_params(HIDDEN)
    ws, bs, gs, bts = [], [], [], []
    for _ in range(5):
        w, b = _init_linear(next(keys), HIDDEN, HIDDEN)
        g, bt = _norm_params(HIDDEN)
        ws.append(w); bs.append(b); gs.append(g); bts.append(bt)
    wf, bf = _init_linear(next(keys), HIDDEN, TEXT_DIM)
    params["text"] = dict(
        w0=w0, b0=b0, g0=g0, bt0=bt0,
        ws=jnp.stack(ws),            # (5, 1024, 1024)
        bs=jnp.stack(bs),            # (5, 1, 1024)
        gs=jnp.stack(gs),
        bts=jnp.stack(bts),
        wf=wf, bf=bf)

    # ---- image path: conv(2x2/s2, 12->64)+BN, 4x conv(1x1, 64->64)+BN ----
    iw0, ib0 = _init_linear(next(keys), PATCH_K, OUT_CH)
    ig0, ibt0 = _norm_params(OUT_CH)
    iws, ibs, igs, ibts = [], [ib0], [ig0], [ibt0]
    for _ in range(4):
        w, b = _init_linear(next(keys), OUT_CH, OUT_CH)
        g, bt = _norm_params(OUT_CH)
        iws.append(w); ibs.append(b); igs.append(g); ibts.append(bt)
    params["img"] = dict(
        w0=iw0,
        ws=jnp.stack(iws),           # (4, 64, 64)
        bs=jnp.stack(ibs),           # (5, 1, 64)
        gs=jnp.stack(igs),
        bts=jnp.stack(ibts))

    # ---- decoder: 2x (Linear+ReLU+LN) + Linear(DEC_DIM, 3) ----
    dws, dbs, dgs, dbts = [], [], [], []
    for _ in range(2):
        w, b = _init_linear(next(keys), DEC_DIM, DEC_DIM)
        g, bt = _norm_params(DEC_DIM)
        dws.append(w); dbs.append(b); dgs.append(g); dbts.append(bt)
    wo, bo = _init_linear(next(keys), DEC_DIM, 3)
    params["dec"] = dict(
        ws=jnp.stack(dws),           # (2, 272, 272)
        bs=jnp.stack(dbs),           # (2, 1, 272)
        gs=jnp.stack(dgs),
        bts=jnp.stack(dbts),
        wo=wo, bo=bo)
    return params


# ---------------- forward ----------------
@jax.jit
def forward(params, image, text_emb):
    # ---- NHWC -> 2x2/s2 patchify for the first conv (B*H/2*W/2, 12) ----
    b_, h_, w_, c_ = image.shape
    p = image.reshape(b_, h_ // 2, 2, w_ // 2, 2, c_)
    p = jnp.transpose(p, (0, 1, 3, 2, 4, 5))                # (B, H/2, W/2, kh, kw, C)
    p = p.reshape(b_ * DIM_HALF * DIM_HALF, PATCH_K)        # (128, 12)

    # ---- fused encoder: text stream + image convs in ONE pallas_call ----
    t, x = encoder_path(params["text"], params["img"], text_emb, p)
    # t: (B, TEXT_DIM) bf16, x: (B*dim*dim, 64) bf16

    # flatten image features in NCHW (channel-major) order, matching PyTorch
    # `.reshape(B, -1)` on NCHW tensors.
    x = x.reshape(b_, DIM_HALF * DIM_HALF, OUT_CH)
    x = jnp.transpose(x, (0, 2, 1)).reshape(b_, -1)         # (B, 64*dim*dim)

    # ---- concat + master layers ----
    src = jnp.concatenate([x, t], axis=-1)                  # (B, CONCAT_DIM)
    # TODO(synk): SquareNetHighMemory master_layers are undefined in the source; identity here.

    # ---- decoder (one fused pallas_call) ----
    src = src.reshape(b_ * IMG_OUT * IMG_OUT, DEC_DIM)      # (32, 272)
    out = decoder_path(params["dec"], src)                  # (32, 3)
    return out.reshape(b_, IMG_OUT, IMG_OUT, 3)


if __name__ == "__main__":
    key = jax.random.PRNGKey(0)
    k_img, k_txt, k_par = jax.random.split(key, 3)

    image = jax.random.normal(k_img, (B, IMAGE_DIM, IMAGE_DIM, 3), jnp.float32).astype(jnp.bfloat16)
    text_emb = jax.random.normal(k_txt, (B, TEXT_DIM), jnp.float32).astype(jnp.bfloat16)
    params = init_params(k_par)

    out = forward(params, image, text_emb)
    out = jax.block_until_ready(out)
    assert out.shape == (B, IMG_OUT, IMG_OUT, 3), out.shape
    assert out.dtype == jnp.bfloat16
    print("KERNEL_OK")
</pallas_src>

<mosaic_0001>
module attributes {stable_mosaic.version = 11 : i64} {
  func.func @_encoder_kernel(%arg0: i32, %arg1: memref<2x256xbf16, #tpu.memory_space<vmem>>, %arg2: memref<256x1024xbf16, #tpu.memory_space<vmem>>, %arg3: memref<1x1024xbf16, #tpu.memory_space<vmem>>, %arg4: memref<1x1024xbf16, #tpu.memory_space<vmem>>, %arg5: memref<1x1024xbf16, #tpu.memory_space<vmem>>, %arg6: memref<1x1024x1024xbf16, #tpu.memory_space<vmem>>, %arg7: memref<1x1x1024xbf16, #tpu.memory_space<vmem>>, %arg8: memref<1x1x1024xbf16, #tpu.memory_space<vmem>>, %arg9: memref<1x1x1024xbf16, #tpu.memory_space<vmem>>, %arg10: memref<1024x256xbf16, #tpu.memory_space<vmem>>, %arg11: memref<1x256xbf16, #tpu.memory_space<vmem>>, %arg12: memref<128x12xbf16, #tpu.memory_space<vmem>>, %arg13: memref<12x64xbf16, #tpu.memory_space<vmem>>, %arg14: memref<4x64x64xbf16, #tpu.memory_space<vmem>>, %arg15: memref<5x1x64xbf16, #tpu.memory_space<vmem>>, %arg16: memref<5x1x64xbf16, #tpu.memory_space<vmem>>, %arg17: memref<5x1x64xbf16, #tpu.memory_space<vmem>>, %arg18: memref<2x256xbf16, #tpu.memory_space<vmem>>, %arg19: memref<128x64xbf16, #tpu.memory_space<vmem>>, %arg20: memref<2x1024xbf16, #tpu.memory_space<vmem>>) attributes {dimension_semantics = [#tpu.dimension_semantics<arbitrary>], iteration_bounds = array<i64: 5>, scalar_prefetch = 0 : i64, scratch_operands = 1 : i64, tpu.core_type = #tpu.core_type<tc>, window_params = [{pipeline_mode = #tpu.pipeline_mode<synchronous>, transform_indices = @transform_0, window_bounds = array<i64: 2, 256>}, {pipeline_mode = #tpu.pipeline_mode<synchronous>, transform_indices = @transform_1, window_bounds = array<i64: 256, 1024>}, {pipeline_mode = #tpu.pipeline_mode<synchronous>, transform_indices = @transform_2, window_bounds = array<i64: 1, 1024>}, {pipeline_mode = #tpu.pipeline_mode<synchronous>, transform_indices = @transform_3, window_bounds = array<i64: 1, 1024>}, {pipeline_mode = #tpu.pipeline_mode<synchronous>, transform_indices = @transform_4, window_bounds = array<i64: 1, 1024>}, {transform_indices = @transform_5, window_bounds = array<i64: 1, 1024, 1024>}, {transform_indices = @transform_6, window_bounds = array<i64: 1, 1, 1024>}, {transform_indices = @transform_7, window_bounds = array<i64: 1, 1, 1024>}, {transform_indices = @transform_8, window_bounds = array<i64: 1, 1, 1024>}, {pipeline_mode = #tpu.pipeline_mode<synchronous>, transform_indices = @transform_9, window_bounds = array<i64: 1024, 256>}, {pipeline_mode = #tpu.pipeline_mode<synchronous>, transform_indices = @transform_10, window_bounds = array<i64: 1, 256>}, {pipeline_mode = #tpu.pipeline_mode<synchronous>, transform_indices = @transform_11, window_bounds = array<i64: 128, 12>}, {pipeline_mode = #tpu.pipeline_mode<synchronous>, transform_indices = @transform_12, window_bounds = array<i64: 12, 64>}, {pipeline_mode = #tpu.pipeline_mode<synchronous>, transform_indices = @transform_13, window_bounds = array<i64: 4, 64, 64>}, {pipeline_mode = #tpu.pipeline_mode<synchronous>, transform_indices = @transform_14, window_bounds = array<i64: 5, 1, 64>}, {pipeline_mode = #tpu.pipeline_mode<synchronous>, transform_indices = @transform_15, window_bounds = array<i64: 5, 1, 64>}, {pipeline_mode = #tpu.pipeline_mode<synchronous>, transform_indices = @transform_16, window_bounds = array<i64: 5, 1, 64>}, {pipeline_mode = #tpu.pipeline_mode<synchronous>, transform_indices = @transform_17, window_bounds = array<i64: 2, 256>}, {pipeline_mode = #tpu.pipeline_mode<synchronous>, transform_indices = @transform_18, window_bounds = array<i64: 128, 64>}]} {
    %c0_i32 = arith.constant 0 : i32
    %0 = arith.cmpi eq, %arg0, %c0_i32 : i32
    %1 = arith.extui %0 : i1 to i32
    %c0_i32_0 = arith.constant 0 : i32
    %2 = arith.cmpi ne, %1, %c0_i32_0 : i32
    scf.if %2 {
      %c0_23 = arith.constant 0 : index
      %c0_24 = arith.constant 0 : index
      %47 = vector.load %arg12[%c0_23, %c0_24] : memref<128x12xbf16, #tpu.memory_space<vmem>>, vector<128x12xbf16>
      %c0_25 = arith.constant 0 : index
      %c0_26 = arith.constant 0 : index
      %48 = vector.load %arg13[%c0_25, %c0_26] : memref<12x64xbf16, #tpu.memory_space<vmem>>, vector<12x64xbf16>
      %cst_27 = arith.constant dense<0.000000e+00> : vector<128x64xf32>
      %49 = tpu.matmul %47, %48, %cst_27 {dimension_numbers = #tpu.dot_dimension_numbers<[1], [0], [0], [1], [0, 0, 1, 1], [], []>} : vector<128x12xbf16>, vector<12x64xbf16>, vector<128x64xf32> -> vector<128x64xf32>
      %c0_28 = arith.constant 0 : index
      %c0_29 = arith.constant 0 : index
      %c0_30 = arith.constant 0 : index
      %50 = vector.load %arg15[%c0_28, %c0_29, %c0_30] : memref<5x1x64xbf16, #tpu.memory_space<vmem>>, vector<1x1x64xbf16>
      %51 = vector.shape_cast %50 : vector<1x1x64xbf16> to vector<1x64xbf16>
      %52 = arith.extf %51 : vector<1x64xbf16> to vector<1x64xf32>
      %53 = vector.broadcast %52 : vector<1x64xf32> to vector<128x64xf32>
      %54 = arith.addf %49, %53 : vector<128x64xf32>
      %cst_31 = arith.constant 0.000000e+00 : f32
      %55 = vector.broadcast %cst_31 : f32 to vector<128x64xf32>
      %56 = arith.maximumf %54, %55 : vector<128x64xf32>
      %c0_32 = arith.constant 0 : index
      %c0_33 = arith.constant 0 : index
      %c0_34 = arith.constant 0 : index
      %57 = vector.load %arg16[%c0_32, %c0_33, %c0_34] : memref<5x1x64xbf16, #tpu.memory_space<vmem>>, vector<1x1x64xbf16>
      %58 = vector.shape_cast %57 : vector<1x1x64xbf16> to vector<1x64xbf16>
      %c0_35 = arith.constant 0 : index
      %c0_36 = arith.constant 0 : index
      %c0_37 = arith.constant 0 : index
      %59 = vector.load %arg17[%c0_35, %c0_36, %c0_37] : memref<5x1x64xbf16, #tpu.memory_space<vmem>>, vector<1x1x64xbf16>
      %60 = vector.shape_cast %59 : vector<1x1x64xbf16> to vector<1x64xbf16>
      %cst_38 = arith.constant dense<0.000000e+00> : vector<64xf32>
      %61 = vector.multi_reduction <add>, %56, %cst_38 [0] : vector<128x64xf32> to vector<64xf32>
      %62 = vector.shape_cast %61 : vector<64xf32> to vector<1x64xf32>
      %cst_39 = arith.constant 1.280000e+02 : f32
      %63 = vector.broadcast %cst_39 : f32 to vector<1x64xf32>
      %64 = arith.divf %62, %63 : vector<1x64xf32>
      %65 = vector.broadcast %64 : vector<1x64xf32> to vector<128x64xf32>
      %66 = arith.subf %56, %65 : vector<128x64xf32>
      %67 = arith.mulf %66, %66 : vector<128x64xf32>
      %cst_40 = arith.constant dense<0.000000e+00> : vector<64xf32>
      %68 = vector.multi_reduction <add>, %67, %cst_40 [0] : vector<128x64xf32> to vector<64xf32>
      %69 = vector.shape_cast %68 : vector<64xf32> to vector<1x64xf32>
      %cst_41 = arith.constant 1.280000e+02 : f32
      %70 = vector.broadcast %cst_41 : f32 to vector<1x64xf32>
      %71 = arith.divf %69, %70 : vector<1x64xf32>
      %72 = vector.broadcast %64 : vector<1x64xf32> to vector<128x64xf32>
      %73 = arith.subf %56, %72 : vector<128x64xf32>
      %cst_42 = arith.constant 9.99999974E-6 : f32
      %74 = vector.broadcast %cst_42 : f32 to vector<1x64xf32>
      %75 = arith.addf %71, %74 : vector<1x64xf32>
      %76 = math.rsqrt %75 : vector<1x64xf32>
      %77 = vector.broadcast %76 : vector<1x64xf32> to vector<128x64xf32>
      %78 = arith.mulf %73, %77 : vector<128x64xf32>
      %79 = arith.extf %58 : vector<1x64xbf16> to vector<1x64xf32>
      %80 = vector.broadcast %79 : vector<1x64xf32> to vector<128x64xf32>
      %81 = arith.mulf %78, %80 : vector<128x64xf32>
      %82 = arith.extf %60 : vector<1x64xbf16> to vector<1x64xf32>
      %83 = vector.broadcast %82 : vector<1x64xf32> to vector<128x64xf32>
      %84 = arith.addf %81, %83 : vector<128x64xf32>
      %85 = arith.truncf %84 : vector<128x64xf32> to vector<128x64xbf16>
      %c0_43 = arith.constant 0 : index
      %c0_44 = arith.constant 0 : index
      %c0_45 = arith.constant 0 : index
      %86 = vector.load %arg14[%c0_43, %c0_44, %c0_45] : memref<4x64x64xbf16, #tpu.memory_space<vmem>>, vector<1x64x64xbf16>
      %87 = vector.shape_cast %86 : vector<1x64x64xbf16> to vector<64x64xbf16>
      %cst_46 = arith.constant dense<0.000000e+00> : vector<128x64xf32>
      %88 = tpu.matmul %85, %87, %cst_46 {dimension_numbers = #tpu.dot_dimension_numbers<[1], [0], [0], [1], [0, 0, 1, 1], [], []>} : vector<128x64xbf16>, vector<64x64xbf16>, vector<128x64xf32> -> vector<128x64xf32>
      %c1 = arith.constant 1 : index
      %c0_47 = arith.constant 0 : index
      %c0_48 = arith.constant 0 : index
      %89 = vector.load %arg15[%c1, %c0_47, %c0_48] : memref<5x1x64xbf16, #tpu.memory_space<vmem>>, vector<1x1x64xbf16>
      %90 = vector.shape_cast %89 : vector<1x1x64xbf16> to vector<1x64xbf16>
      %91 = arith.extf %90 : vector<1x64xbf16> to vector<1x64xf32>
      %92 = vector.broadcast %91 : vector<1x64xf32> to vector<128x64xf32>
      %93 = arith.addf %88, %92 : vector<128x64xf32>
      %cst_49 = arith.constant 0.000000e+00 : f32
      %94 = vector.broadcast %cst_49 : f32 to vector<128x64xf32>
      %95 = arith.maximumf %93, %94 : vector<128x64xf32>
      %c1_50 = arith.constant 1 : index
      %c0_51 = arith.constant 0 : index
      %c0_52 = arith.constant 0 : index
      %96 = vector.load %arg16[%c1_50, %c0_51, %c0_52] : memref<5x1x64xbf16, #tpu.memory_space<vmem>>, vector<1x1x64xbf16>
      %97 = vector.shape_cast %96 : vector<1x1x64xbf16> to vector<1x64xbf16>
      %c1_53 = arith.constant 1 : index
      %c0_54 = arith.constant 0 : index
      %c0_55 = arith.constant 0 : index
      %98 = vector.load %arg17[%c1_53, %c0_54, %c0_55] : memref<5x1x64xbf16, #tpu.memory_space<vmem>>, vector<1x1x64xbf16>
      %99 = vector.shape_cast %98 : vector<1x1x64xbf16> to vector<1x64xbf16>
      %cst_56 = arith.constant dense<0.000000e+00> : vector<64xf32>
      %100 = vector.multi_reduction <add>, %95, %cst_56 [0] : vector<128x64xf32> to vector<64xf32>
      %101 = vector.shape_cast %100 : vector<64xf32> to vector<1x64xf32>
      %cst_57 = arith.constant 1.280000e+02 : f32
      %102 = vector.broadcast %cst_57 : f32 to vector<1x64xf32>
      %103 = arith.divf %101, %102 : vector<1x64xf32>
      %104 = vector.broadcast %103 : vector<1x64xf32> to vector<128x64xf32>
      %105 = arith.subf %95, %104 : vector<128x64xf32>
      %106 = arith.mulf %105, %105 : vector<128x64xf32>
      %cst_58 = arith.constant dense<0.000000e+00> : vector<64xf32>
      %107 = vector.multi_reduction <add>, %106, %cst_58 [0] : vector<128x64xf32> to vector<64xf32>
      %108 = vector.shape_cast %107 : vector<64xf32> to vector<1x64xf32>
      %cst_59 = arith.constant 1.280000e+02 : f32
      %109 = vector.broadcast %cst_59 : f32 to vector<1x64xf32>
      %110 = arith.divf %108, %109 : vector<1x64xf32>
      %111 = vector.broadcast %103 : vector<1x64xf32> to vector<128x64xf32>
      %112 = arith.subf %95, %111 : vector<128x64xf32>
      %cst_60 = arith.constant 9.99999974E-6 : f32
      %113 = vector.broadcast %cst_60 : f32 to vector<1x64xf32>
      %114 = arith.addf %110, %113 : vector<1x64xf32>
      %115 = math.rsqrt %114 : vector<1x64xf32>
      %116 = vector.broadcast %115 : vector<1x64xf32> to vector<128x64xf32>
      %117 = arith.mulf %112, %116 : vector<128x64xf32>
      %118 = arith.extf %97 : vector<1x64xbf16> to vector<1x64xf32>
      %119 = vector.broadcast %118 : vector<1x64xf32> to vector<128x64xf32>
      %120 = arith.mulf %117, %119 : vector<128x64xf32>
      %121 = arith.extf %99 : vector<1x64xbf16> to vector<1x64xf32>
      %122 = vector.broadcast %121 : vector<1x64xf32> to vector<128x64xf32>
      %123 = arith.addf %120, %122 : vector<128x64xf32>
      %124 = arith.truncf %123 : vector<128x64xf32> to vector<128x64xbf16>
      %c1_61 = arith.constant 1 : index
      %c0_62 = arith.constant 0 : index
      %c0_63 = arith.constant 0 : index
      %125 = vector.load %arg14[%c1_61, %c0_62, %c0_63] : memref<4x64x64xbf16, #tpu.memory_space<vmem>>, vector<1x64x64xbf16>
      %126 = vector.shape_cast %125 : vector<1x64x64xbf16> to vector<64x64xbf16>
      %cst_64 = arith.constant dense<0.000000e+00> : vector<128x64xf32>
      %127 = tpu.matmul %124, %126, %cst_64 {dimension_numbers = #tpu.dot_dimension_numbers<[1], [0], [0], [1], [0, 0, 1, 1], [], []>} : vector<128x64xbf16>, vector<64x64xbf16>, vector<128x64xf32> -> vector<128x64xf32>
      %c2 = arith.constant 2 : index
      %c0_65 = arith.constant 0 : index
      %c0_66 = arith.constant 0 : index
      %128 = vector.load %arg15[%c2, %c0_65, %c0_66] : memref<5x1x64xbf16, #tpu.memory_space<vmem>>, vector<1x1x64xbf16>
      %129 = vector.shape_cast %128 : vector<1x1x64xbf16> to vector<1x64xbf16>
      %130 = arith.extf %129 : vector<1x64xbf16> to vector<1x64xf32>
      %131 = vector.broadcast %130 : vector<1x64xf32> to vector<128x64xf32>
      %132 = arith.addf %127, %131 : vector<128x64xf32>
      %cst_67 = arith.constant 0.000000e+00 : f32
      %133 = vector.broadcast %cst_67 : f32 to vector<128x64xf32>
      %134 = arith.maximumf %132, %133 : vector<128x64xf32>
      %c2_68 = arith.constant 2 : index
      %c0_69 = arith.constant 0 : index
      %c0_70 = arith.constant 0 : index
      %135 = vector.load %arg16[%c2_68, %c0_69, %c0_70] : memref<5x1x64xbf16, #tpu.memory_space<vmem>>, vector<1x1x64xbf16>
      %136 = vector.shape_cast %135 : vector<1x1x64xbf16> to vector<1x64xbf16>
      %c2_71 = arith.constant 2 : index
      %c0_72 = arith.constant 0 : index
      %c0_73 = arith.constant 0 : index
      %137 = vector.load %arg17[%c2_71, %c0_72, %c0_73] : memref<5x1x64xbf16, #tpu.memory_space<vmem>>, vector<1x1x64xbf16>
      %138 = vector.shape_cast %137 : vector<1x1x64xbf16> to vector<1x64xbf16>
      %cst_74 = arith.constant dense<0.000000e+00> : vector<64xf32>
      %139 = vector.multi_reduction <add>, %134, %cst_74 [0] : vector<128x64xf32> to vector<64xf32>
      %140 = vector.shape_cast %139 : vector<64xf32> to vector<1x64xf32>
      %cst_75 = arith.constant 1.280000e+02 : f32
      %141 = vector.broadcast %cst_75 : f32 to vector<1x64xf32>
      %142 = arith.divf %140, %141 : vector<1x64xf32>
      %143 = vector.broadcast %142 : vector<1x64xf32> to vector<128x64xf32>
      %144 = arith.subf %134, %143 : vector<128x64xf32>
      %145 = arith.mulf %144, %144 : vector<128x64xf32>
      %cst_76 = arith.constant dense<0.000000e+00> : vector<64xf32>
      %146 = vector.multi_reduction <add>, %145, %cst_76 [0] : vector<128x64xf32> to vector<64xf32>
      %147 = vector.shape_cast %146 : vector<64xf32> to vector<1x64xf32>
      %cst_77 = arith.constant 1.280000e+02 : f32
      %148 = vector.broadcast %cst_77 : f32 to vector<1x64xf32>
      %149 = arith.divf %147, %148 : vector<1x64xf32>
      %150 = vector.broadcast %142 : vector<1x64xf32> to vector<128x64xf32>
      %151 = arith.subf %134, %150 : vector<128x64xf32>
      %cst_78 = arith.constant 9.99999974E-6 : f32
      %152 = vector.broadcast %cst_78 : f32 to vector<1x64xf32>
      %153 = arith.addf %149, %152 : vector<1x64xf32>
      %154 = math.rsqrt %153 : vector<1x64xf32>
      %155 = vector.broadcast %154 : vector<1x64xf32> to vector<128x64xf32>
      %156 = arith.mulf %151, %155 : vector<128x64xf32>
      %157 = arith.extf %136 : vector<1x64xbf16> to vector<1x64xf32>
      %158 = vector.broadcast %157 : vector<1x64xf32> to vector<128x64xf32>
      %159 = arith.mulf %156, %158 : vector<128x64xf32>
      %160 = arith.extf %138 : vector<1x64xbf16> to vector<1x64xf32>
      %161 = vector.broadcast %160 : vector<1x64xf32> to vector<128x64xf32>
      %162 = arith.addf %159, %161 : vector<128x64xf32>
      %163 = arith.truncf %162 : vector<128x64xf32> to vector<128x64xbf16>
      %c2_79 = arith.constant 2 : index
      %c0_80 = arith.constant 0 : index
      %c0_81 = arith.constant 0 : index
      %164 = vector.load %arg14[%c2_79, %c0_80, %c0_81] : memref<4x64x64xbf16, #tpu.memory_space<vmem>>, vector<1x64x64xbf16>
      %165 = vector.shape_cast %164 : vector<1x64x64xbf16> to vector<64x64xbf16>
      %cst_82 = arith.constant dense<0.000000e+00> : vector<128x64xf32>
      %166 = tpu.matmul %163, %165, %cst_82 {dimension_numbers = #tpu.dot_dimension_numbers<[1], [0], [0], [1], [0, 0, 1, 1], [], []>} : vector<128x64xbf16>, vector<64x64xbf16>, vector<128x64xf32> -> vector<128x64xf32>
      %c3 = arith.constant 3 : index
      %c0_83 = arith.constant 0 : index
      %c0_84 = arith.constant 0 : index
      %167 = vector.load %arg15[%c3, %c0_83, %c0_84] : memref<5x1x64xbf16, #tpu.memory_space<vmem>>, vector<1x1x64xbf16>
      %168 = vector.shape_cast %167 : vector<1x1x64xbf16> to vector<1x64xbf16>
      %169 = arith.extf %168 : vector<1x64xbf16> to vector<1x64xf32>
      %170 = vector.broadcast %169 : vector<1x64xf32> to vector<128x64xf32>
      %171 = arith.addf %166, %170 : vector<128x64xf32>
      %cst_85 = arith.constant 0.000000e+00 : f32
      %172 = vector.broadcast %cst_85 : f32 to vector<128x64xf32>
      %173 = arith.maximumf %171, %172 : vector<128x64xf32>
      %c3_86 = arith.constant 3 : index
      %c0_87 = arith.constant 0 : index
      %c0_88 = arith.constant 0 : index
      %174 = vector.load %arg16[%c3_86, %c0_87, %c0_88] : memref<5x1x64xbf16, #tpu.memory_space<vmem>>, vector<1x1x64xbf16>
      %175 = vector.shape_cast %174 : vector<1x1x64xbf16> to vector<1x64xbf16>
      %c3_89 = arith.constant 3 : index
      %c0_90 = arith.constant 0 : index
      %c0_91 = arith.constant 0 : index
      %176 = vector.load %arg17[%c3_89, %c0_90, %c0_91] : memref<5x1x64xbf16, #tpu.memory_space<vmem>>, vector<1x1x64xbf16>
      %177 = vector.shape_cast %176 : vector<1x1x64xbf16> to vector<1x64xbf16>
      %cst_92 = arith.constant dense<0.000000e+00> : vector<64xf32>
      %178 = vector.multi_reduction <add>, %173, %cst_92 [0] : vector<128x64xf32> to vector<64xf32>
      %179 = vector.shape_cast %178 : vector<64xf32> to vector<1x64xf32>
      %cst_93 = arith.constant 1.280000e+02 : f32
      %180 = vector.broadcast %cst_93 : f32 to vector<1x64xf32>
      %181 = arith.divf %179, %180 : vector<1x64xf32>
      %182 = vector.broadcast %181 : vector<1x64xf32> to vector<128x64xf32>
      %183 = arith.subf %173, %182 : vector<128x64xf32>
      %184 = arith.mulf %183, %183 : vector<128x64xf32>
      %cst_94 = arith.constant dense<0.000000e+00> : vector<64xf32>
      %185 = vector.multi_reduction <add>, %184, %cst_94 [0] : vector<128x64xf32> to vector<64xf32>
      %186 = vector.shape_cast %185 : vector<64xf32> to vector<1x64xf32>
      %cst_95 = arith.constant 1.280000e+02 : f32
      %187 = vector.broadcast %cst_95 : f32 to vector<1x64xf32>
      %188 = arith.divf %186, %187 : vector<1x64xf32>
      %189 = vector.broadcast %181 : vector<1x64xf32> to vector<128x64xf32>
      %190 = arith.subf %173, %189 : vector<128x64xf32>
      %cst_96 = arith.constant 9.99999974E-6 : f32
      %191 = vector.broadcast %cst_96 : f32 to vector<1x64xf32>
      %192 = arith.addf %188, %191 : vector<1x64xf32>
      %193 = math.rsqrt %192 : vector<1x64xf32>
      %194 = vector.broadcast %193 : vector<1x64xf32> to vector<128x64xf32>
      %195 = arith.mulf %190, %194 : vector<128x64xf32>
      %196 = arith.extf %175 : vector<1x64xbf16> to vector<1x64xf32>
      %197 = vector.broadcast %196 : vector<1x64xf32> to vector<128x64xf32>
      %198 = arith.mulf %195, %197 : vector<128x64xf32>
      %199 = arith.extf %177 : vector<1x64xbf16> to vector<1x64xf32>
      %200 = vector.broadcast %199 : vector<1x64xf32> to vector<128x64xf32>
      %201 = arith.addf %198, %200 : vector<128x64xf32>
      %202 = arith.truncf %201 : vector<128x64xf32> to vector<128x64xbf16>
      %c3_97 = arith.constant 3 : index
      %c0_98 = arith.constant 0 : index
      %c0_99 = arith.constant 0 : index
      %203 = vector.load %arg14[%c3_97, %c0_98, %c0_99] : memref<4x64x64xbf16, #tpu.memory_space<vmem>>, vector<1x64x64xbf16>
      %204 = vector.shape_cast %203 : vector<1x64x64xbf16> to vector<64x64xbf16>
      %cst_100 = arith.constant dense<0.000000e+00> : vector<128x64xf32>
      %205 = tpu.matmul %202, %204, %cst_100 {dimension_numbers = #tpu.dot_dimension_numbers<[1], [0], [0], [1], [0, 0, 1, 1], [], []>} : vector<128x64xbf16>, vector<64x64xbf16>, vector<128x64xf32> -> vector<128x64xf32>
      %c4 = arith.constant 4 : index
      %c0_101 = arith.constant 0 : index
      %c0_102 = arith.constant 0 : index
      %206 = vector.load %arg15[%c4, %c0_101, %c0_102] : memref<5x1x64xbf16, #tpu.memory_space<vmem>>, vector<1x1x64xbf16>
      %207 = vector.shape_cast %206 : vector<1x1x64xbf16> to vector<1x64xbf16>
      %208 = arith.extf %207 : vector<1x64xbf16> to vector<1x64xf32>
      %209 = vector.broadcast %208 : vector<1x64xf32> to vector<128x64xf32>
      %210 = arith.addf %205, %209 : vector<128x64xf32>
      %c4_103 = arith.constant 4 : index
      %c0_104 = arith.constant 0 : index
      %c0_105 = arith.constant 0 : index
      %211 = vector.load %arg16[%c4_103, %c0_104, %c0_105] : memref<5x1x64xbf16, #tpu.memory_space<vmem>>, vector<1x1x64xbf16>
      %212 = vector.shape_cast %211 : vector<1x1x64xbf16> to vector<1x64xbf16>
      %c4_106 = arith.constant 4 : index
      %c0_107 = arith.constant 0 : index
      %c0_108 = arith.constant 0 : index
      %213 = vector.load %arg17[%c4_106, %c0_107, %c0_108] : memref<5x1x64xbf16, #tpu.memory_space<vmem>>, vector<1x1x64xbf16>
      %214 = vector.shape_cast %213 : vector<1x1x64xbf16> to vector<1x64xbf16>
      %cst_109 = arith.constant dense<0.000000e+00> : vector<64xf32>
      %215 = vector.multi_reduction <add>, %210, %cst_109 [0] : vector<128x64xf32> to vector<64xf32>
      %216 = vector.shape_cast %215 : vector<64xf32> to vector<1x64xf32>
      %cst_110 = arith.constant 1.280000e+02 : f32
      %217 = vector.broadcast %cst_110 : f32 to vector<1x64xf32>
      %218 = arith.divf %216, %217 : vector<1x64xf32>
      %219 = vector.broadcast %218 : vector<1x64xf32> to vector<128x64xf32>
      %220 = arith.subf %210, %219 : vector<128x64xf32>
      %221 = arith.mulf %220, %220 : vector<128x64xf32>
      %cst_111 = arith.constant dense<0.000000e+00> : vector<64xf32>
      %222 = vector.multi_reduction <add>, %221, %cst_111 [0] : vector<128x64xf32> to vector<64xf32>
      %223 = vector.shape_cast %222 : vector<64xf32> to vector<1x64xf32>
      %cst_112 = arith.constant 1.280000e+02 : f32
      %224 = vector.broadcast %cst_112 : f32 to vector<1x64xf32>
      %225 = arith.divf %223, %224 : vector<1x64xf32>
      %226 = vector.broadcast %218 : vector<1x64xf32> to vector<128x64xf32>
      %227 = arith.subf %210, %226 : vector<128x64xf32>
      %cst_113 = arith.constant 9.99999974E-6 : f32
      %228 = vector.broadcast %cst_113 : f32 to vector<1x64xf32>
      %229 = arith.addf %225, %228 : vector<1x64xf32>
      %230 = math.rsqrt %229 : vector<1x64xf32>
      %231 = vector.broadcast %230 : vector<1x64xf32> to vector<128x64xf32>
      %232 = arith.mulf %227, %231 : vector<128x64xf32>
      %233 = arith.extf %212 : vector<1x64xbf16> to vector<1x64xf32>
      %234 = vector.broadcast %233 : vector<1x64xf32> to vector<128x64xf32>
      %235 = arith.mulf %232, %234 : vector<128x64xf32>
      %236 = arith.extf %214 : vector<1x64xbf16> to vector<1x64xf32>
      %237 = vector.broadcast %236 : vector<1x64xf32> to vector<128x64xf32>
      %238 = arith.addf %235, %237 : vector<128x64xf32>
      %239 = arith.truncf %238 : vector<128x64xf32> to vector<128x64xbf16>
      %c0_114 = arith.constant 0 : index
      %c0_115 = arith.constant 0 : index
      %240 = vector.load %arg19[%c0_114, %c0_115] : memref<128x64xbf16, #tpu.memory_space<vmem>>, vector<128x64xbf16>
      tpu.vector_store %arg19[%c0_114, %c0_115], %239 {strides = array<i32>} : memref<128x64xbf16, #tpu.memory_space<vmem>>, vector<128x64xbf16>,
      %c0_116 = arith.constant 0 : index
      %c0_117 = arith.constant 0 : index
      %241 = vector.load %arg1[%c0_116, %c0_117] : memref<2x256xbf16, #tpu.memory_space<vmem>>, vector<2x256xbf16>
      %c0_118 = arith.constant 0 : index
      %c0_119 = arith.constant 0 : index
      %242 = vector.load %arg2[%c0_118, %c0_119] : memref<256x1024xbf16, #tpu.memory_space<vmem>>, vector<256x1024xbf16>
      %cst_120 = arith.constant dense<0.000000e+00> : vector<2x1024xf32>
      %243 = tpu.matmul %241, %242, %cst_120 {dimension_numbers = #tpu.dot_dimension_numbers<[1], [0], [0], [1], [0, 0, 1, 1], [], []>} : vector<2x256xbf16>, vector<256x1024xbf16>, vector<2x1024xf32> -> vector<2x1024xf32>
      %c0_121 = arith.constant 0 : index
      %c0_122 = arith.constant 0 : index
      %244 = vector.load %arg3[%c0_121, %c0_122] : memref<1x1024xbf16, #tpu.memory_space<vmem>>, vector<1x1024xbf16>
      %245 = arith.extf %244 : vector<1x1024xbf16> to vector<1x1024xf32>
      %246 = vector.broadcast %245 : vector<1x1024xf32> to vector<2x1024xf32>
      %247 = arith.addf %243, %246 : vector<2x1024xf32>
      %c0_123 = arith.constant 0 : index
      %c0_124 = arith.constant 0 : index
      %248 = vector.load %arg4[%c0_123, %c0_124] : memref<1x1024xbf16, #tpu.memory_space<vmem>>, vector<1x1024xbf16>
      %c0_125 = arith.constant 0 : index
      %c0_126 = arith.constant 0 : index
      %249 = vector.load %arg5[%c0_125, %c0_126] : memref<1x1024xbf16, #tpu.memory_space<vmem>>, vector<1x1024xbf16>
      %cst_127 = arith.constant 0.000000e+00 : f32
      %250 = vector.broadcast %cst_127 : f32 to vector<2x1024xf32>
      %251 = arith.maximumf %247, %250 : vector<2x1024xf32>
      %cst_128 = arith.constant dense<0.000000e+00> : vector<2xf32>
      %252 = vector.multi_reduction <add>, %251, %cst_128 [1] : vector<2x1024xf32> to vector<2xf32>
      %253 = vector.shape_cast %252 : vector<2xf32> to vector<2x1xf32>
      %cst_129 = arith.constant 1.024000e+03 : f32
      %254 = vector.broadcast %cst_129 : f32 to vector<2x1xf32>
      %255 = arith.divf %253, %254 : vector<2x1xf32>
      %256 = vector.broadcast %255 : vector<2x1xf32> to vector<2x1024xf32>
      %257 = arith.subf %251, %256 : vector<2x1024xf32>
      %258 = arith.mulf %257, %257 : vector<2x1024xf32>
      %cst_130 = arith.constant dense<0.000000e+00> : vector<2xf32>
      %259 = vector.multi_reduction <add>, %258, %cst_130 [1] : vector<2x1024xf32> to vector<2xf32>
      %260 = vector.shape_cast %259 : vector<2xf32> to vector<2x1xf32>
      %cst_131 = arith.constant 1.024000e+03 : f32
      %261 = vector.broadcast %cst_131 : f32 to vector<2x1xf32>
      %262 = arith.divf %260, %261 : vector<2x1xf32>
      %263 = vector.broadcast %255 : vector<2x1xf32> to vector<2x1024xf32>
      %264 = arith.subf %251, %263 : vector<2x1024xf32>
      %cst_132 = arith.constant 9.99999974E-6 : f32
      %265 = vector.broadcast %cst_132 : f32 to vector<2x1xf32>
      %266 = arith.addf %262, %265 : vector<2x1xf32>
      %267 = math.rsqrt %266 : vector<2x1xf32>
      %268 = vector.broadcast %267 : vector<2x1xf32> to vector<2x1024xf32>
      %269 = arith.mulf %264, %268 : vector<2x1024xf32>
      %270 = arith.extf %248 : vector<1x1024xbf16> to vector<1x1024xf32>
      %271 = vector.broadcast %270 : vector<1x1024xf32> to vector<2x1024xf32>
      %272 = arith.mulf %269, %271 : vector<2x1024xf32>
      %273 = arith.extf %249 : vector<1x1024xbf16> to vector<1x1024xf32>
      %274 = vector.broadcast %273 : vector<1x1024xf32> to vector<2x1024xf32>
      %275 = arith.addf %272, %274 : vector<2x1024xf32>
      %276 = arith.truncf %275 : vector<2x1024xf32> to vector<2x1024xbf16>
      %c0_133 = arith.constant 0 : index
      %c0_134 = arith.constant 0 : index
      %277 = vector.load %arg20[%c0_133, %c0_134] : memref<2x1024xbf16, #tpu.memory_space<vmem>>, vector<2x1024xbf16>
      tpu.vector_store %arg20[%c0_133, %c0_134], %276 {strides = array<i32>} : memref<2x1024xbf16, #tpu.memory_space<vmem>>, vector<2x1024xbf16>,
    } else {
    }
    %c0 = arith.constant 0 : index
    %c0_1 = arith.constant 0 : index
    %3 = vector.load %arg20[%c0, %c0_1] : memref<2x1024xbf16, #tpu.memory_space<vmem>>, vector<2x1024xbf16>
    %c0_2 = arith.constant 0 : index
    %c0_3 = arith.constant 0 : index
    %c0_4 = arith.constant 0 : index
    %4 = vector.load %arg6[%c0_2, %c0_3, %c0_4] : memref<1x1024x1024xbf16, #tpu.memory_space<vmem>>, vector<1x1024x1024xbf16>
    %5 = vector.shape_cast %4 : vector<1x1024x1024xbf16> to vector<1024x1024xbf16>
    %cst = arith.constant dense<0.000000e+00> : vector<2x1024xf32>
    %6 = tpu.matmul %3, %5, %cst {dimension_numbers = #tpu.dot_dimension_numbers<[1], [0], [0], [1], [0, 0, 1, 1], [], []>} : vector<2x1024xbf16>, vector<1024x1024xbf16>, vector<2x1024xf32> -> vector<2x1024xf32>
    %c0_5 = arith.constant 0 : index
    %c0_6 = arith.constant 0 : index
    %c0_7 = arith.constant 0 : index
    %7 = vector.load %arg7[%c0_5, %c0_6, %c0_7] : memref<1x1x1024xbf16, #tpu.memory_space<vmem>>, vector<1x1x1024xbf16>
    %8 = vector.shape_cast %7 : vector<1x1x1024xbf16> to vector<1x1024xbf16>
    %9 = arith.extf %8 : vector<1x1024xbf16> to vector<1x1024xf32>
    %10 = vector.broadcast %9 : vector<1x1024xf32> to vector<2x1024xf32>
    %11 = arith.addf %6, %10 : vector<2x1024xf32>
    %c0_8 = arith.constant 0 : index
    %c0_9 = arith.constant 0 : index
    %c0_10 = arith.constant 0 : index
    %12 = vector.load %arg8[%c0_8, %c0_9, %c0_10] : memref<1x1x1024xbf16, #tpu.memory_space<vmem>>, vector<1x1x1024xbf16>
    %13 = vector.shape_cast %12 : vector<1x1x1024xbf16> to vector<1x1024xbf16>
    %c0_11 = arith.constant 0 : index
    %c0_12 = arith.constant 0 : index
    %c0_13 = arith.constant 0 : index
    %14 = vector.load %arg9[%c0_11, %c0_12, %c0_13] : memref<1x1x1024xbf16, #tpu.memory_space<vmem>>, vector<1x1x1024xbf16>
    %15 = vector.shape_cast %14 : vector<1x1x1024xbf16> to vector<1x1024xbf16>
    %cst_14 = arith.constant 0.000000e+00 : f32
    %16 = vector.broadcast %cst_14 : f32 to vector<2x1024xf32>
    %17 = arith.maximumf %11, %16 : vector<2x1024xf32>
    %cst_15 = arith.constant dense<0.000000e+00> : vector<2xf32>
    %18 = vector.multi_reduction <add>, %17, %cst_15 [1] : vector<2x1024xf32> to vector<2xf32>
    %19 = vector.shape_cast %18 : vector<2xf32> to vector<2x1xf32>
    %cst_16 = arith.constant 1.024000e+03 : f32
    %20 = vector.broadcast %cst_16 : f32 to vector<2x1xf32>
    %21 = arith.divf %19, %20 : vector<2x1xf32>
    %22 = vector.broadcast %21 : vector<2x1xf32> to vector<2x1024xf32>
    %23 = arith.subf %17, %22 : vector<2x1024xf32>
    %24 = arith.mulf %23, %23 : vector<2x1024xf32>
    %cst_17 = arith.constant dense<0.000000e+00> : vector<2xf32>
    %25 = vector.multi_reduction <add>, %24, %cst_17 [1] : vector<2x1024xf32> to vector<2xf32>
    %26 = vector.shape_cast %25 : vector<2xf32> to vector<2x1xf32>
    %cst_18 = arith.constant 1.024000e+03 : f32
    %27 = vector.broadcast %cst_18 : f32 to vector<2x1xf32>
    %28 = arith.divf %26, %27 : vector<2x1xf32>
    %29 = vector.broadcast %21 : vector<2x1xf32> to vector<2x1024xf32>
    %30 = arith.subf %17, %29 : vector<2x1024xf32>
    %cst_19 = arith.constant 9.99999974E-6 : f32
    %31 = vector.broadcast %cst_19 : f32 to vector<2x1xf32>
    %32 = arith.addf %28, %31 : vector<2x1xf32>
    %33 = math.rsqrt %32 : vector<2x1xf32>
    %34 = vector.broadcast %33 : vector<2x1xf32> to vector<2x1024xf32>
    %35 = arith.mulf %30, %34 : vector<2x1024xf32>
    %36 = arith.extf %13 : vector<1x1024xbf16> to vector<1x1024xf32>
    %37 = vector.broadcast %36 : vector<1x1024xf32> to vector<2x1024xf32>
    %38 = arith.mulf %35, %37 : vector<2x1024xf32>
    %39 = arith.extf %15 : vector<1x1024xbf16> to vector<1x1024xf32>
    %40 = vector.broadcast %39 : vector<1x1024xf32> to vector<2x1024xf32>
    %41 = arith.addf %38, %40 : vector<2x1024xf32>
    %42 = arith.truncf %41 : vector<2x1024xf32> to vector<2x1024xbf16>
    %c0_20 = arith.constant 0 : index
    %c0_21 = arith.constant 0 : index
    %43 = vector.load %arg20[%c0_20, %c0_21] : memref<2x1024xbf16, #tpu.memory_space<vmem>>, vector<2x1024xbf16>
    tpu.vector_store %arg20[%c0_20, %c0_21], %42 {strides = array<i32>} : memref<2x1024xbf16, #tpu.memory_space<vmem>>, vector<2x1024xbf16>,
    %c4_i32 = arith.constant 4 : i32
    %44 = arith.cmpi eq, %arg0, %c4_i32 : i32
    %45 = arith.extui %44 : i1 to i32
    %c0_i32_22 = arith.constant 0 : i32
    %46 = arith.cmpi ne, %45, %c0_i32_22 : i32
    scf.if %46 {
      %c0_23 = arith.constant 0 : index
      %c0_24 = arith.constant 0 : index
      %47 = vector.load %arg20[%c0_23, %c0_24] : memref<2x1024xbf16, #tpu.memory_space<vmem>>, vector<2x1024xbf16>
      %c0_25 = arith.constant 0 : index
      %c0_26 = arith.constant 0 : index
      %48 = vector.load %arg10[%c0_25, %c0_26] : memref<1024x256xbf16, #tpu.memory_space<vmem>>, vector<1024x256xbf16>
      %cst_27 = arith.constant dense<0.000000e+00> : vector<2x256xf32>
      %49 = tpu.matmul %47, %48, %cst_27 {dimension_numbers = #tpu.dot_dimension_numbers<[1], [0], [0], [1], [0, 0, 1, 1], [], []>} : vector<2x1024xbf16>, vector<1024x256xbf16>, vector<2x256xf32> -> vector<2x256xf32>
      %c0_28 = arith.constant 0 : index
      %c0_29 = arith.constant 0 : index
      %50 = vector.load %arg11[%c0_28, %c0_29] : memref<1x256xbf16, #tpu.memory_space<vmem>>, vector<1x256xbf16>
      %51 = arith.extf %50 : vector<1x256xbf16> to vector<1x256xf32>
      %52 = vector.broadcast %51 : vector<1x256xf32> to vector<2x256xf32>
      %53 = arith.addf %49, %52 : vector<2x256xf32>
      %54 = arith.truncf %53 : vector<2x256xf32> to vector<2x256xbf16>
      %c0_30 = arith.constant 0 : index
      %c0_31 = arith.constant 0 : index
      %55 = vector.load %arg18[%c0_30, %c0_31] : memref<2x256xbf16, #tpu.memory_space<vmem>>, vector<2x256xbf16>
      tpu.vector_store %arg18[%c0_30, %c0_31], %54 {strides = array<i32>} : memref<2x256xbf16, #tpu.memory_space<vmem>>, vector<2x256xbf16>,
    } else {
    }
    return
  }
  func.func @transform_0(%arg0: i32) -> (i32, i32) {
    %c0_i32 = arith.constant 0 : i32
    %c0_i32_0 = arith.constant 0 : i32
    %c0_i32_1 = arith.constant 0 : i32
    return %c0_i32, %c0_i32_0 : i32, i32
  }
  func.func @transform_1(%arg0: i32) -> (i32, i32) {
    %c0_i32 = arith.constant 0 : i32
    %c0_i32_0 = arith.constant 0 : i32
    %c0_i32_1 = arith.constant 0 : i32
    return %c0_i32, %c0_i32_0 : i32, i32
  }
  func.func @transform_2(%arg0: i32) -> (i32, i32) {
    %c0_i32 = arith.constant 0 : i32
    %c0_i32_0 = arith.constant 0 : i32
    %c0_i32_1 = arith.constant 0 : i32
    return %c0_i32, %c0_i32_0 : i32, i32
  }
  func.func @transform_3(%arg0: i32) -> (i32, i32) {
    %c0_i32 = arith.constant 0 : i32
    %c0_i32_0 = arith.constant 0 : i32
    %c0_i32_1 = arith.constant 0 : i32
    return %c0_i32, %c0_i32_0 : i32, i32
  }
  func.func @transform_4(%arg0: i32) -> (i32, i32) {
    %c0_i32 = arith.constant 0 : i32
    %c0_i32_0 = arith.constant 0 : i32
    %c0_i32_1 = arith.constant 0 : i32
    return %c0_i32, %c0_i32_0 : i32, i32
  }
  func.func @transform_5(%arg0: i32) -> (i32, i32, i32) {
    %c0_i32 = arith.constant 0 : i32
    %c0_i32_0 = arith.constant 0 : i32
    %c0_i32_1 = arith.constant 0 : i32
    return %arg0, %c0_i32, %c0_i32_0 : i32, i32, i32
  }
  func.func @transform_6(%arg0: i32) -> (i32, i32, i32) {
    %c0_i32 = arith.constant 0 : i32
    %c0_i32_0 = arith.constant 0 : i32
    %c0_i32_1 = arith.constant 0 : i32
    return %arg0, %c0_i32, %c0_i32_0 : i32, i32, i32
  }
  func.func @transform_7(%arg0: i32) -> (i32, i32, i32) {
    %c0_i32 = arith.constant 0 : i32
    %c0_i32_0 = arith.constant 0 : i32
    %c0_i32_1 = arith.constant 0 : i32
    return %arg0, %c0_i32, %c0_i32_0 : i32, i32, i32
  }
  func.func @transform_8(%arg0: i32) -> (i32, i32, i32) {
    %c0_i32 = arith.constant 0 : i32
    %c0_i32_0 = arith.constant 0 : i32
    %c0_i32_1 = arith.constant 0 : i32
    return %arg0, %c0_i32, %c0_i32_0 : i32, i32, i32
  }
  func.func @transform_9(%arg0: i32) -> (i32, i32) {
    %c0_i32 = arith.constant 0 : i32
    %c0_i32_0 = arith.constant 0 : i32
    %c0_i32_1 = arith.constant 0 : i32
    return %c0_i32, %c0_i32_0 : i32, i32
  }
  func.func @transform_10(%arg0: i32) -> (i32, i32) {
    %c0_i32 = arith.constant 0 : i32
    %c0_i32_0 = arith.constant 0 : i32
    %c0_i32_1 = arith.constant 0 : i32
    return %c0_i32, %c0_i32_0 : i32, i32
  }
  func.func @transform_11(%arg0: i32) -> (i32, i32) {
    %c0_i32 = arith.constant 0 : i32
    %c0_i32_0 = arith.constant 0 : i32
    %c0_i32_1 = arith.constant 0 : i32
    return %c0_i32, %c0_i32_0 : i32, i32
  }
  func.func @transform_12(%arg0: i32) -> (i32, i32) {
    %c0_i32 = arith.constant 0 : i32
    %c0_i32_0 = arith.constant 0 : i32
    %c0_i32_1 = arith.constant 0 : i32
    return %c0_i32, %c0_i32_0 : i32, i32
  }
  func.func @transform_13(%arg0: i32) -> (i32, i32, i32) {
    %c0_i32 = arith.constant 0 : i32
    %c0_i32_0 = arith.constant 0 : i32
    %c0_i32_1 = arith.constant 0 : i32
    %c0_i32_2 = arith.constant 0 : i32
    return %c0_i32, %c0_i32_0, %c0_i32_1 : i32, i32, i32
  }
  func.func @transform_14(%arg0: i32) -> (i32, i32, i32) {
    %c0_i32 = arith.constant 0 : i32
    %c0_i32_0 = arith.constant 0 : i32
    %c0_i32_1 = arith.constant 0 : i32
    %c0_i32_2 = arith.constant 0 : i32
    return %c0_i32, %c0_i32_0, %c0_i32_1 : i32, i32, i32
  }
  func.func @transform_15(%arg0: i32) -> (i32, i32, i32) {
    %c0_i32 = arith.constant 0 : i32
    %c0_i32_0 = arith.constant 0 : i32
    %c0_i32_1 = arith.constant 0 : i32
    %c0_i32_2 = arith.constant 0 : i32
    return %c0_i32, %c0_i32_0, %c0_i32_1 : i32, i32, i32
  }
  func.func @transform_16(%arg0: i32) -> (i32, i32, i32) {
    %c0_i32 = arith.constant 0 : i32
    %c0_i32_0 = arith.constant 0 : i32
    %c0_i32_1 = arith.constant 0 : i32
    %c0_i32_2 = arith.constant 0 : i32
    return %c0_i32, %c0_i32_0, %c0_i32_1 : i32, i32, i32
  }
  func.func @transform_17(%arg0: i32) -> (i32, i32) {
    %c0_i32 = arith.constant 0 : i32
    %c0_i32_0 = arith.constant 0 : i32
    %c0_i32_1 = arith.constant 0 : i32
    return %c0_i32, %c0_i32_0 : i32, i32
  }
  func.func @transform_18(%arg0: i32) -> (i32, i32) {
    %c0_i32 = arith.constant 0 : i32
    %c0_i32_0 = arith.constant 0 : i32
    %c0_i32_1 = arith.constant 0 : i32
    return %c0_i32, %c0_i32_0 : i32, i32
  }
}

module attributes {stable_mosaic.version = 11 : i64} {
  func.func @_decoder_kernel(%arg0: i32, %arg1: memref<32x272xbf16, #tpu.memory_space<vmem>>, %arg2: memref<2x272x272xbf16, #tpu.memory_space<vmem>>, %arg3: memref<2x1x272xbf16, #tpu.memory_space<vmem>>, %arg4: memref<2x1x272xbf16, #tpu.memory_space<vmem>>, %arg5: memref<2x1x272xbf16, #tpu.memory_space<vmem>>, %arg6: memref<272x3xbf16, #tpu.memory_space<vmem>>, %arg7: memref<1x3xbf16, #tpu.memory_space<vmem>>, %arg8: memref<32x3xbf16, #tpu.memory_space<vmem>>) attributes {dimension_semantics = [#tpu.dimension_semantics<arbitrary>], iteration_bounds = array<i64: 1>, scalar_prefetch = 0 : i64, scratch_operands = 0 : i64, tpu.core_type = #tpu.core_type<tc>, window_params = [{pipeline_mode = #tpu.pipeline_mode<synchronous>, transform_indices = @transform_0, window_bounds = array<i64: 32, 272>}, {pipeline_mode = #tpu.pipeline_mode<synchronous>, transform_indices = @transform_1, window_bounds = array<i64: 2, 272, 272>}, {pipeline_mode = #tpu.pipeline_mode<synchronous>, transform_indices = @transform_2, window_bounds = array<i64: 2, 1, 272>}, {pipeline_mode = #tpu.pipeline_mode<synchronous>, transform_indices = @transform_3, window_bounds = array<i64: 2, 1, 272>}, {pipeline_mode = #tpu.pipeline_mode<synchronous>, transform_indices = @transform_4, window_bounds = array<i64: 2, 1, 272>}, {pipeline_mode = #tpu.pipeline_mode<synchronous>, transform_indices = @transform_5, window_bounds = array<i64: 272, 3>}, {pipeline_mode = #tpu.pipeline_mode<synchronous>, transform_indices = @transform_6, window_bounds = array<i64: 1, 3>}, {pipeline_mode = #tpu.pipeline_mode<synchronous>, transform_indices = @transform_7, window_bounds = array<i64: 32, 3>}]} {
    %c0 = arith.constant 0 : index
    %c0_0 = arith.constant 0 : index
    %0 = vector.load %arg1[%c0, %c0_0] : memref<32x272xbf16, #tpu.memory_space<vmem>>, vector<32x272xbf16>
    %c0_1 = arith.constant 0 : index
    %c0_2 = arith.constant 0 : index
    %c0_3 = arith.constant 0 : index
    %1 = vector.load %arg2[%c0_1, %c0_2, %c0_3] : memref<2x272x272xbf16, #tpu.memory_space<vmem>>, vector<1x272x272xbf16>
    %2 = vector.shape_cast %1 : vector<1x272x272xbf16> to vector<272x272xbf16>
    %cst = arith.constant dense<0.000000e+00> : vector<32x272xf32>
    %3 = tpu.matmul %0, %2, %cst {dimension_numbers = #tpu.dot_dimension_numbers<[1], [0], [0], [1], [0, 0, 1, 1], [], []>} : vector<32x272xbf16>, vector<272x272xbf16>, vector<32x272xf32> -> vector<32x272xf32>
    %c0_4 = arith.constant 0 : index
    %c0_5 = arith.constant 0 : index
    %c0_6 = arith.constant 0 : index
    %4 = vector.load %arg3[%c0_4, %c0_5, %c0_6] : memref<2x1x272xbf16, #tpu.memory_space<vmem>>, vector<1x1x272xbf16>
    %5 = vector.shape_cast %4 : vector<1x1x272xbf16> to vector<1x272xbf16>
    %6 = arith.extf %5 : vector<1x272xbf16> to vector<1x272xf32>
    %7 = vector.broadcast %6 : vector<1x272xf32> to vector<32x272xf32>
    %8 = arith.addf %3, %7 : vector<32x272xf32>
    %c0_7 = arith.constant 0 : index
    %c0_8 = arith.constant 0 : index
    %c0_9 = arith.constant 0 : index
    %9 = vector.load %arg4[%c0_7, %c0_8, %c0_9] : memref<2x1x272xbf16, #tpu.memory_space<vmem>>, vector<1x1x272xbf16>
    %10 = vector.shape_cast %9 : vector<1x1x272xbf16> to vector<1x272xbf16>
    %c0_10 = arith.constant 0 : index
    %c0_11 = arith.constant 0 : index
    %c0_12 = arith.constant 0 : index
    %11 = vector.load %arg5[%c0_10, %c0_11, %c0_12] : memref<2x1x272xbf16, #tpu.memory_space<vmem>>, vector<1x1x272xbf16>
    %12 = vector.shape_cast %11 : vector<1x1x272xbf16> to vector<1x272xbf16>
    %cst_13 = arith.constant 0.000000e+00 : f32
    %13 = vector.broadcast %cst_13 : f32 to vector<32x272xf32>
    %14 = arith.maximumf %8, %13 : vector<32x272xf32>
    %cst_14 = arith.constant dense<0.000000e+00> : vector<32xf32>
    %15 = vector.multi_reduction <add>, %14, %cst_14 [1] : vector<32x272xf32> to vector<32xf32>
    %16 = vector.shape_cast %15 : vector<32xf32> to vector<32x1xf32>
    %cst_15 = arith.constant 2.720000e+02 : f32
    %17 = vector.broadcast %cst_15 : f32 to vector<32x1xf32>
    %18 = arith.divf %16, %17 : vector<32x1xf32>
    %19 = vector.broadcast %18 : vector<32x1xf32> to vector<32x272xf32>
    %20 = arith.subf %14, %19 : vector<32x272xf32>
    %21 = arith.mulf %20, %20 : vector<32x272xf32>
    %cst_16 = arith.constant dense<0.000000e+00> : vector<32xf32>
    %22 = vector.multi_reduction <add>, %21, %cst_16 [1] : vector<32x272xf32> to vector<32xf32>
    %23 = vector.shape_cast %22 : vector<32xf32> to vector<32x1xf32>
    %cst_17 = arith.constant 2.720000e+02 : f32
    %24 = vector.broadcast %cst_17 : f32 to vector<32x1xf32>
    %25 = arith.divf %23, %24 : vector<32x1xf32>
    %26 = vector.broadcast %18 : vector<32x1xf32> to vector<32x272xf32>
    %27 = arith.subf %14, %26 : vector<32x272xf32>
    %cst_18 = arith.constant 9.99999974E-6 : f32
    %28 = vector.broadcast %cst_18 : f32 to vector<32x1xf32>
    %29 = arith.addf %25, %28 : vector<32x1xf32>
    %30 = math.rsqrt %29 : vector<32x1xf32>
    %31 = vector.broadcast %30 : vector<32x1xf32> to vector<32x272xf32>
    %32 = arith.mulf %27, %31 : vector<32x272xf32>
    %33 = arith.extf %10 : vector<1x272xbf16> to vector<1x272xf32>
    %34 = vector.broadcast %33 : vector<1x272xf32> to vector<32x272xf32>
    %35 = arith.mulf %32, %34 : vector<32x272xf32>
    %36 = arith.extf %12 : vector<1x272xbf16> to vector<1x272xf32>
    %37 = vector.broadcast %36 : vector<1x272xf32> to vector<32x272xf32>
    %38 = arith.addf %35, %37 : vector<32x272xf32>
    %39 = arith.truncf %38 : vector<32x272xf32> to vector<32x272xbf16>
    %c1 = arith.constant 1 : index
    %c0_19 = arith.constant 0 : index
    %c0_20 = arith.constant 0 : index
    %40 = vector.load %arg2[%c1, %c0_19, %c0_20] : memref<2x272x272xbf16, #tpu.memory_space<vmem>>, vector<1x272x272xbf16>
    %41 = vector.shape_cast %40 : vector<1x272x272xbf16> to vector<272x272xbf16>
    %cst_21 = arith.constant dense<0.000000e+00> : vector<32x272xf32>
    %42 = tpu.matmul %39, %41, %cst_21 {dimension_numbers = #tpu.dot_dimension_numbers<[1], [0], [0], [1], [0, 0, 1, 1], [], []>} : vector<32x272xbf16>, vector<272x272xbf16>, vector<32x272xf32> -> vector<32x272xf32>
    %c1_22 = arith.constant 1 : index
    %c0_23 = arith.constant 0 : index
    %c0_24 = arith.constant 0 : index
    %43 = vector.load %arg3[%c1_22, %c0_23, %c0_24] : memref<2x1x272xbf16, #tpu.memory_space<vmem>>, vector<1x1x272xbf16>
    %44 = vector.shape_cast %43 : vector<1x1x272xbf16> to vector<1x272xbf16>
    %45 = arith.extf %44 : vector<1x272xbf16> to vector<1x272xf32>
    %46 = vector.broadcast %45 : vector<1x272xf32> to vector<32x272xf32>
    %47 = arith.addf %42, %46 : vector<32x272xf32>
    %c1_25 = arith.constant 1 : index
    %c0_26 = arith.constant 0 : index
    %c0_27 = arith.constant 0 : index
    %48 = vector.load %arg4[%c1_25, %c0_26, %c0_27] : memref<2x1x272xbf16, #tpu.memory_space<vmem>>, vector<1x1x272xbf16>
    %49 = vector.shape_cast %48 : vector<1x1x272xbf16> to vector<1x272xbf16>
    %c1_28 = arith.constant 1 : index
    %c0_29 = arith.constant 0 : index
    %c0_30 = arith.constant 0 : index
    %50 = vector.load %arg5[%c1_28, %c0_29, %c0_30] : memref<2x1x272xbf16, #tpu.memory_space<vmem>>, vector<1x1x272xbf16>
    %51 = vector.shape_cast %50 : vector<1x1x272xbf16> to vector<1x272xbf16>
    %cst_31 = arith.constant 0.000000e+00 : f32
    %52 = vector.broadcast %cst_31 : f32 to vector<32x272xf32>
    %53 = arith.maximumf %47, %52 : vector<32x272xf32>
    %cst_32 = arith.constant dense<0.000000e+00> : vector<32xf32>
    %54 = vector.multi_reduction <add>, %53, %cst_32 [1] : vector<32x272xf32> to vector<32xf32>
    %55 = vector.shape_cast %54 : vector<32xf32> to vector<32x1xf32>
    %cst_33 = arith.constant 2.720000e+02 : f32
    %56 = vector.broadcast %cst_33 : f32 to vector<32x1xf32>
    %57 = arith.divf %55, %56 : vector<32x1xf32>
    %58 = vector.broadcast %57 : vector<32x1xf32> to vector<32x272xf32>
    %59 = arith.subf %53, %58 : vector<32x272xf32>
    %60 = arith.mulf %59, %59 : vector<32x272xf32>
    %cst_34 = arith.constant dense<0.000000e+00> : vector<32xf32>
    %61 = vector.multi_reduction <add>, %60, %cst_34 [1] : vector<32x272xf32> to vector<32xf32>
    %62 = vector.shape_cast %61 : vector<32xf32> to vector<32x1xf32>
    %cst_35 = arith.constant 2.720000e+02 : f32
    %63 = vector.broadcast %cst_35 : f32 to vector<32x1xf32>
    %64 = arith.divf %62, %63 : vector<32x1xf32>
    %65 = vector.broadcast %57 : vector<32x1xf32> to vector<32x272xf32>
    %66 = arith.subf %53, %65 : vector<32x272xf32>
    %cst_36 = arith.constant 9.99999974E-6 : f32
    %67 = vector.broadcast %cst_36 : f32 to vector<32x1xf32>
    %68 = arith.addf %64, %67 : vector<32x1xf32>
    %69 = math.rsqrt %68 : vector<32x1xf32>
    %70 = vector.broadcast %69 : vector<32x1xf32> to vector<32x272xf32>
    %71 = arith.mulf %66, %70 : vector<32x272xf32>
    %72 = arith.extf %49 : vector<1x272xbf16> to vector<1x272xf32>
    %73 = vector.broadcast %72 : vector<1x272xf32> to vector<32x272xf32>
    %74 = arith.mulf %71, %73 : vector<32x272xf32>
    %75 = arith.extf %51 : vector<1x272xbf16> to vector<1x272xf32>
    %76 = vector.broadcast %75 : vector<1x272xf32> to vector<32x272xf32>
    %77 = arith.addf %74, %76 : vector<32x272xf32>
    %78 = arith.truncf %77 : vector<32x272xf32> to vector<32x272xbf16>
    %c0_37 = arith.constant 0 : index
    %c0_38 = arith.constant 0 : index
    %79 = vector.load %arg6[%c0_37, %c0_38] : memref<272x3xbf16, #tpu.memory_space<vmem>>, vector<272x3xbf16>
    %cst_39 = arith.constant dense<0.000000e+00> : vector<32x3xf32>
    %80 = tpu.matmul %78, %79, %cst_39 {dimension_numbers = #tpu.dot_dimension_numbers<[1], [0], [0], [1], [0, 0, 1, 1], [], []>} : vector<32x272xbf16>, vector<272x3xbf16>, vector<32x3xf32> -> vector<32x3xf32>
    %c0_40 = arith.constant 0 : index
    %c0_41 = arith.constant 0 : index
    %81 = vector.load %arg7[%c0_40, %c0_41] : memref<1x3xbf16, #tpu.memory_space<vmem>>, vector<1x3xbf16>
    %82 = arith.extf %81 : vector<1x3xbf16> to vector<1x3xf32>
    %83 = vector.broadcast %82 : vector<1x3xf32> to vector<32x3xf32>
    %84 = arith.addf %80, %83 : vector<32x3xf32>
    %85 = arith.truncf %84 : vector<32x3xf32> to vector<32x3xbf16>
    %c0_42 = arith.constant 0 : index
    %c0_43 = arith.constant 0 : index
    %86 = vector.load %arg8[%c0_42, %c0_43] : memref<32x3xbf16, #tpu.memory_space<vmem>>, vector<32x3xbf16>
    tpu.vector_store %arg8[%c0_42, %c0_43], %85 {strides = array<i32>} : memref<32x3xbf16, #tpu.memory_space<vmem>>, vector<32x3xbf16>,
    return
  }
  func.func @transform_0(%arg0: i32) -> (i32, i32) {
    %c0_i32 = arith.constant 0 : i32
    %c0_i32_0 = arith.constant 0 : i32
    %c0_i32_1 = arith.constant 0 : i32
    return %c0_i32, %c0_i32_0 : i32, i32
  }
  func.func @transform_1(%arg0: i32) -> (i32, i32, i32) {
    %c0_i32 = arith.constant 0 : i32
    %c0_i32_0 = arith.constant 0 : i32
    %c0_i32_1 = arith.constant 0 : i32
    %c0_i32_2 = arith.constant 0 : i32
    return %c0_i32, %c0_i32_0, %c0_i32_1 : i32, i32, i32
  }
  func.func @transform_2(%arg0: i32) -> (i32, i32, i32) {
    %c0_i32 = arith.constant 0 : i32
    %c0_i32_0 = arith.constant 0 : i32
    %c0_i32_1 = arith.constant 0 : i32
    %c0_i32_2 = arith.constant 0 : i32
    return %c0_i32, %c0_i32_0, %c0_i32_1 : i32, i32, i32
  }
  func.func @transform_3(%arg0: i32) -> (i32, i32, i32) {
    %c0_i32 = arith.constant 0 : i32
    %c0_i32_0 = arith.constant 0 : i32
    %c0_i32_1 = arith.constant 0 : i32
    %c0_i32_2 = arith.constant 0 : i32
    return %c0_i32, %c0_i32_0, %c0_i32_1 : i32, i32, i32
  }
  func.func @transform_4(%arg0: i32) -> (i32, i32, i32) {
    %c0_i32 = arith.constant 0 : i32
    %c0_i32_0 = arith.constant 0 : i32
    %c0_i32_1 = arith.constant 0 : i32
    %c0_i32_2 = arith.constant 0 : i32
    return %c0_i32, %c0_i32_0, %c0_i32_1 : i32, i32, i32
  }
  func.func @transform_5(%arg0: i32) -> (i32, i32) {
    %c0_i32 = arith.constant 0 : i32
    %c0_i32_0 = arith.constant 0 : i32
    %c0_i32_1 = arith.constant 0 : i32
    return %c0_i32, %c0_i32_0 : i32, i32
  }
  func.func @transform_6(%arg0: i32) -> (i32, i32) {
    %c0_i32 = arith.constant 0 : i32
    %c0_i32_0 = arith.constant 0 : i32
    %c0_i32_1 = arith.constant 0 : i32
    return %c0_i32, %c0_i32_0 : i32, i32
  }
  func.func @transform_7(%arg0: i32) -> (i32, i32) {
    %c0_i32 = arith.constant 0 : i32
    %c0_i32_0 = arith.constant 0 : i32
    %c0_i32_1 = arith.constant 0 : i32
    return %c0_i32, %c0_i32_0 : i32, i32
  }
}

</mosaic_0001>

<bundles_post_ra>
// kernel: forward.3
= control target key start
LH: loop header
LB: loop body
LE: loop exit
PB: predicated region body
PF: predicated region fallthrough
CT: control target
= control target key end

     0   :  { %v2393_v1 = vmov 0   ;;  %vm435_vm0 = vcmask 130048   ;;  %vm1881_vm1 = vcmask 19456   ;;  %s3142_s1 = inlined_call_operand.vmem [shape: bf16[2,272,272], index: 1, kind: input, shape index: {}]   ;;  %s3143_s0 = inlined_call_operand.vmem [shape: bf16[32,272], index: 0, kind: input, shape index: {}]   ;;  %s3144_s2 = inlined_call_operand.vmem [shape: bf16[2,1,272], index: 2, kind: input, shape index: {}]   ;;  %s3145_s3 = inlined_call_operand.vmem [shape: bf16[2,1,272], index: 3, kind: input, shape index: {}]   ;;  %s3146_s4 = inlined_call_operand.vmem [shape: bf16[2,1,272], index: 4, kind: input, shape index: {}]   ;;  %s3147_s5 = inlined_call_operand.vmem [shape: bf16[272,3], index: 5, kind: input, shape index: {}]   ;;  %s3148_s6 = inlined_call_operand.vmem [shape: bf16[1,3], index: 6, kind: input, shape index: {}]   ;;  %s3149_s7 = inlined_call_operand.vmem [shape: bf16[32,3], index: 7, kind: output, shape index: {}]  }
   0x1   :  { %v2216_v0 = vld [vmem:[%s3142_s1 + $0xac] ss:$12 sps:$4 sm:$0xff]   ;;  %527 = vmatprep.mubr.bf16.mxu1 %v2393_v1  ;;  %v2218_v2 = vld [vmem:[%s3142_s1 + $0xa8] ss:$12 sps:$4 sm:$0xff]   ;;  %v2221_v4 = vld [vmem:[%s3142_s1 + $0x90] ss:$12 sps:$4 sm:$0xff]  }
   0x2   :  { %442 = vmatprep.subr.bf16.mxu0 %v2216_v0  ;;  %v2219_v3 = vld [vmem:[%s3142_s1 + $0x94] ss:$12 sps:$4 sm:$0xff]   ;;  %v2222_v5 = vld [vmem:[%s3142_s1 + $0x7c] ss:$12 sps:$4 sm:$0xff]   ;;  %v2224_v6 = vld [vmem:[%s3142_s1 + $0x78] ss:$12 sps:$4 sm:$0xff]  }
   0x3   :  { %443 = vmatpush1.bf16.msra.mxu0 %v2218_v2  ;;  %v2225_v7 = vld [vmem:[%s3142_s1 + $0x64] ss:$12 sps:$4 sm:$0xff]   ;;  %v2227_v8 = vld [vmem:[%s3142_s1 + $0x60] ss:$12 sps:$4 sm:$0xff]   ;;  %v2230_v12 = vld [vmem:[%s3142_s1 + $0x48] ss:$12 sps:$4 sm:$0xff]  }
   0x4   :  { %444 = vmatprep.subr.bf16.mxu0 %v2219_v3  ;;  %v2240_v9 = vld [vmem:[%s3142_s1 + $0x184] ss:$12 sps:$4 sm:$0xff]   ;;  %v2242_v10 = vld [vmem:[%s3142_s1 + $0x180] ss:$12 sps:$4 sm:$0xff]   ;;  %v2480_v15 = vld [vmem:[%s3143_s0 + $0x8] ss:$12 sps:$4 sm:$0xff]  }
   0x5   :  { %v2228_v11 = vld [vmem:[%s3142_s1 + $0x4c] ss:$12 sps:$4 sm:$0xff]   ;;  %509 = vmatprep.subr.bf16.mxu1 %v2240_v9  ;;  %v2231_v13 = vld [vmem:[%s3142_s1 + $0x34] ss:$12 sps:$4 sm:$0xff]   ;;  %v2246_v14 = vld [vmem:[%s3142_s1 + $0x170] ss:$12 sps:$4 sm:$0xff]  }
   0x6   :  { %510 = vmatpush1.bf16.msra.mxu1 %v2242_v10  ;;  %v2248_v16 = vld [vmem:[%s3142_s1 + $0xb0] ss:$12 sps:$4 sm:$0xff]   ;;  %v2252_v18 = vld [vmem:[%s3142_s1 + $0x158] ss:$12 sps:$4 sm:$0xff]   ;;  %v2257_v21 = vld [vmem:[%s3142_s1 + $0x140] ss:$12 sps:$4 sm:$0xff]  }
   0x7   :  { %445 = vmatpush1.bf16.msra.mxu0 %v2221_v4  ;;  %2104 = vmatprep.subr.bf16.mxu1 %v2246_v14  ;;  %v2233_v17 = vld [vmem:[%s3142_s1 + $0x30] ss:$12 sps:$4 sm:$0xff]   ;;  %v2253_v19 = vld [vmem:[%s3142_s1 + $0x98] ss:$12 sps:$4 sm:$0xff]   ;;  %v2258_v22 = vld [vmem:[%s3142_s1 + $0x80] ss:$12 sps:$4 sm:$0xff]  }
   0x8   :  { %446 = vmatprep.subr.bf16.mxu0 %v2222_v5  ;;  %v2234_v20 = vld [vmem:[%s3142_s1 + $0x1c] ss:$12 sps:$4 sm:$0xff]   ;;  %v2236_v23 = vld [vmem:[%s3142_s1 + $0x18] ss:$12 sps:$4 sm:$0xff]   ;;  %v2239_v27 = vld [vmem:[%s3142_s1] ss:$12 sps:$4 sm:$0xff]  }
   0x9   :  { %1947 = vmatmul.mubr.msk.bf16.vlgmr.msra.gmra.mxu1 %vm435_vm0, %v2480_v15  ;;  %v2237_v24 = vld [vmem:[%s3142_s1 + $0x4] ss:$12 sps:$4 sm:$0xff]   ;;  %v2262_v25 = vld [vmem:[%s3142_s1 + $0x128] ss:$12 sps:$4 sm:$0xff]   ;;  %v2243_v28 = vld [vmem:[%s3142_s1 + $0x16c] ss:$12 sps:$4 sm:$0xff]  }
   0xa   :  { %2105 = vmatpush3.bf16.msra.mxu1 %v2248_v16  ;;  %537 = vmatprep.mubr.bf16.mxu1 %v2393_v1  ;;  %v2263_v26 = vld [vmem:[%s3142_s1 + $0x68] ss:$12 sps:$4 sm:$0xff]   ;;  %v2267_v29 = vld [vmem:[%s3142_s1 + $0x110] ss:$12 sps:$4 sm:$0xff]   ;;  %v2272_v32 = vld [vmem:[%s3142_s1 + $0xf8] ss:$12 sps:$4 sm:$0xff]  }
   0xb   :  { %447 = vmatpush1.bf16.msra.mxu0 %v2224_v6  ;;  %2106 = vmatprep.subr.bf16.mxu1 %v2252_v18  ;;  %v2245_v30 = vld [vmem:[%s3142_s1 + $0x168] ss:$12 sps:$4 sm:$0xff]   ;;  %v2268_v31 = vld [vmem:[%s3142_s1 + $0x50] ss:$12 sps:$4 sm:$0xff]   ;;  %v2273_v36 = vld [vmem:[%s3142_s1 + $0x38] ss:$12 sps:$4 sm:$0xff]   ;;  %v106_v6 = vlaneseq }
   0xc   :  { %448 = vmatprep.subr.bf16.mxu0 %v2225_v7  ;;  %v2249_v33 = vld [vmem:[%s3142_s1 + $0x154] ss:$12 sps:$4 sm:$0xff]   ;;  %v2251_v34 = vld [vmem:[%s3142_s1 + $0x150] ss:$12 sps:$4 sm:$0xff]   ;;  %v2256_v39 = vld [vmem:[%s3142_s1 + $0x138] ss:$12 sps:$4 sm:$0xff]  }
   0xd   :  { %v2254_v35 = vld [vmem:[%s3142_s1 + $0x13c] ss:$12 sps:$4 sm:$0xff]   ;;  %v2277_v37 = vld [vmem:[%s3143_s0 + $0x20] ss:$12 sps:$4 sm:$0xff]   ;;  %v2259_v42 = vld [vmem:[%s3142_s1 + $0x124] ss:$12 sps:$4 sm:$0xff]  }
   0xe   :  { %2107 = vmatpush3.bf16.msra.mxu1 %v2253_v19  ;;  %v2278_v38 = vld [vmem:[%s3142_s1 + $0xe0] ss:$12 sps:$4 sm:$0xff]   ;;  %v2283_v41 = vld [vmem:[%s3142_s1 + $0xc8] ss:$12 sps:$4 sm:$0xff]   ;;  %v2286_v43 = vld [vmem:[%s3143_s0 + $0x4] ss:$12 sps:$4 sm:$0xff]  }
   0xf   :  { %449 = vmatpush1.bf16.msra.mxu0 %v2227_v8  ;;  %2108 = vmatprep.subr.bf16.mxu1 %v2257_v21  ;;  %v2279_v40 = vld [vmem:[%s3142_s1 + $0x20] ss:$12 sps:$4 sm:$0xff]   ;;  %v2287_v44 = vld [vmem:[%s3142_s1 + $0x8] ss:$12 sps:$4 sm:$0xff]   ;;  %v2271_v51 = vld [vmem:[%s3142_s1 + $0xf0] ss:$12 sps:$4 sm:$0xff]  }
  0x10   :  { %450 = vmatprep.subr.bf16.mxu0 %v2228_v11  ;;  %474 = vmatprep.mubr.bf16.mxu0 %v2286_v43  ;;  %v2261_v45 = vld [vmem:[%s3142_s1 + $0x120] ss:$12 sps:$4 sm:$0xff]   ;;  %v2266_v47 = vld [vmem:[%s3142_s1 + $0x108] ss:$12 sps:$4 sm:$0xff]   ;;  %v2276_v53 = vld [vmem:[%s3142_s1 + $0xd8] ss:$12 sps:$4 sm:$0xff]  }
  0x11   :  { %1948 = vmatmul.mubr.msk.bf16.gmra.mxu1 %vm435_vm0, %v2277_v37  ;;  %v2264_v46 = vld [vmem:[%s3142_s1 + $0x10c] ss:$12 sps:$4 sm:$0xff]   ;;  %v2269_v49 = vld [vmem:[%s3142_s1 + $0xf4] ss:$12 sps:$4 sm:$0xff]   ;;  %v2289_v50 = vld [vmem:[%s3143_s0 + $0x1c] ss:$12 sps:$4 sm:$0xff]  }
  0x12   :  { %2109 = vmatpush3.bf16.msra.mxu1 %v2258_v22  ;;  %580 = vmatprep.mubr.bf16.mxu1 %v2286_v43  ;;  %v2284_v48 = vld [vmem:[%s3143_s0] ss:$12 sps:$4 sm:$0xff]   ;;  %v2274_v52 = vld [vmem:[%s3142_s1 + $0xdc] ss:$12 sps:$4 sm:$0xff]   ;;  %v2291_v54 = vld [vmem:[%s3143_s0 + $0x18] ss:$12 sps:$4 sm:$0xff]  }
  0x13   :  { %451 = vmatpush1.bf16.msra.mxu0 %v2230_v12  ;;  %2110 = vmatprep.subr.bf16.mxu1 %v2262_v25  ;;  %v2280_v55 = vld [vmem:[%s3142_s1 + $0xc4] ss:$12 sps:$4 sm:$0xff]   ;;  %v2282_v56 = vld [vmem:[%s3142_s1 + $0xc0] ss:$12 sps:$4 sm:$0xff]   ;;  %v2288_v57 = vld [vmem:[%s3142_s1 + $0x188] ss:$12 sps:$4 sm:$0xff]  }
  0x14   :  { %452 = vmatprep.subr.bf16.mxu0 %v2231_v13  ;;  %v107_v8 = vshrl.u32 %v106_v6, 7  ;;  %v103_v9 = vld [vmem:[%s3144_s2] sm:$0x7] }
  0x15   :  { %v104_v12 = vunpack.c.l.bf16 %v103_v9 }
  0x16   :  { %2111 = vmatpush3.bf16.msra.mxu1 %v2263_v26  ;;  %v2621_v10 = vsub.s32 2, %v107_v8  ;;  %v2623_v13 = vsub.s32 0, %v107_v8 }
  0x17   :  { %453 = vmatpush1.bf16.msra.mxu0 %v2233_v17  ;;  %2112 = vmatprep.subr.bf16.mxu1 %v2267_v29 }
  0x18   :  { %454 = vmatprep.subr.bf16.mxu0 %v2234_v20  ;;  %v113_v16 = vrot.slane %v104_v12, %v2621_v10  ;;  %v109_v19 = vrot.slane %v104_v12, %v2623_v13 }
  0x1a   :  { %2113 = vmatpush3.bf16.msra.mxu1 %v2268_v31  ;;  %v128_v22 = vrot.slane %v113_v16, %v2623_v13  ;;  %v124_v25 = vrot.slane %v109_v19, %v2623_v13 }
  0x1b   :  { %455 = vmatpush1.bf16.msra.mxu0 %v2236_v23  ;;  %2114 = vmatprep.subr.bf16.mxu1 %v2272_v32 }
  0x1c   :  { %456 = vmatprep.subr.bf16.mxu0 %v2237_v24 }
  0x1e   :  { %2115 = vmatpush3.bf16.msra.mxu1 %v2273_v36 }
  0x1f   :  { %457 = vmatpush1.bf16.msra.mxu0 %v2239_v27  ;;  %2116 = vmatprep.subr.bf16.mxu1 %v2278_v38 }
  0x20   :  { %458 = vmatprep.subr.bf16.mxu0 %v2243_v28 }
  0x22   :  { %2117 = vmatpush3.bf16.msra.mxu1 %v2279_v40 }
  0x23   :  { %459 = vmatpush2.bf16.msra.mxu0 %v2245_v30  ;;  %2118 = vmatprep.subr.bf16.mxu1 %v2283_v41 }
  0x24   :  { %460 = vmatprep.subr.bf16.mxu0 %v2249_v33 }
  0x26   :  { %2119 = vmatpush3.bf16.msra.mxu1 %v2287_v44 }
  0x27   :  { %461 = vmatpush2.bf16.msra.mxu0 %v2251_v34 }
  0x28   :  { %462 = vmatprep.subr.bf16.mxu0 %v2254_v35 }
  0x29   :  { %581 = vmatmul.mubr.bf16.vlgmr.msra.gmra.mxu1 %v2284_v48 }
  0x2a   :  { %588 = vmatprep.mubr.bf16.mxu1 %v2289_v50 }
  0x2b   :  { %463 = vmatpush2.bf16.msra.mxu0 %v2256_v39 }
  0x2c   :  { %464 = vmatprep.subr.bf16.mxu0 %v2259_v42 }
  0x2f   :  { %465 = vmatpush2.bf16.msra.mxu0 %v2261_v45 }
  0x30   :  { %466 = vmatprep.subr.bf16.mxu0 %v2264_v46 }
  0x31   :  { %589 = vmatmul.mubr.bf16.gmra.mxu1 %v2291_v54 }
  0x33   :  { %467 = vmatpush2.bf16.msra.mxu0 %v2266_v47 }
  0x34   :  { %468 = vmatprep.subr.bf16.mxu0 %v2269_v49 }
  0x37   :  { %469 = vmatpush2.bf16.msra.mxu0 %v2271_v51 }
  0x38   :  { %470 = vmatprep.subr.bf16.mxu0 %v2274_v52 }
  0x3b   :  { %471 = vmatpush2.bf16.msra.mxu0 %v2276_v53 }
  0x3c   :  { %472 = vmatprep.subr.bf16.mxu0 %v2280_v55 }
  0x3f   :  { %473 = vmatpush2.bf16.msra.mxu0 %v2282_v56 }
  0x40   :  { %2197 = vmatprep.subr.bf16.mxu0 %v2288_v57 }
  0x42   :  { %475 = vmatmul.mubr.bf16.vlgmr.msra.gmra.mxu0 %v2284_v48 }
  0x43   :  { %2198 = vmatpush3.bf16.msra.mxu0 %v2288_v57  ;;  %484 = vmatprep.mubr.bf16.mxu0 %v2289_v50 }
  0x4a   :  { %485 = vmatmul.mubr.bf16.gmra.mxu0 %v2291_v54 }
  0x4b   :  { %2199 = vmatprep.mubr.msk.bf16.mxu0 %vm435_vm0, %v2480_v15  ;;  %v2625_v15 = vsub.s32 4, %v107_v8 }
  0x4d   :  { %v117_v21 = vrot.slane %v104_v12, %v2625_v15 }
  0x4f   :  { %v132_v28 = vrot.slane %v117_v21, %v2623_v13 }
  0x52   :  { %2200 = vmatmul.mubr.msk.bf16.vlgmr.msra.gmra.mxu0 %vm435_vm0, %v2277_v37 }
  0x53   :  { %1304 = vmatprep.mubr.bf16.mxu0 %v2393_v1 }
  0xc9   :  { %v529_v58 = vpop.f32.mrf.mxu1 }
  0xcb   :  { %v531_v59 = vpop.f32.mrf.mxu1 }
  0xcd   :  { %v2616_v60 = vpop.f32.mrf.mxu1 }
  0xcf   :  { %v535_v61 = vpop.f32.mrf.mxu1 }
  0xd1   :  { %v539_v62 = vpop.f32.mrf.mxu1 }
  0xd3   :  { %v541_v63 = vpop.f32.mrf.mxu1 }
  0xd5   :  { %v543_v0 = vpop.f32.mrf.mxu1 }
  0xd7   :  { %v545_v2 = vpop.f32.mrf.mxu1 }
  0xe9   :  { %v2120_v3 = vpop.f32.mrf.mxu1 }
  0xeb   :  { %v2121_v4 = vpop.f32.mrf.mxu1 }
  0xec   :  { %v2122_v35 = vadd.f32 %v2121_v4, %v2120_v3 }
  0xed   :  { %v2123_v5 = vpop.f32.mrf.mxu1 }
  0xee   :  { %v583_v50 = vadd.f32 %v2122_v35, %v132_v28  ;;  %v2301_v35 = vld [vmem:[%s3142_s1 + $0x1f8] ss:$12 sps:$4 sm:$0xff]  }
  0xef   :  { %v2124_v7 = vpop.f32.mrf.mxu1 }
  0xf0   :  { %v2125_v51 = vadd.f32 %v2124_v7, %v2123_v5 }
  0xf1   :  { %v2126_v11 = vpop.f32.mrf.mxu1 }
  0xf2   :  { %v586_v7 = vadd.f32 %v2125_v51, %v132_v28 }
  0xf3   :  { %v2127_v18 = vpop.f32.mrf.mxu1 }
  0xf4   :  { %v2128_v27 = vadd.f32 %v2127_v18, %v2126_v11 }
  0xf5   :  { %v2129_v24 = vpop.f32.mrf.mxu1 }
  0xf6   :  { %v591_v39 = vadd.f32 %v2128_v27, %v132_v28 }
  0xf7   :  { %v2130_v32 = vpop.f32.mrf.mxu1 }
  0xf8   :  { %v2131_v38 = vadd.f32 %v2130_v32, %v2129_v24  ;;  %v2300_v32 = vld [vmem:[%s3142_s1 + $0x214] ss:$12 sps:$4 sm:$0xff]  }
  0xfa   :  { %v594_v54 = vadd.f32 %v2131_v38, %v132_v28  ;;  %v2292_v28 = vld [vmem:[%s3142_s1 + $0x240] ss:$12 sps:$4 sm:$0xff]  }
  0xfb   :  { %v2304_v38 = vld [vmem:[%s3142_s1 + $0x1e0] ss:$12 sps:$4 sm:$0xff]  }
 0x102   :  { %v476_v14 = vpop.f32.mrf.mxu0 }
 0x103   :  { %v477_v34 = vadd.f32 %v476_v14, %v124_v25 }
 0x104   :  { %v478_v17 = vpop.f32.mrf.mxu0 }
 0x105   :  { %v479_v29 = vadd.f32 %v478_v17, %v128_v22  ;;  %v2639_v46 = vadd.f32 %v529_v58, %v477_v34  ;;  %v2303_v34 = vld [vmem:[%s3142_s1 + $0x1fc] ss:$12 sps:$4 sm:$0xff]  }
 0x106   :  { %v480_v20 = vpop.f32.mrf.mxu0 }
 0x107   :  { %v2635_v40 = vadd.f32 %v531_v59, %v479_v29  ;;  %v481_v47 = vadd.f32 %v480_v20, %v124_v25  ;;  %v648_v3 = vmax.f32 %v2639_v46, 0.0  ;;  %v2294_v29 = vld [vmem:[%s3142_s1 + $0x244] ss:$12 sps:$4 sm:$0xff]  }
 0x108   :  { %v482_v23 = vpop.f32.mrf.mxu0  ;;  %1219 = vmatprep.subr.bf16.mxu1 %v2294_v29 }
 0x109   :  { %v483_v41 = vadd.f32 %v482_v23, %v128_v22  ;;  %v649_v55 = vmax.f32 %v2635_v40, 0.0  ;;  %1220 = vmatpush1.bf16.msra.mxu1 %v2292_v28 }
 0x10a   :  { %v486_v26 = vpop.f32.mrf.mxu0 }
 0x10b   :  { %v487_v30 = vadd.f32 %v486_v26, %v124_v25  ;;  %v2647_v56 = vadd.f32 %v535_v61, %v483_v41  ;;  %v660_v14 = vadd.f32 %v649_v55, %v648_v3  ;;  %v2307_v41 = vld [vmem:[%s3142_s1 + $0x1c8] ss:$12 sps:$4 sm:$0xff]  }
 0x10c   :  { %v488_v31 = vpop.f32.mrf.mxu0 }
 0x10d   :  { %v489_v33 = vadd.f32 %v488_v31, %v128_v22  ;;  %v2637_v42 = vadd.f32 %v539_v62, %v487_v30  ;;  %v2297_v30 = vld [vmem:[%s3142_s1 + $0x22c] ss:$12 sps:$4 sm:$0xff]   ;;  %v2295_v31 = vld [vmem:[%s3142_s1 + $0x228] ss:$12 sps:$4 sm:$0xff]  }
 0x10e   :  { %v490_v36 = vpop.f32.mrf.mxu0  ;;  %1221 = vmatprep.subr.bf16.mxu1 %v2297_v30  ;;  %v2321_v30 = vld [vmem:[%s3142_s1 + $0x2ec] ss:$12 sps:$4 sm:$0xff]  }
 0x10f   :  { %v2633_v37 = vadd.f32 %v541_v63, %v489_v33  ;;  %v491_v43 = vadd.f32 %v490_v36, %v124_v25  ;;  %v654_v57 = vmax.f32 %v2637_v42, 0.0  ;;  %1222 = vmatpush1.bf16.msra.mxu1 %v2295_v31  ;;  %v2298_v33 = vld [vmem:[%s3142_s1 + $0x210] ss:$12 sps:$4 sm:$0xff]   ;;  %v2319_v31 = vld [vmem:[%s3142_s1 + $0x2e8] ss:$12 sps:$4 sm:$0xff]  }
 0x110   :  { %v492_v44 = vpop.f32.mrf.mxu0  ;;  %1223 = vmatprep.subr.bf16.mxu1 %v2300_v32  ;;  %v2306_v36 = vld [vmem:[%s3142_s1 + $0x1e4] ss:$12 sps:$4 sm:$0xff]   ;;  %v2324_v32 = vld [vmem:[%s3142_s1 + $0x2d4] ss:$12 sps:$4 sm:$0xff]  }
 0x111   :  { %v493_v45 = vadd.f32 %v492_v44, %v128_v22  ;;  %v655_v48 = vmax.f32 %v2633_v37, 0.0  ;;  %v2650_v59 = vadd.f32 %v543_v0, %v491_v43  ;;  %v2312_v43 = vld [vmem:[%s3142_s1 + $0x1b4] ss:$12 sps:$4 sm:$0xff]   ;;  %v2310_v44 = vld [vmem:[%s3142_s1 + $0x1b0] ss:$12 sps:$4 sm:$0xff]  }
 0x112   :  { %v2201_v49 = vpop.f32.mrf.mxu0 }
 0x113   :  { %v2642_v52 = vadd.f32 %v545_v2, %v493_v45  ;;  %v2644_v53 = vadd.f32 %v2201_v49, %v591_v39  ;;  %v2657_v2 = vadd.f32 %v2616_v60, %v481_v47  ;;  %v670_v61 = vadd.f32 %v655_v48, %v654_v57  ;;  %1224 = vmatpush1.bf16.msra.mxu1 %v2298_v33  ;;  %v2309_v39 = vld [vmem:[%s3142_s1 + $0x1cc] ss:$12 sps:$4 sm:$0xff]   ;;  %v2315_v45 = vld [vmem:[%s3142_s1 + $0x19c] ss:$12 sps:$4 sm:$0xff]   ;;  %v2318_v49 = vld [vmem:[%s3142_s1 + $0x304] ss:$12 sps:$4 sm:$0xff]  }
 0x114   :  { %v631_v58 = vpop.f32.mrf.mxu0  ;;  %v652_v60 = vmax.f32 %v2647_v56, 0.0  ;;  %v657_v9 = vmax.f32 %v2650_v59, 0.0  ;;  %1225 = vmatprep.subr.bf16.mxu1 %v2303_v34  ;;  %v2313_v47 = vld [vmem:[%s3142_s1 + $0x198] ss:$12 sps:$4 sm:$0xff]   ;;  %v2322_v33 = vld [vmem:[%s3142_s1 + $0x2d0] ss:$12 sps:$4 sm:$0xff]  }
 0x115   :  { %v656_v62 = vmax.f32 %v2644_v53, 0.0  ;;  %v2653_v63 = vadd.f32 %v631_v58, %v583_v50  ;;  %v658_v4 = vmax.f32 %v2642_v52, 0.0  ;;  %v651_v19 = vmax.f32 %v2657_v2, 0.0  ;;  %v2316_v50 = vld [vmem:[%s3142_s1 + $0x300] ss:$12 sps:$4 sm:$0xff]  }
 0x116   :  { %v2202_v5 = vpop.f32.mrf.mxu0  ;;  %v2325_v34 = vld [vmem:[%s3142_s1 + $0x2b8] ss:$12 sps:$4 sm:$0xff]  }
 0x117   :  { %v650_v0 = vmax.f32 %v2653_v63, 0.0  ;;  %v2665_v6 = vadd.f32 %v2202_v5, %v594_v54  ;;  %v671_v8 = vsel %vm435_vm0, %v656_v62, 0.0  ;;  %v675_v21 = vadd.f32 %v658_v4, %v657_v9  ;;  %1226 = vmatpush1.bf16.msra.mxu1 %v2301_v35  ;;  %v2327_v35 = vld [vmem:[%s3142_s1 + $0x2bc] ss:$12 sps:$4 sm:$0xff]  }
 0x118   :  { %v634_v11 = vpop.f32.mrf.mxu0  ;;  %v672_v12 = vadd.f32 %v671_v8, %v670_v61  ;;  %v665_v25 = vadd.f32 %v652_v60, %v651_v19  ;;  %1227 = vmatprep.subr.bf16.mxu1 %v2306_v36  ;;  %v2330_v36 = vld [vmem:[%s3142_s1 + $0x2a4] ss:$12 sps:$4 sm:$0xff]  }
 0x119   :  { %v659_v16 = vmax.f32 %v2665_v6, 0.0  ;;  %v2677_v17 = vadd.f32 %v634_v11, %v586_v7  ;;  %v661_v18 = vsel %vm435_vm0, %v650_v0, 0.0 }
 0x11a   :  { %673 = vadd.xlane.f32.xlu1 %v672_v12  ;;  %v662_v20 = vadd.f32 %v661_v18, %v660_v14 }
 0x11b   :  { %v653_v22 = vmax.f32 %v2677_v17, 0.0  ;;  %v676_v23 = vsel %vm435_vm0, %v659_v16, 0.0  ;;  %1228 = vmatpush1.bf16.msra.mxu1 %v2304_v38  ;;  %v2334_v38 = vld [vmem:[%s3142_s1 + $0x318] ss:$12 sps:$4 sm:$0xff]  }
 0x11c   :  { %663 = vadd.xlane.f32.xlu0 %v662_v20  ;;  %v677_v24 = vadd.f32 %v676_v23, %v675_v21  ;;  %1229 = vmatprep.subr.bf16.mxu1 %v2309_v39  ;;  %v2336_v39 = vld [vmem:[%s3142_s1 + $0x31c] ss:$12 sps:$4 sm:$0xff]  }
 0x11d   :  { %v666_v26 = vsel %vm435_vm0, %v653_v22, 0.0  ;;  %1286 = vmatprep.subr.bf16.mxu0 %v2336_v39 }
 0x11e   :  { %678 = vadd.xlane.f32.xlu1 %v677_v24  ;;  %v667_v27 = vadd.f32 %v666_v26, %v665_v25  ;;  %1287 = vmatpush1.bf16.msra.mxu0 %v2334_v38 }
 0x11f   :  { %1230 = vmatpush1.bf16.msra.mxu1 %v2307_v41  ;;  %v2328_v41 = vld [vmem:[%s3142_s1 + $0x2a0] ss:$12 sps:$4 sm:$0xff]  }
 0x120   :  { %668 = vadd.xlane.f32.xlu0 %v667_v27  ;;  %1231 = vmatprep.subr.bf16.mxu1 %v2312_v43  ;;  %v2333_v43 = vld [vmem:[%s3142_s1 + $0x28c] ss:$12 sps:$4 sm:$0xff]  }
 0x123   :  { %1232 = vmatpush1.bf16.msra.mxu1 %v2310_v44  ;;  %v2343_v44 = vld [vmem:[%s3142_s1 + $0x308] ss:$12 sps:$4 sm:$0xff]  }
 0x124   :  { %1233 = vmatprep.subr.bf16.mxu1 %v2315_v45  ;;  %2135 = vmatprep.subr.bf16.mxu0 %v2343_v44  ;;  %v2331_v45 = vld [vmem:[%s3142_s1 + $0x288] ss:$12 sps:$4 sm:$0xff]  }
 0x127   :  { %1234 = vmatpush1.bf16.msra.mxu1 %v2313_v47  ;;  %v2339_v47 = vld [vmem:[%s3142_s1 + $0x274] ss:$12 sps:$4 sm:$0xff]  }
 0x128   :  { %1235 = vmatprep.subr.bf16.mxu1 %v2318_v49  ;;  %v2337_v49 = vld [vmem:[%s3142_s1 + $0x270] ss:$12 sps:$4 sm:$0xff]  }
 0x12b   :  { %1236 = vmatpush2.bf16.msra.mxu1 %v2316_v50  ;;  %v2342_v50 = vld [vmem:[%s3142_s1 + $0x25c] ss:$12 sps:$4 sm:$0xff]  }
 0x12c   :  { %1237 = vmatprep.subr.bf16.mxu1 %v2321_v30 }
 0x12f   :  { %1238 = vmatpush2.bf16.msra.mxu1 %v2319_v31 }
 0x130   :  { %1239 = vmatprep.subr.bf16.mxu1 %v2324_v32 }
 0x133   :  { %1240 = vmatpush2.bf16.msra.mxu1 %v2322_v33 }
 0x134   :  { %1241 = vmatprep.subr.bf16.mxu1 %v2327_v35 }
 0x137   :  { %1242 = vmatpush2.bf16.msra.mxu1 %v2325_v34 }
 0x138   :  { %1243 = vmatprep.subr.bf16.mxu1 %v2330_v36 }
 0x13b   :  { %1244 = vmatpush2.bf16.msra.mxu1 %v2328_v41 }
 0x13c   :  { %1245 = vmatprep.subr.bf16.mxu1 %v2333_v43 }
 0x13f   :  { %1246 = vmatpush2.bf16.msra.mxu1 %v2331_v45 }
 0x140   :  { %1247 = vmatprep.subr.bf16.mxu1 %v2339_v47 }
 0x143   :  { %1248 = vmatpush2.bf16.msra.mxu1 %v2337_v49 }
 0x144   :  { %1249 = vmatprep.subr.bf16.mxu1 %v2342_v50 }
 0x1a3   :  { %v674_v51 = vpop.xlane.xlu1 %673 }
 0x1a4   :  { %v683_v54 = vmul.f32 0.0036764706, %v674_v51  ;;  %v2340_v51 = vld [vmem:[%s3142_s1 + $0x258] ss:$12 sps:$4 sm:$0xff]  }
 0x1a5   :  { %v664_v58 = vpop.xlane.xlu0 %663  ;;  %1250 = vmatpush2.bf16.msra.mxu1 %v2340_v51 }
 0x1a6   :  { %v2754_v5 = vsub.f32 %v654_v57, %v683_v54  ;;  %v2758_v61 = vsub.f32 %v655_v48, %v683_v54  ;;  %v681_v7 = vmul.f32 0.0036764706, %v664_v58  ;;  %v2762_v8 = vsub.f32 %v656_v62, %v683_v54 }
 0x1a7   :  { %v679_v11 = vpop.xlane.xlu1 %678 }
 0x1a8   :  { %v2766_v12 = vsub.f32 %v648_v3, %v681_v7  ;;  %v2770_v14 = vsub.f32 %v649_v55, %v681_v7  ;;  %v2774_v42 = vsub.f32 %v650_v0, %v681_v7  ;;  %v684_v37 = vmul.f32 0.0036764706, %v679_v11 }
 0x1a9   :  { %v669_v48 = vpop.xlane.xlu0 %668  ;;  %v703_v53 = vmul.f32 %v2754_v5, %v2754_v5  ;;  %v704_v55 = vmul.f32 %v2758_v61, %v2758_v61  ;;  %v705_v6 = vmul.f32 %v2762_v8, %v2762_v8 }
 0x1aa   :  { %v2780_v57 = vsub.f32 %v657_v9, %v684_v37  ;;  %v2784_v46 = vsub.f32 %v658_v4, %v684_v37  ;;  %v682_v40 = vmul.f32 0.0036764706, %v669_v48  ;;  %v2790_v62 = vsub.f32 %v659_v16, %v684_v37 }
 0x1ab   :  { %v697_v63 = vmul.f32 %v2766_v12, %v2766_v12  ;;  %v698_v59 = vmul.f32 %v2770_v14, %v2770_v14  ;;  %v699_v3 = vmul.f32 %v2774_v42, %v2774_v42  ;;  %v719_v20 = vadd.f32 %v704_v55, %v703_v53  ;;  %v646_v55 = vld [vmem:[%s3145_s3] sm:$0x7] }
 0x1ac   :  { %v2800_v52 = vsub.f32 %v651_v19, %v682_v40  ;;  %v2804_v4 = vsub.f32 %v652_v60, %v682_v40  ;;  %v2808_v0 = vsub.f32 %v653_v22, %v682_v40  ;;  %v706_v18 = vmul.f32 %v2780_v57, %v2780_v57 }
 0x1ad   :  { %v709_v9 = vadd.f32 %v698_v59, %v697_v63  ;;  %v710_v16 = vsel %vm435_vm0, %v699_v3, 0.0  ;;  %v707_v17 = vmul.f32 %v2784_v46, %v2784_v46  ;;  %v708_v21 = vmul.f32 %v2790_v62, %v2790_v62 }
 0x1ae   :  { %v700_v2 = vmul.f32 %v2800_v52, %v2800_v52  ;;  %v701_v56 = vmul.f32 %v2804_v4, %v2804_v4  ;;  %v702_v60 = vmul.f32 %v2808_v0, %v2808_v0  ;;  %v720_v22 = vsel %vm435_vm0, %v705_v6, 0.0  ;;  %v647_v6 = vld [vmem:[%s3146_s4] sm:$0x7] }
 0x1af   :  { %v711_v19 = vadd.f32 %v710_v16, %v709_v9  ;;  %v724_v26 = vadd.f32 %v707_v17, %v706_v18  ;;  %v721_v27 = vadd.f32 %v720_v22, %v719_v20  ;;  %v725_v28 = vsel %vm435_vm0, %v708_v21, 0.0 }
 0x1b0   :  { %v714_v23 = vadd.f32 %v701_v56, %v700_v2  ;;  %v715_v24 = vsel %vm435_vm0, %v702_v60, 0.0  ;;  %v753_v9 = vunpack.c.l.bf16 %v646_v55  ;;  %v794_v18 = vunpack.c.l.bf16 %v647_v6 }
 0x1b1   :  { %712 = vadd.xlane.f32.xlu0 %v711_v19  ;;  %v726_v29 = vadd.f32 %v725_v28, %v724_v26 }
 0x1b2   :  { %v716_v25 = vadd.f32 %v715_v24, %v714_v23  ;;  %v762_v2 = vrot.slane %v753_v9, %v2621_v10  ;;  %v766_v56 = vrot.slane %v753_v9, %v2625_v15  ;;  %v758_v60 = vrot.slane %v753_v9, %v2623_v13 }
 0x1b3   :  { %v803_v17 = vrot.slane %v794_v18, %v2621_v10  ;;  %v807_v19 = vrot.slane %v794_v18, %v2625_v15  ;;  %v799_v23 = vrot.slane %v794_v18, %v2623_v13  ;;  %v2348_v18 = vld [vmem:[%s3142_s1 + $0x218] ss:$12 sps:$4 sm:$0xff]  }
 0x1b4   :  { %717 = vadd.xlane.f32.xlu1 %v716_v25  ;;  %v777_v20 = vrot.slane %v762_v2, %v2623_v13  ;;  %v781_v21 = vrot.slane %v766_v56, %v2623_v13  ;;  %v773_v22 = vrot.slane %v758_v60, %v2623_v13 }
 0x1b5   :  { %722 = vadd.xlane.f32.xlu0 %v721_v27  ;;  %v818_v28 = vrot.slane %v803_v17, %v2623_v13  ;;  %v814_v34 = vrot.slane %v799_v23, %v2623_v13  ;;  %v2350_v17 = vld [vmem:[%s3142_s1 + $0x200] ss:$12 sps:$4 sm:$0xff]   ;;  %v2355_v23 = vld [vmem:[%s3142_s1 + $0x278] ss:$12 sps:$4 sm:$0xff]  }
 0x1b8   :  { %727 = vadd.xlane.f32.xlu1 %v726_v29  ;;  %v822_v29 = vrot.slane %v807_v19, %v2623_v13  ;;  %v2351_v19 = vld [vmem:[%s3142_s1 + $0x2a8] ss:$12 sps:$4 sm:$0xff]  }
 0x23a   :  { %v713_v54 = vpop.xlane.xlu0 %712 }
 0x23b   :  { %v729_v58 = vmul.f32 0.0036764706, %v713_v54 }
 0x23d   :  { %v733_v7 = vadd.f32 1e-05, %v729_v58  ;;  %v718_v11 = vpop.xlane.xlu1 %717 }
 0x23e   :  { %v730_v37 = vmul.f32 0.0036764706, %v718_v11  ;;  %v723_v48 = vpop.xlane.xlu0 %722 }
 0x23f   :  { %2377 = vrsqrt.f32 %v733_v7  ;;  %v731_v53 = vmul.f32 0.0036764706, %v723_v48 }
 0x240   :  { %v734_v40 = vadd.f32 1e-05, %v730_v37 }
 0x241   :  { %v735_v63 = vadd.f32 1e-05, %v731_v53  ;;  %v728_v59 = vpop.xlane.xlu1 %727 }
 0x242   :  { %2379 = vrsqrt.f32 %v734_v40  ;;  %v732_v3 = vmul.f32 0.0036764706, %v728_v59 }
 0x243   :  { %2381 = vrsqrt.f32 %v735_v63 }
 0x244   :  { %v736_v16 = vadd.f32 1e-05, %v732_v3  ;;  %v2347_v3 = vld [vmem:[%s3142_s1 + $0x2d8] ss:$12 sps:$4 sm:$0xff]  }
 0x246   :  { %2383 = vrsqrt.f32 %v736_v16 }
 0x24c   :  { %v2378_v24 = vpop.eup %2377 }
 0x24d   :  { %v742_v25 = vmul.f32 %v2378_v24, %v2770_v14  ;;  %v743_v26 = vmul.f32 %v2378_v24, %v2774_v42  ;;  %v741_v27 = vmul.f32 %v2378_v24, %v2766_v12  ;;  %v2356_v24 = vld [vmem:[%s3142_s1 + $0x1b8] ss:$12 sps:$4 sm:$0xff]  }
 0x24f   :  { %v2380_v30 = vpop.eup %2379  ;;  %v783_v31 = vmul.f32 %v777_v20, %v742_v25  ;;  %v784_v32 = vmul.f32 %v781_v21, %v743_v26  ;;  %v782_v33 = vmul.f32 %v773_v22, %v741_v27  ;;  %v2357_v25 = vld [vmem:[%s3142_s1 + $0x260] ss:$12 sps:$4 sm:$0xff]  }
 0x250   :  { %v2382_v35 = vpop.eup %2381  ;;  %v745_v36 = vmul.f32 %v2380_v30, %v2804_v4  ;;  %v746_v38 = vmul.f32 %v2380_v30, %v2808_v0  ;;  %v744_v14 = vmul.f32 %v2380_v30, %v2800_v52  ;;  %v2344_v52 = vld [vmem:[%s3142_s1 + $0x248] ss:$12 sps:$4 sm:$0xff]   ;;  %v2358_v26 = vld [vmem:[%s3142_s1 + $0x1a0] ss:$12 sps:$4 sm:$0xff]  }
 0x251   :  { %v748_v42 = vmul.f32 %v2382_v35, %v2758_v61  ;;  %v824_v39 = vadd.f32 %v818_v28, %v783_v31  ;;  %v825_v45 = vadd.f32 %v822_v29, %v784_v32  ;;  %v823_v47 = vadd.f32 %v814_v34, %v782_v33  ;;  %v2359_v27 = vld [vmem:[%s3142_s1 + $0x320] ss:$12 sps:$4 sm:$0xff]  }
 0x252   :  { %v786_v12 = vmul.f32 %v777_v20, %v745_v36  ;;  %v787_v41 = vmul.f32 %v781_v21, %v746_v38  ;;  %v785_v43 = vmul.f32 %v773_v22, %v744_v14  ;;  %v749_v50 = vmul.f32 %v2382_v35, %v2762_v8  ;;  %v2345_v8 = vld [vmem:[%s3142_s1 + $0x2f0] ss:$12 sps:$4 sm:$0xff]   ;;  %v2019_v14 = vld [vmem:[%s3144_s2 + $0x3] sm:$0x7] }
 0x253   :  { %v2384_v44 = vpop.eup %2383  ;;  %v789_v49 = vmul.f32 %v777_v20, %v748_v42  ;;  %v747_v0 = vmul.f32 %v2382_v35, %v2754_v5  ;;  %v2346_v5 = vld [vmem:[%s3142_s1 + $0x230] ss:$12 sps:$4 sm:$0xff]  }
 0x254   :  { %v827_v51 = vadd.f32 %v818_v28, %v786_v12  ;;  %v828_v54 = vadd.f32 %v822_v29, %v787_v41  ;;  %v826_v58 = vadd.f32 %v814_v34, %v785_v43  ;;  %v751_v4 = vmul.f32 %v2384_v44, %v2784_v46 }
 0x255   :  { %v752_v61 = vmul.f32 %v2384_v44, %v2790_v62  ;;  %v750_v7 = vmul.f32 %v2384_v44, %v2780_v57  ;;  %v830_v55 = vadd.f32 %v818_v28, %v789_v49  ;;  %v790_v62 = vmul.f32 %v781_v21, %v749_v50 }
 0x256   :  { %v836_v11 = vpack.c.bf16 %v827_v51, %v824_v39  ;;  %v837_v37 = vpack.c.bf16 %v828_v54, %v825_v45  ;;  %v835_v48 = vpack.c.bf16 %v826_v58, %v823_v47  ;;  %v792_v53 = vmul.f32 %v777_v20, %v751_v4  ;;  %v2352_v20 = vld [vmem:[%s3142_s1 + $0x1e8] ss:$12 sps:$4 sm:$0xff]  }
 0x257   :  { %v793_v40 = vmul.f32 %v781_v21, %v752_v61  ;;  %v791_v46 = vmul.f32 %v773_v22, %v750_v7  ;;  %v788_v57 = vmul.f32 %v773_v22, %v747_v0  ;;  %v831_v16 = vadd.f32 %v822_v29, %v790_v62  ;;  %v2353_v21 = vld [vmem:[%s3142_s1 + $0x290] ss:$12 sps:$4 sm:$0xff]  }
 0x258   :  { %1251 = vmatprep.mubr.bf16.mxu1 %v836_v11  ;;  %2071 = vmatmul.mubr.msk.bf16.vlgmr.msra.gmra.mxu0 %vm435_vm0, %v837_v37  ;;  %v833_v63 = vadd.f32 %v818_v28, %v792_v53  ;;  %v2354_v22 = vld [vmem:[%s3142_s1 + $0x1d0] ss:$12 sps:$4 sm:$0xff]   ;;  %v912_v39 = vunpack.c.l.bf16 %v2019_v14 }
 0x259   :  { %2136 = vmatpush3.bf16.msra.mxu0 %v2344_v52  ;;  %1252 = vmatmul.mubr.bf16.vlgmr.msra.gmra.mxu1 %v835_v48  ;;  %v834_v6 = vadd.f32 %v822_v29, %v793_v40  ;;  %v832_v9 = vadd.f32 %v814_v34, %v791_v46  ;;  %v829_v2 = vadd.f32 %v814_v34, %v788_v57 }
 0x25a   :  { %2137 = vmatprep.subr.bf16.mxu0 %v2345_v8  ;;  %v839_v59 = vpack.c.bf16 %v833_v63, %v830_v55  ;;  %1314 = vmatprep.mubr.bf16.mxu0 %v2393_v1  ;;  %v2349_v1 = vld [vmem:[%s3142_s1 + $0x2c0] ss:$12 sps:$4 sm:$0xff]   ;;  %v921_v43 = vrot.slane %v912_v39, %v2621_v10  ;;  %v917_v47 = vrot.slane %v912_v39, %v2623_v13 }
 0x25b   :  { %v840_v56 = vpack.c.bf16 %v834_v6, %v831_v16  ;;  %v838_v60 = vpack.c.bf16 %v832_v9, %v829_v2  ;;  %v925_v52 = vrot.slane %v912_v39, %v2625_v15 }
 0x25c   :  { %1261 = vmatprep.mubr.bf16.mxu1 %v839_v59  ;;  %v936_v50 = vrot.slane %v921_v43, %v2623_v13  ;;  %v932_v58 = vrot.slane %v917_v47, %v2623_v13 }
 0x25d   :  { %2138 = vmatpush3.bf16.msra.mxu0 %v2346_v5  ;;  %v940_v53 = vrot.slane %v925_v52, %v2623_v13 }
 0x25e   :  { %2139 = vmatprep.subr.bf16.mxu0 %v2347_v3 }
 0x260   :  { %2072 = vmatmul.mubr.msk.bf16.gmra.mxu0 %vm435_vm0, %v840_v56 }
 0x261   :  { %2140 = vmatpush3.bf16.msra.mxu0 %v2348_v18  ;;  %1262 = vmatmul.mubr.bf16.gmra.mxu1 %v838_v60 }
 0x262   :  { %1357 = vmatprep.mubr.bf16.mxu0 %v836_v11  ;;  %2141 = vmatprep.subr.bf16.mxu0 %v2349_v1 }
 0x265   :  { %2142 = vmatpush3.bf16.msra.mxu0 %v2350_v17 }
 0x266   :  { %2143 = vmatprep.subr.bf16.mxu0 %v2351_v19 }
 0x269   :  { %2144 = vmatpush3.bf16.msra.mxu0 %v2352_v20 }
 0x26a   :  { %2145 = vmatprep.subr.bf16.mxu0 %v2353_v21 }
 0x26d   :  { %2146 = vmatpush3.bf16.msra.mxu0 %v2354_v22 }
 0x26e   :  { %2147 = vmatprep.subr.bf16.mxu0 %v2355_v23 }
 0x271   :  { %2148 = vmatpush3.bf16.msra.mxu0 %v2356_v24 }
 0x272   :  { %2149 = vmatprep.subr.bf16.mxu0 %v2357_v25 }
 0x275   :  { %2150 = vmatpush3.bf16.msra.mxu0 %v2358_v26 }
 0x276   :  { %2203 = vmatprep.subr.bf16.mxu0 %v2359_v27 }
 0x278   :  { %1358 = vmatmul.mubr.bf16.vlgmr.msra.gmra.mxu0 %v835_v48 }
 0x279   :  { %1365 = vmatprep.mubr.bf16.mxu0 %v839_v59  ;;  %2204 = vmatpush3.bf16.msra.mxu0 %v2359_v27 }
 0x280   :  { %1366 = vmatmul.mubr.bf16.gmra.mxu0 %v838_v60 }
 0x281   :  { %2205 = vmatprep.mubr.msk.bf16.mxu0 %vm435_vm0, %v837_v37 }
 0x288   :  { %2206 = vmatmul.mubr.msk.bf16.vlgmr.msra.gmra.mxu0 %vm435_vm0, %v840_v56 }
 0x318   :  { %v1306_v28 = vpop.f32.mrf.mxu0 }
 0x319   :  { %v1253_v33 = vpop.f32.mrf.mxu1 }
 0x31a   :  { %v1308_v29 = vpop.f32.mrf.mxu0  ;;  %v1254_v37 = vadd.f32 %v1253_v33, %v932_v58 }
 0x31b   :  { %v1255_v35 = vpop.f32.mrf.mxu1 }
 0x31c   :  { %v1310_v30 = vpop.f32.mrf.mxu0  ;;  %v1256_v61 = vadd.f32 %v1255_v35, %v936_v50  ;;  %v1307_v59 = vadd.f32 %v1306_v28, %v1254_v37 }
 0x31d   :  { %v1257_v38 = vpop.f32.mrf.mxu1 }
 0x31e   :  { %v1312_v31 = vpop.f32.mrf.mxu0  ;;  %v2973_v40 = vadd.f32 %v1308_v29, %v1256_v61  ;;  %v1258_v3 = vadd.f32 %v1257_v38, %v932_v58  ;;  %v1427_v22 = vmax.f32 %v1307_v59, 0.0 }
 0x31f   :  { %v1259_v12 = vpop.f32.mrf.mxu1 }
 0x320   :  { %v1316_v32 = vpop.f32.mrf.mxu0  ;;  %v1260_v46 = vadd.f32 %v1259_v12, %v936_v50  ;;  %v1428_v56 = vmax.f32 %v2973_v40, 0.0  ;;  %v1311_v23 = vadd.f32 %v1310_v30, %v1258_v3 }
 0x321   :  { %v1263_v45 = vpop.f32.mrf.mxu1 }
 0x322   :  { %v1318_v34 = vpop.f32.mrf.mxu0  ;;  %v1264_v6 = vadd.f32 %v1263_v45, %v932_v58  ;;  %v1313_v1 = vadd.f32 %v1312_v31, %v1260_v46 }
 0x323   :  { %v1265_v54 = vpop.f32.mrf.mxu1 }
 0x324   :  { %v2962_v36 = vpop.f32.mrf.mxu0  ;;  %v1266_v55 = vadd.f32 %v1265_v54, %v936_v50  ;;  %v1317_v24 = vadd.f32 %v1316_v32, %v1264_v6  ;;  %v1431_v35 = vmax.f32 %v1313_v1, 0.0 }
 0x325   :  { %v1267_v7 = vpop.f32.mrf.mxu1 }
 0x326   :  { %v1322_v42 = vpop.f32.mrf.mxu0  ;;  %v1319_v60 = vadd.f32 %v1318_v34, %v1266_v55  ;;  %v1268_v25 = vadd.f32 %v1267_v7, %v932_v58  ;;  %v1439_v34 = vadd.f32 %v1428_v56, %v1427_v22  ;;  %v1433_v43 = vmax.f32 %v1317_v24, 0.0 }
 0x327   :  { %v1269_v62 = vpop.f32.mrf.mxu1 }
 0x328   :  { %v1270_v17 = vadd.f32 %v1269_v62, %v936_v50  ;;  %v1434_v38 = vmax.f32 %v1319_v60, 0.0  ;;  %v1321_v30 = vadd.f32 %v2962_v36, %v1268_v25 }
 0x32a   :  { %v1323_v14 = vadd.f32 %v1322_v42, %v1270_v17  ;;  %v1436_v54 = vmax.f32 %v1321_v30, 0.0  ;;  %v2362_v30 = vld [vmem:[%s3147_s5 + $0x70] sm:$0xff]  }
 0x338   :  { %v2151_v41 = vpop.f32.mrf.mxu0 }
 0x33a   :  { %v2152_v44 = vpop.f32.mrf.mxu0 }
 0x33b   :  { %v2153_v8 = vadd.f32 %v2152_v44, %v2151_v41  ;;  %v1430_v41 = vmax.f32 %v1311_v23, 0.0 }
 0x33c   :  { %v2154_v49 = vpop.f32.mrf.mxu0 }
 0x33d   :  { %v1360_v2 = vadd.f32 %v2153_v8, %v940_v53  ;;  %v1444_v50 = vadd.f32 %v1431_v35, %v1430_v41 }
 0x33e   :  { %v2155_v51 = vpop.f32.mrf.mxu0 }
 0x33f   :  { %v2156_v16 = vadd.f32 %v2155_v51, %v2154_v49  ;;  %v1437_v49 = vmax.f32 %v1323_v14, 0.0  ;;  %v1449_v51 = vadd.f32 %v1434_v38, %v1433_v43 }
 0x340   :  { %v2157_v4 = vpop.f32.mrf.mxu0 }
 0x341   :  { %v1363_v33 = vadd.f32 %v2156_v16, %v940_v53  ;;  %v1454_v36 = vadd.f32 %v1437_v49, %v1436_v54 }
 0x342   :  { %v2158_v0 = vpop.f32.mrf.mxu0 }
 0x343   :  { %v2159_v11 = vadd.f32 %v2158_v0, %v2157_v4  ;;  %v2360_v0 = vld [vmem:[%s3147_s5 + $0x78] sm:$0xff]  }
 0x344   :  { %v2160_v48 = vpop.f32.mrf.mxu0  ;;  %2166 = vmatprep.subr.bf16.mxu1 %v2360_v0 }
 0x345   :  { %v1368_v57 = vadd.f32 %v2159_v11, %v940_v53 }
 0x346   :  { %v2161_v63 = vpop.f32.mrf.mxu0 }
 0x347   :  { %v2162_v5 = vadd.f32 %v2161_v63, %v2160_v48 }
 0x348   :  { %v2207_v9 = vpop.f32.mrf.mxu0 }
 0x349   :  { %v2975_v18 = vadd.f32 %v2207_v9, %v1368_v57  ;;  %v1371_v21 = vadd.f32 %v2162_v5, %v940_v53 }
 0x34a   :  { %v1408_v19 = vpop.f32.mrf.mxu0 }
 0x34b   :  { %v1409_v20 = vadd.f32 %v1408_v19, %v1360_v2  ;;  %v1435_v27 = vmax.f32 %v2975_v18, 0.0 }
 0x34c   :  { %v2208_v26 = vpop.f32.mrf.mxu0 }
 0x34d   :  { %v1429_v28 = vmax.f32 %v1409_v20, 0.0  ;;  %v2979_v29 = vadd.f32 %v2208_v26, %v1371_v21  ;;  %v1450_v47 = vsel %vm435_vm0, %v1435_v27, 0.0 }
 0x34e   :  { %v1411_v31 = vpop.f32.mrf.mxu0  ;;  %v1451_v4 = vadd.f32 %v1450_v47, %v1449_v51  ;;  %v2366_v47 = vld [vmem:[%s3147_s5 + $0x60] sm:$0xff]   ;;  %v2369_v51 = vld [vmem:[%s3147_s5 + $0x18] sm:$0xff]  }
 0x34f   :  { %v1412_v12 = vadd.f32 %v1411_v31, %v1363_v33  ;;  %v1440_v39 = vsel %vm435_vm0, %v1429_v28, 0.0  ;;  %v1438_v44 = vmax.f32 %v2979_v29, 0.0 }
 0x350   :  { %v1441_v32 = vadd.f32 %v1440_v39, %v1439_v34 }
 0x351   :  { %v1432_v45 = vmax.f32 %v1412_v12, 0.0  ;;  %v1455_v52 = vsel %vm435_vm0, %v1438_v44, 0.0 }
 0x352   :  { %1442 = vadd.xlane.f32.xlu0 %v1441_v32  ;;  %v1456_v61 = vadd.f32 %v1455_v52, %v1454_v36  ;;  %v2363_v32 = vld [vmem:[%s3147_s5 + $0x30] sm:$0xff]   ;;  %v2374_v52 = vld [vmem:[%s3147_s5 + $0x40] sm:$0xff]  }
 0x353   :  { %v1445_v42 = vsel %vm435_vm0, %v1432_v45, 0.0  ;;  %v2375_v36 = vld [vmem:[%s3147_s5] sm:$0xff]  }
 0x354   :  { %v1446_v58 = vadd.f32 %v1445_v42, %v1444_v50  ;;  %v2368_v50 = vld [vmem:[%s3147_s5 + $0x58] sm:$0xff]   ;;  %v2370_v42 = vld [vmem:[%s3147_s5 + $0x50] sm:$0xff]  }
 0x356   :  { %1447 = vadd.xlane.f32.xlu1 %v1446_v58  ;;  %1452 = vadd.xlane.f32.xlu0 %v1451_v4  ;;  %v2372_v58 = vld [vmem:[%s3147_s5 + $0x48] sm:$0xff]  }
 0x357   :  { %v2373_v4 = vld [vmem:[%s3147_s5 + $0x8] sm:$0xff]  }
 0x35a   :  { %1457 = vadd.xlane.f32.xlu1 %v1456_v61  ;;  %v2376_v61 = vld [vmem:[%s3147_s5 + $0x80] sm:$0xff]  }
 0x35b   :  { %2209 = vmatprep.subr.bf16.mxu0 %v2376_v61 }
 0x35c   :  { %2210 = vmatpush3.bf16.msra.mxu0 %v2376_v61 }
 0x3db   :  { %v1443_v7 = vpop.xlane.xlu0 %1442 }
 0x3dc   :  { %v1459_v11 = vmul.f32 0.0036764706, %v1443_v7 }
 0x3de   :  { %v2990_v37 = vsub.f32 %v1427_v22, %v1459_v11  ;;  %v2992_v48 = vsub.f32 %v1428_v56, %v1459_v11  ;;  %v2994_v8 = vsub.f32 %v1429_v28, %v1459_v11 }
 0x3df   :  { %v1448_v53 = vpop.xlane.xlu1 %1447  ;;  %v1453_v40 = vpop.xlane.xlu0 %1452 }
 0x3e0   :  { %v1460_v46 = vmul.f32 0.0036764706, %v1448_v53  ;;  %v1461_v55 = vmul.f32 0.0036764706, %v1453_v40  ;;  %v1475_v63 = vmul.f32 %v2990_v37, %v2990_v37  ;;  %v1476_v62 = vmul.f32 %v2992_v48, %v2992_v48 }
 0x3e1   :  { %v1477_v5 = vmul.f32 %v2994_v8, %v2994_v8 }
 0x3e2   :  { %v3002_v57 = vsub.f32 %v1430_v41, %v1460_v46  ;;  %v3004_v59 = vsub.f32 %v1431_v35, %v1460_v46  ;;  %v3006_v3 = vsub.f32 %v1432_v45, %v1460_v46  ;;  %v3008_v6 = vsub.f32 %v1433_v43, %v1461_v55  ;;  %v2361_v43 = vld [vmem:[%s3147_s5 + $0x38] sm:$0xff]   ;;  %v2365_v45 = vld [vmem:[%s3147_s5 + $0x28] sm:$0xff]  }
 0x3e3   :  { %v3010_v9 = vsub.f32 %v1434_v38, %v1461_v55  ;;  %v3012_v16 = vsub.f32 %v1435_v27, %v1461_v55  ;;  %v1458_v18 = vpop.xlane.xlu1 %1457  ;;  %v1487_v2 = vadd.f32 %v1476_v62, %v1475_v63  ;;  %v1488_v56 = vsel %vm435_vm0, %v1477_v5, 0.0  ;;  %2167 = vmatpush3.bf16.msra.mxu1 %v2361_v43  ;;  %v2075_v62 = vld [vmem:[%s3145_s3 + $0x3] sm:$0x7] }
 0x3e4   :  { %v1462_v1 = vmul.f32 0.0036764706, %v1458_v18  ;;  %v1478_v60 = vmul.f32 %v3002_v57, %v3002_v57  ;;  %v1479_v17 = vmul.f32 %v3004_v59, %v3004_v59  ;;  %v1480_v19 = vmul.f32 %v3006_v3, %v3006_v3  ;;  %2168 = vmatprep.subr.bf16.mxu1 %v2362_v30 }
 0x3e5   :  { %v1489_v20 = vadd.f32 %v1488_v56, %v1487_v2  ;;  %v1481_v21 = vmul.f32 %v3008_v6, %v3008_v6  ;;  %v1482_v22 = vmul.f32 %v3010_v9, %v3010_v9  ;;  %v1483_v23 = vmul.f32 %v3012_v16, %v3012_v16  ;;  %v2076_v56 = vld [vmem:[%s3146_s4 + $0x3] sm:$0x7] }
 0x3e6   :  { %v3027_v24 = vsub.f32 %v1436_v54, %v1462_v1  ;;  %v3029_v25 = vsub.f32 %v1437_v49, %v1462_v1  ;;  %v3031_v26 = vsub.f32 %v1438_v44, %v1462_v1  ;;  %v1492_v27 = vadd.f32 %v1479_v17, %v1478_v60  ;;  %v2364_v44 = vld [vmem:[%s3147_s5 + $0x68] sm:$0xff]   ;;  %v2367_v49 = vld [vmem:[%s3147_s5 + $0x20] sm:$0xff]   ;;  %v2371_v54 = vld [vmem:[%s3147_s5 + $0x10] sm:$0xff]  }
 0x3e7   :  { %1490 = vadd.xlane.f32.xlu0 %v1489_v20  ;;  %v1493_v28 = vsel %vm435_vm0, %v1480_v19, 0.0  ;;  %v1497_v29 = vadd.f32 %v1482_v22, %v1481_v21  ;;  %v1498_v33 = vsel %vm435_vm0, %v1483_v23, 0.0  ;;  %2169 = vmatpush3.bf16.msra.mxu1 %v2363_v32  ;;  %v1531_v1 = vunpack.c.l.bf16 %v2075_v62 }
 0x3e8   :  { %v1494_v35 = vadd.f32 %v1493_v28, %v1492_v27  ;;  %v1484_v38 = vmul.f32 %v3027_v24, %v3027_v24  ;;  %v1485_v14 = vmul.f32 %v3029_v25, %v3029_v25  ;;  %v1486_v31 = vmul.f32 %v3031_v26, %v3031_v26  ;;  %2170 = vmatprep.subr.bf16.mxu1 %v2364_v44 }
 0x3e9   :  { %v1499_v34 = vadd.f32 %v1498_v33, %v1497_v29  ;;  %v1572_v17 = vunpack.c.l.bf16 %v2076_v56  ;;  %v1540_v19 = vrot.slane %v1531_v1, %v2621_v10  ;;  %v1544_v20 = vrot.slane %v1531_v1, %v2625_v15 }
 0x3ea   :  { %1495 = vadd.xlane.f32.xlu1 %v1494_v35  ;;  %v1502_v12 = vadd.f32 %v1485_v14, %v1484_v38  ;;  %v1503_v39 = vsel %vm435_vm0, %v1486_v31, 0.0  ;;  %v1536_v21 = vrot.slane %v1531_v1, %v2623_v13 }
 0x3eb   :  { %1500 = vadd.xlane.f32.xlu0 %v1499_v34  ;;  %2171 = vmatpush3.bf16.msra.mxu1 %v2365_v45  ;;  %v1581_v22 = vrot.slane %v1572_v17, %v2621_v10  ;;  %v1585_v23 = vrot.slane %v1572_v17, %v2625_v15  ;;  %v1555_v27 = vrot.slane %v1540_v19, %v2623_v13 }
 0x3ec   :  { %v1504_v41 = vadd.f32 %v1503_v39, %v1502_v12  ;;  %2172 = vmatprep.subr.bf16.mxu1 %v2366_v47  ;;  %v1559_v28 = vrot.slane %v1544_v20, %v2623_v13  ;;  %v1551_v29 = vrot.slane %v1536_v21, %v2623_v13  ;;  %v1577_v33 = vrot.slane %v1572_v17, %v2623_v13 }
 0x3ed   :  { %v1596_v34 = vrot.slane %v1581_v22, %v2623_v13  ;;  %v1600_v10 = vrot.slane %v1585_v23, %v2623_v13 }
 0x3ee   :  { %1505 = vadd.xlane.f32.xlu1 %v1504_v41  ;;  %v1592_v43 = vrot.slane %v1577_v33, %v2623_v13 }
 0x3ef   :  { %2173 = vmatpush3.bf16.msra.mxu1 %v2367_v49 }
 0x3f0   :  { %2174 = vmatprep.subr.bf16.mxu1 %v2368_v50 }
 0x3f3   :  { %2175 = vmatpush3.bf16.msra.mxu1 %v2369_v51 }
 0x3f4   :  { %2176 = vmatprep.subr.bf16.mxu1 %v2370_v42 }
 0x3f7   :  { %2177 = vmatpush3.bf16.msra.mxu1 %v2371_v54 }
 0x3f8   :  { %2178 = vmatprep.subr.bf16.mxu1 %v2372_v58 }
 0x3fb   :  { %2179 = vmatpush3.bf16.msra.mxu1 %v2373_v4 }
 0x3fc   :  { %2180 = vmatprep.subr.bf16.mxu1 %v2374_v52 }
 0x3ff   :  { %2181 = vmatpush3.bf16.msra.mxu1 %v2375_v36 }
 0x470   :  { %v1491_v0 = vpop.xlane.xlu0 %1490 }
 0x471   :  { %v1507_v7 = vmul.f32 0.0036764706, %v1491_v0 }
 0x473   :  { %v1511_v11 = vadd.f32 1e-05, %v1507_v7  ;;  %v1496_v53 = vpop.xlane.xlu1 %1495 }
 0x474   :  { %v1508_v40 = vmul.f32 0.0036764706, %v1496_v53  ;;  %v1501_v46 = vpop.xlane.xlu0 %1500 }
 0x475   :  { %2385 = vrsqrt.f32 %v1511_v11  ;;  %v1509_v55 = vmul.f32 0.0036764706, %v1501_v46 }
 0x476   :  { %v1512_v63 = vadd.f32 1e-05, %v1508_v40 }
 0x477   :  { %v1513_v5 = vadd.f32 1e-05, %v1509_v55  ;;  %v1506_v18 = vpop.xlane.xlu1 %1505 }
 0x478   :  { %2387 = vrsqrt.f32 %v1512_v63  ;;  %v1510_v2 = vmul.f32 0.0036764706, %v1506_v18 }
 0x479   :  { %2389 = vrsqrt.f32 %v1513_v5 }
 0x47a   :  { %v1514_v60 = vadd.f32 1e-05, %v1510_v2  ;;  %v1653_v2 = vld [vmem:[%s3148_s6] sm:$0x1] }
 0x47b   :  { %v1654_v56 = vunpack.c.l.bf16 %v1653_v2 }
 0x47c   :  { %2391 = vrsqrt.f32 %v1514_v60 }
 0x47d   :  { %v1658_v60 = vrot.slane %v1654_v56, %v2623_v13 }
 0x482   :  { %v2386_v35 = vpop.eup %2385 }
 0x483   :  { %v1520_v38 = vmul.f32 %v2386_v35, %v2992_v48  ;;  %v1521_v14 = vmul.f32 %v2386_v35, %v2994_v8  ;;  %v1519_v31 = vmul.f32 %v2386_v35, %v2990_v37 }
 0x485   :  { %v2388_v15 = vpop.eup %2387  ;;  %v1561_v12 = vmul.f32 %v1555_v27, %v1520_v38  ;;  %v1562_v39 = vmul.f32 %v1559_v28, %v1521_v14  ;;  %v1560_v41 = vmul.f32 %v1551_v29, %v1519_v31 }
 0x486   :  { %v2390_v30 = vpop.eup %2389  ;;  %v1523_v32 = vmul.f32 %v2388_v15, %v3004_v59  ;;  %v1524_v44 = vmul.f32 %v2388_v15, %v3006_v3  ;;  %v1522_v48 = vmul.f32 %v2388_v15, %v3002_v57 }
 0x487   :  { %v1526_v8 = vmul.f32 %v2390_v30, %v3010_v9  ;;  %v1527_v49 = vmul.f32 %v2390_v30, %v3012_v16  ;;  %v1602_v51 = vadd.f32 %v1596_v34, %v1561_v12  ;;  %v1603_v42 = vadd.f32 %v1600_v10, %v1562_v39 }
 0x488   :  { %v1564_v37 = vmul.f32 %v1555_v27, %v1523_v32  ;;  %v1565_v45 = vmul.f32 %v1559_v28, %v1524_v44  ;;  %v1563_v47 = vmul.f32 %v1551_v29, %v1522_v48  ;;  %v1601_v54 = vadd.f32 %v1592_v43, %v1560_v41 }
 0x489   :  { %v2392_v50 = vpop.eup %2391  ;;  %v1567_v58 = vmul.f32 %v1555_v27, %v1526_v8  ;;  %v1568_v57 = vmul.f32 %v1559_v28, %v1527_v49  ;;  %v1525_v9 = vmul.f32 %v2390_v30, %v3008_v6 }
 0x48a   :  { %v1605_v4 = vadd.f32 %v1596_v34, %v1564_v37  ;;  %v1606_v52 = vadd.f32 %v1600_v10, %v1565_v45  ;;  %v1604_v36 = vadd.f32 %v1592_v43, %v1563_v47  ;;  %v1529_v59 = vmul.f32 %v2392_v50, %v3029_v25 }
 0x48b   :  { %v1530_v3 = vmul.f32 %v2392_v50, %v3031_v26  ;;  %v1528_v61 = vmul.f32 %v2392_v50, %v3027_v24  ;;  %v1608_v46 = vadd.f32 %v1596_v34, %v1567_v58  ;;  %v1609_v25 = vadd.f32 %v1600_v10, %v1568_v57 }
 0x48c   :  { %v1614_v0 = vpack.c.bf16 %v1605_v4, %v1602_v51  ;;  %v1615_v7 = vpack.c.bf16 %v1606_v52, %v1603_v42  ;;  %v1613_v16 = vpack.c.bf16 %v1604_v36, %v1601_v54  ;;  %v1570_v11 = vmul.f32 %v1555_v27, %v1529_v59 }
 0x48d   :  { %v1571_v53 = vmul.f32 %v1559_v28, %v1530_v3  ;;  %v1569_v40 = vmul.f32 %v1551_v29, %v1528_v61  ;;  %v1566_v26 = vmul.f32 %v1551_v29, %v1525_v9 }
 0x48e   :  { %1799 = vmatprep.mubr.bf16.mxu1 %v1614_v0  ;;  %2211 = vmatprep.mubr.msk.bf16.mxu0 %vm435_vm0, %v1615_v7  ;;  %v1611_v55 = vadd.f32 %v1596_v34, %v1570_v11 }
 0x48f   :  { %1800 = vmatmul.mubr.bf16.vlgmr.msra.gmra.mxu1 %v1613_v16  ;;  %v1612_v63 = vadd.f32 %v1600_v10, %v1571_v53  ;;  %v1610_v6 = vadd.f32 %v1592_v43, %v1569_v40  ;;  %v1607_v24 = vadd.f32 %v1592_v43, %v1566_v26 }
 0x490   :  { %v1617_v62 = vpack.c.bf16 %v1611_v55, %v1608_v46 }
 0x491   :  { %v1618_v5 = vpack.c.bf16 %v1612_v63, %v1609_v25  ;;  %v1616_v18 = vpack.c.bf16 %v1610_v6, %v1607_v24 }
 0x492   :  { %1807 = vmatprep.mubr.bf16.mxu1 %v1617_v62 }
 0x493   :  { %2212 = vmatmul.mubr.msk.bf16.vlgmr.msra.gmra.mxu0 %vm435_vm0, %v1618_v5 }
 0x497   :  { %1808 = vmatmul.mubr.bf16.gmra.mxu1 %v1616_v18 }
 0x54f   :  { %v2182_v1 = vpop.f32.mrf.mxu1 }
 0x551   :  { %v2183_v17 = vpop.f32.mrf.mxu1 }
 0x552   :  { %v2184_v19 = vadd.f32 %v2183_v17, %v2182_v1 }
 0x553   :  { %v2213_v20 = vpop.f32.mrf.mxu0  ;;  %v2185_v21 = vpop.f32.mrf.mxu1 }
 0x554   :  { %v1802_v22 = vadd.f32 %v2184_v19, %v1658_v60 }
 0x555   :  { %v1850_v23 = vpop.f32.mrf.mxu0  ;;  %v2186_v27 = vpop.f32.mrf.mxu1 }
 0x556   :  { %v1851_v28 = vadd.f32 %v1850_v23, %v1802_v22  ;;  %v2187_v29 = vadd.f32 %v2186_v27, %v2185_v21 }
 0x557   :  { %v2214_v33 = vpop.f32.mrf.mxu0  ;;  %v2188_v35 = vpop.f32.mrf.mxu1 }
 0x558   :  { %v2100_v38 = vpack.c.bf16 %v1851_v28, %v1851_v28  ;;  %v1805_v14 = vadd.f32 %v2187_v29, %v1658_v60 }
 0x559   :  { %v1853_v31 = vpop.f32.mrf.mxu0  ;;  %v2189_v34 = vpop.f32.mrf.mxu1 }
 0x55a   :  { %1882 = vst.msk [vmem:[%s3149_s7] sm:$0xf] %vm1881_vm1, %v2100_v38  ;;  %v1854_v13 = vadd.f32 %v1853_v31, %v1805_v14  ;;  %v2190_v10 = vadd.f32 %v2189_v34, %v2188_v35 }
 0x55b   :  { %v2191_v15 = vpop.f32.mrf.mxu1 }
 0x55c   :  { %v2101_v12 = vpack.c.bf16 %v1854_v13, %v1854_v13  ;;  %v1810_v39 = vadd.f32 %v2190_v10, %v1658_v60 }
 0x55d   :  { %v2192_v41 = vpop.f32.mrf.mxu1 }
 0x55e   :  { %1883 = vst.msk [vmem:[%s3149_s7 + $0x4] sm:$0xf] %vm1881_vm1, %v2101_v12  ;;  %v1859_v43 = vadd.f32 %v2213_v20, %v1810_v39  ;;  %v2193_v30 = vadd.f32 %v2192_v41, %v2191_v15 }
 0x560   :  { %v2102_v32 = vpack.c.bf16 %v1859_v43, %v1859_v43  ;;  %v1813_v44 = vadd.f32 %v2193_v30, %v1658_v60 }
 0x562   :  { %1884 = vst.msk [vmem:[%s3149_s7 + $0x8] sm:$0xf] %vm1881_vm1, %v2102_v32  ;;  %v1862_v48 = vadd.f32 %v2214_v33, %v1813_v44 }
 0x564   :  { %v2103_v8 = vpack.c.bf16 %v1862_v48, %v1862_v48 }
 0x566   :  { %1885 = vst.msk [vmem:[%s3149_s7 + $0xc] sm:$0xf] %vm1881_vm1, %v2103_v8 }

// kernel: forward.2
= control target key start
LH: loop header
LB: loop body
LE: loop exit
PB: predicated region body
PF: predicated region fallthrough
CT: control target
= control target key end

     0   :  { %s13839_s0 = inlined_call_operand.hbm [shape: bf16[2,256], index: 0, kind: input, shape index: {}]   ;;  %s13840_s1 = inlined_call_operand.hbm [shape: bf16[256,1024], index: 1, kind: input, shape index: {}]   ;;  %s13841_s2 = inlined_call_operand.hbm [shape: bf16[1,1024], index: 2, kind: input, shape index: {}]   ;;  %s13842_s3 = inlined_call_operand.hbm [shape: bf16[1,1024], index: 3, kind: input, shape index: {}]   ;;  %s13843_s4 = inlined_call_operand.hbm [shape: bf16[1,1024], index: 4, kind: input, shape index: {}]   ;;  %s13844_s5 = inlined_call_operand.hbm [shape: bf16[5,1024,1024], index: 5, kind: input, shape index: {}]   ;;  %s13845_s6 = inlined_call_operand.vmem [shape: bf16[5,1,1024], index: 6, kind: input, shape index: {}]   ;;  %s13846_s7 = inlined_call_operand.vmem [shape: bf16[5,1,1024], index: 7, kind: input, shape index: {}]   ;;  %s13847_s8 = inlined_call_operand.vmem [shape: bf16[5,1,1024], index: 8, kind: input, shape index: {}]   ;;  %s13848_s9 = inlined_call_operand.hbm [shape: bf16[1024,256], index: 9, kind: input, shape index: {}]   ;;  %s13849_s10 = inlined_call_operand.hbm [shape: bf16[1,256], index: 10, kind: input, shape index: {}]   ;;  %s13850_s11 = inlined_call_operand.vmem [shape: bf16[128,12], index: 11, kind: input, shape index: {}]   ;;  %s13851_s12 = inlined_call_operand.hbm [shape: bf16[12,64], index: 12, kind: input, shape index: {}]   ;;  %s13852_s13 = inlined_call_operand.hbm [shape: bf16[4,64,64], index: 13, kind: input, shape index: {}]   ;;  %s13853_s14 = inlined_call_operand.vmem [shape: bf16[5,1,64], index: 14, kind: input, shape index: {}]   ;;  %s13854_s15 = inlined_call_operand.vmem [shape: bf16[5,1,64], index: 15, kind: input, shape index: {}]   ;;  %s13855_s16 = inlined_call_operand.vmem [shape: bf16[5,1,64], index: 16, kind: input, shape index: {}]   ;;  %s13856_s17 = inlined_call_operand.vmem [shape: bf16[2,256], index: 17, kind: output, shape index: {0}]   ;;  %s13857_s18 = inlined_call_operand.vmem [shape: bf16[128,64], index: 18, kind: output, shape index: {1}]  }
   0x1   :  { %13866 = sst [smem:[#allocation26_spill]] %s13839_s0 }
   0x2   :  { %13867 = sst [smem:[#allocation27_spill]] %s13840_s1 }
   0x3   :  { %13868 = sst [smem:[#allocation28_spill]] %s13841_s2 }
   0x4   :  { %13869 = sst [smem:[#allocation29_spill]] %s13842_s3 }
   0x5   :  { %13870 = sst [smem:[#allocation30_spill]] %s13843_s4 }
   0x6   :  { %13871 = sst [smem:[#allocation31_spill]] %s13854_s15 }
   0x7   :  { %13872 = sst [smem:[#allocation32_spill]] %s13855_s16 }
   0x8   :  { %13873 = sst [smem:[#allocation33_spill]] %s13856_s17 }
   0x9   :  { %13874 = sst [smem:[#allocation34_spill]] %s13857_s18 }
   0xa   :  { %24 = vsyncpa [#allocation4], 0 }
   0xb   :  { %25 = vsyncpa [#allocation6], 0 }
   0xc   :  { %26 = vsyncpa [#allocation9], 0 }
   0xd   :  { %27 = vsyncpa [#allocation12], 0 }
   0xe   :  { %29 = vsyncpa [#allocation12 + $0x1], 0 }
   0xf   :  { %30 = vsyncpa [#allocation15], 0 }
  0x10   :  { %31 = vsyncpa [#allocation18], 0  ;;  %s11258_s27 = smov 0   ;;  %s11260_s28 = smov 0  }
  0x11   :  { %s11262_s29 = smov 0   ;;  %s11264_s30 = smov 0  }
  0x12 LB: > { %s11145_s0 = smov [#allocation5]   ;;  %s11279_s1 = sadd.s32 4294967295, %s11143_s30   ;;  %s11143_s30 = sphi %s11264_s30, %s13912_s30   ;;  %s11139_s29 = sphi %s11262_s29, %s13911_s29   ;;  %s11135_s28 = sphi %s11260_s28, %s13910_s28   ;;  %s11131_s27 = sphi %s11258_s27, %s13909_s27  }
  0x13   : > { %s484_s19 = sshll.u32 %s11145_s0, 4  ;;  %p9355_p0 = scmp.ge.s32.totalorder %s11143_s30, 1  ;;  %s485_s19 = int_to_ptr.vmem [resolvable:$true] %s484_s19 }
  0x14   : > { %p13863_p1 = scmp.eq.s32.totalorder %s11279_s1, 0  ;;  %p461_p2 = scmp.lt.s32.totalorder %s11143_s30, 6 }
  0x15   : > { %s11146_s21 = smov [#allocation8]   ;;  %s11147_s23 = smov [#allocation13]  }
  0x16   : > { %p11285_p4 = pnand %p9355_p0, %p461_p2  ;;  %s509_s22 = sshll.u32 %s11146_s21, 4  ;;  %s510_s22 = int_to_ptr.vmem [resolvable:$true] %s509_s22 }
  0x17   : > { %s530_s24 = sshll.u32 %s11147_s23, 4  ;;  %s10834_s26 = scalar_lea.vmem %s485_s19, 16384  ;;  %s11297_s24 = int_to_ptr.vmem [resolvable:$true] %s530_s24 }
  0x18   : > { %s13875_s20 = scalar_select %p11285_p4, 1, 0 }
  0x19   : > { %p10489_p5 = pneg %p11285_p4  ;;  %p10835_p8 = scmp.ne.s32.totalorder %s485_s19, %s10834_s26 }
  0x1a   : > { %p10842_p11 = scmp.lt.s32.totalorder %s485_s19, %s485_s19  ;;  %p10843_p12 = scmp.lt.s32.totalorder %s10834_s26, %s10834_s26 }
  0x1b   : > { %p11293_p6 = pnand %p10489_p5, %p13863_p1 }
  0x1c   : > { %p10844_p13 = por %p10843_p12, %p10842_p11 }
  0x1d   : > { %p11301_p7 = pneg %p11293_p6 }
  0x1f   : > { %p10837_p9 = pnand %p10835_p8, %p11301_p7 }
  0x21   : > { %p10838_p10 = pneg %p10837_p9 }
  0x23   : > { %p10845_p0 = pnand %p10844_p13, %p10838_p10 }
  0x25   : > { %10848 = shalt.err (!%p10845_p0)
}
  0x26   : > { %s13861_s0 = smov 512   ;;  %s13862_s21 = smov 32  }
  0x27   : > { %s13878_s18 = sld [smem:[#allocation27_spill]]  ;;  %s10860_s16 = scalar_lea.vmem %s510_s22, 128 }
  0x28   : > { %p10861_p2 = scmp.ne.s32.totalorder %s510_s22, %s10860_s16  ;;  %p10868_p9 = scmp.lt.s32.totalorder %s510_s22, %s510_s22 }
  0x29   : > { %p10869_p10 = scmp.lt.s32.totalorder %s10860_s16, %s10860_s16 }
  0x2a   : > { %p10863_p5 = pnand %p10861_p2, %p11301_p7 }
  0x2b   : > { %p10870_p11 = por %p10869_p10, %p10868_p9 }
  0x2c   : > { %p10864_p8 = pneg %p10863_p5 }
  0x2d   : > { %10495 = dma.hbm_to_vmem [thread:$0]  (!%p11293_p6), %s13878_s18, 16384, %s485_s19, [#allocation6], %s13861_s0, %s13861_s0, %s13862_s21  }
  0x2e   : > { %p10871_p12 = pnand %p10870_p11, %p10864_p8 }
  0x30   : > { %10874 = shalt.err (!%p10871_p12)
}
  0x31   : > { %s13879_s3 = sld [smem:[#allocation29_spill]]  ;;  %s10886_s17 = scalar_lea.vmem %s11297_s24, 16384 }
  0x32   : > { %p10887_p13 = scmp.ne.s32.totalorder %s11297_s24, %s10886_s17  ;;  %p10894_p5 = scmp.lt.s32.totalorder %s11297_s24, %s11297_s24 }
  0x33   : > { %p10895_p9 = scmp.lt.s32.totalorder %s10886_s17, %s10886_s17 }
  0x34   : > { %p10889_p0 = pnand %p10887_p13, %p11301_p7 }
  0x35   : > { %p10896_p8 = por %p10895_p9, %p10894_p5 }
  0x36   : > { %p10890_p2 = pneg %p10889_p0 }
  0x37   : > { %10501 = dma.hbm_to_vmem [thread:$0]  (!%p11293_p6), %s13879_s3, 128, %s510_s22, [#allocation9]  }
  0x38   : > { %p10897_p10 = pnand %p10896_p8, %p10890_p2 }
  0x3a   : > { %10900 = shalt.err (!%p10897_p10)
}
  0x3b   : > { %s11150_s16 = smov 128   ;;  %s11151_s15 = smov 8  }
  0x3c   : > { %10507 = dma.hbm_to_vmem [thread:$0]  (!%p11293_p6), %s13848_s9, 16384, %s11297_s24, [#allocation12], %s11150_s16, %s11150_s16, %s11151_s15  }
  0x3d   : > { %s11152_s22 = smov [#allocation14]   ;;  %s11153_s26 = smov [#allocation3]  }
  0x3e   : > { %s544_s23 = sshll.u32 %s11152_s22, 4  ;;  %s474_s0 = sshll.u32 %s11153_s26, 4  ;;  %s545_s23 = int_to_ptr.vmem [resolvable:$true] %s544_s23  ;;  %s475_s0 = int_to_ptr.vmem [resolvable:$true] %s474_s0 }
  0x3f   : > { %s10912_s21 = scalar_lea.vmem %s545_s23, 32  ;;  %p10920_p0 = scmp.lt.s32.totalorder %s545_s23, %s545_s23 }
  0x40   : > { %p10913_p11 = scmp.ne.s32.totalorder %s545_s23, %s10912_s21  ;;  %p10921_p2 = scmp.lt.s32.totalorder %s10912_s21, %s10912_s21 }
  0x42   : > { %p10915_p12 = pnand %p10913_p11, %p11301_p7  ;;  %p10922_p5 = por %p10921_p2, %p10920_p0 }
  0x44   : > { %p10916_p13 = pneg %p10915_p12 }
  0x46   : > { %p10923_p9 = pnand %p10922_p5, %p10916_p13 }
  0x48   : > { %10926 = shalt.err (!%p10923_p9)
}
  0x49   : > { %10510 = dma.hbm_to_vmem [thread:$0]  (!%p11293_p6), %s13849_s10, 32, %s545_s23, [#allocation15]  }
  0x4a   : > { %s10938_s24 = scalar_lea.vmem %s475_s0, 32  ;;  %p10946_p11 = scmp.lt.s32.totalorder %s475_s0, %s475_s0 }
  0x4b   : > { %p10939_p8 = scmp.ne.s32.totalorder %s475_s0, %s10938_s24  ;;  %p10947_p12 = scmp.lt.s32.totalorder %s10938_s24, %s10938_s24 }
  0x4d   : > { %p10941_p10 = pnand %p10939_p8, %p11301_p7  ;;  %p10948_p1 = por %p10947_p12, %p10946_p11 }
  0x4f   : > { %p10942_p3 = pneg %p10941_p10 }
  0x51   : > { %p10949_p4 = pnand %p10948_p1, %p10942_p3 }
  0x53   : > { %10952 = shalt.err (!%p10949_p4)
}
  0x54   : > { %s13880_s15 = sld [smem:[#allocation26_spill]]  ;;  %s11154_s19 = smov [#allocation7]  }
  0x55   : > { %s498_s22 = sshll.u32 %s11154_s19, 4  ;;  %s11155_s23 = smov [#allocation10]   ;;  %s499_s22 = int_to_ptr.vmem [resolvable:$true] %s498_s22 }
  0x56   : > { %s520_s26 = sshll.u32 %s11155_s23, 4  ;;  %s10964_s17 = scalar_lea.vmem %s499_s22, 128  ;;  %s521_s26 = int_to_ptr.vmem [resolvable:$true] %s520_s26 }
  0x57   : > { %p10965_p13 = scmp.ne.s32.totalorder %s499_s22, %s10964_s17  ;;  %p10972_p5 = scmp.lt.s32.totalorder %s499_s22, %s499_s22 }
  0x58   : > { %p10973_p1 = scmp.lt.s32.totalorder %s10964_s17, %s10964_s17 }
  0x59   : > { %p10967_p0 = pnand %p10965_p13, %p11301_p7 }
  0x5a   : > { %10492 = dma.hbm_to_vmem [thread:$0]  (!%p11293_p6), %s13880_s15, 32, %s475_s0, [#allocation4]  }
  0x5b   : > { %p10968_p2 = pneg %p10967_p0  ;;  %p10974_p3 = por %p10973_p1, %p10972_p5 }
  0x5d   : > { %p10975_p4 = pnand %p10974_p3, %p10968_p2 }
  0x5f   : > { %10978 = shalt.err (!%p10975_p4)
}
  0x60   : > { %s13881_s0 = sld [smem:[#allocation28_spill]]  ;;  %s10990_s21 = scalar_lea.vmem %s521_s26, 128 }
  0x61   : > { %p10991_p9 = scmp.ne.s32.totalorder %s521_s26, %s10990_s21  ;;  %p10998_p11 = scmp.lt.s32.totalorder %s521_s26, %s521_s26 }
  0x62   : > { %p10999_p12 = scmp.lt.s32.totalorder %s10990_s21, %s10990_s21 }
  0x63   : > { %p10993_p8 = pnand %p10991_p9, %p11301_p7 }
  0x64   : > { %p11000_p13 = por %p10999_p12, %p10998_p11 }
  0x65   : > { %p10994_p10 = pneg %p10993_p8 }
  0x66   : > { %10498 = dma.hbm_to_vmem [thread:$0]  (!%p11293_p6), %s13881_s0, 128, %s499_s22, [#allocation6]  }
  0x67   : > { %p11001_p0 = pnand %p11000_p13, %p10994_p10 }
  0x69   : > { %11004 = shalt.err (!%p11001_p0)
}
  0x6a   : > { %s13882_s4 = sld [smem:[#allocation30_spill]]  ;;  %s11156_s19 = smov [#allocation16]  }
  0x6b   : > { %s557_s22 = sshll.u32 %s11156_s19, 4  ;;  %s558_s22 = int_to_ptr.vmem [resolvable:$true] %s557_s22 }
  0x6c   : > { %s11016_s23 = scalar_lea.vmem %s558_s22, 128  ;;  %p11024_p3 = scmp.lt.s32.totalorder %s558_s22, %s558_s22 }
  0x6d   : > { %p11017_p2 = scmp.ne.s32.totalorder %s558_s22, %s11016_s23  ;;  %p11025_p4 = scmp.lt.s32.totalorder %s11016_s23, %s11016_s23 }
  0x6f   : > { %p11019_p5 = pnand %p11017_p2, %p11301_p7  ;;  %p11026_p9 = por %p11025_p4, %p11024_p3 }
  0x70   : > { %10504 = dma.hbm_to_vmem [thread:$0]  (!%p11293_p6), %s13882_s4, 128, %s521_s26, [#allocation9]  }
  0x71   : > { %p11020_p1 = pneg %p11019_p5 }
  0x73   : > { %p11027_p8 = pnand %p11026_p9, %p11020_p1 }
  0x75   : > { %11030 = shalt.err (!%p11027_p8)
}
  0x76   : > { %s11157_s17 = smov 64   ;;  %s11158_s18 = smov 4  }
  0x77   : > { %10513 = dma.hbm_to_vmem [thread:$0]  (!%p11293_p6), %s13851_s12, 128, %s558_s22, [#allocation15], %s11157_s17, %s11157_s17, %s11158_s18  }
  0x78   : > { %s11159_s0 = smov [#allocation17]  }
  0x79   : > { %s570_s21 = sshll.u32 %s11159_s0, 4  ;;  %s571_s21 = int_to_ptr.vmem [resolvable:$true] %s570_s21 }
  0x7a   : > { %s11042_s16 = scalar_lea.vmem %s571_s21, 2048  ;;  %p11050_p13 = scmp.lt.s32.totalorder %s571_s21, %s571_s21 }
  0x7b   : > { %p11043_p10 = scmp.ne.s32.totalorder %s571_s21, %s11042_s16  ;;  %p11051_p0 = scmp.lt.s32.totalorder %s11042_s16, %s11042_s16 }
  0x7d   : > { %p11045_p11 = pnand %p11043_p10, %p11301_p7  ;;  %p11052_p2 = por %p11051_p0, %p11050_p13 }
  0x7f   : > { %p11046_p12 = pneg %p11045_p11 }
  0x81   : > { %p11053_p5 = pnand %p11052_p2, %p11046_p12 }
  0x83   : > { %11056 = shalt.err (!%p11053_p5)
}
  0x84   : > { %10516 = dma.hbm_to_vmem [thread:$0]  (!%p11293_p6), %s13852_s13, 2048, %s571_s21, [#allocation18], %s11157_s17, %s11157_s17, %s11158_s18  }
  0x85   : > { %s11377_s25 = sadd.s32 1, %s11143_s30   ;;  %s149_s22 = sadd.s32 1, %s11139_s29 }
  0x86   : > { %s146_s2 = ssub.s32 %s11143_s30, %s11377_s25  ;;  %p156_p1 = scmp.ne.s32.totalorder %s11139_s29, %s11135_s28 }
  0x87   : > { %p147_p7 = scmp.eq.s32.totalorder %s146_s2, 0  ;;  %p157_p3 = scmp.eq.s32.totalorder %s11143_s30, 0 }
  0x88   : > { %p162_p4 = scmp.ne.s32.totalorder %s11135_s28, %s11131_s27  ;;  %p13883_p8 = scmp.eq.s32.totalorder %s11279_s1, 0 }
  0x89   : > { %s11388_s23 = scalar_select %p147_p7, %s11139_s29, %s149_s22  }
  0x8a   : > { %p158_p9 = por %p157_p3, %p156_p1  ;;  %p11392_p10 = por %p13883_p8, %p162_p4 }
  0x8b   : > { %p10530_p11 = scmp.lt.s32.totalorder %s11143_s30, 5  ;;  %s593_s26 = sand.u32 1, %s11143_s30  }
  0x8c   : > { %s13884_s24 = scalar_select %p11392_p10, 1, 0 }
  0x8d   : > { %s595_s17 = sand.u32 1, %s11139_s29   ;;  %s10259_s0 = sshll.u32 %s11143_s30, 16 }
  0x8e   : > { %s9366_s18 = sshll.u32 %s595_s17, 12  ;;  %s11403_s15 = scalar_lea.hbm %s13844_s5, %s10259_s0 }
  0x8f   : > { %s597_s27 = scalar_lea.vmem [#allocation11], %s9366_s18  ;;  %p11405_p6 = pnand %p10530_p11, %p158_p9 }
  0x90   : > { %s604_s19 = sshll.u32 %s597_s27, 4  ;;  %s11411_s22 = scalar_lea.sflag [#allocation12], %s593_s26  ;;  %s11409_s19 = int_to_ptr.vmem [resolvable:$true] %s604_s19 }
  0x91   : > { %s11057_s30 = scalar_lea.hbm %s11403_s15, 65536  ;;  %p11059_p13 = pneg %p11405_p6 }
  0x92   : > { %p11058_p12 = scmp.ne.s32.totalorder %s11403_s15, %s11057_s30  ;;  %s11062_s18 = scalar_lea.hbm %s13844_s5, 327680 }
  0x93   : > { %p11063_p5 = scmp.lt.s32.totalorder %s11403_s15, %s13844_s5  ;;  %p11064_p7 = scmp.lt.s32.totalorder %s11062_s18, %s11057_s30 }
  0x94   : > { %p11060_p0 = pnand %p11059_p13, %p11058_p12 }
  0x95   : > { %p11065_p1 = por %p11064_p7, %p11063_p5 }
  0x96   : > { %p11061_p2 = pneg %p11060_p0 }
  0x98   : > { %p11066_p3 = pnand %p11065_p1, %p11061_p2 }
  0x9a   : > { %11069 = shalt.err (!%p11066_p3)
}
  0x9b   : > { %s11070_s26 = scalar_lea.vmem %s11409_s19, 65536  ;;  %s11160_s27 = smov [#allocation11]  }
  0x9c   : > { %p11071_p4 = scmp.ne.s32.totalorder %s11409_s19, %s11070_s26  ;;  %s11075_s3 = sshll.u32 %s11160_s27, 4  ;;  %s11076_s3 = int_to_ptr.vmem [resolvable:$false] %s11075_s3 }
  0x9d   : > { %s11077_s17 = scalar_lea.vmem %s11076_s3, 131072  ;;  %p11078_p11 = scmp.lt.s32.totalorder %s11409_s19, %s11076_s3 }
  0x9e   : > { %p11073_p9 = pnand %p11071_p4, %p11059_p13  ;;  %p11079_p12 = scmp.lt.s32.totalorder %s11077_s17, %s11070_s26 }
  0xa0   : > { %p11074_p8 = pneg %p11073_p9  ;;  %p11080_p0 = por %p11079_p12, %p11078_p11 }
  0xa2   : > { %p11081_p10 = pnand %p11080_p0, %p11074_p8 }
  0xa4   : > { %11084 = shalt.err (!%p11081_p10)
}
  0xa5   : > { %s13886_s30 = smov 32   ;;  %s13887_s0 = smov 512  }
  0xa6   : > { %10520 = dma.hbm_to_vmem [thread:$0]  (!%p11405_p6), %s11403_s15, 65536, %s11409_s19, %s11411_s22, %s13887_s0, %s13887_s0, %s13886_s30  }
  0xa7   : > { %p13888_p13 = scmp.ne.s32.totalorder %s13875_s20, 0 }
  0xa8   : > { %p13889_p2 = scmp.eq.s32.totalorder (!%p13888_p13), %s11279_s1, 0 }
  0xa9   : > { %637 = sbr.rel (%p13888_p13) target bundleno = 3552 (0xde0), region = 88 }
  0xae   : > { %11102 = dma.done.wait (%p13889_p2), [#allocation4], 32   ;;  %p13890_p5 = pmov %p13889_p2 }
  0xaf   : > { %p13891_p10 = pmov %p13889_p2 }
  0xb0   : > { %11104 = vsyncadd (%p13890_p5), [#allocation4], 4294967264 }
  0xb1   : > { %11106 = dma.done.wait (%p13891_p10), [#allocation6], 16512   ;;  %p13892_p7 = pmov %p13889_p2 }
  0xb2   : > { %p13893_p1 = pmov %p13889_p2 }
  0xb3   : > { %11108 = vsyncadd (%p13892_p7), [#allocation6], 4294950784 }
  0xb4   : > { %11110 = dma.done.wait (%p13893_p1), [#allocation9], 256   ;;  %p13894_p6 = pmov %p13893_p1 }
  0xb5   : > { %s659_s3 = sand.u32 1, %s11279_s1   ;;  %s661_s20 = sand.u32 1, %s11135_s28  }
  0xb6   : > { %11112 = vsyncadd (%p13894_p6), [#allocation9], 4294967040  ;;  %s9375_s15 = sshll.u32 %s661_s20, 12  ;;  %s660_s19 = scalar_lea.sflag [#allocation12], %s659_s3 }
  0xb7   : > { %s11451_s2 = scalar_lea.vmem [#allocation11], %s9375_s15  ;;  %p13895_p3 = scmp.ne.s32.totalorder %s13884_s24, 0 }
  0xb9   : > { %11114 = dma.done.wait (%p13895_p3), %s660_s19, 65536  }
  0xba   : > { %11116 = vsyncadd (%p13895_p3), %s660_s19, 4294901760  ;;  %p13896_p4 = pmov %p13893_p1 }
  0xbb   : > { %p13897_p9 = pmov %p13893_p1 }
  0xbc   : > { %11118 = dma.done.wait (%p13896_p4), [#allocation12], 16384  }
  0xbd   : > { %11120 = vsyncadd (%p13897_p9), [#allocation12], 4294950912  ;;  %p13898_p8 = pmov %p13893_p1 }
  0xbe   : > { %p13899_p11 = pmov %p13893_p1 }
  0xbf   : > { %11122 = dma.done.wait (%p13898_p8), [#allocation15], 160  }
  0xc0   : > { %11124 = vsyncadd (%p13899_p11), [#allocation15], 4294967136  ;;  %p13900_p12 = pmov %p13893_p1 }
  0xc1   : > { %p13901_p0 = pmov %p13893_p1 }
  0xc2   : > { %11126 = dma.done.wait (%p13900_p12), [#allocation18], 2048  }
  0xc3   : > { %11128 = vsyncadd (%p13901_p0), [#allocation18], 4294965248  ;;  %p739_p13 = scmp.lt.s32.totalorder %s11279_s1, 4  ;;  %p13902_p2 = scmp.ne.s32.totalorder %s11279_s1, 0 }
  0xc4   : > { %s13903_s20 = sld [smem:[#allocation31_spill]] (!%p13902_p2) }
  0xc5   : > { %s740_s24 = scalar_select %p739_p13, %s11279_s1, 4 }
  0xc6   : > { %755 = sbr.rel (%p13902_p2) target bundleno = 2165 (0x875), region = 132  ;;  %s13905_s26 = sld [smem:[#allocation34_spill]] (!%p13902_p2) }
  0xc7   : > { %s11471_s22 = sshll.u32 %s740_s24, 3  ;;  %s13904_s24 = sld [smem:[#allocation32_spill]] (!%p13902_p2) }
  0xc8   : > { %s11477_s16 = scalar_lea.vmem %s13845_s6, %s11471_s22 }
  0xcb   : > { %v10589_v0 = vld [vmem:[#allocation16] sm:$0x3f]   ;;  %vm850_vm0 = vcmask 1045504   ;;  %vm825_vm1 = vcmask 97280   ;;  %v10592_v4 = vld [vmem:[%s13850_s11 + $0x10] sm:$0xff]   ;;  %v10593_v8 = vld [vmem:[%s13850_s11 + $0x18] sm:$0xff]   ;;  %v776_v10 = vlaneseq }
  0xcc   : > { %v10590_v1 = vld [vmem:[%s13850_s11] sm:$0xff]   ;;  %10449 = vmatprep.subr.msk.bf16.mxu0 %vm850_vm0, %v10589_v0  ;;  %v852_v2 = vsel %vm850_vm0, %v10589_v0, 0  ;;  %10450 = vmatprep.subr.msk.bf16.mxu1 %vm850_vm0, %v10589_v0  ;;  %v10591_v3 = vld [vmem:[%s13850_s11 + $0x8] sm:$0xff]   ;;  %v10596_v7 = vld [vmem:[%s13850_s11 + $0x30] sm:$0xff]   ;;  %vm969_vm2 = vcmask 523264   ;;  %vm3676_vm3 = vcmask 1041408  }
  0xcd   : > { %10334 = vmatpush3.bf16.msra.mxu0 %v852_v2  ;;  %10335 = vmatprep.mubr.msk.bf16.mxu0 %vm825_vm1, %v10590_v1  ;;  %v10594_v5 = vld [vmem:[%s13850_s11 + $0x20] sm:$0xff]   ;;  %v10595_v6 = vld [vmem:[%s13850_s11 + $0x28] sm:$0xff]   ;;  %v10597_v9 = vld [vmem:[%s13850_s11 + $0x38] sm:$0xff]   ;;  %v11521_v12 = vshrl.u32 %v776_v10, 7  ;;  %vm2614_vm4 = vcmask 519168  }
  0xce   : > { %10448 = vmatpush3.bf16.msra.mxu1 %v852_v2  ;;  %10343 = vmatprep.mubr.msk.bf16.mxu1 %vm825_vm1, %v10594_v5  ;;  %v10598_v11 = vld [vmem:[#allocation17 + $0x18] sm:$0xff]   ;;  %v774_v13 = vld [vmem:[%s13853_s14] sm:$0x1]  ;;  %v10600_v18 = vld [vmem:[#allocation17 + $0x8] sm:$0xff]  }
  0xcf   : > { %10351 = vmatprep.subr.bf16.mxu1 %v10598_v11  ;;  %v10599_v14 = vld [vmem:[#allocation17 + $0x10] sm:$0xff]   ;;  %v775_v15 = vunpack.c.l.bf16 %v774_v13  ;;  %v11527_v16 = vsub.s32 0, %v11521_v12  ;;  %v10601_v20 = vld [vmem:[#allocation17] sm:$0xff]  }
  0xd0   : > { %10336 = vmatmul.mubr.msk.bf16.vlgmr.msra.gmra.mxu0 %vm825_vm1, %v10591_v3 }
  0xd1   : > { %10339 = vmatprep.mubr.msk.bf16.mxu0 %vm825_vm1, %v10592_v4  ;;  %10344 = vmatmul.mubr.msk.bf16.vlgmr.msra.gmra.mxu1 %vm825_vm1, %v10595_v6  ;;  %v11530_v19 = vrot.slane %v775_v15, %v11527_v16 }
  0xd2   : > { %10347 = vmatprep.mubr.msk.bf16.mxu1 %vm825_vm1, %v10596_v7  ;;  %10352 = vmatpush3.bf16.msra.mxu1 %v10598_v11 }
  0xd3   : > { %10353 = vmatprep.subr.bf16.mxu1 %v10599_v14 }
  0xd6   : > { %10354 = vmatpush3.bf16.msra.mxu1 %v10599_v14 }
  0xd7   : > { %10355 = vmatprep.subr.bf16.mxu1 %v10600_v18 }
  0xd8   : > { %10340 = vmatmul.mubr.msk.bf16.gmra.mxu0 %vm825_vm1, %v10593_v8 }
  0xd9   : > { %10348 = vmatmul.mubr.msk.bf16.gmra.mxu1 %vm825_vm1, %v10597_v9 }
  0xda   : > { %10356 = vmatpush3.bf16.msra.mxu1 %v10600_v18 }
  0xdb   : > { %10357 = vmatprep.subr.bf16.mxu1 %v10601_v20 }
  0xde   : > { %10358 = vmatpush3.bf16.msra.mxu1 %v10601_v20 }
 0x190   : > { %v10337_v17 = vpop.f32.mrf.mxu0 }
 0x191   : > { %v10345_v23 = vpop.f32.mrf.mxu1  ;;  %v11536_v25 = vadd.f32 %v10337_v17, %v11530_v19 }
 0x192   : > { %v888_v21 = vpop.f32.mrf.mxu0  ;;  %v11590_v1 = vadd.f32 %v10345_v23, %v11530_v19 }
 0x193   : > { %v11533_v22 = vadd.f32 %v888_v21, %v11530_v19  ;;  %v920_v26 = vpop.f32.mrf.mxu1  ;;  %v953_v33 = vmax.f32 %v11536_v25, 0.0 }
 0x194   : > { %v10338_v24 = vpop.f32.mrf.mxu0  ;;  %v11578_v56 = vadd.f32 %v920_v26, %v11530_v19  ;;  %v961_v9 = vmax.f32 %v11590_v1, 0.0 }
 0x195   : > { %v951_v28 = vmax.f32 %v11533_v22, 0.0  ;;  %v11540_v29 = vadd.f32 %v10338_v24, %v11530_v19  ;;  %v10346_v31 = vpop.f32.mrf.mxu1  ;;  %v973_v44 = vsel %vm969_vm2, %v953_v33, 0.0 }
 0x196   : > { %v891_v27 = vpop.f32.mrf.mxu0  ;;  %v959_v2 = vmax.f32 %v11578_v56, 0.0  ;;  %v11597_v5 = vadd.f32 %v10346_v31, %v11530_v19  ;;  %v989_v20 = vsel %vm969_vm2, %v961_v9, 0.0 }
 0x197   : > { %v11543_v30 = vadd.f32 %v891_v27, %v11530_v19  ;;  %v923_v35 = vpop.f32.mrf.mxu1  ;;  %v970_v37 = vsel %vm969_vm2, %v951_v28, 0.0  ;;  %v954_v38 = vmax.f32 %v11540_v29, 0.0 }
 0x198   : > { %v10341_v32 = vpop.f32.mrf.mxu0  ;;  %v11584_v61 = vadd.f32 %v923_v35, %v11530_v19  ;;  %v985_v10 = vsel %vm969_vm2, %v959_v2, 0.0  ;;  %v962_v14 = vmax.f32 %v11597_v5, 0.0 }
 0x199   : > { %v952_v34 = vmax.f32 %v11543_v30, 0.0  ;;  %v10349_v43 = vpop.f32.mrf.mxu1  ;;  %v11561_v45 = vadd.f32 %v10341_v32, %v11530_v19  ;;  %v975_v49 = vsel %vm969_vm2, %v954_v38, 0.0 }
 0x19a   : > { %v904_v36 = vpop.f32.mrf.mxu0  ;;  %v960_v6 = vmax.f32 %v11584_v61, 0.0  ;;  %v11612_v21 = vadd.f32 %v10349_v43, %v11530_v19  ;;  %v991_v26 = vsel %vm969_vm2, %v962_v14, 0.0 }
 0x19b   : > { %v971_v39 = vsel %vm969_vm2, %v952_v34, 0.0  ;;  %v11555_v40 = vadd.f32 %v904_v36, %v11530_v19  ;;  %v936_v53 = vpop.f32.mrf.mxu1  ;;  %v957_v54 = vmax.f32 %v11561_v45, 0.0 }
 0x19c   : > { %v972_v41 = vadd.f32 %v971_v39, %v970_v37  ;;  %v10342_v42 = vpop.f32.mrf.mxu0  ;;  %v11603_v11 = vadd.f32 %v936_v53, %v11530_v19  ;;  %v987_v15 = vsel %vm969_vm2, %v960_v6, 0.0  ;;  %v965_v35 = vmax.f32 %v11612_v21, 0.0 }
 0x19d   : > { %v955_v46 = vmax.f32 %v11555_v40, 0.0  ;;  %v11568_v50 = vadd.f32 %v10342_v42, %v11530_v19  ;;  %v10350_v63 = vpop.f32.mrf.mxu1  ;;  %v981_v0 = vsel %vm969_vm2, %v957_v54, 0.0 }
 0x19e   : > { %v974_v47 = vadd.f32 %v973_v44, %v972_v41  ;;  %v907_v48 = vpop.f32.mrf.mxu0  ;;  %v963_v23 = vmax.f32 %v11603_v11, 0.0  ;;  %v11617_v27 = vadd.f32 %v10350_v63, %v11530_v19  ;;  %v997_v43 = vsel %vm969_vm2, %v965_v35, 0.0 }
 0x19f   : > { %v11571_v51 = vadd.f32 %v907_v48, %v11530_v19  ;;  %v977_v55 = vsel %vm969_vm2, %v955_v46, 0.0  ;;  %v958_v59 = vmax.f32 %v11568_v50, 0.0  ;;  %v939_v8 = vpop.f32.mrf.mxu1 }
 0x1a0   : > { %v976_v52 = vadd.f32 %v975_v49, %v974_v47  ;;  %v11608_v17 = vadd.f32 %v939_v8, %v11530_v19  ;;  %v993_v36 = vsel %vm969_vm2, %v963_v23, 0.0  ;;  %v966_v39 = vmax.f32 %v11617_v27, 0.0 }
 0x1a1   : > { %v956_v57 = vmax.f32 %v11571_v51, 0.0  ;;  %v983_v4 = vsel %vm969_vm2, %v958_v59, 0.0 }
 0x1a2   : > { %v978_v58 = vadd.f32 %v977_v55, %v976_v52  ;;  %v964_v31 = vmax.f32 %v11608_v17, 0.0  ;;  %v999_v19 = vsel %vm969_vm2, %v966_v39, 0.0 }
 0x1a3   : > { %v979_v60 = vsel %vm969_vm2, %v956_v57, 0.0 }
 0x1a4   : > { %v980_v62 = vadd.f32 %v979_v60, %v978_v58  ;;  %v995_v41 = vsel %vm969_vm2, %v964_v31, 0.0 }
 0x1a6   : > { %v982_v3 = vadd.f32 %v981_v0, %v980_v62 }
 0x1a8   : > { %v984_v7 = vadd.f32 %v983_v4, %v982_v3 }
 0x1aa   : > { %v986_v13 = vadd.f32 %v985_v10, %v984_v7 }
 0x1ac   : > { %v988_v18 = vadd.f32 %v987_v15, %v986_v13 }
 0x1ae   : > { %v990_v24 = vadd.f32 %v989_v20, %v988_v18 }
 0x1b0   : > { %v992_v32 = vadd.f32 %v991_v26, %v990_v24 }
 0x1b2   : > { %v994_v37 = vadd.f32 %v993_v36, %v992_v32 }
 0x1b4   : > { %v996_v42 = vadd.f32 %v995_v41, %v994_v37 }
 0x1b6   : > { %v998_v44 = vadd.f32 %v997_v43, %v996_v42 }
 0x1b8   : > { %v1000_v47 = vadd.f32 %v999_v19, %v998_v44 }
 0x1ba   : > { %v1001_v48 = vrot.slane %v1000_v47, 4 }
 0x1bc   : > { %v1002_v49 = vadd.f32 %v1001_v48, %v1000_v47 }
 0x1be   : > { %v1003_v51 = vrot.slane %v1002_v49, 2 }
 0x1c0   : > { %v1004_v52 = vadd.f32 %v1003_v51, %v1002_v49 }
 0x1c2   : > { %v1005_v53 = vrot.slane %v1004_v52, 1 }
 0x1c4   : > { %v1006_v55 = vadd.f32 %v1005_v53, %v1004_v52 }
 0x1c6   : > { %v1008_v56 = vmul.f32 0.0078125, %v1006_v55 }
 0x1c8   : > { %v11630_v58 = vsub.f32 %v951_v28, %v1008_v56  ;;  %v11634_v60 = vsub.f32 %v952_v34, %v1008_v56  ;;  %v11638_v61 = vsub.f32 %v953_v33, %v1008_v56  ;;  %v11642_v62 = vsub.f32 %v954_v38, %v1008_v56 }
 0x1c9   : > { %v11650_v28 = vsub.f32 %v955_v46, %v1008_v56  ;;  %v11654_v25 = vsub.f32 %v956_v57, %v1008_v56  ;;  %v11662_v0 = vsub.f32 %v957_v54, %v1008_v56  ;;  %v11669_v57 = vsub.f32 %v958_v59, %v1008_v56 }
 0x1ca   : > { %v1025_v63 = vmul.f32 %v11630_v58, %v11630_v58  ;;  %v1026_v22 = vmul.f32 %v11634_v60, %v11634_v60  ;;  %v1027_v30 = vmul.f32 %v11638_v61, %v11638_v61  ;;  %v1028_v29 = vmul.f32 %v11642_v62, %v11642_v62 }
 0x1cb   : > { %v1029_v40 = vmul.f32 %v11650_v28, %v11650_v28  ;;  %v1030_v3 = vmul.f32 %v11654_v25, %v11654_v25  ;;  %v11674_v7 = vsub.f32 %v959_v2, %v1008_v56  ;;  %v1031_v45 = vmul.f32 %v11662_v0, %v11662_v0 }
 0x1cc   : > { %v1041_v33 = vsel %vm969_vm2, %v1025_v63, 0.0  ;;  %v1042_v34 = vsel %vm969_vm2, %v1026_v22, 0.0  ;;  %v1044_v46 = vsel %vm969_vm2, %v1027_v30, 0.0  ;;  %v1046_v4 = vsel %vm969_vm2, %v1028_v29, 0.0 }
 0x1cd   : > { %v1043_v38 = vadd.f32 %v1042_v34, %v1041_v33  ;;  %v1048_v54 = vsel %vm969_vm2, %v1029_v40, 0.0  ;;  %v11679_v10 = vsub.f32 %v960_v6, %v1008_v56  ;;  %v1032_v50 = vmul.f32 %v11669_v57, %v11669_v57 }
 0x1ce   : > { %v1050_v59 = vsel %vm969_vm2, %v1030_v3, 0.0  ;;  %v11684_v13 = vsub.f32 %v961_v9, %v1008_v56  ;;  %v1033_v2 = vmul.f32 %v11674_v7, %v11674_v7  ;;  %v1052_v15 = vsel %vm969_vm2, %v1031_v45, 0.0  ;;  %v968_v3 = vld [vmem:[%s13904_s24] sm:$0x1] }
 0x1cf   : > { %v1045_v1 = vadd.f32 %v1044_v46, %v1043_v38  ;;  %v11689_v18 = vsub.f32 %v962_v14, %v1008_v56  ;;  %v1034_v6 = vmul.f32 %v11679_v10, %v11679_v10  ;;  %v1054_v20 = vsel %vm969_vm2, %v1032_v50, 0.0 }
 0x1d0   : > { %v11694_v24 = vsub.f32 %v963_v23, %v1008_v56  ;;  %v1035_v9 = vmul.f32 %v11684_v13, %v11684_v13  ;;  %v1056_v26 = vsel %vm969_vm2, %v1033_v2, 0.0  ;;  %v11699_v36 = vsub.f32 %v964_v31, %v1008_v56 }
 0x1d1   : > { %v1047_v5 = vadd.f32 %v1046_v4, %v1045_v1  ;;  %v1036_v14 = vmul.f32 %v11689_v18, %v11689_v18  ;;  %v1058_v37 = vsel %vm969_vm2, %v1034_v6, 0.0  ;;  %v11704_v42 = vsub.f32 %v965_v35, %v1008_v56  ;;  %v967_v1 = vld [vmem:[%s13903_s20] sm:$0x1] }
 0x1d2   : > { %v1037_v23 = vmul.f32 %v11694_v24, %v11694_v24  ;;  %v1060_v43 = vsel %vm969_vm2, %v1035_v9, 0.0  ;;  %v11711_v19 = vsub.f32 %v966_v39, %v1008_v56  ;;  %v1038_v31 = vmul.f32 %v11699_v36, %v11699_v36 }
 0x1d3   : > { %v1049_v8 = vadd.f32 %v1048_v54, %v1047_v5  ;;  %v1062_v47 = vsel %vm969_vm2, %v1036_v14, 0.0  ;;  %v1039_v35 = vmul.f32 %v11704_v42, %v11704_v42  ;;  %v1097_v4 = vunpack.c.l.bf16 %v967_v1 }
 0x1d4   : > { %v1064_v49 = vsel %vm969_vm2, %v1037_v23, 0.0  ;;  %v1040_v52 = vmul.f32 %v11711_v19, %v11711_v19  ;;  %v1066_v53 = vsel %vm969_vm2, %v1038_v31, 0.0  ;;  %v1118_v5 = vunpack.c.l.bf16 %v968_v3 }
 0x1d5   : > { %v1051_v11 = vadd.f32 %v1050_v59, %v1049_v8  ;;  %v1068_v39 = vsel %vm969_vm2, %v1039_v35, 0.0  ;;  %v1101_v45 = vrot.slane %v1097_v4, %v11527_v16 }
 0x1d6   : > { %v1070_v56 = vsel %vm969_vm2, %v1040_v52, 0.0  ;;  %v1122_v8 = vrot.slane %v1118_v5, %v11527_v16  ;;  %v10602_v5 = vld [vmem:[#allocation17 + $0x38] sm:$0xff]  }
 0x1d7   : > { %v1053_v17 = vadd.f32 %v1052_v15, %v1051_v11  ;;  %10375 = vmatprep.subr.bf16.mxu0 %v10602_v5 }
 0x1d8   : > { %10376 = vmatpush3.bf16.msra.mxu0 %v10602_v5 }
 0x1d9   : > { %v1055_v21 = vadd.f32 %v1054_v20, %v1053_v17 }
 0x1db   : > { %v1057_v32 = vadd.f32 %v1056_v26, %v1055_v21 }
 0x1dd   : > { %v1059_v41 = vadd.f32 %v1058_v37, %v1057_v32 }
 0x1df   : > { %v1061_v44 = vadd.f32 %v1060_v43, %v1059_v41 }
 0x1e1   : > { %v1063_v48 = vadd.f32 %v1062_v47, %v1061_v44 }
 0x1e3   : > { %v1065_v51 = vadd.f32 %v1064_v49, %v1063_v48 }
 0x1e5   : > { %v1067_v27 = vadd.f32 %v1066_v53, %v1065_v51 }
 0x1e7   : > { %v1069_v55 = vadd.f32 %v1068_v39, %v1067_v27 }
 0x1e9   : > { %v1071_v63 = vadd.f32 %v1070_v56, %v1069_v55 }
 0x1eb   : > { %v1072_v22 = vrot.slane %v1071_v63, 4 }
 0x1ed   : > { %v1073_v30 = vadd.f32 %v1072_v22, %v1071_v63 }
 0x1ef   : > { %v1074_v29 = vrot.slane %v1073_v30, 2 }
 0x1f1   : > { %v1075_v33 = vadd.f32 %v1074_v29, %v1073_v30 }
 0x1f3   : > { %v1076_v34 = vrot.slane %v1075_v33, 1 }
 0x1f5   : > { %v1077_v38 = vadd.f32 %v1076_v34, %v1075_v33 }
 0x1f7   : > { %v1078_v40 = vmul.f32 0.0078125, %v1077_v38 }
 0x1f9   : > { %v1079_v46 = vadd.f32 1e-05, %v1078_v40 }
 0x1fb   : > { %10614 = vrsqrt.f32 %v1079_v46 }
 0x208   : > { %v10615_v54 = vpop.eup %10614 }
 0x209   : > { %v1081_v50 = vmul.f32 %v10615_v54, %v11630_v58  ;;  %v1082_v59 = vmul.f32 %v10615_v54, %v11634_v60  ;;  %v1083_v11 = vmul.f32 %v10615_v54, %v11638_v61  ;;  %v1084_v2 = vmul.f32 %v10615_v54, %v11642_v62 }
 0x20a   : > { %v1085_v15 = vmul.f32 %v10615_v54, %v11650_v28  ;;  %v1086_v17 = vmul.f32 %v10615_v54, %v11654_v25  ;;  %v1087_v9 = vmul.f32 %v10615_v54, %v11662_v0  ;;  %v1088_v58 = vmul.f32 %v10615_v54, %v11669_v57 }
 0x20b   : > { %v1102_v6 = vmul.f32 %v1101_v45, %v1081_v50  ;;  %v1103_v20 = vmul.f32 %v1101_v45, %v1082_v59  ;;  %v1104_v21 = vmul.f32 %v1101_v45, %v1083_v11  ;;  %v1105_v26 = vmul.f32 %v1101_v45, %v1084_v2  ;;  %v10604_v59 = vld [vmem:[#allocation17 + $0x28] sm:$0xff]  }
 0x20c   : > { %v1106_v32 = vmul.f32 %v1101_v45, %v1085_v15  ;;  %v1107_v14 = vmul.f32 %v1101_v45, %v1086_v17  ;;  %v1089_v28 = vmul.f32 %v10615_v54, %v11674_v7  ;;  %v1090_v25 = vmul.f32 %v10615_v54, %v11679_v10 }
 0x20d   : > { %v1123_v37 = vadd.f32 %v1122_v8, %v1102_v6  ;;  %v1124_v60 = vadd.f32 %v1122_v8, %v1103_v20  ;;  %v1125_v41 = vadd.f32 %v1122_v8, %v1104_v21  ;;  %v1126_v61 = vadd.f32 %v1122_v8, %v1105_v26 }
 0x20e   : > { %v1127_v23 = vadd.f32 %v1122_v8, %v1106_v32  ;;  %v1128_v62 = vadd.f32 %v1122_v8, %v1107_v14  ;;  %v1108_v31 = vmul.f32 %v1101_v45, %v1087_v9  ;;  %v1109_v47 = vmul.f32 %v1101_v45, %v1088_v58 }
 0x20f   : > { %v1139_v43 = vpack.c.bf16 %v1124_v60, %v1123_v37  ;;  %v1140_v44 = vpack.c.bf16 %v1126_v61, %v1125_v41  ;;  %v1110_v48 = vmul.f32 %v1101_v45, %v1089_v28  ;;  %v1111_v35 = vmul.f32 %v1101_v45, %v1090_v25 }
 0x210   : > { %v1141_v0 = vpack.c.bf16 %v1128_v62, %v1127_v23  ;;  %v1129_v57 = vadd.f32 %v1122_v8, %v1108_v31  ;;  %v1130_v49 = vadd.f32 %v1122_v8, %v1109_v47  ;;  %v1091_v51 = vmul.f32 %v10615_v54, %v11684_v13 }
 0x211   : > { %10359 = vmatprep.mubr.msk.bf16.mxu1 %vm969_vm2, %v1139_v43  ;;  %v1092_v7 = vmul.f32 %v10615_v54, %v11689_v18  ;;  %v1094_v10 = vmul.f32 %v10615_v54, %v11699_v36  ;;  %v1131_v52 = vadd.f32 %v1122_v8, %v1110_v48  ;;  %v1132_v53 = vadd.f32 %v1122_v8, %v1111_v35 }
 0x212   : > { %10360 = vmatmul.mubr.msk.bf16.vlgmr.msra.gmra.mxu1 %vm969_vm2, %v1140_v44  ;;  %v1093_v27 = vmul.f32 %v10615_v54, %v11694_v24  ;;  %v1142_v39 = vpack.c.bf16 %v1130_v49, %v1129_v57  ;;  %v1112_v55 = vmul.f32 %v1101_v45, %v1091_v51  ;;  %v1095_v18 = vmul.f32 %v10615_v54, %v11704_v42  ;;  %v9401_v42 = vld [vmem:[%s13853_s14 + $0x1] sm:$0x1] }
 0x213   : > { %10363 = vmatprep.mubr.msk.bf16.mxu1 %vm969_vm2, %v1141_v0  ;;  %v1113_v56 = vmul.f32 %v1101_v45, %v1092_v7  ;;  %v1115_v63 = vmul.f32 %v1101_v45, %v1094_v10  ;;  %v1143_v22 = vpack.c.bf16 %v1132_v53, %v1131_v52  ;;  %v1096_v36 = vmul.f32 %v10615_v54, %v11711_v19  ;;  %v10603_v54 = vld [vmem:[#allocation17 + $0x30] sm:$0xff]  }
 0x214   : > { %v1114_v30 = vmul.f32 %v1101_v45, %v1093_v27  ;;  %v1133_v29 = vadd.f32 %v1122_v8, %v1112_v55  ;;  %v1116_v24 = vmul.f32 %v1101_v45, %v1095_v18  ;;  %v1157_v19 = vunpack.c.l.bf16 %v9401_v42  ;;  %10377 = vmatprep.subr.bf16.mxu0 %v10603_v54 }
 0x215   : > { %v1134_v13 = vadd.f32 %v1122_v8, %v1113_v56  ;;  %v1136_v33 = vadd.f32 %v1122_v8, %v1115_v63  ;;  %v1117_v40 = vmul.f32 %v1101_v45, %v1096_v36  ;;  %10378 = vmatpush3.bf16.msra.mxu0 %v10603_v54 }
 0x216   : > { %v1135_v34 = vadd.f32 %v1122_v8, %v1114_v30  ;;  %v1137_v1 = vadd.f32 %v1122_v8, %v1116_v24  ;;  %v11760_v50 = vrot.slane %v1157_v19, %v11527_v16  ;;  %10379 = vmatprep.subr.bf16.mxu0 %v10604_v59 }
 0x217   : > { %v1144_v38 = vpack.c.bf16 %v1134_v13, %v1133_v29  ;;  %v1138_v3 = vadd.f32 %v1122_v8, %v1117_v40  ;;  %v10605_v8 = vld [vmem:[#allocation17 + $0x20] sm:$0xff]  }
 0x218   : > { %v1145_v46 = vpack.c.bf16 %v1136_v33, %v1135_v34 }
 0x219   : > { %v1146_v4 = vpack.c.bf16 %v1138_v3, %v1137_v1  ;;  %10380 = vmatpush3.bf16.msra.mxu0 %v10604_v59 }
 0x21a   : > { %10364 = vmatmul.mubr.msk.bf16.gmra.mxu1 %vm969_vm2, %v1142_v39  ;;  %10381 = vmatprep.subr.bf16.mxu0 %v10605_v8 }
 0x21b   : > { %10367 = vmatprep.mubr.msk.bf16.mxu1 %vm969_vm2, %v1143_v22 }
 0x21d   : > { %10382 = vmatpush3.bf16.msra.mxu0 %v10605_v8 }
 0x222   : > { %10368 = vmatmul.mubr.msk.bf16.gmra.mxu1 %vm969_vm2, %v1144_v38 }
 0x223   : > { %10371 = vmatprep.mubr.msk.bf16.mxu1 %vm969_vm2, %v1145_v46 }
 0x22a   : > { %10372 = vmatmul.mubr.msk.bf16.gmra.mxu1 %vm969_vm2, %v1146_v4 }
 0x2d2   : > { %v10361_v45 = vpop.f32.mrf.mxu1 }
 0x2d3   : > { %v11766_v17 = vadd.f32 %v10361_v45, %v11760_v50 }
 0x2d4   : > { %v1244_v11 = vpop.f32.mrf.mxu1 }
 0x2d5   : > { %v11763_v2 = vadd.f32 %v1244_v11, %v11760_v50  ;;  %v1309_v32 = vmax.f32 %v11766_v17, 0.0 }
 0x2d6   : > { %v10362_v15 = vpop.f32.mrf.mxu1 }
 0x2d7   : > { %v1307_v20 = vmax.f32 %v11763_v2, 0.0  ;;  %v11770_v21 = vadd.f32 %v10362_v15, %v11760_v50  ;;  %v1330_v43 = vsel %vm969_vm2, %v1309_v32, 0.0 }
 0x2d8   : > { %v1247_v6 = vpop.f32.mrf.mxu1 }
 0x2d9   : > { %v11773_v9 = vadd.f32 %v1247_v6, %v11760_v50  ;;  %v1327_v37 = vsel %vm969_vm2, %v1307_v20, 0.0  ;;  %v1310_v60 = vmax.f32 %v11770_v21, 0.0 }
 0x2da   : > { %v10365_v26 = vpop.f32.mrf.mxu1 }
 0x2db   : > { %v1308_v14 = vmax.f32 %v11773_v9, 0.0  ;;  %v11791_v28 = vadd.f32 %v10365_v26, %v11760_v50  ;;  %v1332_v47 = vsel %vm969_vm2, %v1310_v60, 0.0 }
 0x2dc   : > { %v1260_v58 = vpop.f32.mrf.mxu1 }
 0x2dd   : > { %v1328_v41 = vsel %vm969_vm2, %v1308_v14, 0.0  ;;  %v11785_v61 = vadd.f32 %v1260_v58, %v11760_v50  ;;  %v1313_v49 = vmax.f32 %v11791_v28, 0.0 }
 0x2de   : > { %v1329_v23 = vadd.f32 %v1328_v41, %v1327_v37  ;;  %v10366_v62 = vpop.f32.mrf.mxu1 }
 0x2df   : > { %v1311_v25 = vmax.f32 %v11785_v61, 0.0  ;;  %v11798_v0 = vadd.f32 %v10366_v62, %v11760_v50  ;;  %v1338_v63 = vsel %vm969_vm2, %v1313_v49, 0.0 }
 0x2e0   : > { %v1331_v44 = vadd.f32 %v1330_v43, %v1329_v23  ;;  %v1263_v31 = vpop.f32.mrf.mxu1 }
 0x2e1   : > { %v11801_v48 = vadd.f32 %v1263_v31, %v11760_v50  ;;  %v1334_v51 = vsel %vm969_vm2, %v1311_v25, 0.0  ;;  %v1314_v53 = vmax.f32 %v11798_v0, 0.0 }
 0x2e2   : > { %v1333_v35 = vadd.f32 %v1332_v47, %v1331_v44  ;;  %v10369_v57 = vpop.f32.mrf.mxu1 }
 0x2e3   : > { %v1312_v7 = vmax.f32 %v11801_v48, 0.0  ;;  %v11819_v22 = vadd.f32 %v10369_v57, %v11760_v50  ;;  %v1340_v18 = vsel %vm969_vm2, %v1314_v53, 0.0 }
 0x2e4   : > { %v1335_v10 = vadd.f32 %v1334_v51, %v1333_v35  ;;  %v1276_v52 = vpop.f32.mrf.mxu1 }
 0x2e5   : > { %v1336_v27 = vsel %vm969_vm2, %v1312_v7, 0.0  ;;  %v11813_v39 = vadd.f32 %v1276_v52, %v11760_v50  ;;  %v1317_v24 = vmax.f32 %v11819_v22, 0.0 }
 0x2e6   : > { %v1337_v55 = vadd.f32 %v1336_v27, %v1335_v10  ;;  %v10370_v56 = vpop.f32.mrf.mxu1 }
 0x2e7   : > { %v1315_v30 = vmax.f32 %v11813_v39, 0.0  ;;  %v11826_v36 = vadd.f32 %v10370_v56, %v11760_v50  ;;  %v1346_v45 = vsel %vm969_vm2, %v1317_v24, 0.0 }
 0x2e8   : > { %v1339_v29 = vadd.f32 %v1338_v63, %v1337_v55  ;;  %v1279_v13 = vpop.f32.mrf.mxu1 }
 0x2e9   : > { %v11829_v33 = vadd.f32 %v1279_v13, %v11760_v50  ;;  %v1342_v40 = vsel %vm969_vm2, %v1315_v30, 0.0  ;;  %v1318_v4 = vmax.f32 %v11826_v36, 0.0 }
 0x2ea   : > { %v1341_v34 = vadd.f32 %v1340_v18, %v1339_v29  ;;  %v10373_v38 = vpop.f32.mrf.mxu1 }
 0x2eb   : > { %v1316_v46 = vmax.f32 %v11829_v33, 0.0  ;;  %v11845_v59 = vadd.f32 %v10373_v38, %v11760_v50  ;;  %v1348_v6 = vsel %vm969_vm2, %v1318_v4, 0.0 }
 0x2ec   : > { %v1343_v1 = vadd.f32 %v1342_v40, %v1341_v34  ;;  %v1292_v3 = vpop.f32.mrf.mxu1 }
 0x2ed   : > { %v1344_v5 = vsel %vm969_vm2, %v1316_v46, 0.0  ;;  %v11839_v42 = vadd.f32 %v1292_v3, %v11760_v50  ;;  %v1321_v41 = vmax.f32 %v11845_v59, 0.0 }
 0x2ee   : > { %v1345_v19 = vadd.f32 %v1344_v5, %v1343_v1  ;;  %v10374_v54 = vpop.f32.mrf.mxu1 }
 0x2ef   : > { %v1319_v8 = vmax.f32 %v11839_v42, 0.0  ;;  %v11852_v26 = vadd.f32 %v10374_v54, %v11760_v50  ;;  %v1354_v35 = vsel %vm969_vm2, %v1321_v41, 0.0 }
 0x2f0   : > { %v1347_v11 = vadd.f32 %v1346_v45, %v1345_v19  ;;  %v1295_v15 = vpop.f32.mrf.mxu1 }
 0x2f1   : > { %v1296_v58 = vadd.f32 %v1295_v15, %v11760_v50  ;;  %v1350_v23 = vsel %vm969_vm2, %v1319_v8, 0.0  ;;  %v1322_v44 = vmax.f32 %v11852_v26, 0.0 }
 0x2f2   : > { %v1349_v37 = vadd.f32 %v1348_v6, %v1347_v11 }
 0x2f3   : > { %v1320_v62 = vmax.f32 %v1296_v58, 0.0  ;;  %v1356_v50 = vsel %vm969_vm2, %v1322_v44, 0.0 }
 0x2f4   : > { %v1351_v43 = vadd.f32 %v1350_v23, %v1349_v37 }
 0x2f5   : > { %v1352_v31 = vsel %vm969_vm2, %v1320_v62, 0.0 }
 0x2f6   : > { %v1353_v47 = vadd.f32 %v1352_v31, %v1351_v43 }
 0x2f8   : > { %v1355_v57 = vadd.f32 %v1354_v35, %v1353_v47 }
 0x2fa   : > { %v1357_v51 = vadd.f32 %v1356_v50, %v1355_v57 }
 0x2fc   : > { %v1358_v10 = vrot.slane %v1357_v51, 4 }
 0x2fe   : > { %v1359_v52 = vadd.f32 %v1358_v10, %v1357_v51 }
 0x300   : > { %v1360_v27 = vrot.slane %v1359_v52, 2 }
 0x302   : > { %v1361_v55 = vadd.f32 %v1360_v27, %v1359_v52 }
 0x304   : > { %v1362_v56 = vrot.slane %v1361_v55, 1 }
 0x306   : > { %v1363_v63 = vadd.f32 %v1362_v56, %v1361_v55 }
 0x308   : > { %v1364_v29 = vmul.f32 0.0078125, %v1363_v63 }
 0x30a   : > { %v11867_v13 = vsub.f32 %v1307_v20, %v1364_v29  ;;  %v11871_v18 = vsub.f32 %v1308_v14, %v1364_v29  ;;  %v11875_v33 = vsub.f32 %v1309_v32, %v1364_v29  ;;  %v11879_v34 = vsub.f32 %v1310_v60, %v1364_v29 }
 0x30b   : > { %v11887_v20 = vsub.f32 %v1311_v25, %v1364_v29  ;;  %v11893_v17 = vsub.f32 %v1312_v7, %v1364_v29  ;;  %v11901_v61 = vsub.f32 %v1313_v49, %v1364_v29  ;;  %v11908_v7 = vsub.f32 %v1314_v53, %v1364_v29 }
 0x30c   : > { %v1381_v38 = vmul.f32 %v11867_v13, %v11867_v13  ;;  %v1382_v2 = vmul.f32 %v11871_v18, %v11871_v18  ;;  %v1383_v9 = vmul.f32 %v11875_v33, %v11875_v33  ;;  %v1384_v21 = vmul.f32 %v11879_v34, %v11879_v34 }
 0x30d   : > { %v1385_v25 = vmul.f32 %v11887_v20, %v11887_v20  ;;  %v1386_v1 = vmul.f32 %v11893_v17, %v11893_v17  ;;  %v11915_v28 = vsub.f32 %v1315_v30, %v1364_v29  ;;  %v1387_v49 = vmul.f32 %v11901_v61, %v11901_v61 }
 0x30e   : > { %v1397_v32 = vsel %vm969_vm2, %v1381_v38, 0.0  ;;  %v1398_v14 = vsel %vm969_vm2, %v1382_v2, 0.0  ;;  %v1400_v40 = vsel %vm969_vm2, %v1383_v9, 0.0  ;;  %v1402_v3 = vsel %vm969_vm2, %v1384_v21, 0.0 }
 0x30f   : > { %v1399_v60 = vadd.f32 %v1398_v14, %v1397_v32  ;;  %v1404_v42 = vsel %vm969_vm2, %v1385_v25, 0.0  ;;  %v11920_v54 = vsub.f32 %v1316_v46, %v1364_v29  ;;  %v1388_v0 = vmul.f32 %v11908_v7, %v11908_v7 }
 0x310   : > { %v1406_v53 = vsel %vm969_vm2, %v1386_v1, 0.0  ;;  %v11927_v11 = vsub.f32 %v1317_v24, %v1364_v29  ;;  %v1389_v39 = vmul.f32 %v11915_v28, %v11915_v28  ;;  %v1408_v30 = vsel %vm969_vm2, %v1387_v49, 0.0  ;;  %v9415_v1 = vld [vmem:[%s13904_s24 + $0x1] sm:$0x1] }
 0x311   : > { %v1401_v48 = vadd.f32 %v1400_v40, %v1399_v60  ;;  %v11934_v46 = vsub.f32 %v1318_v4, %v1364_v29  ;;  %v1390_v6 = vmul.f32 %v11920_v54, %v11920_v54  ;;  %v1410_v58 = vsel %vm969_vm2, %v1388_v0, 0.0 }
 0x312   : > { %v11939_v23 = vsub.f32 %v1319_v8, %v1364_v29  ;;  %v1391_v22 = vmul.f32 %v11927_v11, %v11927_v11  ;;  %v1412_v24 = vsel %vm969_vm2, %v1389_v39, 0.0  ;;  %v11944_v31 = vsub.f32 %v1320_v62, %v1364_v29 }
 0x313   : > { %v1403_v5 = vadd.f32 %v1402_v3, %v1401_v48  ;;  %v1392_v36 = vmul.f32 %v11934_v46, %v11934_v46  ;;  %v1414_v4 = vsel %vm969_vm2, %v1390_v6, 0.0  ;;  %v11951_v35 = vsub.f32 %v1321_v41, %v1364_v29  ;;  %v9414_v48 = vld [vmem:[%s13903_s20 + $0x1] sm:$0x1] }
 0x314   : > { %v1393_v8 = vmul.f32 %v11939_v23, %v11939_v23  ;;  %v1416_v57 = vsel %vm969_vm2, %v1391_v22, 0.0  ;;  %v11958_v62 = vsub.f32 %v1322_v44, %v1364_v29  ;;  %v1394_v51 = vmul.f32 %v11944_v31, %v11944_v31 }
 0x315   : > { %v1405_v19 = vadd.f32 %v1404_v42, %v1403_v5  ;;  %v1418_v10 = vsel %vm969_vm2, %v1392_v36, 0.0  ;;  %v1395_v59 = vmul.f32 %v11951_v35, %v11951_v35  ;;  %v1453_v3 = vunpack.c.l.bf16 %v9414_v48 }
 0x316   : > { %v1420_v41 = vsel %vm969_vm2, %v1393_v8, 0.0  ;;  %v1396_v55 = vmul.f32 %v11958_v62, %v11958_v62  ;;  %v1422_v56 = vsel %vm969_vm2, %v1394_v51, 0.0  ;;  %v1474_v5 = vunpack.c.l.bf16 %v9415_v1 }
 0x317   : > { %v1407_v45 = vadd.f32 %v1406_v53, %v1405_v19  ;;  %v1424_v44 = vsel %vm969_vm2, %v1395_v59, 0.0  ;;  %v1457_v49 = vrot.slane %v1453_v3, %v11527_v16 }
 0x318   : > { %v1426_v29 = vsel %vm969_vm2, %v1396_v55, 0.0  ;;  %v1478_v19 = vrot.slane %v1474_v5, %v11527_v16  ;;  %v10606_v5 = vld [vmem:[#allocation17 + $0x58] sm:$0xff]  }
 0x319   : > { %v1409_v15 = vadd.f32 %v1408_v30, %v1407_v45  ;;  %10399 = vmatprep.subr.bf16.mxu1 %v10606_v5 }
 0x31a   : > { %10400 = vmatpush3.bf16.msra.mxu1 %v10606_v5 }
 0x31b   : > { %v1411_v37 = vadd.f32 %v1410_v58, %v1409_v15 }
 0x31d   : > { %v1413_v43 = vadd.f32 %v1412_v24, %v1411_v37 }
 0x31f   : > { %v1415_v47 = vadd.f32 %v1414_v4, %v1413_v43 }
 0x321   : > { %v1417_v50 = vadd.f32 %v1416_v57, %v1415_v47 }
 0x323   : > { %v1419_v52 = vadd.f32 %v1418_v10, %v1417_v50 }
 0x325   : > { %v1421_v27 = vadd.f32 %v1420_v41, %v1419_v52 }
 0x327   : > { %v1423_v26 = vadd.f32 %v1422_v56, %v1421_v27 }
 0x329   : > { %v1425_v63 = vadd.f32 %v1424_v44, %v1423_v26 }
 0x32b   : > { %v1427_v38 = vadd.f32 %v1426_v29, %v1425_v63 }
 0x32d   : > { %v1428_v2 = vrot.slane %v1427_v38, 4 }
 0x32f   : > { %v1429_v9 = vadd.f32 %v1428_v2, %v1427_v38 }
 0x331   : > { %v1430_v21 = vrot.slane %v1429_v9, 2 }
 0x333   : > { %v1431_v32 = vadd.f32 %v1430_v21, %v1429_v9 }
 0x335   : > { %v1432_v14 = vrot.slane %v1431_v32, 1 }
 0x337   : > { %v1433_v60 = vadd.f32 %v1432_v14, %v1431_v32 }
 0x339   : > { %v1434_v25 = vmul.f32 0.0078125, %v1433_v60 }
 0x33b   : > { %v1435_v40 = vadd.f32 1e-05, %v1434_v25 }
 0x33d   : > { %10616 = vrsqrt.f32 %v1435_v40 }
 0x34a   : > { %v10617_v42 = vpop.eup %10616 }
 0x34b   : > { %v1437_v0 = vmul.f32 %v10617_v42, %v11867_v13  ;;  %v1438_v53 = vmul.f32 %v10617_v42, %v11871_v18  ;;  %v1439_v45 = vmul.f32 %v10617_v42, %v11875_v33  ;;  %v1440_v39 = vmul.f32 %v10617_v42, %v11879_v34 }
 0x34c   : > { %v1441_v30 = vmul.f32 %v10617_v42, %v11887_v20  ;;  %v1442_v15 = vmul.f32 %v10617_v42, %v11893_v17  ;;  %v1443_v22 = vmul.f32 %v10617_v42, %v11901_v61  ;;  %v1444_v13 = vmul.f32 %v10617_v42, %v11908_v7 }
 0x34d   : > { %v1458_v6 = vmul.f32 %v1457_v49, %v1437_v0  ;;  %v1459_v58 = vmul.f32 %v1457_v49, %v1438_v53  ;;  %v1460_v37 = vmul.f32 %v1457_v49, %v1439_v45  ;;  %v1461_v24 = vmul.f32 %v1457_v49, %v1440_v39  ;;  %v10608_v53 = vld [vmem:[#allocation17 + $0x48] sm:$0xff]  }
 0x34e   : > { %v1462_v43 = vmul.f32 %v1457_v49, %v1441_v30  ;;  %v1463_v36 = vmul.f32 %v1457_v49, %v1442_v15  ;;  %v1445_v20 = vmul.f32 %v10617_v42, %v11915_v28  ;;  %v1446_v17 = vmul.f32 %v10617_v42, %v11920_v54 }
 0x34f   : > { %v1479_v4 = vadd.f32 %v1478_v19, %v1458_v6  ;;  %v1480_v18 = vadd.f32 %v1478_v19, %v1459_v58  ;;  %v1481_v47 = vadd.f32 %v1478_v19, %v1460_v37  ;;  %v1482_v33 = vadd.f32 %v1478_v19, %v1461_v24 }
 0x350   : > { %v1483_v8 = vadd.f32 %v1478_v19, %v1462_v43  ;;  %v1484_v34 = vadd.f32 %v1478_v19, %v1463_v36  ;;  %v1464_v51 = vmul.f32 %v1457_v49, %v1443_v22  ;;  %v1465_v10 = vmul.f32 %v1457_v49, %v1444_v13 }
 0x351   : > { %v1495_v57 = vpack.c.bf16 %v1480_v18, %v1479_v4  ;;  %v1496_v50 = vpack.c.bf16 %v1482_v33, %v1481_v47  ;;  %v1466_v52 = vmul.f32 %v1457_v49, %v1445_v20  ;;  %v1467_v59 = vmul.f32 %v1457_v49, %v1446_v17 }
 0x352   : > { %v1497_v61 = vpack.c.bf16 %v1484_v34, %v1483_v8  ;;  %v1485_v7 = vadd.f32 %v1478_v19, %v1464_v51  ;;  %v1486_v41 = vadd.f32 %v1478_v19, %v1465_v10  ;;  %v1447_v27 = vmul.f32 %v10617_v42, %v11927_v11 }
 0x353   : > { %10383 = vmatprep.mubr.msk.bf16.mxu0 %vm969_vm2, %v1495_v57  ;;  %v1448_v28 = vmul.f32 %v10617_v42, %v11934_v46  ;;  %v1450_v54 = vmul.f32 %v10617_v42, %v11944_v31  ;;  %v1487_v55 = vadd.f32 %v1478_v19, %v1466_v52  ;;  %v1488_v56 = vadd.f32 %v1478_v19, %v1467_v59 }
 0x354   : > { %10384 = vmatmul.mubr.msk.bf16.vlgmr.msra.gmra.mxu0 %vm969_vm2, %v1496_v50  ;;  %v1449_v26 = vmul.f32 %v10617_v42, %v11939_v23  ;;  %v1498_v44 = vpack.c.bf16 %v1486_v41, %v1485_v7  ;;  %v1468_v63 = vmul.f32 %v1457_v49, %v1447_v27  ;;  %v1451_v46 = vmul.f32 %v10617_v42, %v11951_v35  ;;  %v9416_v35 = vld [vmem:[%s13853_s14 + $0x2] sm:$0x1] }
 0x355   : > { %10387 = vmatprep.mubr.msk.bf16.mxu0 %vm969_vm2, %v1497_v61  ;;  %v1469_v29 = vmul.f32 %v1457_v49, %v1448_v28  ;;  %v1471_v38 = vmul.f32 %v1457_v49, %v1450_v54  ;;  %v1499_v2 = vpack.c.bf16 %v1488_v56, %v1487_v55  ;;  %v1452_v31 = vmul.f32 %v10617_v42, %v11958_v62  ;;  %v10607_v42 = vld [vmem:[#allocation17 + $0x50] sm:$0xff]  }
 0x356   : > { %v1470_v9 = vmul.f32 %v1457_v49, %v1449_v26  ;;  %v1489_v21 = vadd.f32 %v1478_v19, %v1468_v63  ;;  %v1472_v23 = vmul.f32 %v1457_v49, %v1451_v46  ;;  %v1514_v62 = vunpack.c.l.bf16 %v9416_v35  ;;  %10401 = vmatprep.subr.bf16.mxu1 %v10607_v42 }
 0x357   : > { %v1490_v11 = vadd.f32 %v1478_v19, %v1469_v29  ;;  %v1492_v32 = vadd.f32 %v1478_v19, %v1471_v38  ;;  %v1473_v25 = vmul.f32 %v1457_v49, %v1452_v31  ;;  %10402 = vmatpush3.bf16.msra.mxu1 %v10607_v42 }
 0x358   : > { %v1491_v14 = vadd.f32 %v1478_v19, %v1470_v9  ;;  %v1493_v48 = vadd.f32 %v1478_v19, %v1472_v23  ;;  %v12007_v0 = vrot.slane %v1514_v62, %v11527_v16  ;;  %10403 = vmatprep.subr.bf16.mxu1 %v10608_v53 }
 0x359   : > { %v1500_v60 = vpack.c.bf16 %v1490_v11, %v1489_v21  ;;  %v1494_v1 = vadd.f32 %v1478_v19, %v1473_v25  ;;  %v10609_v19 = vld [vmem:[#allocation17 + $0x40] sm:$0xff]  }
 0x35a   : > { %v1501_v40 = vpack.c.bf16 %v1492_v32, %v1491_v14 }
 0x35b   : > { %v1502_v3 = vpack.c.bf16 %v1494_v1, %v1493_v48  ;;  %10404 = vmatpush3.bf16.msra.mxu1 %v10608_v53 }
 0x35c   : > { %10388 = vmatmul.mubr.msk.bf16.gmra.mxu0 %vm969_vm2, %v1498_v44  ;;  %10405 = vmatprep.subr.bf16.mxu1 %v10609_v19 }
 0x35d   : > { %10391 = vmatprep.mubr.msk.bf16.mxu0 %vm969_vm2, %v1499_v2 }
 0x35f   : > { %10406 = vmatpush3.bf16.msra.mxu1 %v10609_v19 }
 0x364   : > { %10392 = vmatmul.mubr.msk.bf16.gmra.mxu0 %vm969_vm2, %v1500_v60 }
 0x365   : > { %10395 = vmatprep.mubr.msk.bf16.mxu0 %vm969_vm2, %v1501_v40 }
 0x36c   : > { %10396 = vmatmul.mubr.msk.bf16.gmra.mxu0 %vm969_vm2, %v1502_v3 }
 0x414   : > { %v10385_v49 = vpop.f32.mrf.mxu0 }
 0x415   : > { %v12013_v15 = vadd.f32 %v10385_v49, %v12007_v0 }
 0x416   : > { %v1601_v45 = vpop.f32.mrf.mxu0 }
 0x417   : > { %v12010_v39 = vadd.f32 %v1601_v45, %v12007_v0  ;;  %v1666_v43 = vmax.f32 %v12013_v15, 0.0 }
 0x418   : > { %v10386_v30 = vpop.f32.mrf.mxu0 }
 0x419   : > { %v1664_v58 = vmax.f32 %v12010_v39, 0.0  ;;  %v12017_v37 = vadd.f32 %v10386_v30, %v12007_v0  ;;  %v1687_v57 = vsel %vm969_vm2, %v1666_v43, 0.0 }
 0x41a   : > { %v1604_v6 = vpop.f32.mrf.mxu0 }
 0x41b   : > { %v12020_v22 = vadd.f32 %v1604_v6, %v12007_v0  ;;  %v1684_v4 = vsel %vm969_vm2, %v1664_v58, 0.0  ;;  %v1667_v18 = vmax.f32 %v12017_v37, 0.0 }
 0x41c   : > { %v10389_v24 = vpop.f32.mrf.mxu0 }
 0x41d   : > { %v1665_v36 = vmax.f32 %v12020_v22, 0.0  ;;  %v12038_v20 = vadd.f32 %v10389_v24, %v12007_v0  ;;  %v1689_v10 = vsel %vm969_vm2, %v1667_v18, 0.0 }
 0x41e   : > { %v1617_v13 = vpop.f32.mrf.mxu0 }
 0x41f   : > { %v1685_v47 = vsel %vm969_vm2, %v1665_v36, 0.0  ;;  %v12032_v33 = vadd.f32 %v1617_v13, %v12007_v0  ;;  %v1670_v41 = vmax.f32 %v12038_v20, 0.0 }
 0x420   : > { %v1686_v8 = vadd.f32 %v1685_v47, %v1684_v4  ;;  %v10390_v34 = vpop.f32.mrf.mxu0 }
 0x421   : > { %v1668_v17 = vmax.f32 %v12032_v33, 0.0  ;;  %v12045_v61 = vadd.f32 %v10390_v34, %v12007_v0  ;;  %v1695_v38 = vsel %vm969_vm2, %v1670_v41, 0.0 }
 0x422   : > { %v1688_v50 = vadd.f32 %v1687_v57, %v1686_v8  ;;  %v1620_v51 = vpop.f32.mrf.mxu0 }
 0x423   : > { %v12048_v52 = vadd.f32 %v1620_v51, %v12007_v0  ;;  %v1691_v27 = vsel %vm969_vm2, %v1668_v17, 0.0  ;;  %v1671_v56 = vmax.f32 %v12045_v61, 0.0 }
 0x424   : > { %v1690_v59 = vadd.f32 %v1689_v10, %v1688_v50  ;;  %v10393_v7 = vpop.f32.mrf.mxu0 }
 0x425   : > { %v1669_v28 = vmax.f32 %v12048_v52, 0.0  ;;  %v12066_v2 = vadd.f32 %v10393_v7, %v12007_v0  ;;  %v1697_v46 = vsel %vm969_vm2, %v1671_v56, 0.0 }
 0x426   : > { %v1692_v54 = vadd.f32 %v1691_v27, %v1690_v59  ;;  %v1633_v55 = vpop.f32.mrf.mxu0 }
 0x427   : > { %v1693_v26 = vsel %vm969_vm2, %v1669_v28, 0.0  ;;  %v12060_v44 = vadd.f32 %v1633_v55, %v12007_v0  ;;  %v1674_v23 = vmax.f32 %v12066_v2, 0.0 }
 0x428   : > { %v1694_v63 = vadd.f32 %v1693_v26, %v1692_v54  ;;  %v10394_v29 = vpop.f32.mrf.mxu0 }
 0x429   : > { %v1672_v9 = vmax.f32 %v12060_v44, 0.0  ;;  %v12073_v31 = vadd.f32 %v10394_v29, %v12007_v0  ;;  %v1703_v49 = vsel %vm969_vm2, %v1674_v23, 0.0 }
 0x42a   : > { %v1696_v21 = vadd.f32 %v1695_v38, %v1694_v63  ;;  %v1636_v11 = vpop.f32.mrf.mxu0 }
 0x42b   : > { %v12076_v32 = vadd.f32 %v1636_v11, %v12007_v0  ;;  %v1699_v25 = vsel %vm969_vm2, %v1672_v9, 0.0  ;;  %v1675_v3 = vmax.f32 %v12073_v31, 0.0 }
 0x42c   : > { %v1698_v14 = vadd.f32 %v1697_v46, %v1696_v21  ;;  %v10397_v60 = vpop.f32.mrf.mxu0 }
 0x42d   : > { %v1673_v40 = vmax.f32 %v12076_v32, 0.0  ;;  %v12092_v53 = vadd.f32 %v10397_v60, %v12007_v0  ;;  %v1705_v6 = vsel %vm969_vm2, %v1675_v3, 0.0 }
 0x42e   : > { %v1700_v48 = vadd.f32 %v1699_v25, %v1698_v14  ;;  %v1649_v1 = vpop.f32.mrf.mxu0 }
 0x42f   : > { %v1701_v5 = vsel %vm969_vm2, %v1673_v40, 0.0  ;;  %v12086_v35 = vadd.f32 %v1649_v1, %v12007_v0  ;;  %v1678_v47 = vmax.f32 %v12092_v53, 0.0 }
 0x430   : > { %v1702_v62 = vadd.f32 %v1701_v5, %v1700_v48  ;;  %v10398_v42 = vpop.f32.mrf.mxu0 }
 0x431   : > { %v1676_v19 = vmax.f32 %v12086_v35, 0.0  ;;  %v12099_v24 = vadd.f32 %v10398_v42, %v12007_v0  ;;  %v1711_v59 = vsel %vm969_vm2, %v1678_v47, 0.0 }
 0x432   : > { %v1704_v45 = vadd.f32 %v1703_v49, %v1702_v62  ;;  %v1652_v30 = vpop.f32.mrf.mxu0 }
 0x433   : > { %v1653_v13 = vadd.f32 %v1652_v30, %v12007_v0  ;;  %v1707_v8 = vsel %vm969_vm2, %v1676_v19, 0.0  ;;  %v1679_v50 = vmax.f32 %v12099_v24, 0.0 }
 0x434   : > { %v1706_v4 = vadd.f32 %v1705_v6, %v1704_v45 }
 0x435   : > { %v1677_v34 = vmax.f32 %v1653_v13, 0.0  ;;  %v1713_v0 = vsel %vm969_vm2, %v1679_v50, 0.0 }
 0x436   : > { %v1708_v57 = vadd.f32 %v1707_v8, %v1706_v4 }
 0x437   : > { %v1709_v51 = vsel %vm969_vm2, %v1677_v34, 0.0 }
 0x438   : > { %v1710_v10 = vadd.f32 %v1709_v51, %v1708_v57 }
 0x43a   : > { %v1712_v7 = vadd.f32 %v1711_v59, %v1710_v10 }
 0x43c   : > { %v1714_v27 = vadd.f32 %v1713_v0, %v1712_v7 }
 0x43e   : > { %v1715_v54 = vrot.slane %v1714_v27, 4 }
 0x440   : > { %v1716_v55 = vadd.f32 %v1715_v54, %v1714_v27 }
 0x442   : > { %v1717_v26 = vrot.slane %v1716_v55, 2 }
 0x444   : > { %v1718_v63 = vadd.f32 %v1717_v26, %v1716_v55 }
 0x446   : > { %v1719_v29 = vrot.slane %v1718_v63, 1 }
 0x448   : > { %v1720_v38 = vadd.f32 %v1719_v29, %v1718_v63 }
 0x44a   : > { %v1721_v21 = vmul.f32 0.0078125, %v1720_v38 }
 0x44c   : > { %v12114_v11 = vsub.f32 %v1664_v58, %v1721_v21  ;;  %v12118_v46 = vsub.f32 %v1665_v36, %v1721_v21  ;;  %v12122_v32 = vsub.f32 %v1666_v43, %v1721_v21  ;;  %v12126_v14 = vsub.f32 %v1667_v18, %v1721_v21 }
 0x44d   : > { %v12134_v58 = vsub.f32 %v1668_v17, %v1721_v21  ;;  %v12140_v15 = vsub.f32 %v1669_v28, %v1721_v21  ;;  %v12148_v33 = vsub.f32 %v1670_v41, %v1721_v21  ;;  %v12155_v28 = vsub.f32 %v1671_v56, %v1721_v21 }
 0x44e   : > { %v1738_v60 = vmul.f32 %v12114_v11, %v12114_v11  ;;  %v1739_v39 = vmul.f32 %v12118_v46, %v12118_v46  ;;  %v1740_v22 = vmul.f32 %v12122_v32, %v12122_v32  ;;  %v1741_v37 = vmul.f32 %v12126_v14, %v12126_v14 }
 0x44f   : > { %v1742_v17 = vmul.f32 %v12134_v58, %v12134_v58  ;;  %v1743_v48 = vmul.f32 %v12140_v15, %v12140_v15  ;;  %v12162_v20 = vsub.f32 %v1672_v9, %v1721_v21  ;;  %v1744_v41 = vmul.f32 %v12148_v33, %v12148_v33 }
 0x450   : > { %v1754_v43 = vsel %vm969_vm2, %v1738_v60, 0.0  ;;  %v1755_v36 = vsel %vm969_vm2, %v1739_v39, 0.0  ;;  %v1757_v25 = vsel %vm969_vm2, %v1740_v22, 0.0  ;;  %v1759_v1 = vsel %vm969_vm2, %v1741_v37, 0.0 }
 0x451   : > { %v1756_v18 = vadd.f32 %v1755_v36, %v1754_v43  ;;  %v1761_v35 = vsel %vm969_vm2, %v1742_v17, 0.0  ;;  %v12167_v42 = vsub.f32 %v1673_v40, %v1721_v21  ;;  %v1745_v61 = vmul.f32 %v12155_v28, %v12155_v28 }
 0x452   : > { %v1763_v56 = vsel %vm969_vm2, %v1743_v48, 0.0  ;;  %v12174_v45 = vsub.f32 %v1674_v23, %v1721_v21  ;;  %v1746_v44 = vmul.f32 %v12162_v20, %v12162_v20  ;;  %v1765_v9 = vsel %vm969_vm2, %v1744_v41, 0.0  ;;  %v9430_v48 = vld [vmem:[%s13904_s24 + $0x2] sm:$0x1] }
 0x453   : > { %v1758_v52 = vadd.f32 %v1757_v25, %v1756_v18  ;;  %v12181_v40 = vsub.f32 %v1675_v3, %v1721_v21  ;;  %v1747_v6 = vmul.f32 %v12167_v42, %v12167_v42  ;;  %v1767_v13 = vsel %vm969_vm2, %v1745_v61, 0.0 }
 0x454   : > { %v12186_v8 = vsub.f32 %v1676_v19, %v1721_v21  ;;  %v1748_v2 = vmul.f32 %v12174_v45, %v12174_v45  ;;  %v1769_v23 = vsel %vm969_vm2, %v1746_v44, 0.0  ;;  %v12191_v51 = vsub.f32 %v1677_v34, %v1721_v21 }
 0x455   : > { %v1760_v5 = vadd.f32 %v1759_v1, %v1758_v52  ;;  %v1749_v31 = vmul.f32 %v12181_v40, %v12181_v40  ;;  %v1771_v3 = vsel %vm969_vm2, %v1747_v6, 0.0  ;;  %v12198_v59 = vsub.f32 %v1678_v47, %v1721_v21  ;;  %v9429_v52 = vld [vmem:[%s13903_s20 + $0x2] sm:$0x1] }
 0x456   : > { %v1750_v19 = vmul.f32 %v12186_v8, %v12186_v8  ;;  %v1773_v7 = vsel %vm969_vm2, %v1748_v2, 0.0  ;;  %v12205_v34 = vsub.f32 %v1679_v50, %v1721_v21  ;;  %v1751_v27 = vmul.f32 %v12191_v51, %v12191_v51 }
 0x457   : > { %v1762_v62 = vadd.f32 %v1761_v35, %v1760_v5  ;;  %v1775_v54 = vsel %vm969_vm2, %v1749_v31, 0.0  ;;  %v1752_v53 = vmul.f32 %v12198_v59, %v12198_v59  ;;  %v1810_v1 = vunpack.c.l.bf16 %v9429_v52 }
 0x458   : > { %v1777_v47 = vsel %vm969_vm2, %v1750_v19, 0.0  ;;  %v1753_v63 = vmul.f32 %v12205_v34, %v12205_v34  ;;  %v1779_v29 = vsel %vm969_vm2, %v1751_v27, 0.0  ;;  %v1831_v5 = vunpack.c.l.bf16 %v9430_v48 }
 0x459   : > { %v1764_v49 = vadd.f32 %v1763_v56, %v1762_v62  ;;  %v1781_v50 = vsel %vm969_vm2, %v1752_v53, 0.0  ;;  %v1814_v41 = vrot.slane %v1810_v1, %v11527_v16 }
 0x45a   : > { %v1783_v21 = vsel %vm969_vm2, %v1753_v63, 0.0  ;;  %v1835_v62 = vrot.slane %v1831_v5, %v11527_v16  ;;  %v2688_v5 = vld [vmem:[#allocation5 + $0x1c0] sm:$0xff] }
 0x45b   : > { %v1766_v30 = vadd.f32 %v1765_v9, %v1764_v49 }
 0x45d   : > { %v1768_v4 = vadd.f32 %v1767_v13, %v1766_v30 }
 0x45f   : > { %v1770_v57 = vadd.f32 %v1769_v23, %v1768_v4 }
 0x461   : > { %v1772_v10 = vadd.f32 %v1771_v3, %v1770_v57 }
 0x463   : > { %v1774_v0 = vadd.f32 %v1773_v7, %v1772_v10 }
 0x465   : > { %v1776_v55 = vadd.f32 %v1775_v54, %v1774_v0 }
 0x467   : > { %v1778_v26 = vadd.f32 %v1777_v47, %v1776_v55 }
 0x469   : > { %v1780_v24 = vadd.f32 %v1779_v29, %v1778_v26 }
 0x46b   : > { %v1782_v38 = vadd.f32 %v1781_v50, %v1780_v24 }
 0x46d   : > { %v1784_v60 = vadd.f32 %v1783_v21, %v1782_v38 }
 0x46f   : > { %v1785_v39 = vrot.slane %v1784_v60, 4 }
 0x471   : > { %v1786_v22 = vadd.f32 %v1785_v39, %v1784_v60 }
 0x473   : > { %v1787_v37 = vrot.slane %v1786_v22, 2 }
 0x475   : > { %v1788_v43 = vadd.f32 %v1787_v37, %v1786_v22 }
 0x477   : > { %v1789_v36 = vrot.slane %v1788_v43, 1 }
 0x479   : > { %v1790_v18 = vadd.f32 %v1789_v36, %v1788_v43 }
 0x47b   : > { %v1791_v17 = vmul.f32 0.0078125, %v1790_v18 }
 0x47d   : > { %v1792_v25 = vadd.f32 1e-05, %v1791_v17 }
 0x47f   : > { %10618 = vrsqrt.f32 %v1792_v25 }
 0x48c   : > { %v10619_v35 = vpop.eup %10618 }
 0x48d   : > { %v1794_v61 = vmul.f32 %v10619_v35, %v12114_v11  ;;  %v1795_v56 = vmul.f32 %v10619_v35, %v12118_v46  ;;  %v1796_v49 = vmul.f32 %v10619_v35, %v12122_v32  ;;  %v1797_v44 = vmul.f32 %v10619_v35, %v12126_v14 }
 0x48e   : > { %v1798_v9 = vmul.f32 %v10619_v35, %v12134_v58  ;;  %v1799_v30 = vmul.f32 %v10619_v35, %v12140_v15  ;;  %v1800_v2 = vmul.f32 %v10619_v35, %v12148_v33  ;;  %v1801_v11 = vmul.f32 %v10619_v35, %v12155_v28 }
 0x48f   : > { %v1815_v6 = vmul.f32 %v1814_v41, %v1794_v61  ;;  %v1816_v13 = vmul.f32 %v1814_v41, %v1795_v56  ;;  %v1817_v4 = vmul.f32 %v1814_v41, %v1796_v49  ;;  %v1818_v23 = vmul.f32 %v1814_v41, %v1797_v44  ;;  %v2692_v61 = vld [vmem:[#allocation5 + $0x1e0] sm:$0xff] }
 0x490   : > { %v1819_v57 = vmul.f32 %v1814_v41, %v1798_v9  ;;  %v1820_v31 = vmul.f32 %v1814_v41, %v1799_v30  ;;  %v1802_v58 = vmul.f32 %v10619_v35, %v12162_v20  ;;  %v1803_v15 = vmul.f32 %v10619_v35, %v12167_v42  ;;  %v2672_v44 = vld [vmem:[#allocation5 + $0x140] sm:$0xff] }
 0x491   : > { %v1836_v3 = vadd.f32 %v1835_v62, %v1815_v6  ;;  %v1837_v46 = vadd.f32 %v1835_v62, %v1816_v13  ;;  %v1838_v10 = vadd.f32 %v1835_v62, %v1817_v4  ;;  %v1839_v32 = vadd.f32 %v1835_v62, %v1818_v23  ;;  %v2676_v9 = vld [vmem:[#allocation5 + $0x160] sm:$0xff] }
 0x492   : > { %v1840_v19 = vadd.f32 %v1835_v62, %v1819_v57  ;;  %v1841_v14 = vadd.f32 %v1835_v62, %v1820_v31  ;;  %v1821_v27 = vmul.f32 %v1814_v41, %v1800_v2  ;;  %v1822_v54 = vmul.f32 %v1814_v41, %v1801_v11  ;;  %v2668_v13 = vld [vmem:[#allocation5 + $0x120] sm:$0xff] }
 0x493   : > { %v1852_v7 = vpack.c.bf16 %v1837_v46, %v1836_v3  ;;  %v1853_v0 = vpack.c.bf16 %v1839_v32, %v1838_v10  ;;  %v1823_v55 = vmul.f32 %v1814_v41, %v1802_v58  ;;  %v1824_v53 = vmul.f32 %v1814_v41, %v1803_v15  ;;  %v2656_v23 = vld [vmem:[#allocation5 + $0xc0] sm:$0xff] }
 0x494   : > { %v1854_v33 = vpack.c.bf16 %v1841_v14, %v1840_v19  ;;  %v1842_v28 = vadd.f32 %v1835_v62, %v1821_v27  ;;  %v1843_v47 = vadd.f32 %v1835_v62, %v1822_v54  ;;  %v1804_v26 = vmul.f32 %v10619_v35, %v12174_v45  ;;  %v2660_v57 = vld [vmem:[#allocation5 + $0xe0] sm:$0xff] }
 0x495   : > { %10407 = vmatprep.mubr.msk.bf16.mxu1 %vm969_vm2, %v1852_v7  ;;  %v1805_v20 = vmul.f32 %v10619_v35, %v12181_v40  ;;  %v1807_v42 = vmul.f32 %v10619_v35, %v12191_v51  ;;  %v1844_v63 = vadd.f32 %v1835_v62, %v1823_v55  ;;  %v1845_v29 = vadd.f32 %v1835_v62, %v1824_v53  ;;  %v2648_v3 = vld [vmem:[#allocation5 + $0x80] sm:$0xff] }
 0x496   : > { %10408 = vmatmul.mubr.msk.bf16.vlgmr.msra.gmra.mxu1 %vm969_vm2, %v1853_v0  ;;  %v1806_v24 = vmul.f32 %v10619_v35, %v12186_v8  ;;  %v1855_v50 = vpack.c.bf16 %v1843_v47, %v1842_v28  ;;  %v1825_v38 = vmul.f32 %v1814_v41, %v1804_v26  ;;  %v1808_v40 = vmul.f32 %v10619_v35, %v12198_v59  ;;  %v2652_v46 = vld [vmem:[#allocation5 + $0xa0] sm:$0xff] }
 0x497   : > { %10411 = vmatprep.mubr.msk.bf16.mxu1 %vm969_vm2, %v1854_v33  ;;  %v1826_v21 = vmul.f32 %v1814_v41, %v1805_v20  ;;  %v1828_v60 = vmul.f32 %v1814_v41, %v1807_v42  ;;  %v1856_v39 = vpack.c.bf16 %v1845_v29, %v1844_v63  ;;  %v1809_v51 = vmul.f32 %v10619_v35, %v12205_v34  ;;  %v2680_v34 = vld [vmem:[#allocation5 + $0x180] sm:$0xff] }
 0x498   : > { %v1827_v22 = vmul.f32 %v1814_v41, %v1806_v24  ;;  %v1846_v37 = vadd.f32 %v1835_v62, %v1825_v38  ;;  %v1829_v8 = vmul.f32 %v1814_v41, %v1808_v40  ;;  %v9535_v59 = vcombine.high %v2688_v5, %v2692_v61  ;;  %v2684_v35 = vld [vmem:[#allocation5 + $0x1a0] sm:$0xff] }
 0x499   : > { %v1847_v45 = vadd.f32 %v1835_v62, %v1826_v21  ;;  %v1849_v43 = vadd.f32 %v1835_v62, %v1828_v60  ;;  %v1830_v17 = vmul.f32 %v1814_v41, %v1809_v51  ;;  %v9534_v56 = vcombine.low %v2688_v5, %v2692_v61  ;;  %v2640_v19 = vld [vmem:[#allocation5 + $0x40] sm:$0xff]  ;;  %v10611_v51 = vld [vmem:[#allocation17 + $0x70] sm:$0xff]  }
 0x49a   : > { %v1848_v36 = vadd.f32 %v1835_v62, %v1827_v22  ;;  %v1850_v52 = vadd.f32 %v1835_v62, %v1829_v8  ;;  %3502 = vmatprep.subr.bf16.mxu1 %v9535_v59  ;;  %v9527_v49 = vcombine.high %v2680_v34, %v2684_v35  ;;  %v9526_v41 = vcombine.low %v2680_v34, %v2684_v35  ;;  %v2644_v14 = vld [vmem:[#allocation5 + $0x60] sm:$0xff] }
 0x49b   : > { %v1857_v18 = vpack.c.bf16 %v1847_v45, %v1846_v37  ;;  %v1851_v48 = vadd.f32 %v1835_v62, %v1830_v17  ;;  %3503 = vmatpush1.bf16.msra.mxu1 %v9534_v56  ;;  %v9519_v30 = vcombine.high %v2672_v44, %v2676_v9  ;;  %v9518_v6 = vcombine.low %v2672_v44, %v2676_v9  ;;  %v2664_v62 = vld [vmem:[#allocation5 + $0x100] sm:$0xff]  ;;  %v9431_v37 = vld [vmem:[%s13853_s14 + $0x3] sm:$0x1] }
 0x49c   : > { %v1858_v25 = vpack.c.bf16 %v1849_v43, %v1848_v36  ;;  %3504 = vmatprep.subr.bf16.mxu1 %v9527_v49  ;;  %v9511_v4 = vcombine.high %v2664_v62, %v2668_v13  ;;  %v9510_v2 = vcombine.low %v2664_v62, %v2668_v13  ;;  %v9503_v31 = vcombine.high %v2656_v23, %v2660_v57  ;;  %v2632_v15 = vld [vmem:[#allocation5] sm:$0xff]  ;;  %v12262_v62 = vld [vmem:[#allocation5 + $0x1c8] sm:$0xff] }
 0x49d   : > { %v1859_v1 = vpack.c.bf16 %v1851_v48, %v1850_v52  ;;  %v9502_v11 = vcombine.low %v2656_v23, %v2660_v57  ;;  %v9495_v10 = vcombine.high %v2648_v3, %v2652_v46  ;;  %v9494_v32 = vcombine.low %v2648_v3, %v2652_v46  ;;  %v2636_v0 = vld [vmem:[#allocation5 + $0x20] sm:$0xff]  ;;  %v10612_v52 = vld [vmem:[#allocation17 + $0x68] sm:$0xff]   ;;  %v9477_v46 = vld.sshfl [vmem:[#allocation3] sm:$0x11 pattern:$0x75316420] }
 0x49e   : > { %10412 = vmatmul.mubr.msk.bf16.gmra.mxu1 %vm969_vm2, %v1855_v50  ;;  %v9487_v7 = vcombine.high %v2640_v19, %v2644_v14  ;;  %v9486_v58 = vcombine.low %v2640_v19, %v2644_v14  ;;  %v9479_v27 = vcombine.high %v2632_v15, %v2636_v0  ;;  %v9478_v54 = vcombine.low %v2632_v15, %v2636_v0  ;;  %v2752_v33 = vld [vmem:[#allocation5 + $0x3c0] sm:$0xff]  ;;  %v12267_v23 = vld [vmem:[#allocation5 + $0x1e8] sm:$0xff]  ;;  %v2694_v0 = vld [vmem:[#allocation5 + $0x1f0] sm:$0xff] }
 0x49f   : > { %10415 = vmatprep.mubr.msk.bf16.mxu1 %vm969_vm2, %v1856_v39  ;;  %3505 = vmatpush1.bf16.msra.mxu1 %v9526_v41  ;;  %v2756_v55 = vld [vmem:[#allocation5 + $0x3e0] sm:$0xff]  ;;  %v1871_v36 = vunpack.c.l.bf16 %v9431_v37  ;;  %v9536_v3 = vcombine.low %v12262_v62, %v12267_v23  ;;  %v11161_v19 = vmov 1966171168  }
 0x4a0   : > { %3506 = vmatprep.subr.bf16.mxu1 %v9519_v30  ;;  %v9599_v53 = vcombine.high %v2752_v33, %v2756_v55  ;;  %v9598_v28 = vcombine.low %v2752_v33, %v2756_v55  ;;  %v2744_v47 = vld [vmem:[#allocation5 + $0x380] sm:$0xff]  ;;  %v2847_v14 = vunpack.c.l.s4 %v11161_v19 }
 0x4a1   : > { %v2748_v26 = vld [vmem:[#allocation5 + $0x3a0] sm:$0xff] }
 0x4a2   : > { %v9591_v20 = vcombine.high %v2744_v47, %v2748_v26  ;;  %v9590_v42 = vcombine.low %v2744_v47, %v2748_v26  ;;  %v2736_v63 = vld [vmem:[#allocation5 + $0x340] sm:$0xff]  ;;  %v2848_v33 = vunpack.c.0.s8 %v2847_v14 }
 0x4a3   : > { %3507 = vmatpush1.bf16.msra.mxu1 %v9518_v6  ;;  %v2740_v29 = vld [vmem:[#allocation5 + $0x360] sm:$0xff] }
 0x4a4   : > { %3508 = vmatprep.subr.bf16.mxu1 %v9511_v4  ;;  %v9583_v24 = vcombine.high %v2736_v63, %v2740_v29  ;;  %v9582_v50 = vcombine.low %v2736_v63, %v2740_v29  ;;  %v2728_v38 = vld [vmem:[#allocation5 + $0x300] sm:$0xff]  ;;  %v12290_v63 = vsub.s32 %v2848_v33, %v11521_v12  ;;  %v2682_v29 = vld [vmem:[#allocation5 + $0x190] sm:$0xff] }
 0x4a5   : > { %v2732_v21 = vld [vmem:[#allocation5 + $0x320] sm:$0xff] }
 0x4a6   : > { %10416 = vmatmul.mubr.msk.bf16.gmra.mxu1 %vm969_vm2, %v1857_v18  ;;  %v10610_v60 = vld [vmem:[#allocation17 + $0x78] sm:$0xff]   ;;  %v9575_v39 = vcombine.high %v2728_v38, %v2732_v21  ;;  %v9574_v22 = vcombine.low %v2728_v38, %v2732_v21  ;;  %v10613_v5 = vld [vmem:[#allocation17 + $0x60] sm:$0xff]  }
 0x4a7   : > { %10419 = vmatprep.mubr.msk.bf16.mxu1 %vm969_vm2, %v1858_v25  ;;  %3509 = vmatpush1.bf16.msra.mxu1 %v9510_v2  ;;  %v2720_v45 = vld [vmem:[#allocation5 + $0x2c0] sm:$0xff] }
 0x4a8   : > { %3510 = vmatprep.subr.bf16.mxu1 %v9503_v31  ;;  %10423 = vmatprep.subr.bf16.mxu0 %v10610_v60  ;;  %v2724_v40 = vld [vmem:[#allocation5 + $0x2e0] sm:$0xff] }
 0x4a9   : > { %10424 = vmatpush3.bf16.msra.mxu0 %v10610_v60  ;;  %v9567_v43 = vcombine.high %v2720_v45, %v2724_v40  ;;  %v9566_v18 = vcombine.low %v2720_v45, %v2724_v40  ;;  %v2712_v8 = vld [vmem:[#allocation5 + $0x280] sm:$0xff] }
 0x4aa   : > { %10425 = vmatprep.subr.bf16.mxu0 %v10611_v51  ;;  %v2716_v17 = vld [vmem:[#allocation5 + $0x2a0] sm:$0xff] }
 0x4ab   : > { %3511 = vmatpush1.bf16.msra.mxu1 %v9502_v11  ;;  %v9559_v48 = vcombine.high %v2712_v8, %v2716_v17  ;;  %v9558_v61 = vcombine.low %v2712_v8, %v2716_v17  ;;  %v2704_v59 = vld [vmem:[#allocation5 + $0x240] sm:$0xff]  ;;  %v2674_v17 = vld [vmem:[#allocation5 + $0x150] sm:$0xff] }
 0x4ac   : > { %3512 = vmatprep.subr.bf16.mxu1 %v9495_v10  ;;  %v2708_v56 = vld [vmem:[#allocation5 + $0x260] sm:$0xff] }
 0x4ad   : > { %10426 = vmatpush3.bf16.msra.mxu0 %v10611_v51  ;;  %v9551_v35 = vcombine.high %v2704_v59, %v2708_v56  ;;  %v9550_v41 = vcombine.low %v2704_v59, %v2708_v56  ;;  %v2696_v30 = vld [vmem:[#allocation5 + $0x200] sm:$0xff] }
 0x4ae   : > { %10420 = vmatmul.mubr.msk.bf16.gmra.mxu1 %vm969_vm2, %v1859_v1  ;;  %v12254_v1 = vrot.slane %v1871_v36, %v11527_v16  ;;  %10427 = vmatprep.subr.bf16.mxu0 %v10612_v52  ;;  %v2700_v6 = vld [vmem:[#allocation5 + $0x220] sm:$0xff] }
 0x4af   : > { %3513 = vmatpush1.bf16.msra.mxu1 %v9494_v32  ;;  %v9543_v2 = vcombine.high %v2696_v30, %v2700_v6  ;;  %v9542_v11 = vcombine.low %v2696_v30, %v2700_v6  ;;  %v9537_v32 = vcombine.high %v12262_v62, %v12267_v23 }
 0x4b0   : > { %3514 = vmatprep.subr.bf16.mxu1 %v9487_v7  ;;  %v2690_v7 = vld [vmem:[#allocation5 + $0x1d0] sm:$0xff] }
 0x4b1   : > { %10428 = vmatpush3.bf16.msra.mxu0 %v10612_v52  ;;  %v9539_v55 = vcombine.high %v2690_v7, %v2694_v0  ;;  %v9538_v45 = vcombine.low %v2690_v7, %v2694_v0 }
 0x4b2   : > { %10429 = vmatprep.subr.bf16.mxu0 %v10613_v5 }
 0x4b3   : > { %3515 = vmatpush1.bf16.msra.mxu1 %v9486_v58 }
 0x4b4   : > { %3516 = vmatprep.subr.bf16.mxu1 %v9479_v27 }
 0x4b5   : > { %10430 = vmatpush3.bf16.msra.mxu0 %v10613_v5 }
 0x4b6   : > { %3543 = vmatprep.subr.bf16.mxu0 %v9537_v32 }
 0x4b7   : > { %3517 = vmatpush1.bf16.msra.mxu1 %v9478_v54  ;;  %v2845_v54 = vcombine.high %v9477_v46, %v9477_v46 }
 0x4b8   : > { %3518 = vmatprep.subr.bf16.mxu1 %v9599_v53 }
 0x4b9   : > { %v12303_v37 = vrot.slane %v2845_v54, %v12290_v63 }
 0x4bb   : > { %3519 = vmatpush2.bf16.msra.mxu1 %v9598_v28  ;;  %3534 = vmatprep.mubr.bf16.mxu1 %v12303_v37 }
 0x4bc   : > { %3520 = vmatprep.subr.bf16.mxu1 %v9591_v20 }
 0x4bf   : > { %3521 = vmatpush2.bf16.msra.mxu1 %v9590_v42 }
 0x4c0   : > { %3522 = vmatprep.subr.bf16.mxu1 %v9583_v24  ;;  %v2686_v24 = vld [vmem:[#allocation5 + $0x1b0] sm:$0xff] }
 0x4c1   : > { %v9531_v36 = vcombine.high %v2682_v29, %v2686_v24  ;;  %v9530_v56 = vcombine.low %v2682_v29, %v2686_v24 }
 0x4c3   : > { %3523 = vmatpush2.bf16.msra.mxu1 %v9582_v50 }
 0x4c4   : > { %3524 = vmatprep.subr.bf16.mxu1 %v9575_v39 }
 0x4c7   : > { %3525 = vmatpush2.bf16.msra.mxu1 %v9574_v22  ;;  %v12300_v22 = vrot.slane %v9477_v46, %v12290_v63 }
 0x4c8   : > { %3526 = vmatprep.subr.bf16.mxu1 %v9567_v43 }
 0x4cb   : > { %3527 = vmatpush2.bf16.msra.mxu1 %v9566_v18 }
 0x4cc   : > { %3528 = vmatprep.subr.bf16.mxu1 %v9559_v48 }
 0x4cf   : > { %3529 = vmatpush2.bf16.msra.mxu1 %v9558_v61 }
 0x4d0   : > { %3530 = vmatprep.subr.bf16.mxu1 %v9551_v35 }
 0x4d3   : > { %3531 = vmatpush2.bf16.msra.mxu1 %v9550_v41 }
 0x4d4   : > { %3532 = vmatprep.subr.bf16.mxu1 %v9543_v2  ;;  %v2670_v2 = vld [vmem:[#allocation5 + $0x130] sm:$0xff] }
 0x4d7   : > { %3533 = vmatpush2.bf16.msra.mxu1 %v9542_v11 }
 0x4d8   : > { %3584 = vmatprep.subr.bf16.mxu1 %v9539_v55 }
 0x4da   : > { %3535 = vmatmul.mubr.bf16.vlgmr.msra.gmra.mxu1 %v12300_v22 }
 0x4db   : > { %3585 = vmatpush1.bf16.msra.mxu1 %v9538_v45  ;;  %3616 = vmatprep.mubr.bf16.mxu1 %v12303_v37 }
 0x4dc   : > { %3586 = vmatprep.subr.bf16.mxu1 %v9531_v36 }
 0x4df   : > { %3587 = vmatpush1.bf16.msra.mxu1 %v9530_v56 }
 0x556   : > { %v10409_v25 = vpop.f32.mrf.mxu1 }
 0x557   : > { %v12260_v9 = vadd.f32 %v10409_v25, %v12254_v1  ;;  %v2678_v25 = vld [vmem:[#allocation5 + $0x170] sm:$0xff] }
 0x558   : > { %v1958_v34 = vpop.f32.mrf.mxu1  ;;  %v9522_v14 = vcombine.low %v2674_v17, %v2678_v25 }
 0x559   : > { %v12257_v49 = vadd.f32 %v1958_v34, %v12254_v1  ;;  %v2023_v58 = vmax.f32 %v12260_v9, 0.0 }
 0x55a   : > { %v10410_v44 = vpop.f32.mrf.mxu1 }
 0x55b   : > { %v12265_v13 = vadd.f32 %v10410_v44, %v12254_v1  ;;  %v2021_v57 = vmax.f32 %v12257_v49, 0.0  ;;  %v2044_v50 = vsel %vm969_vm2, %v2023_v58, 0.0  ;;  %v9523_v44 = vcombine.high %v2674_v17, %v2678_v25  ;;  %v2650_v17 = vld [vmem:[#allocation5 + $0x90] sm:$0xff] }
 0x55c   : > { %v1961_v4 = vpop.f32.mrf.mxu1  ;;  %v2654_v25 = vld [vmem:[#allocation5 + $0xb0] sm:$0xff] }
 0x55d   : > { %v12271_v31 = vadd.f32 %v1961_v4, %v12254_v1  ;;  %v2041_v53 = vsel %vm969_vm2, %v2021_v57, 0.0  ;;  %v2024_v28 = vmax.f32 %v12265_v13, 0.0  ;;  %v2666_v4 = vld [vmem:[#allocation5 + $0x110] sm:$0xff]  ;;  %3588 = vmatprep.subr.bf16.mxu1 %v9523_v44 }
 0x55e   : > { %v10413_v10 = vpop.f32.mrf.mxu1  ;;  %v9515_v54 = vcombine.high %v2666_v4, %v2670_v2  ;;  %3589 = vmatpush1.bf16.msra.mxu1 %v9522_v14 }
 0x55f   : > { %v2022_v15 = vmax.f32 %v12271_v31, 0.0  ;;  %v12296_v38 = vadd.f32 %v10413_v10, %v12254_v1  ;;  %v2046_v40 = vsel %vm969_vm2, %v2024_v28, 0.0 }
 0x560   : > { %v1974_v27 = vpop.f32.mrf.mxu1  ;;  %3590 = vmatprep.subr.bf16.mxu1 %v9515_v54 }
 0x561   : > { %v2042_v47 = vsel %vm969_vm2, %v2022_v15, 0.0  ;;  %v12287_v26 = vadd.f32 %v1974_v27, %v12254_v1  ;;  %v2027_v52 = vmax.f32 %v12296_v38, 0.0 }
 0x562   : > { %v2043_v20 = vadd.f32 %v2042_v47, %v2041_v53  ;;  %v10414_v42 = vpop.f32.mrf.mxu1  ;;  %v2658_v53 = vld [vmem:[#allocation5 + $0xd0] sm:$0xff] }
 0x563   : > { %v2025_v21 = vmax.f32 %v12287_v26, 0.0  ;;  %v12309_v51 = vadd.f32 %v10414_v42, %v12254_v1  ;;  %v2052_v11 = vsel %vm969_vm2, %v2027_v52, 0.0  ;;  %v2662_v47 = vld [vmem:[#allocation5 + $0xf0] sm:$0xff] }
 0x564   : > { %v2045_v60 = vadd.f32 %v2044_v50, %v2043_v20  ;;  %v1977_v39 = vpop.f32.mrf.mxu1  ;;  %v9507_v36 = vcombine.high %v2658_v53, %v2662_v47  ;;  %v9506_v44 = vcombine.low %v2658_v53, %v2662_v47 }
 0x565   : > { %v12312_v43 = vadd.f32 %v1977_v39, %v12254_v1  ;;  %v2048_v48 = vsel %vm969_vm2, %v2025_v21, 0.0  ;;  %v2028_v34 = vmax.f32 %v12309_v51, 0.0 }
 0x566   : > { %v2047_v18 = vadd.f32 %v2046_v40, %v2045_v60  ;;  %v10417_v8 = vpop.f32.mrf.mxu1  ;;  %v9514_v60 = vcombine.low %v2666_v4, %v2670_v2  ;;  %v9499_v2 = vcombine.high %v2650_v17, %v2654_v25 }
 0x567   : > { %v2026_v5 = vmax.f32 %v12312_v43, 0.0  ;;  %v12333_v46 = vadd.f32 %v10417_v8, %v12254_v1  ;;  %v2054_v7 = vsel %vm969_vm2, %v2028_v34, 0.0 }
 0x568   : > { %v2049_v61 = vadd.f32 %v2048_v48, %v2047_v18  ;;  %v1990_v59 = vpop.f32.mrf.mxu1  ;;  %3591 = vmatpush1.bf16.msra.mxu1 %v9514_v60 }
 0x569   : > { %v2050_v35 = vsel %vm969_vm2, %v2026_v5, 0.0  ;;  %v12327_v41 = vadd.f32 %v1990_v59, %v12254_v1  ;;  %v2031_v20 = vmax.f32 %v12333_v46, 0.0  ;;  %3592 = vmatprep.subr.bf16.mxu1 %v9507_v36 }
 0x56a   : > { %v2051_v30 = vadd.f32 %v2050_v35, %v2049_v61  ;;  %v10418_v6 = vpop.f32.mrf.mxu1 }
 0x56b   : > { %v2029_v10 = vmax.f32 %v12327_v41, 0.0  ;;  %v12340_v0 = vadd.f32 %v10418_v6, %v12254_v1  ;;  %v2060_v48 = vsel %vm969_vm2, %v2031_v20, 0.0 }
 0x56c   : > { %v2053_v32 = vadd.f32 %v2052_v11, %v2051_v30  ;;  %v1993_v19 = vpop.f32.mrf.mxu1  ;;  %3593 = vmatpush1.bf16.msra.mxu1 %v9506_v44 }
 0x56d   : > { %v12343_v27 = vadd.f32 %v1993_v19, %v12254_v1  ;;  %v2056_v42 = vsel %vm969_vm2, %v2029_v10, 0.0  ;;  %v2032_v39 = vmax.f32 %v12340_v0, 0.0  ;;  %v2646_v19 = vld [vmem:[#allocation5 + $0x70] sm:$0xff]  ;;  %3594 = vmatprep.subr.bf16.mxu1 %v9499_v2 }
 0x56e   : > { %v2055_v33 = vadd.f32 %v2054_v7, %v2053_v32  ;;  %v10421_v55 = vpop.f32.mrf.mxu1  ;;  %v2642_v32 = vld [vmem:[#allocation5 + $0x50] sm:$0xff] }
 0x56f   : > { %v2030_v29 = vmax.f32 %v12343_v27, 0.0  ;;  %v12361_v61 = vadd.f32 %v10421_v55, %v12254_v1  ;;  %v2062_v30 = vsel %vm969_vm2, %v2032_v39, 0.0  ;;  %v9498_v55 = vcombine.low %v2650_v17, %v2654_v25  ;;  %v2754_v25 = vld [vmem:[#allocation5 + $0x3d0] sm:$0xff] }
 0x570   : > { %v2057_v24 = vadd.f32 %v2056_v42, %v2055_v33  ;;  %v2006_v50 = vpop.f32.mrf.mxu1  ;;  %v9491_v47 = vcombine.high %v2642_v32, %v2646_v19  ;;  %v9490_v36 = vcombine.low %v2642_v32, %v2646_v19  ;;  %v2746_v2 = vld [vmem:[#allocation5 + $0x390] sm:$0xff] }
 0x571   : > { %v2058_v45 = vsel %vm969_vm2, %v2030_v29, 0.0  ;;  %v12355_v40 = vadd.f32 %v2006_v50, %v12254_v1  ;;  %v2035_v14 = vmax.f32 %v12361_v61, 0.0  ;;  %v2638_v50 = vld [vmem:[#allocation5 + $0x30] sm:$0xff]  ;;  %3595 = vmatpush1.bf16.msra.mxu1 %v9498_v55 }
 0x572   : > { %v2059_v18 = vadd.f32 %v2058_v45, %v2057_v24  ;;  %v10422_v8 = vpop.f32.mrf.mxu1  ;;  %v2634_v24 = vld [vmem:[#allocation5 + $0x10] sm:$0xff]  ;;  %3596 = vmatprep.subr.bf16.mxu1 %v9491_v47 }
 0x573   : > { %v2033_v59 = vmax.f32 %v12355_v40, 0.0  ;;  %v12368_v6 = vadd.f32 %v10422_v8, %v12254_v1  ;;  %v2068_v60 = vsel %vm969_vm2, %v2035_v14, 0.0  ;;  %v9483_v8 = vcombine.high %v2634_v24, %v2638_v50  ;;  %v2738_v55 = vld [vmem:[#allocation5 + $0x350] sm:$0xff] }
 0x574   : > { %v2061_v56 = vadd.f32 %v2060_v48, %v2059_v18  ;;  %v2009_v35 = vpop.f32.mrf.mxu1  ;;  %v2758_v48 = vld [vmem:[#allocation5 + $0x3f0] sm:$0xff] }
 0x575   : > { %v12371_v4 = vadd.f32 %v2009_v35, %v12254_v1  ;;  %v2064_v7 = vsel %vm969_vm2, %v2033_v59, 0.0  ;;  %v2036_v53 = vmax.f32 %v12368_v6, 0.0  ;;  %3597 = vmatpush1.bf16.msra.mxu1 %v9490_v36  ;;  %v9482_v35 = vcombine.low %v2634_v24, %v2638_v50  ;;  %v2730_v24 = vld [vmem:[#allocation5 + $0x310] sm:$0xff] }
 0x576   : > { %v2063_v11 = vadd.f32 %v2062_v30, %v2061_v56  ;;  %3598 = vmatprep.subr.bf16.mxu1 %v9483_v8  ;;  %v9603_v44 = vcombine.high %v2754_v25, %v2758_v48  ;;  %v9602_v32 = vcombine.low %v2754_v25, %v2758_v48  ;;  %v2734_v50 = vld [vmem:[#allocation5 + $0x330] sm:$0xff] }
 0x577   : > { %v2034_v54 = vmax.f32 %v12371_v4, 0.0  ;;  %v2070_v18 = vsel %vm969_vm2, %v2036_v53, 0.0  ;;  %v9579_v8 = vcombine.high %v2730_v24, %v2734_v50 }
 0x578   : > { %v2065_v33 = vadd.f32 %v2064_v7, %v2063_v11  ;;  %v2750_v11 = vld [vmem:[#allocation5 + $0x3b0] sm:$0xff] }
 0x579   : > { %v2066_v1 = vsel %vm969_vm2, %v2034_v54, 0.0  ;;  %3599 = vmatpush1.bf16.msra.mxu1 %v9482_v35  ;;  %v9595_v19 = vcombine.high %v2746_v2, %v2750_v11 }
 0x57a   : > { %v2067_v42 = vadd.f32 %v2066_v1, %v2065_v33  ;;  %3600 = vmatprep.subr.bf16.mxu1 %v9603_v44  ;;  %v2742_v1 = vld [vmem:[#allocation5 + $0x370] sm:$0xff] }
 0x57c   : > { %v2069_v45 = vadd.f32 %v2068_v60, %v2067_v42  ;;  %v9594_v42 = vcombine.low %v2746_v2, %v2750_v11  ;;  %v9587_v60 = vcombine.high %v2738_v55, %v2742_v1  ;;  %v2714_v11 = vld [vmem:[#allocation5 + $0x290] sm:$0xff] }
 0x57d   : > { %3601 = vmatpush2.bf16.msra.mxu1 %v9602_v32 }
 0x57e   : > { %v2071_v17 = vadd.f32 %v2070_v18, %v2069_v45  ;;  %3602 = vmatprep.subr.bf16.mxu1 %v9595_v19  ;;  %v9586_v18 = vcombine.low %v2738_v55, %v2742_v1 }
 0x580   : > { %v2072_v56 = vrot.slane %v2071_v17, 4 }
 0x581   : > { %3603 = vmatpush2.bf16.msra.mxu1 %v9594_v42  ;;  %v2706_v42 = vld [vmem:[#allocation5 + $0x250] sm:$0xff] }
 0x582   : > { %v2073_v30 = vadd.f32 %v2072_v56, %v2071_v17  ;;  %3604 = vmatprep.subr.bf16.mxu1 %v9587_v60  ;;  %v9578_v56 = vcombine.low %v2730_v24, %v2734_v50  ;;  %v2710_v60 = vld [vmem:[#allocation5 + $0x270] sm:$0xff] }
 0x584   : > { %v2074_v7 = vrot.slane %v2073_v30, 2 }
 0x585   : > { %3605 = vmatpush2.bf16.msra.mxu1 %v9586_v18 }
 0x586   : > { %v2075_v33 = vadd.f32 %v2074_v7, %v2073_v30  ;;  %3606 = vmatprep.subr.bf16.mxu1 %v9579_v8  ;;  %v2726_v30 = vld [vmem:[#allocation5 + $0x2f0] sm:$0xff]  ;;  %v9555_v8 = vcombine.high %v2706_v42, %v2710_v60 }
 0x587   : > { %v2718_v7 = vld [vmem:[#allocation5 + $0x2b0] sm:$0xff] }
 0x588   : > { %v2076_v47 = vrot.slane %v2075_v33, 1  ;;  %v9562_v50 = vcombine.low %v2714_v11, %v2718_v7 }
 0x589   : > { %3607 = vmatpush2.bf16.msra.mxu1 %v9578_v56 }
 0x58a   : > { %v2077_v45 = vadd.f32 %v2076_v47, %v2075_v33 }
 0x58c   : > { %v12388_v36 = vmul.f32 0.0078125, %v2077_v45 }
 0x58e   : > { %v12393_v17 = vsub.f32 %v2021_v57, %v12388_v36  ;;  %v12398_v25 = vsub.f32 %v2022_v15, %v12388_v36  ;;  %v12403_v48 = vsub.f32 %v2023_v58, %v12388_v36  ;;  %v12408_v35 = vsub.f32 %v2024_v28, %v12388_v36 }
 0x58f   : > { %v12417_v9 = vsub.f32 %v2025_v21, %v12388_v36  ;;  %v12424_v13 = vsub.f32 %v2026_v5, %v12388_v36  ;;  %v12433_v26 = vsub.f32 %v2027_v52, %v12388_v36  ;;  %v2722_v5 = vld [vmem:[#allocation5 + $0x2d0] sm:$0xff]  ;;  %v12441_v32 = vsub.f32 %v2028_v34, %v12388_v36 }
 0x590   : > { %v2095_v49 = vmul.f32 %v12393_v17, %v12393_v17  ;;  %v2096_v57 = vmul.f32 %v12398_v25, %v12398_v25  ;;  %v2097_v31 = vmul.f32 %v12403_v48, %v12403_v48  ;;  %v2098_v58 = vmul.f32 %v12408_v35, %v12408_v35 }
 0x591   : > { %v2099_v21 = vmul.f32 %v12417_v9, %v12417_v9  ;;  %v2100_v38 = vmul.f32 %v12424_v13, %v12424_v13  ;;  %v9570_v33 = vcombine.low %v2722_v5, %v2726_v30  ;;  %v9571_v55 = vcombine.high %v2722_v5, %v2726_v30 }
 0x592   : > { %v2111_v15 = vsel %vm969_vm2, %v2095_v49, 0.0  ;;  %v2112_v28 = vsel %vm969_vm2, %v2096_v57, 0.0  ;;  %v2114_v43 = vsel %vm969_vm2, %v2097_v31, 0.0  ;;  %v2116_v52 = vsel %vm969_vm2, %v2098_v58, 0.0  ;;  %v2698_v49 = vld [vmem:[#allocation5 + $0x210] sm:$0xff] }
 0x593   : > { %v2113_v44 = vadd.f32 %v2112_v28, %v2111_v15  ;;  %v12449_v1 = vsub.f32 %v2029_v10, %v12388_v36  ;;  %v2101_v47 = vmul.f32 %v12433_v26, %v12433_v26  ;;  %v2118_v51 = vsel %vm969_vm2, %v2099_v21, 0.0  ;;  %3608 = vmatprep.subr.bf16.mxu1 %v9571_v55  ;;  %v2702_v57 = vld [vmem:[#allocation5 + $0x230] sm:$0xff] }
 0x594   : > { %v9563_v34 = vcombine.high %v2714_v11, %v2718_v7  ;;  %v12457_v24 = vsub.f32 %v2030_v29, %v12388_v36  ;;  %v2102_v41 = vmul.f32 %v12441_v32, %v12441_v32  ;;  %v2120_v10 = vsel %vm969_vm2, %v2100_v38, 0.0  ;;  %3609 = vmatpush2.bf16.msra.mxu1 %v9570_v33 }
 0x595   : > { %v2115_v2 = vadd.f32 %v2114_v43, %v2113_v44  ;;  %v12465_v56 = vsub.f32 %v2031_v20, %v12388_v36  ;;  %v2103_v27 = vmul.f32 %v12449_v1, %v12449_v1  ;;  %v2122_v29 = vsel %vm969_vm2, %v2101_v47, 0.0 }
 0x596   : > { %3610 = vmatprep.subr.bf16.mxu1 %v9563_v34  ;;  %v12473_v58 = vsub.f32 %v2032_v39, %v12388_v36  ;;  %v2104_v15 = vmul.f32 %v12457_v24, %v12457_v24  ;;  %v2124_v46 = vsel %vm969_vm2, %v2102_v41, 0.0  ;;  %v9554_v20 = vcombine.low %v2706_v42, %v2710_v60 }
 0x597   : > { %v2117_v19 = vadd.f32 %v2116_v52, %v2115_v2  ;;  %v9547_v44 = vcombine.high %v2698_v49, %v2702_v57  ;;  %v12481_v21 = vsub.f32 %v2033_v59, %v12388_v36  ;;  %v2105_v0 = vmul.f32 %v12465_v56, %v12465_v56 }
 0x598   : > { %3611 = vmatpush2.bf16.msra.mxu1 %v9562_v50  ;;  %v2126_v39 = vsel %vm969_vm2, %v2103_v27, 0.0  ;;  %v12489_v5 = vsub.f32 %v2034_v54, %v12388_v36  ;;  %v2106_v30 = vmul.f32 %v12473_v58, %v12473_v58  ;;  %v2128_v2 = vsel %vm969_vm2, %v2104_v15, 0.0 }
 0x599   : > { %v2119_v45 = vadd.f32 %v2118_v51, %v2117_v19  ;;  %3612 = vmatprep.subr.bf16.mxu1 %v9555_v8  ;;  %v9546_v40 = vcombine.low %v2698_v49, %v2702_v57  ;;  %v12497_v11 = vsub.f32 %v2035_v14, %v12388_v36  ;;  %v2107_v7 = vmul.f32 %v12481_v21, %v12481_v21  ;;  %v9445_v49 = vld [vmem:[%s13904_s24 + $0x3] sm:$0x1] }
 0x59a   : > { %v2130_v4 = vsel %vm969_vm2, %v2105_v0, 0.0  ;;  %v12505_v38 = vsub.f32 %v2036_v53, %v12388_v36  ;;  %v2108_v52 = vmul.f32 %v12489_v5, %v12489_v5  ;;  %v2132_v19 = vsel %vm969_vm2, %v2106_v30, 0.0 }
 0x59b   : > { %v2121_v18 = vadd.f32 %v2120_v10, %v2119_v45  ;;  %v2109_v14 = vmul.f32 %v12497_v11, %v12497_v11  ;;  %v2134_v33 = vsel %vm969_vm2, %v2107_v7, 0.0 }
 0x59c   : > { %3613 = vmatpush2.bf16.msra.mxu1 %v9554_v20  ;;  %v2110_v6 = vmul.f32 %v12505_v38, %v12505_v38  ;;  %v2136_v53 = vsel %vm969_vm2, %v2108_v52, 0.0  ;;  %v2685_v52 = vld [vmem:[#allocation5 + $0x1a8] sm:$0xff] }
 0x59d   : > { %v2123_v31 = vadd.f32 %v2122_v29, %v2121_v18  ;;  %3614 = vmatprep.subr.bf16.mxu1 %v9547_v44  ;;  %v2138_v47 = vsel %vm969_vm2, %v2109_v14, 0.0  ;;  %v9444_v29 = vld [vmem:[%s13903_s20 + $0x3] sm:$0x1] }
 0x59e   : > { %v2140_v34 = vsel %vm969_vm2, %v2110_v6, 0.0  ;;  %v2167_v57 = vunpack.c.l.bf16 %v9444_v29 }
 0x59f   : > { %v2125_v28 = vadd.f32 %v2124_v46, %v2123_v31  ;;  %v2188_v31 = vunpack.c.l.bf16 %v9445_v49 }
 0x5a0   : > { %3615 = vmatpush2.bf16.msra.mxu1 %v9546_v40  ;;  %v12526_v15 = vrot.slane %v2167_v57, %v11527_v16  ;;  %v2657_v57 = vld [vmem:[#allocation5 + $0xc8] sm:$0xff] }
 0x5a1   : > { %v2127_v43 = vadd.f32 %v2126_v39, %v2125_v28  ;;  %v12531_v20 = vrot.slane %v2188_v31, %v11527_v16  ;;  %v2661_v31 = vld [vmem:[#allocation5 + $0xe8] sm:$0xff] }
 0x5a3   : > { %v2129_v59 = vadd.f32 %v2128_v2, %v2127_v43  ;;  %3617 = vmatmul.mubr.bf16.vlgmr.msra.gmra.mxu1 %v12300_v22 }
 0x5a5   : > { %v2131_v54 = vadd.f32 %v2130_v4, %v2129_v59 }
 0x5a7   : > { %v2133_v61 = vadd.f32 %v2132_v19, %v2131_v54  ;;  %v2681_v54 = vld [vmem:[#allocation5 + $0x188] sm:$0xff] }
 0x5a8   : > { %v9529_v6 = vcombine.high %v2681_v54, %v2685_v52 }
 0x5a9   : > { %v2135_v55 = vadd.f32 %v2134_v33, %v2133_v61 }
 0x5ab   : > { %v2137_v36 = vadd.f32 %v2136_v53, %v2135_v55  ;;  %v2673_v53 = vld [vmem:[#allocation5 + $0x148] sm:$0xff] }
 0x5ad   : > { %v2139_v51 = vadd.f32 %v2138_v47, %v2137_v36  ;;  %v2677_v36 = vld [vmem:[#allocation5 + $0x168] sm:$0xff] }
 0x5ae   : > { %v9520_v29 = vcombine.low %v2673_v53, %v2677_v36 }
 0x5af   : > { %v2141_v42 = vadd.f32 %v2140_v34, %v2139_v51 }
 0x5b1   : > { %v2142_v60 = vrot.slane %v2141_v42, 4 }
 0x5b3   : > { %v2143_v45 = vadd.f32 %v2142_v60, %v2141_v42 }
 0x5b5   : > { %v2144_v41 = vrot.slane %v2143_v45, 2 }
 0x5b7   : > { %v2145_v10 = vadd.f32 %v2144_v41, %v2143_v45 }
 0x5b9   : > { %v2146_v50 = vrot.slane %v2145_v10, 1 }
 0x5bb   : > { %v2147_v18 = vadd.f32 %v2146_v50, %v2145_v10 }
 0x5bd   : > { %v2148_v8 = vmul.f32 0.0078125, %v2147_v18 }
 0x5bf   : > { %v2149_v27 = vadd.f32 1e-05, %v2148_v8  ;;  %v2669_v8 = vld [vmem:[#allocation5 + $0x128] sm:$0xff] }
 0x5c1   : > { %10620 = vrsqrt.f32 %v2149_v27 }
 0x5ce   : > { %v12528_v46 = vpop.eup %10620 }
 0x5cf   : > { %v2151_v28 = vmul.f32 %v12528_v46, %v12393_v17  ;;  %v2152_v44 = vmul.f32 %v12528_v46, %v12398_v25  ;;  %v2153_v0 = vmul.f32 %v12528_v46, %v12403_v48  ;;  %v2154_v39 = vmul.f32 %v12528_v46, %v12408_v35 }
 0x5d0   : > { %v2155_v43 = vmul.f32 %v12528_v46, %v12417_v9  ;;  %v2156_v30 = vmul.f32 %v12528_v46, %v12424_v13  ;;  %v2157_v25 = vmul.f32 %v12528_v46, %v12433_v26  ;;  %v2158_v9 = vmul.f32 %v12528_v46, %v12441_v32 }
 0x5d1   : > { %v2172_v2 = vmul.f32 %v12526_v15, %v2151_v28  ;;  %v2173_v40 = vmul.f32 %v12526_v15, %v2152_v44  ;;  %v2174_v17 = vmul.f32 %v12526_v15, %v2153_v0  ;;  %v2175_v48 = vmul.f32 %v12526_v15, %v2154_v39 }
 0x5d2   : > { %v2176_v59 = vmul.f32 %v12526_v15, %v2155_v43  ;;  %v2177_v35 = vmul.f32 %v12526_v15, %v2156_v30  ;;  %v2159_v33 = vmul.f32 %v12528_v46, %v12449_v1  ;;  %v2160_v32 = vmul.f32 %v12528_v46, %v12457_v24 }
 0x5d3   : > { %v2193_v13 = vadd.f32 %v12531_v20, %v2172_v2  ;;  %v2194_v7 = vadd.f32 %v12531_v20, %v2173_v40  ;;  %v2195_v4 = vadd.f32 %v12531_v20, %v2174_v17  ;;  %v2196_v19 = vadd.f32 %v12531_v20, %v2175_v48  ;;  %v2649_v48 = vld [vmem:[#allocation5 + $0x88] sm:$0xff] }
 0x5d4   : > { %v2197_v26 = vadd.f32 %v12531_v20, %v2176_v59  ;;  %v2198_v61 = vadd.f32 %v12531_v20, %v2177_v35  ;;  %v2178_v47 = vmul.f32 %v12526_v15, %v2157_v25  ;;  %v2179_v51 = vmul.f32 %v12526_v15, %v2158_v9  ;;  %v2653_v59 = vld [vmem:[#allocation5 + $0xa8] sm:$0xff] }
 0x5d5   : > { %v2209_v14 = vpack.c.bf16 %v2194_v7, %v2193_v13  ;;  %v2210_v55 = vpack.c.bf16 %v2196_v19, %v2195_v4  ;;  %v2180_v42 = vmul.f32 %v12526_v15, %v2159_v33  ;;  %v2181_v60 = vmul.f32 %v12526_v15, %v2160_v32 }
 0x5d6   : > { %v2211_v34 = vpack.c.bf16 %v2198_v61, %v2197_v26  ;;  %v9528_v1 = vcombine.low %v2681_v54, %v2685_v52  ;;  %v9521_v24 = vcombine.high %v2673_v53, %v2677_v36  ;;  %v2199_v45 = vadd.f32 %v12531_v20, %v2178_v47  ;;  %v2645_v52 = vld [vmem:[#allocation5 + $0x68] sm:$0xff] }
 0x5d7   : > { %10431 = vmatprep.mubr.msk.bf16.mxu0 %vm969_vm2, %v2209_v14  ;;  %v2200_v41 = vadd.f32 %v12531_v20, %v2179_v51  ;;  %v2161_v10 = vmul.f32 %v12528_v46, %v12465_v56  ;;  %v2162_v50 = vmul.f32 %v12528_v46, %v12473_v58  ;;  %v2164_v18 = vmul.f32 %v12528_v46, %v12489_v5  ;;  %v2633_v61 = vld [vmem:[#allocation5 + $0x8] sm:$0xff] }
 0x5d8   : > { %10432 = vmatmul.mubr.msk.bf16.vlgmr.msra.gmra.mxu0 %vm969_vm2, %v2210_v55  ;;  %v2201_v62 = vadd.f32 %v12531_v20, %v2180_v42  ;;  %v2202_v23 = vadd.f32 %v12531_v20, %v2181_v60  ;;  %v2163_v27 = vmul.f32 %v12528_v46, %v12481_v21  ;;  %v9505_v39 = vcombine.high %v2657_v57, %v2661_v31  ;;  %v2637_v14 = vld [vmem:[#allocation5 + $0x28] sm:$0xff] }
 0x5d9   : > { %3544 = vmatpush1.bf16.msra.mxu0 %v9536_v3  ;;  %10435 = vmatprep.mubr.msk.bf16.mxu0 %vm969_vm2, %v2211_v34  ;;  %v2665_v3 = vld [vmem:[#allocation5 + $0x108] sm:$0xff]  ;;  %v2212_v49 = vpack.c.bf16 %v2200_v41, %v2199_v45  ;;  %v2182_v58 = vmul.f32 %v12526_v15, %v2161_v10  ;;  %v2183_v5 = vmul.f32 %v12526_v15, %v2162_v50 }
 0x5da   : > { %3545 = vmatprep.subr.bf16.mxu0 %v9529_v6  ;;  %v9513_v56 = vcombine.high %v2665_v3, %v2669_v8  ;;  %v2185_v28 = vmul.f32 %v12526_v15, %v2164_v18  ;;  %v2213_v44 = vpack.c.bf16 %v2202_v23, %v2201_v62  ;;  %v2184_v0 = vmul.f32 %v12526_v15, %v2163_v27  ;;  %v2753_v55 = vld [vmem:[#allocation5 + $0x3c8] sm:$0xff] }
 0x5db   : > { %v9512_v21 = vcombine.low %v2665_v3, %v2669_v8  ;;  %v2203_v43 = vadd.f32 %v12531_v20, %v2182_v58  ;;  %v2204_v30 = vadd.f32 %v12531_v20, %v2183_v5  ;;  %v2165_v2 = vmul.f32 %v12528_v46, %v12497_v11  ;;  %v2641_v11 = vld [vmem:[#allocation5 + $0x48] sm:$0xff] }
 0x5dc   : > { %v2166_v40 = vmul.f32 %v12528_v46, %v12505_v38  ;;  %v2206_v17 = vadd.f32 %v12531_v20, %v2185_v28  ;;  %v2205_v25 = vadd.f32 %v12531_v20, %v2184_v0  ;;  %v9504_v35 = vcombine.low %v2657_v57, %v2661_v31  ;;  %v2757_v6 = vld [vmem:[#allocation5 + $0x3e8] sm:$0xff] }
 0x5dd   : > { %3546 = vmatpush1.bf16.msra.mxu0 %v9528_v1  ;;  %v2214_v9 = vpack.c.bf16 %v2204_v30, %v2203_v43  ;;  %v9497_v13 = vcombine.high %v2649_v48, %v2653_v59  ;;  %v2186_v7 = vmul.f32 %v12526_v15, %v2165_v2  ;;  %v9496_v38 = vcombine.low %v2649_v48, %v2653_v59  ;;  %v2745_v47 = vld [vmem:[#allocation5 + $0x388] sm:$0xff]  ;;  %v2683_v2 = vld [vmem:[#allocation5 + $0x198] sm:$0xff] }
 0x5de   : > { %3547 = vmatprep.subr.bf16.mxu0 %v9521_v24  ;;  %v2187_v4 = vmul.f32 %v12526_v15, %v2166_v40  ;;  %v2215_v54 = vpack.c.bf16 %v2206_v17, %v2205_v25  ;;  %v9489_v46 = vcombine.high %v2641_v11, %v2645_v52  ;;  %v9488_v33 = vcombine.low %v2641_v11, %v2645_v52  ;;  %v2749_v51 = vld [vmem:[#allocation5 + $0x3a8] sm:$0xff]  ;;  %v2687_v40 = vld [vmem:[#allocation5 + $0x1b8] sm:$0xff] }
 0x5df   : > { %v2207_v19 = vadd.f32 %v12531_v20, %v2186_v7  ;;  %v9481_v32 = vcombine.high %v2633_v61, %v2637_v14  ;;  %v9480_v53 = vcombine.low %v2633_v61, %v2637_v14  ;;  %v9601_v36 = vcombine.high %v2753_v55, %v2757_v6  ;;  %v2737_v42 = vld [vmem:[#allocation5 + $0x348] sm:$0xff]  ;;  %v2675_v48 = vld [vmem:[#allocation5 + $0x158] sm:$0xff] }
 0x5e0   : > { %10436 = vmatmul.mubr.msk.bf16.gmra.mxu0 %vm969_vm2, %v2212_v49  ;;  %v2208_v26 = vadd.f32 %v12531_v20, %v2187_v4  ;;  %v9600_v20 = vcombine.low %v2753_v55, %v2757_v6  ;;  %v9593_v34 = vcombine.high %v2745_v47, %v2749_v51  ;;  %v2741_v60 = vld [vmem:[#allocation5 + $0x368] sm:$0xff]  ;;  %v9592_v1 = vcombine.low %v2745_v47, %v2749_v51  ;;  %v2679_v59 = vld [vmem:[#allocation5 + $0x178] sm:$0xff] }
 0x5e1   : > { %3548 = vmatpush1.bf16.msra.mxu0 %v9520_v29  ;;  %10439 = vmatprep.mubr.msk.bf16.mxu0 %vm969_vm2, %v2213_v44  ;;  %v9585_v24 = vcombine.high %v2737_v42, %v2741_v60  ;;  %v2729_v45 = vld [vmem:[#allocation5 + $0x308] sm:$0xff]  ;;  %v9584_v10 = vcombine.low %v2737_v42, %v2741_v60  ;;  %v9533_v25 = vcombine.high %v2683_v2, %v2687_v40  ;;  %v2671_v7 = vld [vmem:[#allocation5 + $0x138] sm:$0xff] }
 0x5e2   : > { %3549 = vmatprep.subr.bf16.mxu0 %v9513_v56  ;;  %v2216_v15 = vpack.c.bf16 %v2208_v26, %v2207_v19  ;;  %v2733_v41 = vld [vmem:[#allocation5 + $0x328] sm:$0xff]  ;;  %v9524_v4 = vcombine.low %v2675_v48, %v2679_v59  ;;  %v2659_v11 = vld [vmem:[#allocation5 + $0xd8] sm:$0xff] }
 0x5e3   : > { %v9577_v50 = vcombine.high %v2729_v45, %v2733_v41  ;;  %v2721_v18 = vld [vmem:[#allocation5 + $0x2c8] sm:$0xff]  ;;  %v9576_v23 = vcombine.low %v2729_v45, %v2733_v41  ;;  %v2663_v52 = vld [vmem:[#allocation5 + $0xf8] sm:$0xff] }
 0x5e4   : > { %v2725_v62 = vld [vmem:[#allocation5 + $0x2e8] sm:$0xff]  ;;  %v2651_v19 = vld [vmem:[#allocation5 + $0x98] sm:$0xff]  ;;  %v9508_v61 = vcombine.low %v2659_v11, %v2663_v52 }
 0x5e5   : > { %3550 = vmatpush1.bf16.msra.mxu0 %v9512_v21  ;;  %v9569_v3 = vcombine.high %v2721_v18, %v2725_v62  ;;  %v2713_v8 = vld [vmem:[#allocation5 + $0x288] sm:$0xff]  ;;  %v9568_v29 = vcombine.low %v2721_v18, %v2725_v62  ;;  %v2691_v21 = vld [vmem:[#allocation5 + $0x1d8] sm:$0xff] }
 0x5e6   : > { %3551 = vmatprep.subr.bf16.mxu0 %v9505_v39  ;;  %v2717_v27 = vld [vmem:[#allocation5 + $0x2a8] sm:$0xff]  ;;  %v2695_v39 = vld [vmem:[#allocation5 + $0x1f8] sm:$0xff] }
 0x5e7   : > { %v9561_v49 = vcombine.high %v2713_v8, %v2717_v27  ;;  %v2705_v56 = vld [vmem:[#allocation5 + $0x248] sm:$0xff]  ;;  %v9560_v31 = vcombine.low %v2713_v8, %v2717_v27  ;;  %v9541_v30 = vcombine.high %v2691_v21, %v2695_v39  ;;  %v9540_v17 = vcombine.low %v2691_v21, %v2695_v39  ;;  %v2655_v26 = vld [vmem:[#allocation5 + $0xb8] sm:$0xff] }
 0x5e8   : > { %10440 = vmatmul.mubr.msk.bf16.gmra.mxu0 %vm969_vm2, %v2214_v9  ;;  %v2709_v57 = vld [vmem:[#allocation5 + $0x268] sm:$0xff]  ;;  %v9525_v9 = vcombine.high %v2675_v48, %v2679_v59  ;;  %v2643_v14 = vld [vmem:[#allocation5 + $0x58] sm:$0xff] }
 0x5e9   : > { %3552 = vmatpush1.bf16.msra.mxu0 %v9504_v35  ;;  %10443 = vmatprep.mubr.msk.bf16.mxu0 %vm969_vm2, %v2215_v54  ;;  %v9553_v58 = vcombine.high %v2705_v56, %v2709_v57  ;;  %v2697_v5 = vld [vmem:[#allocation5 + $0x208] sm:$0xff]  ;;  %v9552_v44 = vcombine.low %v2705_v56, %v2709_v57  ;;  %v9532_v35 = vcombine.low %v2683_v2, %v2687_v40  ;;  %v2635_v55 = vld [vmem:[#allocation5 + $0x18] sm:$0xff]  ;;  %v12612_v40 = vpop.f32.mrf.mxu1 }
 0x5ea   : > { %3553 = vmatprep.subr.bf16.mxu0 %v9497_v13  ;;  %v2701_v28 = vld [vmem:[#allocation5 + $0x228] sm:$0xff]  ;;  %v2667_v13 = vld [vmem:[#allocation5 + $0x118] sm:$0xff] }
 0x5eb   : > { %v9545_v0 = vcombine.high %v2697_v5, %v2701_v28  ;;  %v9544_v43 = vcombine.low %v2697_v5, %v2701_v28  ;;  %v9517_v54 = vcombine.high %v2667_v13, %v2671_v7  ;;  %v2639_v6 = vld [vmem:[#allocation5 + $0x38] sm:$0xff] }
 0x5ec   : > { %v2755_v47 = vld [vmem:[#allocation5 + $0x3d8] sm:$0xff] }
 0x5ed   : > { %3554 = vmatpush1.bf16.msra.mxu0 %v9496_v38  ;;  %v9516_v38 = vcombine.low %v2667_v13, %v2671_v7  ;;  %v2759_v51 = vld [vmem:[#allocation5 + $0x3f8] sm:$0xff] }
 0x5ee   : > { %3555 = vmatprep.subr.bf16.mxu0 %v9489_v46  ;;  %v9509_v46 = vcombine.high %v2659_v11, %v2663_v52  ;;  %v2747_v42 = vld [vmem:[#allocation5 + $0x398] sm:$0xff] }
 0x5ef   : > { %v2751_v60 = vld [vmem:[#allocation5 + $0x3b8] sm:$0xff] }
 0x5f0   : > { %10444 = vmatmul.mubr.msk.bf16.gmra.mxu0 %vm969_vm2, %v2216_v15  ;;  %v9500_v15 = vcombine.low %v2651_v19, %v2655_v26  ;;  %v2739_v45 = vld [vmem:[#allocation5 + $0x358] sm:$0xff] }
 0x5f1   : > { %3556 = vmatpush1.bf16.msra.mxu0 %v9488_v33  ;;  %3575 = vmatprep.mubr.bf16.mxu0 %v12303_v37  ;;  %v2647_v33 = vld [vmem:[#allocation5 + $0x78] sm:$0xff] }
 0x5f2   : > { %3557 = vmatprep.subr.bf16.mxu0 %v9481_v32  ;;  %v9493_v32 = vcombine.high %v2643_v14, %v2647_v33  ;;  %v2743_v41 = vld [vmem:[#allocation5 + $0x378] sm:$0xff] }
 0x5f3   : > { %v2731_v18 = vld [vmem:[#allocation5 + $0x318] sm:$0xff] }
 0x5f4   : > { %v2735_v62 = vld [vmem:[#allocation5 + $0x338] sm:$0xff] }
 0x5f5   : > { %3558 = vmatpush1.bf16.msra.mxu0 %v9480_v53  ;;  %v9492_v53 = vcombine.low %v2643_v14, %v2647_v33  ;;  %v2723_v8 = vld [vmem:[#allocation5 + $0x2d8] sm:$0xff] }
 0x5f6   : > { %3559 = vmatprep.subr.bf16.mxu0 %v9601_v36  ;;  %v9485_v36 = vcombine.high %v2635_v55, %v2639_v6  ;;  %v2727_v27 = vld [vmem:[#allocation5 + $0x2f8] sm:$0xff] }
 0x5f7   : > { %v2715_v56 = vld [vmem:[#allocation5 + $0x298] sm:$0xff] }
 0x5f8   : > { %v2719_v57 = vld [vmem:[#allocation5 + $0x2b8] sm:$0xff] }
 0x5f9   : > { %3560 = vmatpush2.bf16.msra.mxu0 %v9600_v20  ;;  %v9484_v20 = vcombine.low %v2635_v55, %v2639_v6  ;;  %v2707_v5 = vld [vmem:[#allocation5 + $0x258] sm:$0xff] }
 0x5fa   : > { %3561 = vmatprep.subr.bf16.mxu0 %v9593_v34  ;;  %v9605_v34 = vcombine.high %v2755_v47, %v2759_v51  ;;  %v2711_v28 = vld [vmem:[#allocation5 + $0x278] sm:$0xff] }
 0x5fb   : > { %v2699_v21 = vld [vmem:[#allocation5 + $0x218] sm:$0xff] }
 0x5fc   : > { %v2703_v39 = vld [vmem:[#allocation5 + $0x238] sm:$0xff] }
 0x5fd   : > { %3562 = vmatpush2.bf16.msra.mxu0 %v9592_v1  ;;  %v9604_v1 = vcombine.low %v2755_v47, %v2759_v51  ;;  %v9548_v2 = vcombine.low %v2699_v21, %v2703_v39  ;;  %v9446_v7 = vld [vmem:[%s13853_s14 + $0x4] sm:$0x1] }
 0x5fe   : > { %3563 = vmatprep.subr.bf16.mxu0 %v9585_v24  ;;  %v9597_v24 = vcombine.high %v2747_v42, %v2751_v60 }
 0x601   : > { %3564 = vmatpush2.bf16.msra.mxu0 %v9584_v10  ;;  %v9596_v10 = vcombine.low %v2747_v42, %v2751_v60 }
 0x602   : > { %3565 = vmatprep.subr.bf16.mxu0 %v9577_v50  ;;  %v9589_v50 = vcombine.high %v2739_v45, %v2743_v41 }
 0x605   : > { %3566 = vmatpush2.bf16.msra.mxu0 %v9576_v23  ;;  %v9588_v23 = vcombine.low %v2739_v45, %v2743_v41 }
 0x606   : > { %3567 = vmatprep.subr.bf16.mxu0 %v9569_v3  ;;  %v9581_v3 = vcombine.high %v2731_v18, %v2735_v62 }
 0x609   : > { %3568 = vmatpush2.bf16.msra.mxu0 %v9568_v29  ;;  %v9580_v29 = vcombine.low %v2731_v18, %v2735_v62 }
 0x60a   : > { %3569 = vmatprep.subr.bf16.mxu0 %v9561_v49  ;;  %v9573_v49 = vcombine.high %v2723_v8, %v2727_v27 }
 0x60d   : > { %3570 = vmatpush2.bf16.msra.mxu0 %v9560_v31  ;;  %v9572_v31 = vcombine.low %v2723_v8, %v2727_v27 }
 0x60e   : > { %3571 = vmatprep.subr.bf16.mxu0 %v9553_v58  ;;  %v9565_v58 = vcombine.high %v2715_v56, %v2719_v57 }
 0x611   : > { %3572 = vmatpush2.bf16.msra.mxu0 %v9552_v44  ;;  %v9564_v44 = vcombine.low %v2715_v56, %v2719_v57 }
 0x612   : > { %3573 = vmatprep.subr.bf16.mxu0 %v9545_v0  ;;  %v9557_v0 = vcombine.high %v2707_v5, %v2711_v28 }
 0x615   : > { %3574 = vmatpush2.bf16.msra.mxu0 %v9544_v43  ;;  %v9556_v43 = vcombine.low %v2707_v5, %v2711_v28 }
 0x616   : > { %3625 = vmatprep.subr.bf16.mxu0 %v9541_v30  ;;  %v9549_v30 = vcombine.high %v2699_v21, %v2703_v39 }
 0x618   : > { %3576 = vmatmul.mubr.bf16.vlgmr.msra.gmra.mxu0 %v12300_v22 }
 0x619   : > { %3626 = vmatpush1.bf16.msra.mxu0 %v9540_v17  ;;  %3657 = vmatprep.mubr.bf16.mxu0 %v12303_v37  ;;  %v9501_v37 = vcombine.high %v2651_v19, %v2655_v26  ;;  %v12614_v17 = vpop.f32.mrf.mxu1 }
 0x61a   : > { %3627 = vmatprep.subr.bf16.mxu0 %v9533_v25 }
 0x61b   : > { %v3540_v25 = vpop.f32.mrf.mxu1 }
 0x61d   : > { %3628 = vmatpush1.bf16.msra.mxu0 %v9532_v35  ;;  %v3541_v48 = vpop.f32.mrf.mxu1 }
 0x61e   : > { %3629 = vmatprep.subr.bf16.mxu0 %v9525_v9 }
 0x621   : > { %3630 = vmatpush1.bf16.msra.mxu0 %v9524_v4  ;;  %v2228_v4 = vunpack.c.l.bf16 %v9446_v7 }
 0x622   : > { %3631 = vmatprep.subr.bf16.mxu0 %v9517_v54 }
 0x625   : > { %3632 = vmatpush1.bf16.msra.mxu0 %v9516_v38 }
 0x626   : > { %3633 = vmatprep.subr.bf16.mxu0 %v9509_v46 }
 0x629   : > { %3634 = vmatpush1.bf16.msra.mxu0 %v9508_v61 }
 0x62a   : > { %3635 = vmatprep.subr.bf16.mxu0 %v9501_v37 }
 0x62d   : > { %3636 = vmatpush1.bf16.msra.mxu0 %v9500_v15 }
 0x62e   : > { %3637 = vmatprep.subr.bf16.mxu0 %v9493_v32 }
 0x631   : > { %3638 = vmatpush1.bf16.msra.mxu0 %v9492_v53 }
 0x632   : > { %3639 = vmatprep.subr.bf16.mxu0 %v9485_v36 }
 0x635   : > { %3640 = vmatpush1.bf16.msra.mxu0 %v9484_v20 }
 0x636   : > { %3641 = vmatprep.subr.bf16.mxu0 %v9605_v34 }
 0x639   : > { %3642 = vmatpush2.bf16.msra.mxu0 %v9604_v1 }
 0x63a   : > { %3643 = vmatprep.subr.bf16.mxu0 %v9597_v24 }
 0x63d   : > { %3644 = vmatpush2.bf16.msra.mxu0 %v9596_v10 }
 0x63e   : > { %3645 = vmatprep.subr.bf16.mxu0 %v9589_v50 }
 0x641   : > { %3646 = vmatpush2.bf16.msra.mxu0 %v9588_v23 }
 0x642   : > { %3647 = vmatprep.subr.bf16.mxu0 %v9581_v3 }
 0x645   : > { %3648 = vmatpush2.bf16.msra.mxu0 %v9580_v29 }
 0x646   : > { %3649 = vmatprep.subr.bf16.mxu0 %v9573_v49 }
 0x649   : > { %3650 = vmatpush2.bf16.msra.mxu0 %v9572_v31 }
 0x64a   : > { %3651 = vmatprep.subr.bf16.mxu0 %v9565_v58 }
 0x64d   : > { %3652 = vmatpush2.bf16.msra.mxu0 %v9564_v44 }
 0x64e   : > { %3653 = vmatprep.subr.bf16.mxu0 %v9557_v0 }
 0x651   : > { %3654 = vmatpush2.bf16.msra.mxu0 %v9556_v43 }
 0x652   : > { %3655 = vmatprep.subr.bf16.mxu0 %v9549_v30 }
 0x655   : > { %3656 = vmatpush2.bf16.msra.mxu0 %v9548_v2 }
 0x658   : > { %3658 = vmatmul.mubr.bf16.vlgmr.msra.gmra.mxu0 %v12300_v22  ;;  %v2232_v22 = vrot.slane %v2228_v4, %v11527_v16 }
 0x663   : > { %v12616_v59 = vpop.f32.mrf.mxu1 }
 0x665   : > { %v12618_v35 = vpop.f32.mrf.mxu1 }
 0x667   : > { %v3622_v9 = vpop.f32.mrf.mxu1 }
 0x669   : > { %v3623_v13 = vpop.f32.mrf.mxu1 }
 0x698   : > { %v10433_v54 = vpop.f32.mrf.mxu0 }
 0x699   : > { %v12626_v19 = vadd.f32 %v10433_v54, %v2232_v22 }
 0x69a   : > { %v2315_v11 = vpop.f32.mrf.mxu0 }
 0x69b   : > { %v12624_v38 = vadd.f32 %v2315_v11, %v2232_v22  ;;  %v2385_v55 = vsel %vm969_vm2, %v12626_v19, 0.0 }
 0x69c   : > { %v10434_v52 = vpop.f32.mrf.mxu0 }
 0x69d   : > { %v2382_v37 = vsel %vm969_vm2, %v12624_v38, 0.0  ;;  %v12632_v14 = vadd.f32 %v10434_v52, %v2232_v22 }
 0x69e   : > { %v2318_v46 = vpop.f32.mrf.mxu0 }
 0x69f   : > { %v12628_v26 = vadd.f32 %v2318_v46, %v2232_v22  ;;  %v2387_v47 = vsel %vm969_vm2, %v12632_v14, 0.0 }
 0x6a0   : > { %v10437_v61 = vpop.f32.mrf.mxu0 }
 0x6a1   : > { %v2383_v33 = vsel %vm969_vm2, %v12628_v26, 0.0  ;;  %v12640_v34 = vadd.f32 %v10437_v61, %v2232_v22 }
 0x6a2   : > { %v2384_v15 = vadd.f32 %v2383_v33, %v2382_v37  ;;  %v2331_v32 = vpop.f32.mrf.mxu0 }
 0x6a3   : > { %v2332_v6 = vadd.f32 %v2331_v32, %v2232_v22  ;;  %v2393_v18 = vsel %vm969_vm2, %v12640_v34, 0.0 }
 0x6a4   : > { %v2386_v53 = vadd.f32 %v2385_v55, %v2384_v15  ;;  %v10438_v36 = vpop.f32.mrf.mxu0 }
 0x6a5   : > { %v2389_v42 = vsel %vm969_vm2, %v2332_v6, 0.0  ;;  %v12643_v45 = vadd.f32 %v10438_v36, %v2232_v22 }
 0x6a6   : > { %v2388_v51 = vadd.f32 %v2387_v47, %v2386_v53  ;;  %v2334_v20 = vpop.f32.mrf.mxu0 }
 0x6a7   : > { %v2335_v60 = vadd.f32 %v2334_v20, %v2232_v22  ;;  %v2395_v8 = vsel %vm969_vm2, %v12643_v45, 0.0 }
 0x6a8   : > { %v2390_v1 = vadd.f32 %v2389_v42, %v2388_v51  ;;  %v10441_v24 = vpop.f32.mrf.mxu0 }
 0x6a9   : > { %v2391_v41 = vsel %vm969_vm2, %v2335_v60, 0.0  ;;  %v12652_v49 = vadd.f32 %v10441_v24, %v2232_v22 }
 0x6aa   : > { %v2392_v10 = vadd.f32 %v2391_v41, %v2390_v1  ;;  %v2347_v50 = vpop.f32.mrf.mxu0 }
 0x6ab   : > { %v12648_v62 = vadd.f32 %v2347_v50, %v2232_v22  ;;  %v2401_v21 = vsel %vm969_vm2, %v12652_v49, 0.0 }
 0x6ac   : > { %v2394_v23 = vadd.f32 %v2393_v18, %v2392_v10  ;;  %v10442_v3 = vpop.f32.mrf.mxu0 }
 0x6ad   : > { %v2397_v56 = vsel %vm969_vm2, %v12648_v62, 0.0  ;;  %v12656_v5 = vadd.f32 %v10442_v3, %v2232_v22 }
 0x6ae   : > { %v2396_v27 = vadd.f32 %v2395_v8, %v2394_v23  ;;  %v2350_v29 = vpop.f32.mrf.mxu0 }
 0x6af   : > { %v2351_v57 = vadd.f32 %v2350_v29, %v2232_v22  ;;  %v2403_v2 = vsel %vm969_vm2, %v12656_v5, 0.0 }
 0x6b0   : > { %v2398_v31 = vadd.f32 %v2397_v56, %v2396_v27  ;;  %v10445_v58 = vpop.f32.mrf.mxu0 }
 0x6b1   : > { %v2399_v28 = vsel %vm969_vm2, %v2351_v57, 0.0  ;;  %v12665_v9 = vadd.f32 %v10445_v58, %v2232_v22 }
 0x6b2   : > { %v2400_v44 = vadd.f32 %v2399_v28, %v2398_v31  ;;  %v2363_v0 = vpop.f32.mrf.mxu0 }
 0x6b3   : > { %v12661_v39 = vadd.f32 %v2363_v0, %v2232_v22  ;;  %v2409_v46 = vsel %vm969_vm2, %v12665_v9, 0.0 }
 0x6b4   : > { %v2402_v43 = vadd.f32 %v2401_v21, %v2400_v44  ;;  %v10446_v30 = vpop.f32.mrf.mxu0 }
 0x6b5   : > { %v2405_v13 = vsel %vm969_vm2, %v12661_v39, 0.0  ;;  %v12669_v54 = vadd.f32 %v10446_v30, %v2232_v22 }
 0x6b6   : > { %v2404_v25 = vadd.f32 %v2403_v2, %v2402_v43  ;;  %v2366_v48 = vpop.f32.mrf.mxu0 }
 0x6b7   : > { %v2367_v7 = vadd.f32 %v2366_v48, %v2232_v22  ;;  %v2411_v37 = vsel %vm969_vm2, %v12669_v54, 0.0 }
 0x6b8   : > { %v2406_v4 = vadd.f32 %v2405_v13, %v2404_v25 }
 0x6b9   : > { %v2407_v11 = vsel %vm969_vm2, %v2367_v7, 0.0 }
 0x6ba   : > { %v2408_v52 = vadd.f32 %v2407_v11, %v2406_v4 }
 0x6bc   : > { %v2410_v61 = vadd.f32 %v2409_v46, %v2408_v52 }
 0x6be   : > { %v2412_v33 = vadd.f32 %v2411_v37, %v2410_v61 }
 0x6c0   : > { %v2413_v15 = vrot.slane %v2412_v33, 4 }
 0x6c2   : > { %v2414_v32 = vadd.f32 %v2413_v15, %v2412_v33 }
 0x6c4   : > { %v2415_v55 = vrot.slane %v2414_v32, 2 }
 0x6c6   : > { %v2416_v53 = vadd.f32 %v2415_v55, %v2414_v32 }
 0x6c8   : > { %v2417_v36 = vrot.slane %v2416_v53, 1 }
 0x6ca   : > { %v2418_v47 = vadd.f32 %v2417_v36, %v2416_v53 }
 0x6cc   : > { %v2419_v51 = vmul.f32 0.0078125, %v2418_v47 }
 0x6ce   : > { %v12677_v22 = vsub.f32 %v12624_v38, %v2419_v51  ;;  %v12680_v20 = vsub.f32 %v12628_v26, %v2419_v51  ;;  %v12683_v42 = vsub.f32 %v12626_v19, %v2419_v51  ;;  %v12686_v1 = vsub.f32 %v12632_v14, %v2419_v51 }
 0x6cf   : > { %v12692_v10 = vsub.f32 %v2332_v6, %v2419_v51  ;;  %v12696_v50 = vsub.f32 %v2335_v60, %v2419_v51  ;;  %v12703_v23 = vsub.f32 %v12640_v34, %v2419_v51  ;;  %v12711_v27 = vsub.f32 %v12643_v45, %v2419_v51 }
 0x6d0   : > { %v2436_v24 = vmul.f32 %v12677_v22, %v12677_v22  ;;  %v2437_v41 = vmul.f32 %v12680_v20, %v12680_v20  ;;  %v2438_v38 = vmul.f32 %v12683_v42, %v12683_v42  ;;  %v2439_v19 = vmul.f32 %v12686_v1, %v12686_v1 }
 0x6d1   : > { %v2440_v6 = vmul.f32 %v12692_v10, %v12692_v10  ;;  %v2441_v29 = vmul.f32 %v12696_v50, %v12696_v50  ;;  %v12719_v58 = vsub.f32 %v12648_v62, %v2419_v51  ;;  %v2442_v28 = vmul.f32 %v12703_v23, %v12703_v23 }
 0x6d2   : > { %v2452_v26 = vsel %vm969_vm2, %v2436_v24, 0.0  ;;  %v2453_v14 = vsel %vm969_vm2, %v2437_v41, 0.0  ;;  %v2455_v3 = vsel %vm969_vm2, %v2438_v38, 0.0  ;;  %v2457_v56 = vsel %vm969_vm2, %v2439_v19, 0.0  ;;  %v2760_v19 = vld [vmem:[#allocation7] sm:$0xff] }
 0x6d3   : > { %v2454_v18 = vadd.f32 %v2453_v14, %v2452_v26  ;;  %v2459_v44 = vsel %vm969_vm2, %v2440_v6, 0.0  ;;  %v12724_v45 = vsub.f32 %v2351_v57, %v2419_v51  ;;  %v2443_v43 = vmul.f32 %v12711_v27, %v12711_v27 }
 0x6d4   : > { %v2461_v30 = vsel %vm969_vm2, %v2441_v29, 0.0  ;;  %v12730_v48 = vsub.f32 %v12652_v49, %v2419_v51  ;;  %v2444_v62 = vmul.f32 %v12719_v58, %v12719_v58  ;;  %v2463_v13 = vsel %vm969_vm2, %v2442_v28, 0.0 }
 0x6d5   : > { %v2456_v60 = vadd.f32 %v2455_v3, %v2454_v18  ;;  %v12736_v11 = vsub.f32 %v12656_v5, %v2419_v51  ;;  %v2445_v57 = vmul.f32 %v12724_v45, %v12724_v45  ;;  %v2465_v52 = vsel %vm969_vm2, %v2443_v43, 0.0 }
 0x6d6   : > { %v12742_v61 = vsub.f32 %v12661_v39, %v2419_v51  ;;  %v2446_v49 = vmul.f32 %v12730_v48, %v12730_v48  ;;  %v2467_v37 = vsel %vm969_vm2, %v2444_v62, 0.0  ;;  %v12747_v15 = vsub.f32 %v2367_v7, %v2419_v51 }
 0x6d7   : > { %v2458_v34 = vadd.f32 %v2457_v56, %v2456_v60  ;;  %v2447_v5 = vmul.f32 %v12736_v11, %v12736_v11  ;;  %v2469_v32 = vsel %vm969_vm2, %v2445_v57, 0.0  ;;  %v12753_v53 = vsub.f32 %v12665_v9, %v2419_v51 }
 0x6d8   : > { %v12708_v8 = vpop.f32.mrf.mxu0  ;;  %v2448_v39 = vmul.f32 %v12742_v61, %v12742_v61  ;;  %v2471_v36 = vsel %vm969_vm2, %v2446_v49, 0.0  ;;  %v12759_v24 = vsub.f32 %v12669_v54, %v2419_v51  ;;  %v2449_v7 = vmul.f32 %v12747_v15, %v12747_v15 }
 0x6d9   : > { %v2460_v21 = vadd.f32 %v2459_v44, %v2458_v34  ;;  %v2473_v41 = vsel %vm969_vm2, %v2447_v5, 0.0  ;;  %v2450_v9 = vmul.f32 %v12753_v53, %v12753_v53  ;;  %v2761_v54 = vunpack.c.l.bf16 %v2760_v19 }
 0x6da   : > { %v12716_v31 = vpop.f32.mrf.mxu0  ;;  %v2475_v26 = vsel %vm969_vm2, %v2448_v39, 0.0  ;;  %v2451_v18 = vmul.f32 %v12759_v24, %v12759_v24  ;;  %v2477_v6 = vsel %vm969_vm2, %v2449_v7, 0.0  ;;  %v12771_v51 = vsub.s32 2, %v11521_v12 }
 0x6db   : > { %v2462_v25 = vadd.f32 %v2461_v30, %v2460_v21  ;;  %v2479_v60 = vsel %vm969_vm2, %v2450_v9, 0.0  ;;  %v2768_v34 = vrot.slane %v2761_v54, %v11527_v16  ;;  %v12784_v62 = vsub.s32 6, %v11521_v12 }
 0x6dc   : > { %v3581_v0 = vpop.f32.mrf.mxu0  ;;  %v2481_v56 = vsel %vm969_vm2, %v2451_v18, 0.0  ;;  %v2772_v28 = vrot.slane %v2761_v54, %v12771_v51 }
 0x6dd   : > { %v2464_v4 = vadd.f32 %v2463_v13, %v2462_v25  ;;  %v12778_v0 = vsub.s32 4, %v11521_v12  ;;  %v2808_v43 = vrot.slane %v2768_v34, %v11527_v16  ;;  %v2780_v49 = vrot.slane %v2761_v54, %v12784_v62 }
 0x6de   : > { %v3582_v2 = vpop.f32.mrf.mxu0  ;;  %v2812_v30 = vrot.slane %v2772_v28, %v11527_v16 }
 0x6df   : > { %v2466_v46 = vadd.f32 %v2465_v52, %v2464_v4  ;;  %v2776_v25 = vrot.slane %v2761_v54, %v12778_v0  ;;  %v12787_v4 = vadd.f32 %v12612_v40, %v2808_v43  ;;  %v2820_v40 = vrot.slane %v2780_v49, %v11527_v16 }
 0x6e0   : > { %v12790_v57 = vadd.f32 %v12614_v17, %v2812_v30 }
 0x6e1   : > { %v2468_v33 = vadd.f32 %v2467_v37, %v2466_v46  ;;  %v2816_v46 = vrot.slane %v2776_v25, %v11527_v16  ;;  %v2762_v37 = vunpack.c.h.bf16 %v2760_v19  ;;  %v3668_v5 = vmax.f32 %v12787_v4, 0.0 }
 0x6e2   : > { %v3669_v12 = vmax.f32 %v12790_v57, 0.0 }
 0x6e3   : > { %v2470_v55 = vadd.f32 %v2469_v32, %v2468_v33  ;;  %v2784_v17 = vrot.slane %v2762_v37, %v11527_v16  ;;  %v2788_v19 = vrot.slane %v2762_v37, %v12771_v51 }
 0x6e5   : > { %v2472_v47 = vadd.f32 %v2471_v36, %v2470_v55  ;;  %v12797_v55 = vadd.f32 %v12708_v8, %v2816_v46  ;;  %v3677_v36 = vsel %vm3676_vm3, %v3668_v5, 0.0  ;;  %v2824_v8 = vrot.slane %v2784_v17, %v11527_v16 }
 0x6e7   : > { %v2474_v38 = vadd.f32 %v2473_v41, %v2472_v47  ;;  %v3678_v47 = vsel %vm3676_vm3, %v3669_v12, 0.0  ;;  %v3670_v41 = vmax.f32 %v12797_v55, 0.0  ;;  %v12818_v18 = vadd.f32 %v12616_v59, %v2824_v8 }
 0x6e8   : > { %v3679_v9 = vadd.f32 %v3678_v47, %v3677_v36 }
 0x6e9   : > { %v2476_v14 = vadd.f32 %v2475_v26, %v2474_v38  ;;  %v12809_v38 = vadd.f32 %v12716_v31, %v2820_v40  ;;  %v3680_v26 = vsel %vm3676_vm3, %v3670_v41, 0.0  ;;  %v9459_v31 = vld [vmem:[%s13903_s20 + $0x4] sm:$0x1] }
 0x6ea   : > { %v3681_v54 = vadd.f32 %v3680_v26, %v3679_v9 }
 0x6eb   : > { %v2478_v3 = vadd.f32 %v2477_v6, %v2476_v14  ;;  %v3671_v14 = vmax.f32 %v12809_v38, 0.0  ;;  %v2828_v6 = vrot.slane %v2788_v19, %v11527_v16 }
 0x6ed   : > { %v2480_v29 = vadd.f32 %v2479_v60, %v2478_v3  ;;  %v9460_v3 = vld [vmem:[%s13904_s24 + $0x4] sm:$0x1]  ;;  %v3682_v60 = vsel %vm3676_vm3, %v3671_v14, 0.0  ;;  %v12832_v59 = vadd.f32 %v12618_v35, %v2828_v6 }
 0x6ee   : > { %v2529_v34 = vunpack.c.l.bf16 %v9460_v3  ;;  %v3683_v28 = vadd.f32 %v3682_v60, %v3681_v54 }
 0x6ef   : > { %v2482_v44 = vadd.f32 %v2481_v56, %v2480_v29  ;;  %v3672_v29 = vmax.f32 %v12818_v18, 0.0  ;;  %v2508_v56 = vunpack.c.l.bf16 %v9459_v31 }
 0x6f1   : > { %v2483_v21 = vrot.slane %v2482_v44, 4  ;;  %v3684_v43 = vsel %vm3676_vm3, %v3672_v29, 0.0  ;;  %v2512_v30 = vrot.slane %v2508_v56, %v11527_v16 }
 0x6f3   : > { %v2484_v2 = vadd.f32 %v2483_v21, %v2482_v44  ;;  %v2792_v44 = vrot.slane %v2762_v37, %v12778_v0  ;;  %v2796_v21 = vrot.slane %v2762_v37, %v12784_v62 }
 0x6f5   : > { %v2485_v13 = vrot.slane %v2484_v2, 2  ;;  %v12845_v35 = vrot.slane %v2792_v44, %v11527_v16  ;;  %v12848_v46 = vrot.slane %v2796_v21, %v11527_v16 }
 0x6f7   : > { %v2486_v52 = vadd.f32 %v2485_v13, %v2484_v2  ;;  %v3673_v2 = vmax.f32 %v12832_v59, 0.0  ;;  %v2533_v13 = vrot.slane %v2529_v34, %v11527_v16 }
 0x6f9   : > { %v2487_v33 = vrot.slane %v2486_v52, 1 }
 0x6fb   : > { %v2488_v32 = vadd.f32 %v2487_v33, %v2486_v52  ;;  %v12842_v52 = vadd.f32 %v3684_v43, %v3683_v28 }
 0x6fd   : > { %v2489_v39 = vmul.f32 0.0078125, %v2488_v32 }
 0x6ff   : > { %v2490_v7 = vadd.f32 1e-05, %v2489_v39 }
 0x701   : > { %10622 = vrsqrt.f32 %v2490_v7 }
 0x70e   : > { %v10623_v25 = vpop.eup %10622 }
 0x70f   : > { %v2492_v49 = vmul.f32 %v10623_v25, %v12677_v22  ;;  %v2493_v37 = vmul.f32 %v10623_v25, %v12680_v20  ;;  %v2494_v33 = vmul.f32 %v10623_v25, %v12683_v42  ;;  %v2495_v32 = vmul.f32 %v10623_v25, %v12686_v1 }
 0x710   : > { %v2496_v40 = vmul.f32 %v10623_v25, %v12692_v10  ;;  %v2497_v17 = vmul.f32 %v10623_v25, %v12696_v50  ;;  %v2498_v39 = vmul.f32 %v10623_v25, %v12703_v23  ;;  %v2499_v36 = vmul.f32 %v10623_v25, %v12711_v27 }
 0x711   : > { %v2500_v47 = vmul.f32 %v10623_v25, %v12719_v58  ;;  %v2501_v7 = vmul.f32 %v10623_v25, %v12724_v45  ;;  %v2502_v22 = vmul.f32 %v10623_v25, %v12730_v48  ;;  %v2503_v20 = vmul.f32 %v10623_v25, %v12736_v11 }
 0x712   : > { %v2504_v42 = vmul.f32 %v10623_v25, %v12742_v61  ;;  %v2505_v1 = vmul.f32 %v10623_v25, %v12747_v15  ;;  %v2506_v10 = vmul.f32 %v10623_v25, %v12753_v53  ;;  %v2507_v50 = vmul.f32 %v10623_v25, %v12759_v24 }
 0x713   : > { %v2513_v23 = vmul.f32 %v2512_v30, %v2492_v49  ;;  %v2514_v8 = vmul.f32 %v2512_v30, %v2493_v37  ;;  %v2515_v27 = vmul.f32 %v2512_v30, %v2494_v33  ;;  %v2516_v19 = vmul.f32 %v2512_v30, %v2495_v32 }
 0x714   : > { %v2517_v58 = vmul.f32 %v2512_v30, %v2496_v40  ;;  %v2518_v9 = vmul.f32 %v2512_v30, %v2497_v17  ;;  %v2519_v45 = vmul.f32 %v2512_v30, %v2498_v39  ;;  %v2520_v26 = vmul.f32 %v2512_v30, %v2499_v36 }
 0x715   : > { %v2521_v6 = vmul.f32 %v2512_v30, %v2500_v47  ;;  %v2522_v11 = vmul.f32 %v2512_v30, %v2501_v7  ;;  %v2523_v31 = vmul.f32 %v2512_v30, %v2502_v22  ;;  %v2524_v61 = vmul.f32 %v2512_v30, %v2503_v20 }
 0x716   : > { %v2525_v54 = vmul.f32 %v2512_v30, %v2504_v42  ;;  %v2526_v15 = vmul.f32 %v2512_v30, %v2505_v1  ;;  %v2527_v3 = vmul.f32 %v2512_v30, %v2506_v10  ;;  %v2528_v53 = vmul.f32 %v2512_v30, %v2507_v50 }
 0x717   : > { %v2534_v24 = vadd.f32 %v2533_v13, %v2513_v23  ;;  %v2535_v56 = vadd.f32 %v2533_v13, %v2514_v8  ;;  %v2536_v34 = vadd.f32 %v2533_v13, %v2515_v27  ;;  %v2537_v28 = vadd.f32 %v2533_v13, %v2516_v19 }
 0x718   : > { %v3659_v48 = vpop.f32.mrf.mxu0  ;;  %v2538_v44 = vadd.f32 %v2533_v13, %v2517_v58  ;;  %v2539_v21 = vadd.f32 %v2533_v13, %v2518_v9  ;;  %v2540_v43 = vadd.f32 %v2533_v13, %v2519_v45  ;;  %v2541_v25 = vadd.f32 %v2533_v13, %v2520_v26 }
 0x719   : > { %v2542_v37 = vadd.f32 %v2533_v13, %v2521_v6  ;;  %v2543_v33 = vadd.f32 %v2533_v13, %v2522_v11  ;;  %v2544_v32 = vadd.f32 %v2533_v13, %v2523_v31  ;;  %v2545_v40 = vadd.f32 %v2533_v13, %v2524_v61 }
 0x71a   : > { %v3661_v60 = vpop.f32.mrf.mxu0  ;;  %v2546_v17 = vadd.f32 %v2533_v13, %v2525_v54  ;;  %v2547_v39 = vadd.f32 %v2533_v13, %v2526_v15  ;;  %v2548_v36 = vadd.f32 %v2533_v13, %v2527_v3  ;;  %v2549_v47 = vadd.f32 %v2533_v13, %v2528_v53 }
 0x71b   : > { %v10260_v30 = vpack.c.bf16 %v2534_v24, %v2534_v24  ;;  %v10261_v22 = vpack.c.bf16 %v2535_v56, %v2535_v56  ;;  %v10262_v20 = vpack.c.bf16 %v2536_v34, %v2536_v34  ;;  %v10263_v42 = vpack.c.bf16 %v2537_v28, %v2537_v28 }
 0x71c   : > { %v3663_v49 = vpop.f32.mrf.mxu0  ;;  %v10264_v1 = vpack.c.bf16 %v2538_v44, %v2538_v44  ;;  %v10265_v10 = vpack.c.bf16 %v2539_v21, %v2539_v21  ;;  %v10266_v50 = vpack.c.bf16 %v2540_v43, %v2540_v43  ;;  %v10267_v23 = vpack.c.bf16 %v2541_v25, %v2541_v25 }
 0x71d   : > { %v10268_v8 = vpack.c.bf16 %v2542_v37, %v2542_v37  ;;  %v10269_v27 = vpack.c.bf16 %v2543_v33, %v2543_v33  ;;  %v10270_v19 = vpack.c.bf16 %v2544_v32, %v2544_v32  ;;  %v10271_v58 = vpack.c.bf16 %v2545_v40, %v2545_v40  ;;  %2615 = vst.msk [vmem:[%s13905_s26] sm:$0xf] %vm2614_vm4, %v10260_v30 }
 0x71e   : > { %v3664_v7 = vpop.f32.mrf.mxu0  ;;  %2616 = vst.msk [vmem:[%s13905_s26 + $0x4] sm:$0xf] %vm2614_vm4, %v10261_v22  ;;  %2617 = vst.msk [vmem:[%s13905_s26 + $0x8] sm:$0xf] %vm2614_vm4, %v10262_v20  ;;  %v10272_v13 = vpack.c.bf16 %v2546_v17, %v2546_v17  ;;  %v10273_v9 = vpack.c.bf16 %v2547_v39, %v2547_v39  ;;  %v10274_v45 = vpack.c.bf16 %v2548_v36, %v2548_v36  ;;  %v3686_v6 = vsel %vm3676_vm3, %v3673_v2, 0.0 }
 0x71f   : > { %2618 = vst.msk [vmem:[%s13905_s26 + $0xc] sm:$0xf] %vm2614_vm4, %v10263_v42  ;;  %v10275_v26 = vpack.c.bf16 %v2549_v47, %v2549_v47  ;;  %2619 = vst.msk [vmem:[%s13905_s26 + $0x10] sm:$0xf] %vm2614_vm4, %v10264_v1  ;;  %v3660_v11 = vadd.f32 %v3659_v48, %v12845_v35  ;;  %v3662_v31 = vadd.f32 %v3661_v60, %v12848_v46  ;;  %v3666_v42 = vld [vmem:[#allocation8] sm:$0xff]  ;;  %v3667_v1 = vld [vmem:[#allocation10] sm:$0xff] }
 0x720   : > { %2620 = vst.msk [vmem:[%s13905_s26 + $0x14] sm:$0xf] %vm2614_vm4, %v10265_v10  ;;  %2621 = vst.msk [vmem:[%s13905_s26 + $0x18] sm:$0xf] %vm2614_vm4, %v10266_v50  ;;  %v3687_v48 = vadd.f32 %v3686_v6, %v12842_v52  ;;  %v3740_v10 = vunpack.c.l.bf16 %v3666_v42  ;;  %v3741_v50 = vunpack.c.h.bf16 %v3666_v42 }
 0x721   : > { %2622 = vst.msk [vmem:[%s13905_s26 + $0x1c] sm:$0xf] %vm2614_vm4, %v10267_v23  ;;  %2623 = vst.msk [vmem:[%s13905_s26 + $0x20] sm:$0xf] %vm2614_vm4, %v10268_v8  ;;  %v3674_v35 = vmax.f32 %v3660_v11, 0.0  ;;  %v3675_v46 = vmax.f32 %v3662_v31, 0.0  ;;  %v3824_v23 = vunpack.c.l.bf16 %v3667_v1  ;;  %v3825_v8 = vunpack.c.h.bf16 %v3667_v1 }
 0x722   : > { %2624 = vst.msk [vmem:[%s13905_s26 + $0x24] sm:$0xf] %vm2614_vm4, %v10269_v27  ;;  %2625 = vst.msk [vmem:[%s13905_s26 + $0x28] sm:$0xf] %vm2614_vm4, %v10270_v19  ;;  %v3747_v27 = vrot.slane %v3740_v10, %v11527_v16  ;;  %v3751_v19 = vrot.slane %v3740_v10, %v12771_v51  ;;  %v3755_v11 = vrot.slane %v3740_v10, %v12778_v0 }
 0x723   : > { %2626 = vst.msk [vmem:[%s13905_s26 + $0x2c] sm:$0xf] %vm2614_vm4, %v10271_v58  ;;  %2627 = vst.msk [vmem:[%s13905_s26 + $0x30] sm:$0xf] %vm2614_vm4, %v10272_v13  ;;  %v3688_v61 = vsel %vm3676_vm3, %v3674_v35, 0.0  ;;  %v3690_v54 = vsel %vm3676_vm3, %v3675_v46, 0.0  ;;  %v3763_v58 = vrot.slane %v3741_v50, %v11527_v16  ;;  %v3767_v13 = vrot.slane %v3741_v50, %v12771_v51 }
 0x724   : > { %2628 = vst.msk [vmem:[%s13905_s26 + $0x34] sm:$0xf] %vm2614_vm4, %v10273_v9  ;;  %2629 = vst.msk [vmem:[%s13905_s26 + $0x38] sm:$0xf] %vm2614_vm4, %v10274_v45  ;;  %v3689_v15 = vadd.f32 %v3688_v61, %v3687_v48  ;;  %v3831_v9 = vrot.slane %v3824_v23, %v11527_v16  ;;  %v3835_v45 = vrot.slane %v3824_v23, %v12771_v51 }
 0x725   : > { %2630 = vst.msk [vmem:[%s13905_s26 + $0x3c] sm:$0xf] %vm2614_vm4, %v10275_v26  ;;  %v3847_v26 = vrot.slane %v3825_v8, %v11527_v16  ;;  %v3851_v6 = vrot.slane %v3825_v8, %v12771_v51  ;;  %v3771_v31 = vrot.slane %v3741_v50, %v12778_v0  ;;  %v3855_v48 = vrot.slane %v3825_v8, %v12778_v0 }
 0x726   : > { %v3691_v3 = vadd.f32 %v3690_v54, %v3689_v15  ;;  %v3775_v61 = vrot.slane %v3741_v50, %v12784_v62  ;;  %v3843_v54 = vrot.slane %v3824_v23, %v12784_v62  ;;  %v3859_v15 = vrot.slane %v3825_v8, %v12784_v62 }
 0x727   : > { %v3791_v51 = vrot.slane %v3751_v19, %v11527_v16 }
 0x728   : > { %3692 = vadd.xlane.f32.xlu0 %v3691_v3  ;;  %v3787_v3 = vrot.slane %v3747_v27, %v11527_v16 }
 0x7b1   : > { %v3693_v53 = vpop.xlane.xlu0 %3692 }
 0x7b2   : > { %v3695_v60 = vmul.f32 0.0009765625, %v3693_v53  ;;  %v3803_v53 = vrot.slane %v3763_v58, %v11527_v16 }
 0x7b4   : > { %v12940_v24 = vsub.f32 %v3668_v5, %v3695_v60  ;;  %v12944_v56 = vsub.f32 %v3669_v12, %v3695_v60  ;;  %v12948_v52 = vsub.f32 %v3670_v41, %v3695_v60  ;;  %v12952_v34 = vsub.f32 %v3671_v14, %v3695_v60 }
 0x7b5   : > { %v12956_v28 = vsub.f32 %v3672_v29, %v3695_v60  ;;  %v12966_v12 = vsub.f32 %v3673_v2, %v3695_v60  ;;  %v12972_v18 = vsub.f32 %v3674_v35, %v3695_v60  ;;  %v12977_v43 = vsub.f32 %v3675_v46, %v3695_v60 }
 0x7b6   : > { %v3704_v4 = vmul.f32 %v12940_v24, %v12940_v24  ;;  %v3705_v57 = vmul.f32 %v12944_v56, %v12944_v56  ;;  %v3706_v5 = vmul.f32 %v12948_v52, %v12948_v52  ;;  %v3707_v55 = vmul.f32 %v12952_v34, %v12952_v34 }
 0x7b7   : > { %v3708_v29 = vmul.f32 %v12956_v28, %v12956_v28  ;;  %v3709_v59 = vmul.f32 %v12966_v12, %v12966_v12  ;;  %v3710_v49 = vmul.f32 %v12972_v18, %v12972_v18  ;;  %v3711_v32 = vmul.f32 %v12977_v43, %v12977_v43 }
 0x7b8   : > { %v3712_v41 = vsel %vm3676_vm3, %v3704_v4, 0.0  ;;  %v3713_v38 = vsel %vm3676_vm3, %v3705_v57, 0.0  ;;  %v3715_v44 = vsel %vm3676_vm3, %v3706_v5, 0.0  ;;  %v3717_v2 = vsel %vm3676_vm3, %v3707_v55, 0.0 }
 0x7b9   : > { %v3714_v14 = vadd.f32 %v3713_v38, %v3712_v41  ;;  %v3719_v37 = vsel %vm3676_vm3, %v3708_v29, 0.0  ;;  %v3721_v40 = vsel %vm3676_vm3, %v3709_v59, 0.0  ;;  %v3723_v39 = vsel %vm3676_vm3, %v3710_v49, 0.0 }
 0x7ba   : > { %v3725_v47 = vsel %vm3676_vm3, %v3711_v32, 0.0  ;;  %v3839_v35 = vrot.slane %v3824_v23, %v12778_v0  ;;  %v3759_v46 = vrot.slane %v3740_v10, %v12784_v62  ;;  %v3807_v60 = vrot.slane %v3767_v13, %v11527_v16 }
 0x7bb   : > { %v3716_v21 = vadd.f32 %v3715_v44, %v3714_v14  ;;  %v3871_v4 = vrot.slane %v3831_v9, %v11527_v16  ;;  %v3875_v57 = vrot.slane %v3835_v45, %v11527_v16  ;;  %v3887_v0 = vrot.slane %v3847_v26, %v11527_v16 }
 0x7bc   : > { %v3891_v5 = vrot.slane %v3851_v6, %v11527_v16  ;;  %v3795_v55 = vrot.slane %v3755_v11, %v11527_v16  ;;  %v3811_v62 = vrot.slane %v3771_v31, %v11527_v16  ;;  %v3879_v41 = vrot.slane %v3839_v35, %v11527_v16 }
 0x7bd   : > { %v3718_v25 = vadd.f32 %v3717_v2, %v3716_v21  ;;  %v3799_v38 = vrot.slane %v3759_v46, %v11527_v16  ;;  %v3895_v29 = vrot.slane %v3855_v48, %v11527_v16  ;;  %v3815_v44 = vrot.slane %v3775_v61, %v11527_v16 }
 0x7be   : > { %v3883_v21 = vrot.slane %v3843_v54, %v11527_v16  ;;  %v3899_v59 = vrot.slane %v3859_v15, %v11527_v16 }
 0x7bf   : > { %v3720_v33 = vadd.f32 %v3719_v37, %v3718_v25 }
 0x7c1   : > { %v3722_v17 = vadd.f32 %v3721_v40, %v3720_v33 }
 0x7c3   : > { %v3724_v36 = vadd.f32 %v3723_v39, %v3722_v17 }
 0x7c5   : > { %v3726_v7 = vadd.f32 %v3725_v47, %v3724_v36 }
 0x7c7   : > { %3727 = vadd.xlane.f32.xlu0 %v3726_v7 }
 0x850   : > { %v3728_v30 = vpop.xlane.xlu0 %3727 }
 0x851   : > { %v3729_v22 = vmul.f32 0.0009765625, %v3728_v30 }
 0x853   : > { %v3730_v20 = vadd.f32 1e-05, %v3729_v22 }
 0x855   : > { %10624 = vrsqrt.f32 %v3730_v20 }
 0x862   : > { %v10625_v14 = vpop.eup %10624 }
 0x863   : > { %v3732_v2 = vmul.f32 %v10625_v14, %v12940_v24  ;;  %v3733_v25 = vmul.f32 %v10625_v14, %v12944_v56  ;;  %v3734_v49 = vmul.f32 %v10625_v14, %v12948_v52  ;;  %v3735_v37 = vmul.f32 %v10625_v14, %v12952_v34 }
 0x864   : > { %v3736_v33 = vmul.f32 %v10625_v14, %v12956_v28  ;;  %v3737_v32 = vmul.f32 %v10625_v14, %v12966_v12  ;;  %v3738_v40 = vmul.f32 %v10625_v14, %v12972_v18  ;;  %v3739_v17 = vmul.f32 %v10625_v14, %v12977_v43 }
 0x865   : > { %v3816_v39 = vmul.f32 %v3787_v3, %v3732_v2  ;;  %v3817_v36 = vmul.f32 %v3791_v51, %v3733_v25  ;;  %v3818_v47 = vmul.f32 %v3795_v55, %v3734_v49  ;;  %v3819_v16 = vmul.f32 %v3799_v38, %v3735_v37 }
 0x866   : > { %v3820_v7 = vmul.f32 %v3803_v53, %v3736_v33  ;;  %v3821_v24 = vmul.f32 %v3807_v60, %v3737_v32  ;;  %v3822_v30 = vmul.f32 %v3811_v62, %v3738_v40  ;;  %v3823_v56 = vmul.f32 %v3815_v44, %v3739_v17 }
 0x867   : > { %v3900_v22 = vadd.f32 %v3871_v4, %v3816_v39  ;;  %v3901_v52 = vadd.f32 %v3875_v57, %v3817_v36  ;;  %v3902_v20 = vadd.f32 %v3879_v41, %v3818_v47  ;;  %v3903_v34 = vadd.f32 %v3883_v21, %v3819_v16 }
 0x868   : > { %v3904_v42 = vadd.f32 %v3887_v0, %v3820_v7  ;;  %v3905_v28 = vadd.f32 %v3891_v5, %v3821_v24  ;;  %v3906_v1 = vadd.f32 %v3895_v29, %v3822_v30  ;;  %v3907_v12 = vadd.f32 %v3899_v59, %v3823_v56 }
 0x869   : > { %v9606_v10 = vpack.c.bf16 %v3901_v52, %v3900_v22  ;;  %v9607_v18 = vpack.c.bf16 %v3903_v34, %v3902_v20 }
 0x86a   : > { %v9608_v50 = vpack.c.bf16 %v3905_v28, %v3904_v42  ;;  %v9609_v43 = vpack.c.bf16 %v3907_v12, %v3906_v1 }
 0x86b   : > { %v3934_v23 = vrot.slane %v9606_v10, %v12290_v63  ;;  %v3941_v8 = vrot.slane %v9607_v18, %v12290_v63 }
 0x86c   : > { %v3948_v27 = vrot.slane %v9608_v50, %v12290_v63  ;;  %v3955_v19 = vrot.slane %v9609_v43, %v12290_v63 }
 0x86d   : > { %v3956_v58 = vcombine.low %v3934_v23, %v3941_v8 }
 0x86e   : > { %v3957_v13 = vcombine.low %v3948_v27, %v3955_v19 }
 0x86f   : > { %v3964_v9 = vrot.slane %v3956_v58, %v12290_v63 }
 0x870   : > { %v3971_v45 = vrot.slane %v3957_v13, %v12290_v63 }
 0x872   : > { %v3972_v26 = vcombine.low %v3964_v9, %v3971_v45 }
 0x874   : > { %3974 = vst [vmem:[#allocation2] sm:$0xff] %v3972_v26 }
 0x875 PF: > { %v4032_v6 = vld [vmem:[%s11451_s2 + $0x1c0] sm:$0xff]  ;;  %v4493_v32 = vlaneseq  ;;  %v11162_v40 = vmov 1966171168   ;;  %vm7849_vm5 = vcmask 1041408   ;;  %s13906_s0 = scalar_lea.vmem %s13846_s7, %s11471_s22  ;;  %s13907_s17 = scalar_lea.vmem %s13847_s8, %s11471_s22 }
 0x876   : > { %v4036_v11 = vld [vmem:[%s11451_s2 + $0x1e0] sm:$0xff]  ;;  %v4568_v17 = vunpack.c.l.s4 %v11162_v40  ;;  %p10126_p5 = scmp.ne.s32.totalorder %s11279_s1, 4 }
 0x877   : > { %v4160_v31 = vld [vmem:[%s11451_s2 + $0x5c0] sm:$0xff]  ;;  %v9667_v35 = vcombine.high %v4032_v6, %v4036_v11  ;;  %v9666_v46 = vcombine.low %v4032_v6, %v4036_v11  ;;  %v13058_v22 = vshrl.u32 %v4493_v32, 7  ;;  %s13908_s3 = sld [smem:[#allocation33_spill]] (!%p10126_p5) }
 0x878   : > { %v4164_v63 = vld [vmem:[%s11451_s2 + $0x5e0] sm:$0xff]  ;;  %v4569_v52 = vunpack.c.0.s8 %v4568_v17 }
 0x879   : > { %v4024_v48 = vld [vmem:[%s11451_s2 + $0x180] sm:$0xff]  ;;  %v9795_v54 = vcombine.high %v4160_v31, %v4164_v63  ;;  %v9794_v15 = vcombine.low %v4160_v31, %v4164_v63  ;;  %7183 = vmatprep.subr.bf16.mxu0 %v9667_v35 }
 0x87a   : > { %v4028_v61 = vld [vmem:[%s11451_s2 + $0x1a0] sm:$0xff]  ;;  %7184 = vmatpush1.bf16.msra.mxu0 %v9666_v46  ;;  %v13065_v50 = vsub.s32 %v4569_v52, %v13058_v22 }
 0x87b   : > { %v9659_v3 = vcombine.high %v4024_v48, %v4028_v61  ;;  %v4152_v51 = vld [vmem:[%s11451_s2 + $0x580] sm:$0xff]  ;;  %7224 = vmatprep.subr.bf16.mxu1 %v9795_v54  ;;  %v9658_v55 = vcombine.low %v4024_v48, %v4028_v61 }
 0x87c   : > { %v4156_v53 = vld [vmem:[%s11451_s2 + $0x5a0] sm:$0xff]  ;;  %7225 = vmatpush1.bf16.msra.mxu1 %v9794_v15 }
 0x87d   : > { %v4016_v60 = vld [vmem:[%s11451_s2 + $0x140] sm:$0xff]  ;;  %v9787_v4 = vcombine.high %v4152_v51, %v4156_v53  ;;  %7185 = vmatprep.subr.bf16.mxu0 %v9659_v3  ;;  %v9786_v62 = vcombine.low %v4152_v51, %v4156_v53 }
 0x87e   : > { %v4020_v57 = vld [vmem:[%s11451_s2 + $0x160] sm:$0xff]  ;;  %7186 = vmatpush1.bf16.msra.mxu0 %v9658_v55 }
 0x87f   : > { %v4144_v0 = vld [vmem:[%s11451_s2 + $0x540] sm:$0xff]  ;;  %v9651_v41 = vcombine.high %v4016_v60, %v4020_v57  ;;  %7226 = vmatprep.subr.bf16.mxu1 %v9787_v4  ;;  %v9650_v59 = vcombine.low %v4016_v60, %v4020_v57 }
 0x880   : > { %v4148_v5 = vld [vmem:[%s11451_s2 + $0x560] sm:$0xff]  ;;  %7227 = vmatpush1.bf16.msra.mxu1 %v9786_v62 }
 0x881   : > { %v9779_v38 = vcombine.high %v4144_v0, %v4148_v5  ;;  %v4008_v14 = vld [vmem:[%s11451_s2 + $0x100] sm:$0xff]  ;;  %7187 = vmatprep.subr.bf16.mxu0 %v9651_v41  ;;  %v9778_v2 = vcombine.low %v4144_v0, %v4148_v5 }
 0x882   : > { %v4012_v29 = vld [vmem:[%s11451_s2 + $0x120] sm:$0xff]  ;;  %7188 = vmatpush1.bf16.msra.mxu0 %v9650_v59 }
 0x883   : > { %v4136_v44 = vld [vmem:[%s11451_s2 + $0x500] sm:$0xff]  ;;  %v9643_v25 = vcombine.high %v4008_v14, %v4012_v29  ;;  %7228 = vmatprep.subr.bf16.mxu1 %v9779_v38  ;;  %v9642_v47 = vcombine.low %v4008_v14, %v4012_v29 }
 0x884   : > { %v4140_v21 = vld [vmem:[%s11451_s2 + $0x520] sm:$0xff]  ;;  %7229 = vmatpush1.bf16.msra.mxu1 %v9778_v2 }
 0x885   : > { %v9771_v49 = vcombine.high %v4136_v44, %v4140_v21  ;;  %v4000_v37 = vld [vmem:[%s11451_s2 + $0xc0] sm:$0xff]  ;;  %7189 = vmatprep.subr.bf16.mxu0 %v9643_v25  ;;  %v9770_v16 = vcombine.low %v4136_v44, %v4140_v21 }
 0x886   : > { %v4004_v33 = vld [vmem:[%s11451_s2 + $0xe0] sm:$0xff]  ;;  %7190 = vmatpush1.bf16.msra.mxu0 %v9642_v47 }
 0x887   : > { %v4128_v39 = vld [vmem:[%s11451_s2 + $0x4c0] sm:$0xff]  ;;  %v9635_v7 = vcombine.high %v4000_v37, %v4004_v33  ;;  %7230 = vmatprep.subr.bf16.mxu1 %v9771_v49  ;;  %v9634_v42 = vcombine.low %v4000_v37, %v4004_v33 }
 0x888   : > { %v4132_v36 = vld [vmem:[%s11451_s2 + $0x4e0] sm:$0xff]  ;;  %7231 = vmatpush1.bf16.msra.mxu1 %v9770_v16 }
 0x889   : > { %v9763_v24 = vcombine.high %v4128_v39, %v4132_v36  ;;  %v3992_v30 = vld [vmem:[%s11451_s2 + $0x80] sm:$0xff]  ;;  %7191 = vmatprep.subr.bf16.mxu0 %v9635_v7  ;;  %v9762_v28 = vcombine.low %v4128_v39, %v4132_v36 }
 0x88a   : > { %v3996_v56 = vld [vmem:[%s11451_s2 + $0xa0] sm:$0xff]  ;;  %7192 = vmatpush1.bf16.msra.mxu0 %v9634_v42 }
 0x88b   : > { %v4120_v20 = vld [vmem:[%s11451_s2 + $0x480] sm:$0xff]  ;;  %v9627_v1 = vcombine.high %v3992_v30, %v3996_v56  ;;  %7232 = vmatprep.subr.bf16.mxu1 %v9763_v24  ;;  %v9626_v8 = vcombine.low %v3992_v30, %v3996_v56 }
 0x88c   : > { %v4124_v34 = vld [vmem:[%s11451_s2 + $0x4a0] sm:$0xff]  ;;  %7233 = vmatpush1.bf16.msra.mxu1 %v9762_v28 }
 0x88d   : > { %v9755_v12 = vcombine.high %v4120_v20, %v4124_v34  ;;  %v3984_v10 = vld [vmem:[%s11451_s2 + $0x40] sm:$0xff]  ;;  %7193 = vmatprep.subr.bf16.mxu0 %v9627_v1  ;;  %v9754_v27 = vcombine.low %v4120_v20, %v4124_v34 }
 0x88e   : > { %v3988_v18 = vld [vmem:[%s11451_s2 + $0x60] sm:$0xff]  ;;  %7194 = vmatpush1.bf16.msra.mxu0 %v9626_v8 }
 0x88f   : > { %v4112_v43 = vld [vmem:[%s11451_s2 + $0x440] sm:$0xff]  ;;  %v9619_v19 = vcombine.high %v3984_v10, %v3988_v18  ;;  %7234 = vmatprep.subr.bf16.mxu1 %v9755_v12  ;;  %v9618_v31 = vcombine.low %v3984_v10, %v3988_v18 }
 0x890   : > { %v4116_v23 = vld [vmem:[%s11451_s2 + $0x460] sm:$0xff]  ;;  %7235 = vmatpush1.bf16.msra.mxu1 %v9754_v27 }
 0x891   : > { %v13069_v58 = vld [vmem:[#allocation2] sm:$0xff]  ;;  %v9747_v13 = vcombine.high %v4112_v43, %v4116_v23  ;;  %7195 = vmatprep.subr.bf16.mxu0 %v9619_v19  ;;  %v9746_v63 = vcombine.low %v4112_v43, %v4116_v23 }
 0x892   : > { %v3976_v9 = vld [vmem:[%s11451_s2] sm:$0xff]  ;;  %v13075_v26 = vrot.slane %v13069_v58, %v13065_v50  ;;  %7196 = vmatpush1.bf16.msra.mxu0 %v9618_v31 }
 0x893   : > { %v3980_v45 = vld [vmem:[%s11451_s2 + $0x20] sm:$0xff]  ;;  %7236 = vmatprep.subr.bf16.mxu1 %v9747_v13 }
 0x894   : > { %v4104_v6 = vld [vmem:[%s11451_s2 + $0x400] sm:$0xff]  ;;  %v4581_v35 = vcombine.high %v13075_v26, %v13075_v26  ;;  %v9611_v46 = vcombine.high %v3976_v9, %v3980_v45  ;;  %v9610_v53 = vcombine.low %v3976_v9, %v3980_v45  ;;  %7237 = vmatpush1.bf16.msra.mxu1 %v9746_v63 }
 0x895   : > { %v4108_v11 = vld [vmem:[%s11451_s2 + $0x420] sm:$0xff] }
 0x896   : > { %v9739_v48 = vcombine.high %v4104_v6, %v4108_v11  ;;  %v4096_v61 = vld [vmem:[%s11451_s2 + $0x3c0] sm:$0xff]  ;;  %v13084_v15 = vrot.slane %v4581_v35, %v13065_v50  ;;  %7197 = vmatprep.subr.bf16.mxu0 %v9611_v46  ;;  %v9738_v4 = vcombine.low %v4104_v6, %v4108_v11  ;;  %v4566_v11 = vcombine.high %v13069_v58, %v13069_v58 }
 0x897   : > { %v4100_v54 = vld [vmem:[%s11451_s2 + $0x3e0] sm:$0xff]  ;;  %7198 = vmatpush1.bf16.msra.mxu0 %v9610_v53 }
 0x898   : > { %v4224_v3 = vld [vmem:[%s11451_s2 + $0x7c0] sm:$0xff]  ;;  %7215 = vmatprep.mubr.bf16.mxu0 %v13084_v15  ;;  %v13091_v60 = vcombine.high %v13084_v15, %v13084_v15  ;;  %v9731_v57 = vcombine.high %v4096_v61, %v4100_v54  ;;  %7238 = vmatprep.subr.bf16.mxu1 %v9739_v48  ;;  %v9730_v38 = vcombine.low %v4096_v61, %v4100_v54 }
 0x899   : > { %v4228_v51 = vld [vmem:[%s11451_s2 + $0x7e0] sm:$0xff]  ;;  %7239 = vmatpush1.bf16.msra.mxu1 %v9738_v4 }
 0x89a   : > { %v9859_v0 = vcombine.high %v4224_v3, %v4228_v51  ;;  %v4088_v5 = vld [vmem:[%s11451_s2 + $0x380] sm:$0xff]  ;;  %7256 = vmatprep.mubr.bf16.mxu1 %v13091_v60  ;;  %7199 = vmatprep.subr.bf16.mxu0 %v9731_v57  ;;  %v9858_v14 = vcombine.low %v4224_v3, %v4228_v51  ;;  %v13125_v51 = vrot.slane %v4566_v11, %v13065_v50 }
 0x89b   : > { %v4092_v55 = vld [vmem:[%s11451_s2 + $0x3a0] sm:$0xff]  ;;  %7200 = vmatpush2.bf16.msra.mxu0 %v9730_v38 }
 0x89c   : > { %v4216_v62 = vld [vmem:[%s11451_s2 + $0x780] sm:$0xff]  ;;  %v9723_v29 = vcombine.high %v4088_v5, %v4092_v55  ;;  %7240 = vmatprep.subr.bf16.mxu1 %v9859_v0  ;;  %v9722_v49 = vcombine.low %v4088_v5, %v4092_v55 }
 0x89d   : > { %v4220_v41 = vld [vmem:[%s11451_s2 + $0x7a0] sm:$0xff]  ;;  %7241 = vmatpush2.bf16.msra.mxu1 %v9858_v14  ;;  %v13135_v14 = vrot.slane %v13075_v26, %v13065_v50 }
 0x89e   : > { %v9851_v44 = vcombine.high %v4216_v62, %v4220_v41  ;;  %v4080_v21 = vld [vmem:[%s11451_s2 + $0x340] sm:$0xff]  ;;  %7201 = vmatprep.subr.bf16.mxu0 %v9723_v29  ;;  %v9850_v37 = vcombine.low %v4216_v62, %v4220_v41  ;;  %v4582_v41 = vcombine.high %v13125_v51, %v13125_v51 }
 0x89f   : > { %v4084_v59 = vld [vmem:[%s11451_s2 + $0x360] sm:$0xff]  ;;  %7202 = vmatpush2.bf16.msra.mxu0 %v9722_v49  ;;  %v13146_v26 = vcombine.high %v13135_v14, %v13135_v14 }
 0x8a0   : > { %v4208_v2 = vld [vmem:[%s11451_s2 + $0x740] sm:$0xff]  ;;  %v9715_v33 = vcombine.high %v4080_v21, %v4084_v59  ;;  %7242 = vmatprep.subr.bf16.mxu1 %v9851_v44  ;;  %v9714_v47 = vcombine.low %v4080_v21, %v4084_v59 }
 0x8a1   : > { %v4212_v25 = vld [vmem:[%s11451_s2 + $0x760] sm:$0xff]  ;;  %7243 = vmatpush2.bf16.msra.mxu1 %v9850_v37  ;;  %v13142_v37 = vrot.slane %v4582_v41, %v13065_v50 }
 0x8a2   : > { %v9843_v32 = vcombine.high %v4208_v2, %v4212_v25  ;;  %v4072_v40 = vld [vmem:[%s11451_s2 + $0x300] sm:$0xff]  ;;  %7203 = vmatprep.subr.bf16.mxu0 %v9715_v33  ;;  %v9842_v16 = vcombine.low %v4208_v2, %v4212_v25 }
 0x8a3   : > { %v4076_v17 = vld [vmem:[%s11451_s2 + $0x320] sm:$0xff]  ;;  %7204 = vmatpush2.bf16.msra.mxu0 %v9714_v47 }
 0x8a4   : > { %v4200_v39 = vld [vmem:[%s11451_s2 + $0x700] sm:$0xff]  ;;  %v9707_v7 = vcombine.high %v4072_v40, %v4076_v17  ;;  %7244 = vmatprep.subr.bf16.mxu1 %v9843_v32  ;;  %v9706_v34 = vcombine.low %v4072_v40, %v4076_v17 }
 0x8a5   : > { %v4204_v36 = vld [vmem:[%s11451_s2 + $0x720] sm:$0xff]  ;;  %7245 = vmatpush2.bf16.msra.mxu1 %v9842_v16 }
 0x8a6   : > { %v9835_v24 = vcombine.high %v4200_v39, %v4204_v36  ;;  %v4064_v30 = vld [vmem:[%s11451_s2 + $0x2c0] sm:$0xff]  ;;  %7205 = vmatprep.subr.bf16.mxu0 %v9707_v7  ;;  %v9834_v42 = vcombine.low %v4200_v39, %v4204_v36  ;;  %v13155_v7 = vcombine.high %v13142_v37, %v13142_v37 }
 0x8a7   : > { %v4068_v56 = vld [vmem:[%s11451_s2 + $0x2e0] sm:$0xff]  ;;  %7206 = vmatpush2.bf16.msra.mxu0 %v9706_v34 }
 0x8a8   : > { %v4192_v52 = vld [vmem:[%s11451_s2 + $0x6c0] sm:$0xff]  ;;  %v9699_v28 = vcombine.high %v4064_v30, %v4068_v56  ;;  %7246 = vmatprep.subr.bf16.mxu1 %v9835_v24  ;;  %v9698_v23 = vcombine.low %v4064_v30, %v4068_v56 }
 0x8a9   : > { %v4196_v20 = vld [vmem:[%s11451_s2 + $0x6e0] sm:$0xff]  ;;  %7247 = vmatpush2.bf16.msra.mxu1 %v9834_v42 }
 0x8aa   : > { %v9827_v1 = vcombine.high %v4192_v52, %v4196_v20  ;;  %v4056_v12 = vld [vmem:[%s11451_s2 + $0x280] sm:$0xff]  ;;  %7207 = vmatprep.subr.bf16.mxu0 %v9699_v28  ;;  %v9826_v8 = vcombine.low %v4192_v52, %v4196_v20 }
 0x8ab   : > { %v4060_v10 = vld [vmem:[%s11451_s2 + $0x2a0] sm:$0xff]  ;;  %7208 = vmatpush2.bf16.msra.mxu0 %v9698_v23 }
 0x8ac   : > { %v4184_v18 = vld [vmem:[%s11451_s2 + $0x680] sm:$0xff]  ;;  %v9691_v27 = vcombine.high %v4056_v12, %v4060_v10  ;;  %7248 = vmatprep.subr.bf16.mxu1 %v9827_v1  ;;  %v9690_v31 = vcombine.low %v4056_v12, %v4060_v10 }
 0x8ad   : > { %v4188_v43 = vld [vmem:[%s11451_s2 + $0x6a0] sm:$0xff]  ;;  %7249 = vmatpush2.bf16.msra.mxu1 %v9826_v8 }
 0x8ae   : > { %v9819_v19 = vcombine.high %v4184_v18, %v4188_v43  ;;  %v4048_v13 = vld [vmem:[%s11451_s2 + $0x240] sm:$0xff]  ;;  %7209 = vmatprep.subr.bf16.mxu0 %v9691_v27  ;;  %v9818_v35 = vcombine.low %v4184_v18, %v4188_v43 }
 0x8af   : > { %v4052_v9 = vld [vmem:[%s11451_s2 + $0x260] sm:$0xff]  ;;  %7210 = vmatpush2.bf16.msra.mxu0 %v9690_v31 }
 0x8b0   : > { %v4176_v45 = vld [vmem:[%s11451_s2 + $0x640] sm:$0xff]  ;;  %v9683_v63 = vcombine.high %v4048_v13, %v4052_v9  ;;  %7250 = vmatprep.subr.bf16.mxu1 %v9819_v19  ;;  %v9682_v58 = vcombine.low %v4048_v13, %v4052_v9 }
 0x8b1   : > { %v4180_v6 = vld [vmem:[%s11451_s2 + $0x660] sm:$0xff]  ;;  %7251 = vmatpush2.bf16.msra.mxu1 %v9818_v35 }
 0x8b2   : > { %v9811_v46 = vcombine.high %v4176_v45, %v4180_v6  ;;  %v4040_v48 = vld [vmem:[%s11451_s2 + $0x200] sm:$0xff]  ;;  %7211 = vmatprep.subr.bf16.mxu0 %v9683_v63  ;;  %v9810_v53 = vcombine.low %v4176_v45, %v4180_v6 }
 0x8b3   : > { %v4044_v61 = vld [vmem:[%s11451_s2 + $0x220] sm:$0xff]  ;;  %7212 = vmatpush2.bf16.msra.mxu0 %v9682_v58 }
 0x8b4   : > { %v4168_v54 = vld [vmem:[%s11451_s2 + $0x600] sm:$0xff]  ;;  %v9675_v4 = vcombine.high %v4040_v48, %v4044_v61  ;;  %7252 = vmatprep.subr.bf16.mxu1 %v9811_v46  ;;  %v9674_v38 = vcombine.low %v4040_v48, %v4044_v61 }
 0x8b5   : > { %v4172_v3 = vld [vmem:[%s11451_s2 + $0x620] sm:$0xff]  ;;  %7253 = vmatpush2.bf16.msra.mxu1 %v9810_v53 }
 0x8b6   : > { %v9803_v57 = vcombine.high %v4168_v54, %v4172_v3  ;;  %v4288_v0 = vld [vmem:[%s11451_s2 + $0x9c0] sm:$0xff]  ;;  %7213 = vmatprep.subr.bf16.mxu0 %v9675_v4  ;;  %v9802_v29 = vcombine.low %v4168_v54, %v4172_v3 }
 0x8b7   : > { %v4292_v5 = vld [vmem:[%s11451_s2 + $0x9e0] sm:$0xff]  ;;  %7214 = vmatpush2.bf16.msra.mxu0 %v9674_v38 }
 0x8b8   : > { %v4416_v55 = vld [vmem:[%s11451_s2 + $0xdc0] sm:$0xff]  ;;  %v9923_v44 = vcombine.high %v4288_v0, %v4292_v5  ;;  %7254 = vmatprep.subr.bf16.mxu1 %v9803_v57  ;;  %v9922_v33 = vcombine.low %v4288_v0, %v4292_v5 }
 0x8b9   : > { %v4420_v62 = vld [vmem:[%s11451_s2 + $0xde0] sm:$0xff]  ;;  %7255 = vmatpush2.bf16.msra.mxu1 %v9802_v29 }
 0x8ba   : > { %v10051_v21 = vcombine.high %v4416_v55, %v4420_v62  ;;  %v4280_v59 = vld [vmem:[%s11451_s2 + $0x980] sm:$0xff]  ;;  %7265 = vmatprep.subr.bf16.mxu0 %v9923_v44  ;;  %v10050_v32 = vcombine.low %v4416_v55, %v4420_v62  ;;  %7216 = vmatmul.mubr.bf16.vlgmr.msra.gmra.mxu0 %v13135_v14 }
 0x8bb   : > { %v4284_v2 = vld [vmem:[%s11451_s2 + $0x9a0] sm:$0xff]  ;;  %7266 = vmatpush1.bf16.msra.mxu0 %v9922_v33  ;;  %7297 = vmatprep.mubr.bf16.mxu0 %v13142_v37 }
 0x8bc   : > { %v4408_v25 = vld [vmem:[%s11451_s2 + $0xd80] sm:$0xff]  ;;  %v9915_v40 = vcombine.high %v4280_v59, %v4284_v2  ;;  %7306 = vmatprep.subr.bf16.mxu1 %v10051_v21  ;;  %7257 = vmatmul.mubr.bf16.vlgmr.msra.gmra.mxu1 %v13146_v26  ;;  %v9914_v24 = vcombine.low %v4280_v59, %v4284_v2 }
 0x8bd   : > { %v4412_v49 = vld [vmem:[%s11451_s2 + $0xda0] sm:$0xff]  ;;  %7307 = vmatpush1.bf16.msra.mxu1 %v10050_v32  ;;  %7338 = vmatprep.mubr.bf16.mxu1 %v13155_v7 }
 0x8be   : > { %v10043_v17 = vcombine.high %v4408_v25, %v4412_v49  ;;  %v4272_v39 = vld [vmem:[%s11451_s2 + $0x940] sm:$0xff]  ;;  %7267 = vmatprep.subr.bf16.mxu0 %v9915_v40  ;;  %v10042_v30 = vcombine.low %v4408_v25, %v4412_v49 }
 0x8bf   : > { %v4276_v36 = vld [vmem:[%s11451_s2 + $0x960] sm:$0xff]  ;;  %7268 = vmatpush1.bf16.msra.mxu0 %v9914_v24 }
 0x8c0   : > { %v4400_v47 = vld [vmem:[%s11451_s2 + $0xd40] sm:$0xff]  ;;  %v9907_v56 = vcombine.high %v4272_v39, %v4276_v36  ;;  %7308 = vmatprep.subr.bf16.mxu1 %v10043_v17  ;;  %v9906_v1 = vcombine.low %v4272_v39, %v4276_v36 }
 0x8c1   : > { %v4404_v16 = vld [vmem:[%s11451_s2 + $0xd60] sm:$0xff]  ;;  %7309 = vmatpush1.bf16.msra.mxu1 %v10042_v30 }
 0x8c2   : > { %v10035_v52 = vcombine.high %v4400_v47, %v4404_v16  ;;  %v4264_v20 = vld [vmem:[%s11451_s2 + $0x900] sm:$0xff]  ;;  %7269 = vmatprep.subr.bf16.mxu0 %v9907_v56  ;;  %v10034_v12 = vcombine.low %v4400_v47, %v4404_v16 }
 0x8c3   : > { %v4268_v34 = vld [vmem:[%s11451_s2 + $0x920] sm:$0xff]  ;;  %7270 = vmatpush1.bf16.msra.mxu0 %v9906_v1 }
 0x8c4   : > { %v4392_v42 = vld [vmem:[%s11451_s2 + $0xd00] sm:$0xff]  ;;  %v9899_v10 = vcombine.high %v4264_v20, %v4268_v34  ;;  %7310 = vmatprep.subr.bf16.mxu1 %v10035_v52  ;;  %v9898_v19 = vcombine.low %v4264_v20, %v4268_v34 }
 0x8c5   : > { %v4396_v28 = vld [vmem:[%s11451_s2 + $0xd20] sm:$0xff]  ;;  %7311 = vmatpush1.bf16.msra.mxu1 %v10034_v12 }
 0x8c6   : > { %v10027_v18 = vcombine.high %v4392_v42, %v4396_v28  ;;  %v4256_v43 = vld [vmem:[%s11451_s2 + $0x8c0] sm:$0xff]  ;;  %7271 = vmatprep.subr.bf16.mxu0 %v9899_v10  ;;  %v10026_v13 = vcombine.low %v4392_v42, %v4396_v28 }
 0x8c7   : > { %v4260_v23 = vld [vmem:[%s11451_s2 + $0x8e0] sm:$0xff]  ;;  %7272 = vmatpush1.bf16.msra.mxu0 %v9898_v19 }
 0x8c8   : > { %v4384_v8 = vld [vmem:[%s11451_s2 + $0xcc0] sm:$0xff]  ;;  %v9891_v9 = vcombine.high %v4256_v43, %v4260_v23  ;;  %7312 = vmatprep.subr.bf16.mxu1 %v10027_v18  ;;  %v9890_v63 = vcombine.low %v4256_v43, %v4260_v23 }
 0x8c9   : > { %v4388_v27 = vld [vmem:[%s11451_s2 + $0xce0] sm:$0xff]  ;;  %7313 = vmatpush1.bf16.msra.mxu1 %v10026_v13 }
 0x8ca   : > { %v10019_v45 = vcombine.high %v4384_v8, %v4388_v27  ;;  %v4248_v6 = vld [vmem:[%s11451_s2 + $0x880] sm:$0xff]  ;;  %7273 = vmatprep.subr.bf16.mxu0 %v9891_v9  ;;  %v10018_v46 = vcombine.low %v4384_v8, %v4388_v27 }
 0x8cb   : > { %v4252_v11 = vld [vmem:[%s11451_s2 + $0x8a0] sm:$0xff]  ;;  %7274 = vmatpush1.bf16.msra.mxu0 %v9890_v63 }
 0x8cc   : > { %v4376_v31 = vld [vmem:[%s11451_s2 + $0xc80] sm:$0xff]  ;;  %v9883_v48 = vcombine.high %v4248_v6, %v4252_v11  ;;  %7314 = vmatprep.subr.bf16.mxu1 %v10019_v45  ;;  %v9882_v4 = vcombine.low %v4248_v6, %v4252_v11 }
 0x8cd   : > { %v4380_v35 = vld [vmem:[%s11451_s2 + $0xca0] sm:$0xff]  ;;  %7315 = vmatpush1.bf16.msra.mxu1 %v10018_v46 }
 0x8ce   : > { %v10011_v61 = vcombine.high %v4376_v31, %v4380_v35  ;;  %v4240_v54 = vld [vmem:[%s11451_s2 + $0x840] sm:$0xff]  ;;  %7275 = vmatprep.subr.bf16.mxu0 %v9883_v48  ;;  %v10010_v57 = vcombine.low %v4376_v31, %v4380_v35 }
 0x8cf   : > { %v4244_v3 = vld [vmem:[%s11451_s2 + $0x860] sm:$0xff]  ;;  %7276 = vmatpush1.bf16.msra.mxu0 %v9882_v4 }
 0x8d0   : > { %v4368_v58 = vld [vmem:[%s11451_s2 + $0xc40] sm:$0xff]  ;;  %v9875_v0 = vcombine.high %v4240_v54, %v4244_v3  ;;  %7316 = vmatprep.subr.bf16.mxu1 %v10011_v61  ;;  %v9874_v29 = vcombine.low %v4240_v54, %v4244_v3 }
 0x8d1   : > { %v4372_v53 = vld [vmem:[%s11451_s2 + $0xc60] sm:$0xff]  ;;  %7317 = vmatpush1.bf16.msra.mxu1 %v10010_v57 }
 0x8d2   : > { %v10003_v5 = vcombine.high %v4368_v58, %v4372_v53  ;;  %v4232_v55 = vld [vmem:[%s11451_s2 + $0x800] sm:$0xff]  ;;  %7277 = vmatprep.subr.bf16.mxu0 %v9875_v0  ;;  %v10002_v44 = vcombine.low %v4368_v58, %v4372_v53 }
 0x8d3   : > { %v4236_v62 = vld [vmem:[%s11451_s2 + $0x820] sm:$0xff]  ;;  %7278 = vmatpush1.bf16.msra.mxu0 %v9874_v29 }
 0x8d4   : > { %v4360_v41 = vld [vmem:[%s11451_s2 + $0xc00] sm:$0xff]  ;;  %v9867_v21 = vcombine.high %v4232_v55, %v4236_v62  ;;  %7318 = vmatprep.subr.bf16.mxu1 %v10003_v5  ;;  %v9866_v32 = vcombine.low %v4232_v55, %v4236_v62 }
 0x8d5   : > { %v4364_v38 = vld [vmem:[%s11451_s2 + $0xc20] sm:$0xff]  ;;  %7319 = vmatpush1.bf16.msra.mxu1 %v10002_v44 }
 0x8d6   : > { %v9995_v59 = vcombine.high %v4360_v41, %v4364_v38  ;;  %v4352_v2 = vld [vmem:[%s11451_s2 + $0xbc0] sm:$0xff]  ;;  %7279 = vmatprep.subr.bf16.mxu0 %v9867_v21  ;;  %v9994_v40 = vcombine.low %v4360_v41, %v4364_v38 }
 0x8d7   : > { %v4356_v25 = vld [vmem:[%s11451_s2 + $0xbe0] sm:$0xff]  ;;  %7280 = vmatpush1.bf16.msra.mxu0 %v9866_v32 }
 0x8d8   : > { %v4480_v49 = vld [vmem:[%s11451_s2 + $0xfc0] sm:$0xff]  ;;  %v9987_v17 = vcombine.high %v4352_v2, %v4356_v25  ;;  %7320 = vmatprep.subr.bf16.mxu1 %v9995_v59  ;;  %v9986_v30 = vcombine.low %v4352_v2, %v4356_v25 }
 0x8d9   : > { %v4484_v33 = vld [vmem:[%s11451_s2 + $0xfe0] sm:$0xff]  ;;  %7321 = vmatpush1.bf16.msra.mxu1 %v9994_v40 }
 0x8da   : > { %v10115_v39 = vcombine.high %v4480_v49, %v4484_v33  ;;  %v4344_v36 = vld [vmem:[%s11451_s2 + $0xb80] sm:$0xff]  ;;  %7281 = vmatprep.subr.bf16.mxu0 %v9987_v17  ;;  %v10114_v56 = vcombine.low %v4480_v49, %v4484_v33 }
 0x8db   : > { %v4348_v47 = vld [vmem:[%s11451_s2 + $0xba0] sm:$0xff]  ;;  %7282 = vmatpush2.bf16.msra.mxu0 %v9986_v30  ;;  %v4165_v30 = vld [vmem:[%s11451_s2 + $0x5e8] sm:$0xff] }
 0x8dc   : > { %v4472_v16 = vld [vmem:[%s11451_s2 + $0xf80] sm:$0xff]  ;;  %v9979_v52 = vcombine.high %v4344_v36, %v4348_v47  ;;  %7322 = vmatprep.subr.bf16.mxu1 %v10115_v39  ;;  %v9978_v12 = vcombine.low %v4344_v36, %v4348_v47  ;;  %v4033_v47 = vld [vmem:[%s11451_s2 + $0x1c8] sm:$0xff] }
 0x8dd   : > { %v4476_v24 = vld [vmem:[%s11451_s2 + $0xfa0] sm:$0xff]  ;;  %7323 = vmatpush2.bf16.msra.mxu1 %v10114_v56 }
 0x8de   : > { %v10107_v20 = vcombine.high %v4472_v16, %v4476_v24  ;;  %v4336_v34 = vld [vmem:[%s11451_s2 + $0xb40] sm:$0xff]  ;;  %7283 = vmatprep.subr.bf16.mxu0 %v9979_v52  ;;  %v10106_v10 = vcombine.low %v4472_v16, %v4476_v24  ;;  %v4037_v16 = vld [vmem:[%s11451_s2 + $0x1e8] sm:$0xff]  ;;  %v13218_v52 = vrot.slane %v13125_v51, %v13065_v50 }
 0x8df   : > { %v4340_v42 = vld [vmem:[%s11451_s2 + $0xb60] sm:$0xff]  ;;  %7284 = vmatpush2.bf16.msra.mxu0 %v9978_v12  ;;  %v4161_v24 = vld [vmem:[%s11451_s2 + $0x5c8] sm:$0xff]  ;;  %v9668_v51 = vcombine.low %v4033_v47, %v4037_v16 }
 0x8e0   : > { %v4464_v28 = vld [vmem:[%s11451_s2 + $0xf40] sm:$0xff]  ;;  %v9971_v18 = vcombine.high %v4336_v34, %v4340_v42  ;;  %7324 = vmatprep.subr.bf16.mxu1 %v10107_v20  ;;  %v9970_v13 = vcombine.low %v4336_v34, %v4340_v42  ;;  %v9669_v34 = vcombine.high %v4033_v47, %v4037_v16  ;;  %v9797_v42 = vcombine.high %v4161_v24, %v4165_v30  ;;  %v4153_v12 = vld [vmem:[%s11451_s2 + $0x588] sm:$0xff] }
 0x8e1   : > { %v4468_v1 = vld [vmem:[%s11451_s2 + $0xf60] sm:$0xff]  ;;  %7325 = vmatpush2.bf16.msra.mxu1 %v10106_v10  ;;  %v4157_v10 = vld [vmem:[%s11451_s2 + $0x5a8] sm:$0xff] }
 0x8e2   : > { %v10099_v43 = vcombine.high %v4464_v28, %v4468_v1  ;;  %v4328_v23 = vld [vmem:[%s11451_s2 + $0xb00] sm:$0xff]  ;;  %7285 = vmatprep.subr.bf16.mxu0 %v9971_v18  ;;  %v10098_v9 = vcombine.low %v4464_v28, %v4468_v1  ;;  %v4025_v28 = vld [vmem:[%s11451_s2 + $0x188] sm:$0xff]  ;;  %v13226_v18 = vcombine.high %v13218_v52, %v13218_v52 }
 0x8e3   : > { %v4332_v8 = vld [vmem:[%s11451_s2 + $0xb20] sm:$0xff]  ;;  %7286 = vmatpush2.bf16.msra.mxu0 %v9970_v13  ;;  %v4029_v1 = vld [vmem:[%s11451_s2 + $0x1a8] sm:$0xff] }
 0x8e4   : > { %v4456_v27 = vld [vmem:[%s11451_s2 + $0xf00] sm:$0xff]  ;;  %v9963_v45 = vcombine.high %v4328_v23, %v4332_v8  ;;  %7326 = vmatprep.subr.bf16.mxu1 %v10099_v43  ;;  %v9962_v46 = vcombine.low %v4328_v23, %v4332_v8  ;;  %v9796_v43 = vcombine.low %v4161_v24, %v4165_v30  ;;  %v9661_v23 = vcombine.high %v4025_v28, %v4029_v1  ;;  %v4145_v13 = vld [vmem:[%s11451_s2 + $0x548] sm:$0xff] }
 0x8e5   : > { %v4460_v19 = vld [vmem:[%s11451_s2 + $0xf20] sm:$0xff]  ;;  %7327 = vmatpush2.bf16.msra.mxu1 %v10098_v9  ;;  %v9789_v8 = vcombine.high %v4153_v12, %v4157_v10  ;;  %v4149_v9 = vld [vmem:[%s11451_s2 + $0x568] sm:$0xff] }
 0x8e6   : > { %v10091_v6 = vcombine.high %v4456_v27, %v4460_v19  ;;  %v4320_v11 = vld [vmem:[%s11451_s2 + $0xac0] sm:$0xff]  ;;  %7287 = vmatprep.subr.bf16.mxu0 %v9963_v45  ;;  %v10090_v48 = vcombine.low %v4456_v27, %v4460_v19  ;;  %v4017_v27 = vld [vmem:[%s11451_s2 + $0x148] sm:$0xff]  ;;  %v9660_v45 = vcombine.low %v4025_v28, %v4029_v1 }
 0x8e7   : > { %v4324_v31 = vld [vmem:[%s11451_s2 + $0xae0] sm:$0xff]  ;;  %7288 = vmatpush2.bf16.msra.mxu0 %v9962_v46  ;;  %v4021_v19 = vld [vmem:[%s11451_s2 + $0x168] sm:$0xff] }
 0x8e8   : > { %v4448_v35 = vld [vmem:[%s11451_s2 + $0xec0] sm:$0xff]  ;;  %v9955_v61 = vcombine.high %v4320_v11, %v4324_v31  ;;  %7328 = vmatprep.subr.bf16.mxu1 %v10091_v6  ;;  %v9954_v57 = vcombine.low %v4320_v11, %v4324_v31  ;;  %v9788_v6 = vcombine.low %v4153_v12, %v4157_v10  ;;  %v9653_v11 = vcombine.high %v4017_v27, %v4021_v19  ;;  %v4137_v46 = vld [vmem:[%s11451_s2 + $0x508] sm:$0xff] }
 0x8e9   : > { %v4452_v63 = vld [vmem:[%s11451_s2 + $0xee0] sm:$0xff]  ;;  %7329 = vmatpush2.bf16.msra.mxu1 %v10090_v48  ;;  %v9781_v31 = vcombine.high %v4145_v13, %v4149_v9  ;;  %v4141_v48 = vld [vmem:[%s11451_s2 + $0x528] sm:$0xff] }
 0x8ea   : > { %v10083_v54 = vcombine.high %v4448_v35, %v4452_v63  ;;  %v4312_v3 = vld [vmem:[%s11451_s2 + $0xa80] sm:$0xff]  ;;  %7289 = vmatprep.subr.bf16.mxu0 %v9955_v61  ;;  %v10082_v0 = vcombine.low %v4448_v35, %v4452_v63  ;;  %v4009_v35 = vld [vmem:[%s11451_s2 + $0x108] sm:$0xff]  ;;  %v9652_v61 = vcombine.low %v4017_v27, %v4021_v19 }
 0x8eb   : > { %v4316_v58 = vld [vmem:[%s11451_s2 + $0xaa0] sm:$0xff]  ;;  %7290 = vmatpush2.bf16.msra.mxu0 %v9954_v57  ;;  %v4013_v63 = vld [vmem:[%s11451_s2 + $0x128] sm:$0xff] }
 0x8ec   : > { %v4440_v53 = vld [vmem:[%s11451_s2 + $0xe80] sm:$0xff]  ;;  %v9947_v5 = vcombine.high %v4312_v3, %v4316_v58  ;;  %7330 = vmatprep.subr.bf16.mxu1 %v10083_v54  ;;  %v9946_v44 = vcombine.low %v4312_v3, %v4316_v58  ;;  %v9780_v54 = vcombine.low %v4145_v13, %v4149_v9  ;;  %v9645_v3 = vcombine.high %v4009_v35, %v4013_v63  ;;  %v4129_v57 = vld [vmem:[%s11451_s2 + $0x4c8] sm:$0xff] }
 0x8ed   : > { %v4444_v4 = vld [vmem:[%s11451_s2 + $0xea0] sm:$0xff]  ;;  %7331 = vmatpush2.bf16.msra.mxu1 %v10082_v0  ;;  %v9773_v58 = vcombine.high %v4137_v46, %v4141_v48  ;;  %v4133_v0 = vld [vmem:[%s11451_s2 + $0x4e8] sm:$0xff] }
 0x8ee   : > { %v10075_v55 = vcombine.high %v4440_v53, %v4444_v4  ;;  %v4304_v62 = vld [vmem:[%s11451_s2 + $0xa40] sm:$0xff]  ;;  %7291 = vmatprep.subr.bf16.mxu0 %v9947_v5  ;;  %v10074_v21 = vcombine.low %v4440_v53, %v4444_v4  ;;  %v4001_v53 = vld [vmem:[%s11451_s2 + $0xc8] sm:$0xff]  ;;  %v9644_v5 = vcombine.low %v4009_v35, %v4013_v63 }
 0x8ef   : > { %v4308_v41 = vld [vmem:[%s11451_s2 + $0xa60] sm:$0xff]  ;;  %7292 = vmatpush2.bf16.msra.mxu0 %v9946_v44  ;;  %v4005_v4 = vld [vmem:[%s11451_s2 + $0xe8] sm:$0xff] }
 0x8f0   : > { %v4432_v38 = vld [vmem:[%s11451_s2 + $0xe40] sm:$0xff]  ;;  %v9939_v59 = vcombine.high %v4304_v62, %v4308_v41  ;;  %7332 = vmatprep.subr.bf16.mxu1 %v10075_v55  ;;  %v9938_v40 = vcombine.low %v4304_v62, %v4308_v41  ;;  %v9772_v55 = vcombine.low %v4137_v46, %v4141_v48  ;;  %v9637_v62 = vcombine.high %v4001_v53, %v4005_v4  ;;  %v4121_v44 = vld [vmem:[%s11451_s2 + $0x488] sm:$0xff] }
 0x8f1   : > { %v4436_v29 = vld [vmem:[%s11451_s2 + $0xe60] sm:$0xff]  ;;  %7333 = vmatpush2.bf16.msra.mxu1 %v10074_v21  ;;  %v9765_v41 = vcombine.high %v4129_v57, %v4133_v0  ;;  %v4125_v21 = vld [vmem:[%s11451_s2 + $0x4a8] sm:$0xff] }
 0x8f2   : > { %v10067_v2 = vcombine.high %v4432_v38, %v4436_v29  ;;  %v4296_v25 = vld [vmem:[%s11451_s2 + $0xa00] sm:$0xff]  ;;  %7293 = vmatprep.subr.bf16.mxu0 %v9939_v59  ;;  %v10066_v17 = vcombine.low %v4432_v38, %v4436_v29  ;;  %v3993_v38 = vld [vmem:[%s11451_s2 + $0x88] sm:$0xff]  ;;  %v9636_v59 = vcombine.low %v4001_v53, %v4005_v4 }
 0x8f3   : > { %v4300_v49 = vld [vmem:[%s11451_s2 + $0xa20] sm:$0xff]  ;;  %7294 = vmatpush2.bf16.msra.mxu0 %v9938_v40  ;;  %v3997_v29 = vld [vmem:[%s11451_s2 + $0xa8] sm:$0xff] }
 0x8f4   : > { %v4424_v33 = vld [vmem:[%s11451_s2 + $0xe00] sm:$0xff]  ;;  %v9931_v39 = vcombine.high %v4296_v25, %v4300_v49  ;;  %7334 = vmatprep.subr.bf16.mxu1 %v10067_v2  ;;  %v9930_v56 = vcombine.low %v4296_v25, %v4300_v49  ;;  %v9764_v2 = vcombine.low %v4129_v57, %v4133_v0  ;;  %v9629_v25 = vcombine.high %v3993_v38, %v3997_v29  ;;  %v4113_v40 = vld [vmem:[%s11451_s2 + $0x448] sm:$0xff] }
 0x8f5   : > { %v4428_v32 = vld [vmem:[%s11451_s2 + $0xe20] sm:$0xff]  ;;  %7335 = vmatpush2.bf16.msra.mxu1 %v10066_v17  ;;  %v9757_v49 = vcombine.high %v4121_v44, %v4125_v21  ;;  %v4117_v17 = vld [vmem:[%s11451_s2 + $0x468] sm:$0xff] }
 0x8f6   : > { %v10059_v36 = vcombine.high %v4424_v33, %v4428_v32  ;;  %7295 = vmatprep.subr.bf16.mxu0 %v9931_v39  ;;  %v10058_v20 = vcombine.low %v4424_v33, %v4428_v32  ;;  %v3985_v33 = vld [vmem:[%s11451_s2 + $0x48] sm:$0xff]  ;;  %v9628_v39 = vcombine.low %v3993_v38, %v3997_v29  ;;  %v9749_v16 = vcombine.high %v4113_v40, %v4117_v17 }
 0x8f7   : > { %7296 = vmatpush2.bf16.msra.mxu0 %v9930_v56  ;;  %v3989_v32 = vld [vmem:[%s11451_s2 + $0x68] sm:$0xff] }
 0x8f8   : > { %7336 = vmatprep.subr.bf16.mxu1 %v10059_v36  ;;  %7347 = vmatprep.subr.bf16.mxu0 %v9669_v34  ;;  %v9756_v36 = vcombine.low %v4121_v44, %v4125_v21  ;;  %v9621_v47 = vcombine.high %v3985_v33, %v3989_v32  ;;  %v3977_v24 = vld [vmem:[%s11451_s2 + $0x8] sm:$0xff]  ;;  %v9620_v34 = vcombine.low %v3985_v33, %v3989_v32 }
 0x8f9   : > { %7337 = vmatpush2.bf16.msra.mxu1 %v10058_v20  ;;  %v3981_v30 = vld [vmem:[%s11451_s2 + $0x28] sm:$0xff] }
 0x8fa   : > { %7388 = vmatprep.subr.bf16.mxu1 %v9797_v42  ;;  %7298 = vmatmul.mubr.bf16.vlgmr.msra.gmra.mxu0 %v13218_v52  ;;  %v4105_v56 = vld [vmem:[%s11451_s2 + $0x408] sm:$0xff]  ;;  %v9748_v42 = vcombine.low %v4113_v40, %v4117_v17  ;;  %v9613_v28 = vcombine.high %v3977_v24, %v3981_v30 }
 0x8fb   : > { %7348 = vmatpush1.bf16.msra.mxu0 %v9668_v51  ;;  %7379 = vmatprep.mubr.bf16.mxu0 %v13084_v15  ;;  %v4109_v20 = vld [vmem:[%s11451_s2 + $0x428] sm:$0xff] }
 0x8fc   : > { %7339 = vmatmul.mubr.bf16.vlgmr.msra.gmra.mxu1 %v13226_v18  ;;  %7349 = vmatprep.subr.bf16.mxu0 %v9661_v23  ;;  %v9741_v1 = vcombine.high %v4105_v56, %v4109_v20  ;;  %v4097_v12 = vld [vmem:[%s11451_s2 + $0x3c8] sm:$0xff]  ;;  %v9612_v23 = vcombine.low %v3977_v24, %v3981_v30 }
 0x8fd   : > { %7389 = vmatpush1.bf16.msra.mxu1 %v9796_v43  ;;  %7420 = vmatprep.mubr.bf16.mxu1 %v13091_v60  ;;  %v4101_v10 = vld [vmem:[%s11451_s2 + $0x3e8] sm:$0xff] }
 0x8fe   : > { %7390 = vmatprep.subr.bf16.mxu1 %v9789_v8  ;;  %v4225_v51 = vld [vmem:[%s11451_s2 + $0x7c8] sm:$0xff]  ;;  %v9740_v8 = vcombine.low %v4105_v56, %v4109_v20  ;;  %v9733_v27 = vcombine.high %v4097_v12, %v4101_v10 }
 0x8ff   : > { %7350 = vmatpush1.bf16.msra.mxu0 %v9660_v45  ;;  %v4229_v43 = vld [vmem:[%s11451_s2 + $0x7e8] sm:$0xff] }
 0x900   : > { %7351 = vmatprep.subr.bf16.mxu0 %v9653_v11  ;;  %v9861_v19 = vcombine.high %v4225_v51, %v4229_v43  ;;  %v4089_v13 = vld [vmem:[%s11451_s2 + $0x388] sm:$0xff]  ;;  %v9732_v11 = vcombine.low %v4097_v12, %v4101_v10 }
 0x901   : > { %7391 = vmatpush1.bf16.msra.mxu1 %v9788_v6  ;;  %v4093_v9 = vld [vmem:[%s11451_s2 + $0x3a8] sm:$0xff] }
 0x902   : > { %7392 = vmatprep.subr.bf16.mxu1 %v9781_v31  ;;  %v4217_v45 = vld [vmem:[%s11451_s2 + $0x788] sm:$0xff]  ;;  %v9860_v31 = vcombine.low %v4225_v51, %v4229_v43  ;;  %v9725_v35 = vcombine.high %v4089_v13, %v4093_v9 }
 0x903   : > { %7352 = vmatpush1.bf16.msra.mxu0 %v9652_v61  ;;  %v4221_v6 = vld [vmem:[%s11451_s2 + $0x7a8] sm:$0xff] }
 0x904   : > { %7353 = vmatprep.subr.bf16.mxu0 %v9645_v3  ;;  %v9853_v63 = vcombine.high %v4217_v45, %v4221_v6  ;;  %v4081_v46 = vld [vmem:[%s11451_s2 + $0x348] sm:$0xff]  ;;  %v9724_v3 = vcombine.low %v4089_v13, %v4093_v9 }
 0x905   : > { %7393 = vmatpush1.bf16.msra.mxu1 %v9780_v54  ;;  %v4085_v48 = vld [vmem:[%s11451_s2 + $0x368] sm:$0xff] }
 0x906   : > { %7394 = vmatprep.subr.bf16.mxu1 %v9773_v58  ;;  %v4209_v61 = vld [vmem:[%s11451_s2 + $0x748] sm:$0xff]  ;;  %v9852_v58 = vcombine.low %v4217_v45, %v4221_v6  ;;  %v9717_v53 = vcombine.high %v4081_v46, %v4085_v48 }
 0x907   : > { %7354 = vmatpush1.bf16.msra.mxu0 %v9644_v5  ;;  %v4213_v54 = vld [vmem:[%s11451_s2 + $0x768] sm:$0xff] }
 0x908   : > { %7355 = vmatprep.subr.bf16.mxu0 %v9637_v62  ;;  %v9845_v4 = vcombine.high %v4209_v61, %v4213_v54  ;;  %v4073_v57 = vld [vmem:[%s11451_s2 + $0x308] sm:$0xff]  ;;  %v9716_v62 = vcombine.low %v4081_v46, %v4085_v48 }
 0x909   : > { %7395 = vmatpush1.bf16.msra.mxu1 %v9772_v55  ;;  %v4077_v0 = vld [vmem:[%s11451_s2 + $0x328] sm:$0xff] }
 0x90a   : > { %7396 = vmatprep.subr.bf16.mxu1 %v9765_v41  ;;  %v4201_v5 = vld [vmem:[%s11451_s2 + $0x708] sm:$0xff]  ;;  %v9844_v41 = vcombine.low %v4209_v61, %v4213_v54  ;;  %v9709_v38 = vcombine.high %v4073_v57, %v4077_v0 }
 0x90b   : > { %7356 = vmatpush1.bf16.msra.mxu0 %v9636_v59  ;;  %v4205_v55 = vld [vmem:[%s11451_s2 + $0x728] sm:$0xff] }
 0x90c   : > { %7357 = vmatprep.subr.bf16.mxu0 %v9629_v25  ;;  %v9837_v29 = vcombine.high %v4201_v5, %v4205_v55  ;;  %v4065_v44 = vld [vmem:[%s11451_s2 + $0x2c8] sm:$0xff]  ;;  %v9708_v25 = vcombine.low %v4073_v57, %v4077_v0 }
 0x90d   : > { %7397 = vmatpush1.bf16.msra.mxu1 %v9764_v2  ;;  %v4069_v21 = vld [vmem:[%s11451_s2 + $0x2e8] sm:$0xff] }
 0x90e   : > { %7398 = vmatprep.subr.bf16.mxu1 %v9757_v49  ;;  %v4193_v59 = vld [vmem:[%s11451_s2 + $0x6c8] sm:$0xff]  ;;  %v9836_v49 = vcombine.low %v4201_v5, %v4205_v55  ;;  %v9701_v33 = vcombine.high %v4065_v44, %v4069_v21 }
 0x90f   : > { %7358 = vmatpush1.bf16.msra.mxu0 %v9628_v39  ;;  %v4197_v2 = vld [vmem:[%s11451_s2 + $0x6e8] sm:$0xff] }
 0x910   : > { %7359 = vmatprep.subr.bf16.mxu0 %v9621_v47  ;;  %v9829_v32 = vcombine.high %v4193_v59, %v4197_v2  ;;  %v4057_v40 = vld [vmem:[%s11451_s2 + $0x288] sm:$0xff]  ;;  %v9700_v47 = vcombine.low %v4065_v44, %v4069_v21 }
 0x911   : > { %7399 = vmatpush1.bf16.msra.mxu1 %v9756_v36  ;;  %v4061_v17 = vld [vmem:[%s11451_s2 + $0x2a8] sm:$0xff] }
 0x912   : > { %7400 = vmatprep.subr.bf16.mxu1 %v9749_v16  ;;  %v4185_v39 = vld [vmem:[%s11451_s2 + $0x688] sm:$0xff]  ;;  %v9828_v16 = vcombine.low %v4193_v59, %v4197_v2  ;;  %v9693_v24 = vcombine.high %v4057_v40, %v4061_v17 }
 0x913   : > { %7360 = vmatpush1.bf16.msra.mxu0 %v9620_v34  ;;  %v4189_v36 = vld [vmem:[%s11451_s2 + $0x6a8] sm:$0xff] }
 0x914   : > { %7361 = vmatprep.subr.bf16.mxu0 %v9613_v28  ;;  %v9821_v30 = vcombine.high %v4185_v39, %v4189_v36  ;;  %v4049_v56 = vld [vmem:[%s11451_s2 + $0x248] sm:$0xff]  ;;  %v9692_v28 = vcombine.low %v4057_v40, %v4061_v17 }
 0x915   : > { %7401 = vmatpush1.bf16.msra.mxu1 %v9748_v42  ;;  %v4053_v20 = vld [vmem:[%s11451_s2 + $0x268] sm:$0xff] }
 0x916   : > { %7402 = vmatprep.subr.bf16.mxu1 %v9741_v1  ;;  %v4177_v34 = vld [vmem:[%s11451_s2 + $0x648] sm:$0xff]  ;;  %v9820_v1 = vcombine.low %v4185_v39, %v4189_v36  ;;  %v9685_v12 = vcombine.high %v4049_v56, %v4053_v20 }
 0x917   : > { %7362 = vmatpush1.bf16.msra.mxu0 %v9612_v23  ;;  %v4181_v42 = vld [vmem:[%s11451_s2 + $0x668] sm:$0xff] }
 0x918   : > { %7363 = vmatprep.subr.bf16.mxu0 %v9733_v27  ;;  %v9813_v10 = vcombine.high %v4177_v34, %v4181_v42  ;;  %v4041_v51 = vld [vmem:[%s11451_s2 + $0x208] sm:$0xff]  ;;  %v9684_v27 = vcombine.low %v4049_v56, %v4053_v20 }
 0x919   : > { %7403 = vmatpush1.bf16.msra.mxu1 %v9740_v8  ;;  %v4045_v43 = vld [vmem:[%s11451_s2 + $0x228] sm:$0xff] }
 0x91a   : > { %7404 = vmatprep.subr.bf16.mxu1 %v9861_v19  ;;  %v4169_v23 = vld [vmem:[%s11451_s2 + $0x608] sm:$0xff]  ;;  %v9812_v19 = vcombine.low %v4177_v34, %v4181_v42  ;;  %v9677_v13 = vcombine.high %v4041_v51, %v4045_v43 }
 0x91b   : > { %7364 = vmatpush2.bf16.msra.mxu0 %v9732_v11  ;;  %v4173_v8 = vld [vmem:[%s11451_s2 + $0x628] sm:$0xff] }
 0x91c   : > { %7365 = vmatprep.subr.bf16.mxu0 %v9725_v35  ;;  %v9805_v9 = vcombine.high %v4169_v23, %v4173_v8  ;;  %v4289_v45 = vld [vmem:[%s11451_s2 + $0x9c8] sm:$0xff]  ;;  %v9676_v35 = vcombine.low %v4041_v51, %v4045_v43 }
 0x91d   : > { %7405 = vmatpush2.bf16.msra.mxu1 %v9860_v31  ;;  %v4293_v6 = vld [vmem:[%s11451_s2 + $0x9e8] sm:$0xff] }
 0x91e   : > { %7406 = vmatprep.subr.bf16.mxu1 %v9853_v63  ;;  %v4417_v11 = vld [vmem:[%s11451_s2 + $0xdc8] sm:$0xff]  ;;  %v9804_v63 = vcombine.low %v4169_v23, %v4173_v8  ;;  %v9925_v46 = vcombine.high %v4289_v45, %v4293_v6 }
 0x91f   : > { %7366 = vmatpush2.bf16.msra.mxu0 %v9724_v3  ;;  %v4421_v31 = vld [vmem:[%s11451_s2 + $0xde8] sm:$0xff] }
 0x920   : > { %7367 = vmatprep.subr.bf16.mxu0 %v9717_v53  ;;  %v10053_v48 = vcombine.high %v4417_v11, %v4421_v31  ;;  %v4281_v61 = vld [vmem:[%s11451_s2 + $0x988] sm:$0xff]  ;;  %v9924_v53 = vcombine.low %v4289_v45, %v4293_v6 }
 0x921   : > { %7407 = vmatpush2.bf16.msra.mxu1 %v9852_v58  ;;  %v4285_v54 = vld [vmem:[%s11451_s2 + $0x9a8] sm:$0xff] }
 0x922   : > { %7408 = vmatprep.subr.bf16.mxu1 %v9845_v4  ;;  %v4409_v3 = vld [vmem:[%s11451_s2 + $0xd88] sm:$0xff]  ;;  %v10052_v4 = vcombine.low %v4417_v11, %v4421_v31  ;;  %v9917_v57 = vcombine.high %v4281_v61, %v4285_v54 }
 0x923   : > { %7368 = vmatpush2.bf16.msra.mxu0 %v9716_v62  ;;  %v4413_v58 = vld [vmem:[%s11451_s2 + $0xda8] sm:$0xff] }
 0x924   : > { %7369 = vmatprep.subr.bf16.mxu0 %v9709_v38  ;;  %v10045_v0 = vcombine.high %v4409_v3, %v4413_v58  ;;  %v4273_v5 = vld [vmem:[%s11451_s2 + $0x948] sm:$0xff]  ;;  %v9916_v38 = vcombine.low %v4281_v61, %v4285_v54 }
 0x925   : > { %7409 = vmatpush2.bf16.msra.mxu1 %v9844_v41  ;;  %v4277_v55 = vld [vmem:[%s11451_s2 + $0x968] sm:$0xff] }
 0x926   : > { %7410 = vmatprep.subr.bf16.mxu1 %v9837_v29  ;;  %v4401_v62 = vld [vmem:[%s11451_s2 + $0xd48] sm:$0xff]  ;;  %v10044_v29 = vcombine.low %v4409_v3, %v4413_v58  ;;  %v9909_v44 = vcombine.high %v4273_v5, %v4277_v55 }
 0x927   : > { %7370 = vmatpush2.bf16.msra.mxu0 %v9708_v25  ;;  %v4405_v41 = vld [vmem:[%s11451_s2 + $0xd68] sm:$0xff] }
 0x928   : > { %7371 = vmatprep.subr.bf16.mxu0 %v9701_v33  ;;  %v10037_v21 = vcombine.high %v4401_v62, %v4405_v41  ;;  %v4265_v59 = vld [vmem:[%s11451_s2 + $0x908] sm:$0xff]  ;;  %v9908_v33 = vcombine.low %v4273_v5, %v4277_v55 }
 0x929   : > { %7411 = vmatpush2.bf16.msra.mxu1 %v9836_v49  ;;  %v4269_v2 = vld [vmem:[%s11451_s2 + $0x928] sm:$0xff] }
 0x92a   : > { %7412 = vmatprep.subr.bf16.mxu1 %v9829_v32  ;;  %v4393_v25 = vld [vmem:[%s11451_s2 + $0xd08] sm:$0xff]  ;;  %v10036_v32 = vcombine.low %v4401_v62, %v4405_v41  ;;  %v9901_v40 = vcombine.high %v4265_v59, %v4269_v2 }
 0x92b   : > { %7372 = vmatpush2.bf16.msra.mxu0 %v9700_v47  ;;  %v4397_v49 = vld [vmem:[%s11451_s2 + $0xd28] sm:$0xff] }
 0x92c   : > { %7373 = vmatprep.subr.bf16.mxu0 %v9693_v24  ;;  %v10029_v17 = vcombine.high %v4393_v25, %v4397_v49  ;;  %v4257_v39 = vld [vmem:[%s11451_s2 + $0x8c8] sm:$0xff]  ;;  %v9900_v24 = vcombine.low %v4265_v59, %v4269_v2 }
 0x92d   : > { %7413 = vmatpush2.bf16.msra.mxu1 %v9828_v16  ;;  %v4261_v36 = vld [vmem:[%s11451_s2 + $0x8e8] sm:$0xff] }
 0x92e   : > { %7414 = vmatprep.subr.bf16.mxu1 %v9821_v30  ;;  %v4385_v47 = vld [vmem:[%s11451_s2 + $0xcc8] sm:$0xff]  ;;  %v10028_v30 = vcombine.low %v4393_v25, %v4397_v49  ;;  %v9893_v56 = vcombine.high %v4257_v39, %v4261_v36 }
 0x92f   : > { %7374 = vmatpush2.bf16.msra.mxu0 %v9692_v28  ;;  %v4389_v16 = vld [vmem:[%s11451_s2 + $0xce8] sm:$0xff] }
 0x930   : > { %7375 = vmatprep.subr.bf16.mxu0 %v9685_v12  ;;  %v10021_v20 = vcombine.high %v4385_v47, %v4389_v16  ;;  %v4249_v34 = vld [vmem:[%s11451_s2 + $0x888] sm:$0xff]  ;;  %v9892_v12 = vcombine.low %v4257_v39, %v4261_v36 }
 0x931   : > { %7415 = vmatpush2.bf16.msra.mxu1 %v9820_v1  ;;  %v4253_v42 = vld [vmem:[%s11451_s2 + $0x8a8] sm:$0xff] }
 0x932   : > { %7416 = vmatprep.subr.bf16.mxu1 %v9813_v10  ;;  %v4377_v28 = vld [vmem:[%s11451_s2 + $0xc88] sm:$0xff]  ;;  %v10020_v10 = vcombine.low %v4385_v47, %v4389_v16  ;;  %v9885_v51 = vcombine.high %v4249_v34, %v4253_v42 }
 0x933   : > { %7376 = vmatpush2.bf16.msra.mxu0 %v9684_v27  ;;  %v4381_v1 = vld [vmem:[%s11451_s2 + $0xca8] sm:$0xff] }
 0x934   : > { %7377 = vmatprep.subr.bf16.mxu0 %v9677_v13  ;;  %v10013_v43 = vcombine.high %v4377_v28, %v4381_v1  ;;  %v4241_v23 = vld [vmem:[%s11451_s2 + $0x848] sm:$0xff]  ;;  %v9884_v13 = vcombine.low %v4249_v34, %v4253_v42 }
 0x935   : > { %7417 = vmatpush2.bf16.msra.mxu1 %v9812_v19  ;;  %v4245_v8 = vld [vmem:[%s11451_s2 + $0x868] sm:$0xff] }
 0x936   : > { %7418 = vmatprep.subr.bf16.mxu1 %v9805_v9  ;;  %v4369_v27 = vld [vmem:[%s11451_s2 + $0xc48] sm:$0xff]  ;;  %v10012_v9 = vcombine.low %v4377_v28, %v4381_v1  ;;  %v9877_v45 = vcombine.high %v4241_v23, %v4245_v8 }
 0x937   : > { %7378 = vmatpush2.bf16.msra.mxu0 %v9676_v35  ;;  %v4373_v19 = vld [vmem:[%s11451_s2 + $0xc68] sm:$0xff] }
 0x938   : > { %7429 = vmatprep.subr.bf16.mxu0 %v9925_v46  ;;  %v10005_v6 = vcombine.high %v4369_v27, %v4373_v19  ;;  %v4233_v11 = vld [vmem:[%s11451_s2 + $0x808] sm:$0xff]  ;;  %v9876_v46 = vcombine.low %v4241_v23, %v4245_v8 }
 0x939   : > { %7419 = vmatpush2.bf16.msra.mxu1 %v9804_v63  ;;  %v4237_v31 = vld [vmem:[%s11451_s2 + $0x828] sm:$0xff] }
 0x93a   : > { %7470 = vmatprep.subr.bf16.mxu1 %v10053_v48  ;;  %7380 = vmatmul.mubr.bf16.vlgmr.msra.gmra.mxu0 %v13135_v14  ;;  %v4361_v35 = vld [vmem:[%s11451_s2 + $0xc08] sm:$0xff]  ;;  %v10004_v48 = vcombine.low %v4369_v27, %v4373_v19  ;;  %v9869_v61 = vcombine.high %v4233_v11, %v4237_v31 }
 0x93b   : > { %7430 = vmatpush1.bf16.msra.mxu0 %v9924_v53  ;;  %7461 = vmatprep.mubr.bf16.mxu0 %v13142_v37  ;;  %v4365_v63 = vld [vmem:[%s11451_s2 + $0xc28] sm:$0xff] }
 0x93c   : > { %7421 = vmatmul.mubr.bf16.vlgmr.msra.gmra.mxu1 %v13146_v26  ;;  %7431 = vmatprep.subr.bf16.mxu0 %v9917_v57  ;;  %v9997_v54 = vcombine.high %v4361_v35, %v4365_v63  ;;  %v4353_v3 = vld [vmem:[%s11451_s2 + $0xbc8] sm:$0xff]  ;;  %v9868_v57 = vcombine.low %v4233_v11, %v4237_v31 }
 0x93d   : > { %7471 = vmatpush1.bf16.msra.mxu1 %v10052_v4  ;;  %7502 = vmatprep.mubr.bf16.mxu1 %v13155_v7  ;;  %v4357_v58 = vld [vmem:[%s11451_s2 + $0xbe8] sm:$0xff] }
 0x93e   : > { %7472 = vmatprep.subr.bf16.mxu1 %v10045_v0  ;;  %v4481_v53 = vld [vmem:[%s11451_s2 + $0xfc8] sm:$0xff]  ;;  %v9996_v0 = vcombine.low %v4361_v35, %v4365_v63  ;;  %v9989_v5 = vcombine.high %v4353_v3, %v4357_v58 }
 0x93f   : > { %7432 = vmatpush1.bf16.msra.mxu0 %v9916_v38  ;;  %v4485_v4 = vld [vmem:[%s11451_s2 + $0xfe8] sm:$0xff] }
 0x940   : > { %7433 = vmatprep.subr.bf16.mxu0 %v9909_v44  ;;  %v10117_v55 = vcombine.high %v4481_v53, %v4485_v4  ;;  %v4345_v62 = vld [vmem:[%s11451_s2 + $0xb88] sm:$0xff]  ;;  %v9988_v44 = vcombine.low %v4353_v3, %v4357_v58  ;;  %v4488_v58 = vld [vmem:[%s11477_s16] sm:$0xff] }
 0x941   : > { %7473 = vmatpush1.bf16.msra.mxu1 %v10044_v29  ;;  %v4349_v41 = vld [vmem:[%s11451_s2 + $0xba8] sm:$0xff] }
 0x942   : > { %7474 = vmatprep.subr.bf16.mxu1 %v10037_v21  ;;  %v4473_v38 = vld [vmem:[%s11451_s2 + $0xf88] sm:$0xff]  ;;  %v10116_v21 = vcombine.low %v4481_v53, %v4485_v4  ;;  %v9981_v59 = vcombine.high %v4345_v62, %v4349_v41 }
 0x943   : > { %7434 = vmatpush1.bf16.msra.mxu0 %v9908_v33  ;;  %v4477_v29 = vld [vmem:[%s11451_s2 + $0xfa8] sm:$0xff] }
 0x944   : > { %7435 = vmatprep.subr.bf16.mxu0 %v9901_v40  ;;  %v10109_v2 = vcombine.high %v4473_v38, %v4477_v29  ;;  %v4337_v25 = vld [vmem:[%s11451_s2 + $0xb48] sm:$0xff]  ;;  %v9980_v40 = vcombine.low %v4345_v62, %v4349_v41  ;;  %v13357_v62 = vunpack.c.l.bf16 %v4488_v58  ;;  %v13360_v41 = vsub.s32 0, %v13058_v22 }
 0x945   : > { %7475 = vmatpush1.bf16.msra.mxu1 %v10036_v32  ;;  %v4341_v49 = vld [vmem:[%s11451_s2 + $0xb68] sm:$0xff] }
 0x946   : > { %7476 = vmatprep.subr.bf16.mxu1 %v10029_v17  ;;  %v4465_v33 = vld [vmem:[%s11451_s2 + $0xf48] sm:$0xff]  ;;  %v10108_v17 = vcombine.low %v4473_v38, %v4477_v29  ;;  %v9973_v39 = vcombine.high %v4337_v25, %v4341_v49 }
 0x947   : > { %7436 = vmatpush1.bf16.msra.mxu0 %v9900_v24  ;;  %v4469_v32 = vld [vmem:[%s11451_s2 + $0xf68] sm:$0xff] }
 0x948   : > { %7437 = vmatprep.subr.bf16.mxu0 %v9893_v56  ;;  %v10101_v36 = vcombine.high %v4465_v33, %v4469_v32  ;;  %v4329_v47 = vld [vmem:[%s11451_s2 + $0xb08] sm:$0xff]  ;;  %v9972_v56 = vcombine.low %v4337_v25, %v4341_v49  ;;  %v4162_v25 = vld [vmem:[%s11451_s2 + $0x5d0] sm:$0xff] }
 0x949   : > { %7477 = vmatpush1.bf16.msra.mxu1 %v10028_v30  ;;  %v4333_v16 = vld [vmem:[%s11451_s2 + $0xb28] sm:$0xff]  ;;  %v4166_v49 = vld [vmem:[%s11451_s2 + $0x5f0] sm:$0xff] }
 0x94a   : > { %7478 = vmatprep.subr.bf16.mxu1 %v10021_v20  ;;  %v4457_v24 = vld [vmem:[%s11451_s2 + $0xf08] sm:$0xff]  ;;  %v10100_v20 = vcombine.low %v4465_v33, %v4469_v32  ;;  %v9965_v34 = vcombine.high %v4329_v47, %v4333_v16  ;;  %v4496_v32 = vrot.slane %v13357_v62, %v13360_v41 }
 0x94b   : > { %7438 = vmatpush1.bf16.msra.mxu0 %v9892_v12  ;;  %v4461_v30 = vld [vmem:[%s11451_s2 + $0xf28] sm:$0xff] }
 0x94c   : > { %7439 = vmatprep.subr.bf16.mxu0 %v9885_v51  ;;  %v10093_v42 = vcombine.high %v4457_v24, %v4461_v30  ;;  %v4321_v28 = vld [vmem:[%s11451_s2 + $0xac8] sm:$0xff]  ;;  %v9964_v51 = vcombine.low %v4329_v47, %v4333_v16  ;;  %v4026_v47 = vld [vmem:[%s11451_s2 + $0x190] sm:$0xff] }
 0x94d   : > { %7479 = vmatpush1.bf16.msra.mxu1 %v10020_v10  ;;  %v4325_v1 = vld [vmem:[%s11451_s2 + $0xae8] sm:$0xff]  ;;  %v4030_v16 = vld [vmem:[%s11451_s2 + $0x1b0] sm:$0xff] }
 0x94e   : > { %7480 = vmatprep.subr.bf16.mxu1 %v10013_v43  ;;  %v4449_v12 = vld [vmem:[%s11451_s2 + $0xec8] sm:$0xff]  ;;  %v10092_v43 = vcombine.low %v4457_v24, %v4461_v30  ;;  %v9957_v23 = vcombine.high %v4321_v28, %v4325_v1  ;;  %v4154_v24 = vld [vmem:[%s11451_s2 + $0x590] sm:$0xff] }
 0x94f   : > { %7440 = vmatpush1.bf16.msra.mxu0 %v9884_v13  ;;  %v4453_v10 = vld [vmem:[%s11451_s2 + $0xee8] sm:$0xff]  ;;  %v4158_v30 = vld [vmem:[%s11451_s2 + $0x5b0] sm:$0xff] }
 0x950   : > { %7441 = vmatprep.subr.bf16.mxu0 %v9877_v45  ;;  %v10085_v8 = vcombine.high %v4449_v12, %v4453_v10  ;;  %v4313_v27 = vld [vmem:[%s11451_s2 + $0xa88] sm:$0xff]  ;;  %v9956_v45 = vcombine.low %v4321_v28, %v4325_v1  ;;  %v9791_v1 = vcombine.high %v4154_v24, %v4158_v30 }
 0x951   : > { %7481 = vmatpush1.bf16.msra.mxu1 %v10012_v9  ;;  %v4317_v19 = vld [vmem:[%s11451_s2 + $0xaa8] sm:$0xff] }
 0x952   : > { %7482 = vmatprep.subr.bf16.mxu1 %v10005_v6  ;;  %v4441_v13 = vld [vmem:[%s11451_s2 + $0xe88] sm:$0xff]  ;;  %v10084_v6 = vcombine.low %v4449_v12, %v4453_v10  ;;  %v9949_v11 = vcombine.high %v4313_v27, %v4317_v19  ;;  %v4018_v12 = vld [vmem:[%s11451_s2 + $0x150] sm:$0xff] }
 0x953   : > { %7442 = vmatpush1.bf16.msra.mxu0 %v9876_v46  ;;  %v4445_v9 = vld [vmem:[%s11451_s2 + $0xea8] sm:$0xff]  ;;  %v4022_v10 = vld [vmem:[%s11451_s2 + $0x170] sm:$0xff] }
 0x954   : > { %7443 = vmatprep.subr.bf16.mxu0 %v9869_v61  ;;  %v10077_v31 = vcombine.high %v4441_v13, %v4445_v9  ;;  %v4305_v35 = vld [vmem:[%s11451_s2 + $0xa48] sm:$0xff]  ;;  %v9948_v61 = vcombine.low %v4313_v27, %v4317_v19  ;;  %v9662_v19 = vcombine.low %v4026_v47, %v4030_v16 }
 0x955   : > { %7483 = vmatpush1.bf16.msra.mxu1 %v10004_v48  ;;  %v4309_v63 = vld [vmem:[%s11451_s2 + $0xa68] sm:$0xff] }
 0x956   : > { %7484 = vmatprep.subr.bf16.mxu1 %v9997_v54  ;;  %v4433_v46 = vld [vmem:[%s11451_s2 + $0xe48] sm:$0xff]  ;;  %v10076_v54 = vcombine.low %v4441_v13, %v4445_v9  ;;  %v9941_v3 = vcombine.high %v4305_v35, %v4309_v63  ;;  %v9790_v9 = vcombine.low %v4154_v24, %v4158_v30  ;;  %v3986_v30 = vld [vmem:[%s11451_s2 + $0x50] sm:$0xff] }
 0x957   : > { %7444 = vmatpush1.bf16.msra.mxu0 %v9868_v57  ;;  %v4437_v48 = vld [vmem:[%s11451_s2 + $0xe68] sm:$0xff] }
 0x958   : > { %7445 = vmatprep.subr.bf16.mxu0 %v9989_v5  ;;  %v10069_v53 = vcombine.high %v4433_v46, %v4437_v48  ;;  %v4297_v4 = vld [vmem:[%s11451_s2 + $0xa08] sm:$0xff]  ;;  %v10068_v38 = vcombine.low %v4433_v46, %v4437_v48  ;;  %v4014_v46 = vld [vmem:[%s11451_s2 + $0x130] sm:$0xff] }
 0x959   : > { %7485 = vmatpush1.bf16.msra.mxu1 %v9996_v0  ;;  %v4301_v57 = vld [vmem:[%s11451_s2 + $0xa28] sm:$0xff] }
 0x95a   : > { %7486 = vmatprep.subr.bf16.mxu1 %v10117_v55  ;;  %v4425_v0 = vld [vmem:[%s11451_s2 + $0xe08] sm:$0xff]  ;;  %v9940_v55 = vcombine.low %v4305_v35, %v4309_v63  ;;  %v9933_v29 = vcombine.high %v4297_v4, %v4301_v57  ;;  %v9932_v33 = vcombine.low %v4297_v4, %v4301_v57  ;;  %v4010_v63 = vld [vmem:[%s11451_s2 + $0x110] sm:$0xff] }
 0x95b   : > { %7446 = vmatpush2.bf16.msra.mxu0 %v9988_v44  ;;  %v4429_v5 = vld [vmem:[%s11451_s2 + $0xe28] sm:$0xff] }
 0x95c   : > { %7447 = vmatprep.subr.bf16.mxu0 %v9981_v59  ;;  %v10061_v44 = vcombine.high %v4425_v0, %v4429_v5  ;;  %v4038_v59 = vld [vmem:[%s11451_s2 + $0x1f0] sm:$0xff] }
 0x95d   : > { %7487 = vmatpush2.bf16.msra.mxu1 %v10116_v21  ;;  %v4034_v21 = vld [vmem:[%s11451_s2 + $0x1d0] sm:$0xff] }
 0x95e   : > { %7488 = vmatprep.subr.bf16.mxu1 %v10109_v2  ;;  %v13365_v2 = vsub.s32 2, %v13058_v22 }
 0x95f   : > { %7448 = vmatpush2.bf16.msra.mxu0 %v9980_v40  ;;  %v10060_v40 = vcombine.low %v4425_v0, %v4429_v5  ;;  %v9647_v0 = vcombine.high %v4010_v63, %v4014_v46 }
 0x960   : > { %7449 = vmatprep.subr.bf16.mxu0 %v9973_v39  ;;  %v9799_v39 = vcombine.high %v4162_v25, %v4166_v49 }
 0x961   : > { %7489 = vmatpush2.bf16.msra.mxu1 %v10108_v17  ;;  %v9671_v17 = vcombine.high %v4034_v21, %v4038_v59 }
 0x962   : > { %7490 = vmatprep.subr.bf16.mxu1 %v10101_v36  ;;  %v4500_v36 = vrot.slane %v13357_v62, %v13365_v2 }
 0x963   : > { %7450 = vmatpush2.bf16.msra.mxu0 %v9972_v56  ;;  %v4536_v56 = vrot.slane %v4496_v32, %v13360_v41  ;;  %v3994_v32 = vld [vmem:[%s11451_s2 + $0x90] sm:$0xff] }
 0x964   : > { %7451 = vmatprep.subr.bf16.mxu0 %v9965_v34  ;;  %v9798_v34 = vcombine.low %v4162_v25, %v4166_v49  ;;  %v4540_v28 = vrot.slane %v4500_v36, %v13360_v41 }
 0x965   : > { %7491 = vmatpush2.bf16.msra.mxu1 %v10100_v20  ;;  %v9670_v20 = vcombine.low %v4034_v21, %v4038_v59  ;;  %v4134_v21 = vld [vmem:[%s11451_s2 + $0x4f0] sm:$0xff]  ;;  %v9646_v59 = vcombine.low %v4010_v63, %v4014_v46 }
 0x966   : > { %7492 = vmatprep.subr.bf16.mxu1 %v10093_v42  ;;  %v9663_v42 = vcombine.high %v4026_v47, %v4030_v16 }
 0x967   : > { %7452 = vmatpush2.bf16.msra.mxu0 %v9964_v51 }
 0x968   : > { %7453 = vmatprep.subr.bf16.mxu0 %v9957_v23  ;;  %v4150_v23 = vld [vmem:[%s11451_s2 + $0x570] sm:$0xff] }
 0x969   : > { %7493 = vmatpush2.bf16.msra.mxu1 %v10092_v43  ;;  %v4146_v43 = vld [vmem:[%s11451_s2 + $0x550] sm:$0xff] }
 0x96a   : > { %7494 = vmatprep.subr.bf16.mxu1 %v10085_v8  ;;  %v9783_v35 = vcombine.high %v4146_v43, %v4150_v23  ;;  %v9782_v57 = vcombine.low %v4146_v43, %v4150_v23  ;;  %v4106_v43 = vld [vmem:[%s11451_s2 + $0x410] sm:$0xff] }
 0x96b   : > { %7454 = vmatpush2.bf16.msra.mxu0 %v9956_v45  ;;  %v9655_v45 = vcombine.high %v4018_v12, %v4022_v10  ;;  %v4110_v23 = vld [vmem:[%s11451_s2 + $0x430] sm:$0xff] }
 0x96c   : > { %7455 = vmatprep.subr.bf16.mxu0 %v9949_v11  ;;  %v9742_v63 = vcombine.low %v4106_v43, %v4110_v23 }
 0x96d   : > { %7495 = vmatpush2.bf16.msra.mxu1 %v10084_v6 }
 0x96e   : > { %7496 = vmatprep.subr.bf16.mxu1 %v10077_v31 }
 0x96f   : > { %7456 = vmatpush2.bf16.msra.mxu0 %v9948_v61  ;;  %v4138_v61 = vld [vmem:[%s11451_s2 + $0x510] sm:$0xff] }
 0x970   : > { %7457 = vmatprep.subr.bf16.mxu0 %v9941_v3 }
 0x971   : > { %7497 = vmatpush2.bf16.msra.mxu1 %v10076_v54  ;;  %v4142_v54 = vld [vmem:[%s11451_s2 + $0x530] sm:$0xff] }
 0x972   : > { %7498 = vmatprep.subr.bf16.mxu1 %v10069_v53  ;;  %v9654_v53 = vcombine.low %v4018_v12, %v4022_v10  ;;  %v9774_v25 = vcombine.low %v4138_v61, %v4142_v54  ;;  %v3978_v10 = vld [vmem:[%s11451_s2 + $0x10] sm:$0xff] }
 0x973   : > { %7458 = vmatpush2.bf16.msra.mxu0 %v9940_v55  ;;  %v9775_v55 = vcombine.high %v4138_v61, %v4142_v54  ;;  %v4090_v61 = vld [vmem:[%s11451_s2 + $0x390] sm:$0xff] }
 0x974   : > { %7459 = vmatprep.subr.bf16.mxu0 %v9933_v29  ;;  %v4006_v29 = vld [vmem:[%s11451_s2 + $0xf0] sm:$0xff] }
 0x975   : > { %7499 = vmatpush2.bf16.msra.mxu1 %v10068_v38  ;;  %v4002_v38 = vld [vmem:[%s11451_s2 + $0xd0] sm:$0xff] }
 0x976   : > { %7500 = vmatprep.subr.bf16.mxu1 %v10061_v44  ;;  %v4130_v44 = vld [vmem:[%s11451_s2 + $0x4d0] sm:$0xff]  ;;  %v9639_v49 = vcombine.high %v4002_v38, %v4006_v29  ;;  %v9638_v36 = vcombine.low %v4002_v38, %v4006_v29 }
 0x977   : > { %7460 = vmatpush2.bf16.msra.mxu0 %v9932_v33  ;;  %v9767_v33 = vcombine.high %v4130_v44, %v4134_v21  ;;  %v9766_v47 = vcombine.low %v4130_v44, %v4134_v21  ;;  %v4094_v54 = vld [vmem:[%s11451_s2 + $0x3b0] sm:$0xff] }
 0x978   : > { %7511 = vmatprep.subr.bf16.mxu0 %v9671_v17  ;;  %v4122_v17 = vld [vmem:[%s11451_s2 + $0x490] sm:$0xff]  ;;  %v9726_v21 = vcombine.low %v4090_v61, %v4094_v54 }
 0x979   : > { %7501 = vmatpush2.bf16.msra.mxu1 %v10060_v40  ;;  %v3998_v40 = vld [vmem:[%s11451_s2 + $0xb0] sm:$0xff] }
 0x97a   : > { %7552 = vmatprep.subr.bf16.mxu1 %v9799_v39  ;;  %v7217_v51 = vpop.f32.mrf.mxu0  ;;  %7462 = vmatmul.mubr.bf16.vlgmr.msra.gmra.mxu0 %v13218_v52  ;;  %v4126_v39 = vld [vmem:[%s11451_s2 + $0x4b0] sm:$0xff]  ;;  %v9631_v16 = vcombine.high %v3994_v32, %v3998_v40 }
 0x97b   : > { %v7218_v8 = vadd.f32 %v7217_v51, %v4536_v56  ;;  %7512 = vmatpush1.bf16.msra.mxu0 %v9670_v20  ;;  %7543 = vmatprep.mubr.bf16.mxu0 %v13084_v15  ;;  %v9759_v24 = vcombine.high %v4122_v17, %v4126_v39  ;;  %v3990_v56 = vld [vmem:[%s11451_s2 + $0x70] sm:$0xff] }
 0x97c   : > { %v7258_v27 = vpop.f32.mrf.mxu1  ;;  %7503 = vmatmul.mubr.bf16.vlgmr.msra.gmra.mxu1 %v13226_v18  ;;  %v7219_v13 = vpop.f32.mrf.mxu0  ;;  %7513 = vmatprep.subr.bf16.mxu0 %v9663_v42  ;;  %v4114_v20 = vld [vmem:[%s11451_s2 + $0x450] sm:$0xff]  ;;  %v9630_v42 = vcombine.low %v3994_v32, %v3998_v40 }
 0x97d   : > { %7553 = vmatpush1.bf16.msra.mxu1 %v9798_v34  ;;  %v13385_v6 = vadd.f32 %v7258_v27, %v7218_v8  ;;  %v7220_v11 = vadd.f32 %v7219_v13, %v4540_v28  ;;  %7584 = vmatprep.mubr.bf16.mxu1 %v13091_v60  ;;  %v4118_v34 = vld [vmem:[%s11451_s2 + $0x470] sm:$0xff]  ;;  %v9758_v28 = vcombine.low %v4122_v17, %v4126_v39 }
 0x97e   : > { %v7260_v31 = vpop.f32.mrf.mxu1  ;;  %7554 = vmatprep.subr.bf16.mxu1 %v9791_v1  ;;  %v7221_v48 = vpop.f32.mrf.mxu0  ;;  %v9623_v1 = vcombine.high %v3986_v30, %v3990_v56  ;;  %v9751_v12 = vcombine.high %v4114_v20, %v4118_v34  ;;  %v3982_v51 = vld [vmem:[%s11451_s2 + $0x30] sm:$0xff]  ;;  %v9622_v8 = vcombine.low %v3986_v30, %v3990_v56  ;;  %v9750_v27 = vcombine.low %v4114_v20, %v4118_v34 }
 0x97f   : > { %v13393_v3 = vadd.f32 %v7260_v31, %v7220_v11  ;;  %7514 = vmatpush1.bf16.msra.mxu0 %v9662_v19  ;;  %v9615_v19 = vcombine.high %v3978_v10, %v3982_v51  ;;  %v9743_v13 = vcombine.high %v4106_v43, %v4110_v23  ;;  %v4226_v11 = vld [vmem:[%s11451_s2 + $0x7d0] sm:$0xff] }
 0x980   : > { %v7262_v58 = vpop.f32.mrf.mxu1  ;;  %v7222_v4 = vpop.f32.mrf.mxu0  ;;  %7515 = vmatprep.subr.bf16.mxu0 %v9655_v45  ;;  %v4102_v45 = vld [vmem:[%s11451_s2 + $0x3f0] sm:$0xff] }
 0x981   : > { %7555 = vmatpush1.bf16.msra.mxu1 %v9790_v9  ;;  %v4098_v9 = vld [vmem:[%s11451_s2 + $0x3d0] sm:$0xff] }
 0x982   : > { %v7263_v5 = vpop.f32.mrf.mxu1  ;;  %7556 = vmatprep.subr.bf16.mxu1 %v9783_v35  ;;  %v4230_v31 = vld [vmem:[%s11451_s2 + $0x7f0] sm:$0xff]  ;;  %v9614_v35 = vcombine.low %v3978_v10, %v3982_v51  ;;  %v9735_v46 = vcombine.high %v4098_v9, %v4102_v45  ;;  %v9734_v4 = vcombine.low %v4098_v9, %v4102_v45 }
 0x983   : > { %7516 = vmatpush1.bf16.msra.mxu0 %v9654_v53  ;;  %v9863_v48 = vcombine.high %v4226_v11, %v4230_v31  ;;  %v4218_v58 = vld [vmem:[%s11451_s2 + $0x790] sm:$0xff] }
 0x984   : > { %7517 = vmatprep.subr.bf16.mxu0 %v9647_v0  ;;  %v4222_v53 = vld [vmem:[%s11451_s2 + $0x7b0] sm:$0xff]  ;;  %v9727_v0 = vcombine.high %v4090_v61, %v4094_v54 }
 0x985   : > { %7557 = vmatpush1.bf16.msra.mxu1 %v9782_v57  ;;  %v9862_v57 = vcombine.low %v4226_v11, %v4230_v31  ;;  %v9855_v5 = vcombine.high %v4218_v58, %v4222_v53  ;;  %v4086_v38 = vld [vmem:[%s11451_s2 + $0x370] sm:$0xff] }
 0x986   : > { %7558 = vmatprep.subr.bf16.mxu1 %v9775_v55  ;;  %v4082_v55 = vld [vmem:[%s11451_s2 + $0x350] sm:$0xff] }
 0x987   : > { %7518 = vmatpush1.bf16.msra.mxu0 %v9646_v59  ;;  %v4210_v29 = vld [vmem:[%s11451_s2 + $0x750] sm:$0xff]  ;;  %v9854_v59 = vcombine.low %v4218_v58, %v4222_v53  ;;  %v9718_v39 = vcombine.low %v4082_v55, %v4086_v38 }
 0x988   : > { %7519 = vmatprep.subr.bf16.mxu0 %v9639_v49  ;;  %v4214_v44 = vld [vmem:[%s11451_s2 + $0x770] sm:$0xff] }
 0x989   : > { %7559 = vmatpush1.bf16.msra.mxu1 %v9774_v25  ;;  %v9719_v25 = vcombine.high %v4082_v55, %v4086_v38  ;;  %v9847_v49 = vcombine.high %v4210_v29, %v4214_v44  ;;  %v4078_v32 = vld [vmem:[%s11451_s2 + $0x330] sm:$0xff] }
 0x98a   : > { %7560 = vmatprep.subr.bf16.mxu1 %v9767_v33  ;;  %v4074_v33 = vld [vmem:[%s11451_s2 + $0x310] sm:$0xff] }
 0x98b   : > { %7520 = vmatpush1.bf16.msra.mxu0 %v9638_v36  ;;  %v4202_v40 = vld [vmem:[%s11451_s2 + $0x710] sm:$0xff]  ;;  %v9846_v36 = vcombine.low %v4210_v29, %v4214_v44  ;;  %v9710_v34 = vcombine.low %v4074_v33, %v4078_v32 }
 0x98c   : > { %7521 = vmatprep.subr.bf16.mxu0 %v9631_v16  ;;  %v4206_v17 = vld [vmem:[%s11451_s2 + $0x730] sm:$0xff] }
 0x98d   : > { %7561 = vmatpush1.bf16.msra.mxu1 %v9766_v47  ;;  %v9711_v47 = vcombine.high %v4074_v33, %v4078_v32  ;;  %v9839_v16 = vcombine.high %v4202_v40, %v4206_v17  ;;  %v4070_v30 = vld [vmem:[%s11451_s2 + $0x2f0] sm:$0xff] }
 0x98e   : > { %7562 = vmatprep.subr.bf16.mxu1 %v9759_v24  ;;  %v4066_v24 = vld [vmem:[%s11451_s2 + $0x2d0] sm:$0xff] }
 0x98f   : > { %7522 = vmatpush1.bf16.msra.mxu0 %v9630_v42  ;;  %v4194_v56 = vld [vmem:[%s11451_s2 + $0x6d0] sm:$0xff]  ;;  %v9838_v42 = vcombine.low %v4202_v40, %v4206_v17  ;;  %v9702_v23 = vcombine.low %v4066_v24, %v4070_v30 }
 0x990   : > { %7523 = vmatprep.subr.bf16.mxu0 %v9623_v1  ;;  %v4198_v20 = vld [vmem:[%s11451_s2 + $0x6f0] sm:$0xff] }
 0x991   : > { %7563 = vmatpush1.bf16.msra.mxu1 %v9758_v28  ;;  %v9703_v28 = vcombine.high %v4066_v24, %v4070_v30  ;;  %v9831_v1 = vcombine.high %v4194_v56, %v4198_v20  ;;  %v4062_v10 = vld [vmem:[%s11451_s2 + $0x2b0] sm:$0xff] }
 0x992   : > { %7564 = vmatprep.subr.bf16.mxu1 %v9751_v12  ;;  %v4058_v12 = vld [vmem:[%s11451_s2 + $0x290] sm:$0xff] }
 0x993   : > { %7524 = vmatpush1.bf16.msra.mxu0 %v9622_v8  ;;  %v4186_v51 = vld [vmem:[%s11451_s2 + $0x690] sm:$0xff]  ;;  %v9830_v8 = vcombine.low %v4194_v56, %v4198_v20  ;;  %v9694_v31 = vcombine.low %v4058_v12, %v4062_v10 }
 0x994   : > { %7525 = vmatprep.subr.bf16.mxu0 %v9615_v19  ;;  %v4190_v43 = vld [vmem:[%s11451_s2 + $0x6b0] sm:$0xff] }
 0x995   : > { %7565 = vmatpush1.bf16.msra.mxu1 %v9750_v27  ;;  %v9695_v27 = vcombine.high %v4058_v12, %v4062_v10  ;;  %v9823_v19 = vcombine.high %v4186_v51, %v4190_v43  ;;  %v4054_v9 = vld [vmem:[%s11451_s2 + $0x270] sm:$0xff] }
 0x996   : > { %7566 = vmatprep.subr.bf16.mxu1 %v9743_v13  ;;  %v4050_v13 = vld [vmem:[%s11451_s2 + $0x250] sm:$0xff] }
 0x997   : > { %7526 = vmatpush1.bf16.msra.mxu0 %v9614_v35  ;;  %v4178_v45 = vld [vmem:[%s11451_s2 + $0x650] sm:$0xff]  ;;  %v9822_v35 = vcombine.low %v4186_v51, %v4190_v43  ;;  %v9686_v53 = vcombine.low %v4050_v13, %v4054_v9 }
 0x998   : > { %7527 = vmatprep.subr.bf16.mxu0 %v9735_v46  ;;  %v4182_v11 = vld [vmem:[%s11451_s2 + $0x670] sm:$0xff] }
 0x999   : > { %7567 = vmatpush1.bf16.msra.mxu1 %v9742_v63  ;;  %v9687_v63 = vcombine.high %v4050_v13, %v4054_v9  ;;  %v9815_v46 = vcombine.high %v4178_v45, %v4182_v11  ;;  %v4046_v61 = vld [vmem:[%s11451_s2 + $0x230] sm:$0xff] }
 0x99a   : > { %7568 = vmatprep.subr.bf16.mxu1 %v9863_v48  ;;  %v4042_v48 = vld [vmem:[%s11451_s2 + $0x210] sm:$0xff] }
 0x99b   : > { %7528 = vmatpush2.bf16.msra.mxu0 %v9734_v4  ;;  %v4170_v54 = vld [vmem:[%s11451_s2 + $0x610] sm:$0xff]  ;;  %v9814_v4 = vcombine.low %v4178_v45, %v4182_v11  ;;  %v9678_v44 = vcombine.low %v4042_v48, %v4046_v61 }
 0x99c   : > { %7529 = vmatprep.subr.bf16.mxu0 %v9727_v0  ;;  %v4174_v58 = vld [vmem:[%s11451_s2 + $0x630] sm:$0xff] }
 0x99d   : > { %7569 = vmatpush2.bf16.msra.mxu1 %v9862_v57  ;;  %v9679_v57 = vcombine.high %v4042_v48, %v4046_v61  ;;  %v9807_v0 = vcombine.high %v4170_v54, %v4174_v58  ;;  %v4294_v55 = vld [vmem:[%s11451_s2 + $0x9f0] sm:$0xff] }
 0x99e   : > { %7570 = vmatprep.subr.bf16.mxu1 %v9855_v5  ;;  %v4290_v5 = vld [vmem:[%s11451_s2 + $0x9d0] sm:$0xff] }
 0x99f   : > { %7530 = vmatpush2.bf16.msra.mxu0 %v9726_v21  ;;  %v4418_v38 = vld [vmem:[%s11451_s2 + $0xdd0] sm:$0xff]  ;;  %v9806_v21 = vcombine.low %v4170_v54, %v4174_v58  ;;  %v9926_v17 = vcombine.low %v4290_v5, %v4294_v55 }
 0x9a0   : > { %7531 = vmatprep.subr.bf16.mxu0 %v9719_v25  ;;  %v4422_v29 = vld [vmem:[%s11451_s2 + $0xdf0] sm:$0xff] }
 0x9a1   : > { %7571 = vmatpush2.bf16.msra.mxu1 %v9854_v59  ;;  %v9927_v59 = vcombine.high %v4290_v5, %v4294_v55  ;;  %v10055_v25 = vcombine.high %v4418_v38, %v4422_v29  ;;  %v4286_v33 = vld [vmem:[%s11451_s2 + $0x9b0] sm:$0xff] }
 0x9a2   : > { %7572 = vmatprep.subr.bf16.mxu1 %v9847_v49  ;;  %v4282_v49 = vld [vmem:[%s11451_s2 + $0x990] sm:$0xff] }
 0x9a3   : > { %7532 = vmatpush2.bf16.msra.mxu0 %v9718_v39  ;;  %v4410_v32 = vld [vmem:[%s11451_s2 + $0xd90] sm:$0xff]  ;;  %v10054_v39 = vcombine.low %v4418_v38, %v4422_v29 }
 0x9a4   : > { %7533 = vmatprep.subr.bf16.mxu0 %v9711_v47  ;;  %v4414_v40 = vld [vmem:[%s11451_s2 + $0xdb0] sm:$0xff] }
 0x9a5   : > { %7573 = vmatpush2.bf16.msra.mxu1 %v9846_v36  ;;  %v9919_v36 = vcombine.high %v4282_v49, %v4286_v33  ;;  %v10047_v47 = vcombine.high %v4410_v32, %v4414_v40  ;;  %v4278_v24 = vld [vmem:[%s11451_s2 + $0x970] sm:$0xff]  ;;  %v10046_v12 = vcombine.low %v4410_v32, %v4414_v40 }
 0x9a6   : > { %7574 = vmatprep.subr.bf16.mxu1 %v9839_v16  ;;  %v4274_v16 = vld [vmem:[%s11451_s2 + $0x950] sm:$0xff] }
 0x9a7   : > { %7534 = vmatpush2.bf16.msra.mxu0 %v9710_v34  ;;  %v4402_v56 = vld [vmem:[%s11451_s2 + $0xd50] sm:$0xff]  ;;  %v9911_v10 = vcombine.high %v4274_v16, %v4278_v24 }
 0x9a8   : > { %7535 = vmatprep.subr.bf16.mxu0 %v9703_v28  ;;  %v4406_v20 = vld [vmem:[%s11451_s2 + $0xd70] sm:$0xff]  ;;  %v9918_v28 = vcombine.low %v4282_v49, %v4286_v33 }
 0x9a9   : > { %7575 = vmatpush2.bf16.msra.mxu1 %v9838_v42  ;;  %v4394_v13 = vld [vmem:[%s11451_s2 + $0xd10] sm:$0xff] }
 0x9aa   : > { %7576 = vmatprep.subr.bf16.mxu1 %v9831_v1  ;;  %v4398_v9 = vld [vmem:[%s11451_s2 + $0xd30] sm:$0xff] }
 0x9ab   : > { %7536 = vmatpush2.bf16.msra.mxu0 %v9702_v23  ;;  %v10031_v48 = vcombine.high %v4394_v13, %v4398_v9  ;;  %v4258_v61 = vld [vmem:[%s11451_s2 + $0x8d0] sm:$0xff] }
 0x9ac   : > { %7537 = vmatprep.subr.bf16.mxu0 %v9695_v27  ;;  %v4270_v27 = vld [vmem:[%s11451_s2 + $0x930] sm:$0xff] }
 0x9ad   : > { %7577 = vmatpush2.bf16.msra.mxu1 %v9830_v8  ;;  %v4266_v8 = vld [vmem:[%s11451_s2 + $0x910] sm:$0xff] }
 0x9ae   : > { %7578 = vmatprep.subr.bf16.mxu1 %v9823_v19  ;;  %v4262_v54 = vld [vmem:[%s11451_s2 + $0x8f0] sm:$0xff] }
 0x9af   : > { %7538 = vmatpush2.bf16.msra.mxu0 %v9694_v31  ;;  %v4386_v58 = vld [vmem:[%s11451_s2 + $0xcd0] sm:$0xff] }
 0x9b0   : > { %7539 = vmatprep.subr.bf16.mxu0 %v9687_v63  ;;  %v9903_v63 = vcombine.high %v4266_v8, %v4270_v27  ;;  %v4250_v55 = vld [vmem:[%s11451_s2 + $0x890] sm:$0xff] }
 0x9b1   : > { %7579 = vmatpush2.bf16.msra.mxu1 %v9822_v35  ;;  %v10038_v35 = vcombine.low %v4402_v56, %v4406_v20  ;;  %v4254_v38 = vld [vmem:[%s11451_s2 + $0x8b0] sm:$0xff] }
 0x9b2   : > { %7580 = vmatprep.subr.bf16.mxu1 %v9815_v46  ;;  %v4378_v29 = vld [vmem:[%s11451_s2 + $0xc90] sm:$0xff] }
 0x9b3   : > { %7540 = vmatpush2.bf16.msra.mxu0 %v9686_v53  ;;  %v4390_v53 = vld [vmem:[%s11451_s2 + $0xcf0] sm:$0xff] }
 0x9b4   : > { %7541 = vmatprep.subr.bf16.mxu0 %v9679_v57  ;;  %v10030_v57 = vcombine.low %v4394_v13, %v4398_v9  ;;  %v10023_v5 = vcombine.high %v4386_v58, %v4390_v53  ;;  %v4242_v33 = vld [vmem:[%s11451_s2 + $0x850] sm:$0xff] }
 0x9b5   : > { %7581 = vmatpush2.bf16.msra.mxu1 %v9814_v4  ;;  %v9902_v4 = vcombine.low %v4266_v8, %v4270_v27  ;;  %v4246_v32 = vld [vmem:[%s11451_s2 + $0x870] sm:$0xff] }
 0x9b6   : > { %7582 = vmatprep.subr.bf16.mxu1 %v9807_v0  ;;  %v9895_v0 = vcombine.high %v4258_v61, %v4262_v54  ;;  %v4370_v40 = vld [vmem:[%s11451_s2 + $0xc50] sm:$0xff] }
 0x9b7   : > { %7542 = vmatpush2.bf16.msra.mxu0 %v9678_v44  ;;  %v4382_v44 = vld [vmem:[%s11451_s2 + $0xcb0] sm:$0xff] }
 0x9b8   : > { %7593 = vmatprep.subr.bf16.mxu0 %v9927_v59  ;;  %v10022_v59 = vcombine.low %v4386_v58, %v4390_v53  ;;  %v10015_v49 = vcombine.high %v4378_v29, %v4382_v44  ;;  %v4346_v13 = vld [vmem:[%s11451_s2 + $0xb90] sm:$0xff] }
 0x9b9   : > { %7583 = vmatpush2.bf16.msra.mxu1 %v9806_v21  ;;  %v9894_v21 = vcombine.low %v4258_v61, %v4262_v54  ;;  %v4350_v9 = vld [vmem:[%s11451_s2 + $0xbb0] sm:$0xff] }
 0x9ba   : > { %7634 = vmatprep.subr.bf16.mxu1 %v10055_v25  ;;  %v7299_v30 = vpop.f32.mrf.mxu0  ;;  %7544 = vmatmul.mubr.bf16.vlgmr.msra.gmra.mxu0 %v13135_v14  ;;  %v9887_v25 = vcombine.high %v4250_v55, %v4254_v38  ;;  %v4342_v61 = vld [vmem:[%s11451_s2 + $0xb70] sm:$0xff]  ;;  %v9982_v53 = vcombine.low %v4346_v13, %v4350_v9 }
 0x9bb   : > { %v7300_v34 = vadd.f32 %v7299_v30, %v13385_v6  ;;  %7594 = vmatpush1.bf16.msra.mxu0 %v9926_v17  ;;  %v10039_v6 = vcombine.high %v4402_v56, %v4406_v20  ;;  %7625 = vmatprep.mubr.bf16.mxu0 %v13142_v37  ;;  %v4374_v17 = vld [vmem:[%s11451_s2 + $0xc70] sm:$0xff] }
 0x9bc   : > { %v7340_v42 = vpop.f32.mrf.mxu1  ;;  %7585 = vmatmul.mubr.bf16.vlgmr.msra.gmra.mxu1 %v13146_v26  ;;  %v7301_v1 = vpop.f32.mrf.mxu0  ;;  %7595 = vmatprep.subr.bf16.mxu0 %v9919_v36  ;;  %v10014_v36 = vcombine.low %v4378_v29, %v4382_v44  ;;  %v4238_v30 = vld [vmem:[%s11451_s2 + $0x830] sm:$0xff] }
 0x9bd   : > { %7635 = vmatpush1.bf16.msra.mxu1 %v10054_v39  ;;  %v13458_v51 = vadd.f32 %v7340_v42, %v7300_v34  ;;  %v7302_v43 = vadd.f32 %v7301_v1, %v13393_v3  ;;  %7666 = vmatprep.mubr.bf16.mxu1 %v13155_v7  ;;  %v9910_v3 = vcombine.low %v4274_v16, %v4278_v24  ;;  %v4234_v24 = vld [vmem:[%s11451_s2 + $0x810] sm:$0xff] }
 0x9be   : > { %v7342_v23 = vpop.f32.mrf.mxu1  ;;  %7636 = vmatprep.subr.bf16.mxu1 %v10047_v47  ;;  %v7303_v19 = vpop.f32.mrf.mxu0  ;;  %v9886_v39 = vcombine.low %v4250_v55, %v4254_v38  ;;  %v9879_v47 = vcombine.high %v4242_v33, %v4246_v32  ;;  %v10007_v16 = vcombine.high %v4370_v40, %v4374_v17  ;;  %v4362_v56 = vld [vmem:[%s11451_s2 + $0xc10] sm:$0xff]  ;;  %v9878_v34 = vcombine.low %v4242_v33, %v4246_v32 }
 0x9bf   : > { %v13467_v45 = vadd.f32 %v7342_v23, %v7302_v43  ;;  %7596 = vmatpush1.bf16.msra.mxu0 %v9918_v28  ;;  %v4366_v20 = vld [vmem:[%s11451_s2 + $0xc30] sm:$0xff]  ;;  %v10006_v42 = vcombine.low %v4370_v40, %v4374_v17  ;;  %v9871_v28 = vcombine.high %v4234_v24, %v4238_v30 }
 0x9c0   : > { %v7344_v11 = vpop.f32.mrf.mxu1  ;;  %v7304_v31 = vpop.f32.mrf.mxu0  ;;  %7597 = vmatprep.subr.bf16.mxu0 %v9911_v10  ;;  %v9999_v1 = vcombine.high %v4362_v56, %v4366_v20  ;;  %v4358_v10 = vld [vmem:[%s11451_s2 + $0xbf0] sm:$0xff]  ;;  %v9998_v8 = vcombine.low %v4362_v56, %v4366_v20 }
 0x9c1   : > { %7637 = vmatpush1.bf16.msra.mxu1 %v10046_v12  ;;  %v4354_v12 = vld [vmem:[%s11451_s2 + $0xbd0] sm:$0xff] }
 0x9c2   : > { %v7345_v46 = vpop.f32.mrf.mxu1  ;;  %7638 = vmatprep.subr.bf16.mxu1 %v10039_v6  ;;  %v4482_v43 = vld [vmem:[%s11451_s2 + $0xfd0] sm:$0xff]  ;;  %v9870_v6 = vcombine.low %v4234_v24, %v4238_v30  ;;  %v9991_v27 = vcombine.high %v4354_v12, %v4358_v10  ;;  %v9990_v31 = vcombine.low %v4354_v12, %v4358_v10 }
 0x9c3   : > { %7598 = vmatpush1.bf16.msra.mxu0 %v9910_v3  ;;  %v4486_v23 = vld [vmem:[%s11451_s2 + $0xff0] sm:$0xff] }
 0x9c4   : > { %7599 = vmatprep.subr.bf16.mxu0 %v9903_v63  ;;  %v10119_v19 = vcombine.high %v4482_v43, %v4486_v23  ;;  %v4474_v11 = vld [vmem:[%s11451_s2 + $0xf90] sm:$0xff]  ;;  %v9983_v63 = vcombine.high %v4346_v13, %v4350_v9 }
 0x9c5   : > { %7639 = vmatpush1.bf16.msra.mxu1 %v10038_v35  ;;  %v4478_v3 = vld [vmem:[%s11451_s2 + $0xfb0] sm:$0xff]  ;;  %v10118_v35 = vcombine.low %v4482_v43, %v4486_v23 }
 0x9c6   : > { %7640 = vmatprep.subr.bf16.mxu1 %v10031_v48  ;;  %v10111_v46 = vcombine.high %v4474_v11, %v4478_v3  ;;  %v4338_v48 = vld [vmem:[%s11451_s2 + $0xb50] sm:$0xff] }
 0x9c7   : > { %7600 = vmatpush1.bf16.msra.mxu0 %v9902_v4  ;;  %v4466_v54 = vld [vmem:[%s11451_s2 + $0xf50] sm:$0xff]  ;;  %v10110_v4 = vcombine.low %v4474_v11, %v4478_v3  ;;  %v9974_v44 = vcombine.low %v4338_v48, %v4342_v61 }
 0x9c8   : > { %7601 = vmatprep.subr.bf16.mxu0 %v9895_v0  ;;  %v4470_v58 = vld [vmem:[%s11451_s2 + $0xf70] sm:$0xff] }
 0x9c9   : > { %7641 = vmatpush1.bf16.msra.mxu1 %v10030_v57  ;;  %v9975_v57 = vcombine.high %v4338_v48, %v4342_v61  ;;  %v10103_v0 = vcombine.high %v4466_v54, %v4470_v58  ;;  %v4334_v55 = vld [vmem:[%s11451_s2 + $0xb30] sm:$0xff]  ;;  %v4035_v48 = vld [vmem:[%s11451_s2 + $0x1d8] sm:$0xff] }
 0x9ca   : > { %7642 = vmatprep.subr.bf16.mxu1 %v10023_v5  ;;  %v4330_v5 = vld [vmem:[%s11451_s2 + $0xb10] sm:$0xff]  ;;  %v4039_v61 = vld [vmem:[%s11451_s2 + $0x1f8] sm:$0xff] }
 0x9cb   : > { %7602 = vmatpush1.bf16.msra.mxu0 %v9894_v21  ;;  %v4458_v38 = vld [vmem:[%s11451_s2 + $0xf10] sm:$0xff]  ;;  %v10102_v21 = vcombine.low %v4466_v54, %v4470_v58  ;;  %v9966_v17 = vcombine.low %v4330_v5, %v4334_v55  ;;  %v13523_v54 = vsub.s32 6, %v13058_v22  ;;  %v4163_v58 = vld [vmem:[%s11451_s2 + $0x5d8] sm:$0xff] }
 0x9cc   : > { %7603 = vmatprep.subr.bf16.mxu0 %v9887_v25  ;;  %v4462_v29 = vld [vmem:[%s11451_s2 + $0xf30] sm:$0xff] }
 0x9cd   : > { %7643 = vmatpush1.bf16.msra.mxu1 %v10022_v59  ;;  %v9967_v59 = vcombine.high %v4330_v5, %v4334_v55  ;;  %v10095_v25 = vcombine.high %v4458_v38, %v4462_v29  ;;  %v4326_v33 = vld [vmem:[%s11451_s2 + $0xaf0] sm:$0xff]  ;;  %v9673_v5 = vcombine.high %v4035_v48, %v4039_v61 }
 0x9ce   : > { %7644 = vmatprep.subr.bf16.mxu1 %v10015_v49  ;;  %v4322_v49 = vld [vmem:[%s11451_s2 + $0xad0] sm:$0xff] }
 0x9cf   : > { %7604 = vmatpush1.bf16.msra.mxu0 %v9886_v39  ;;  %v4450_v32 = vld [vmem:[%s11451_s2 + $0xed0] sm:$0xff]  ;;  %v10094_v39 = vcombine.low %v4458_v38, %v4462_v29  ;;  %v9958_v20 = vcombine.low %v4322_v49, %v4326_v33  ;;  %v4508_v38 = vrot.slane %v13357_v62, %v13523_v54  ;;  %v4031_v29 = vld [vmem:[%s11451_s2 + $0x1b8] sm:$0xff] }
 0x9d0   : > { %7605 = vmatprep.subr.bf16.mxu0 %v9879_v47  ;;  %v4454_v40 = vld [vmem:[%s11451_s2 + $0xef0] sm:$0xff] }
 0x9d1   : > { %7645 = vmatpush1.bf16.msra.mxu1 %v10014_v36  ;;  %v9959_v36 = vcombine.high %v4322_v49, %v4326_v33  ;;  %v10087_v47 = vcombine.high %v4450_v32, %v4454_v40  ;;  %v4318_v24 = vld [vmem:[%s11451_s2 + $0xab0] sm:$0xff] }
 0x9d2   : > { %7646 = vmatprep.subr.bf16.mxu1 %v10007_v16  ;;  %v4314_v16 = vld [vmem:[%s11451_s2 + $0xa90] sm:$0xff] }
 0x9d3   : > { %7606 = vmatpush1.bf16.msra.mxu0 %v9878_v34  ;;  %v4442_v30 = vld [vmem:[%s11451_s2 + $0xe90] sm:$0xff]  ;;  %v10086_v34 = vcombine.low %v4450_v32, %v4454_v40  ;;  %v9950_v23 = vcombine.low %v4314_v16, %v4318_v24  ;;  %v4548_v32 = vrot.slane %v4508_v38, %v13360_v41 }
 0x9d4   : > { %7607 = vmatprep.subr.bf16.mxu0 %v9871_v28  ;;  %v4446_v56 = vld [vmem:[%s11451_s2 + $0xeb0] sm:$0xff] }
 0x9d5   : > { %7647 = vmatpush1.bf16.msra.mxu1 %v10006_v42  ;;  %v9951_v42 = vcombine.high %v4314_v16, %v4318_v24  ;;  %v10079_v28 = vcombine.high %v4442_v30, %v4446_v56  ;;  %v4310_v12 = vld [vmem:[%s11451_s2 + $0xa70] sm:$0xff] }
 0x9d6   : > { %7648 = vmatprep.subr.bf16.mxu1 %v9999_v1  ;;  %v4306_v1 = vld [vmem:[%s11451_s2 + $0xa50] sm:$0xff] }
 0x9d7   : > { %7608 = vmatpush1.bf16.msra.mxu0 %v9870_v6  ;;  %v4434_v10 = vld [vmem:[%s11451_s2 + $0xe50] sm:$0xff]  ;;  %v10078_v6 = vcombine.low %v4442_v30, %v4446_v56  ;;  %v9942_v3 = vcombine.low %v4306_v1, %v4310_v12 }
 0x9d8   : > { %7609 = vmatprep.subr.bf16.mxu0 %v9991_v27  ;;  %v4438_v43 = vld [vmem:[%s11451_s2 + $0xe70] sm:$0xff] }
 0x9d9   : > { %7649 = vmatpush1.bf16.msra.mxu1 %v9998_v8  ;;  %v9943_v8 = vcombine.high %v4306_v1, %v4310_v12  ;;  %v10071_v27 = vcombine.high %v4434_v10, %v4438_v43  ;;  %v4302_v13 = vld [vmem:[%s11451_s2 + $0xa30] sm:$0xff] }
 0x9da   : > { %7650 = vmatprep.subr.bf16.mxu1 %v10119_v19  ;;  %v4298_v19 = vld [vmem:[%s11451_s2 + $0xa10] sm:$0xff] }
 0x9db   : > { %7610 = vmatpush2.bf16.msra.mxu0 %v9990_v31  ;;  %v4426_v9 = vld [vmem:[%s11451_s2 + $0xe10] sm:$0xff]  ;;  %v13518_v31 = vsub.s32 4, %v13058_v22  ;;  %v4027_v22 = vld [vmem:[%s11451_s2 + $0x198] sm:$0xff] }
 0x9dc   : > { %7611 = vmatprep.subr.bf16.mxu0 %v9983_v63  ;;  %v4430_v11 = vld [vmem:[%s11451_s2 + $0xe30] sm:$0xff]  ;;  %v9935_v63 = vcombine.high %v4298_v19, %v4302_v13  ;;  %v9665_v33 = vcombine.high %v4027_v22, %v4031_v29  ;;  %v9664_v30 = vcombine.low %v4027_v22, %v4031_v29 }
 0x9dd   : > { %7651 = vmatpush2.bf16.msra.mxu1 %v10118_v35  ;;  %v10070_v35 = vcombine.low %v4434_v10, %v4438_v43  ;;  %v4011_v10 = vld [vmem:[%s11451_s2 + $0x118] sm:$0xff] }
 0x9de   : > { %7652 = vmatprep.subr.bf16.mxu1 %v10111_v46  ;;  %v10063_v46 = vcombine.high %v4426_v9, %v4430_v11  ;;  %v4015_v43 = vld [vmem:[%s11451_s2 + $0x138] sm:$0xff] }
 0x9df   : > { %7612 = vmatpush2.bf16.msra.mxu0 %v9982_v53  ;;  %v4167_v53 = vld [vmem:[%s11451_s2 + $0x5f8] sm:$0xff] }
 0x9e0   : > { %7613 = vmatprep.subr.bf16.mxu0 %v9975_v57  ;;  %v4504_v57 = vrot.slane %v13357_v62, %v13518_v31  ;;  %v9801_v55 = vcombine.high %v4163_v58, %v4167_v53  ;;  %v9800_v49 = vcombine.low %v4163_v58, %v4167_v53  ;;  %v4019_v62 = vld [vmem:[%s11451_s2 + $0x158] sm:$0xff] }
 0x9e1   : > { %7653 = vmatpush2.bf16.msra.mxu1 %v10110_v4  ;;  %v9934_v4 = vcombine.low %v4298_v19, %v4302_v13 }
 0x9e2   : > { %7654 = vmatprep.subr.bf16.mxu1 %v10103_v0  ;;  %v10062_v0 = vcombine.low %v4426_v9, %v4430_v11 }
 0x9e3   : > { %7614 = vmatpush2.bf16.msra.mxu0 %v9974_v44  ;;  %v4155_v44 = vld [vmem:[%s11451_s2 + $0x598] sm:$0xff] }
 0x9e4   : > { %7615 = vmatprep.subr.bf16.mxu0 %v9967_v59  ;;  %v4544_v59 = vrot.slane %v4504_v57, %v13360_v41  ;;  %v3995_v57 = vld [vmem:[%s11451_s2 + $0x98] sm:$0xff] }
 0x9e5   : > { %7655 = vmatpush2.bf16.msra.mxu1 %v10102_v21  ;;  %v4159_v21 = vld [vmem:[%s11451_s2 + $0x5b8] sm:$0xff] }
 0x9e6   : > { %7656 = vmatprep.subr.bf16.mxu1 %v10095_v25  ;;  %v9672_v25 = vcombine.low %v4035_v48, %v4039_v61  ;;  %v9793_v40 = vcombine.high %v4155_v44, %v4159_v21  ;;  %v4135_v48 = vld [vmem:[%s11451_s2 + $0x4f8] sm:$0xff]  ;;  %v9648_v61 = vcombine.low %v4011_v10, %v4015_v43 }
 0x9e7   : > { %7616 = vmatpush2.bf16.msra.mxu0 %v9966_v17  ;;  %v4023_v17 = vld [vmem:[%s11451_s2 + $0x178] sm:$0xff] }
 0x9e8   : > { %7617 = vmatprep.subr.bf16.mxu0 %v9959_v36  ;;  %v4147_v36 = vld [vmem:[%s11451_s2 + $0x558] sm:$0xff]  ;;  %v9656_v13 = vcombine.low %v4019_v62, %v4023_v17 }
 0x9e9   : > { %7657 = vmatpush2.bf16.msra.mxu1 %v10094_v39 }
 0x9ea   : > { %7658 = vmatprep.subr.bf16.mxu1 %v10087_v47  ;;  %v4151_v47 = vld [vmem:[%s11451_s2 + $0x578] sm:$0xff] }
 0x9eb   : > { %7618 = vmatpush2.bf16.msra.mxu0 %v9958_v20  ;;  %v9792_v20 = vcombine.low %v4155_v44, %v4159_v21  ;;  %v9785_v12 = vcombine.high %v4147_v36, %v4151_v47  ;;  %v9784_v11 = vcombine.low %v4147_v36, %v4151_v47  ;;  %v3987_v21 = vld [vmem:[%s11451_s2 + $0x58] sm:$0xff] }
 0x9ec   : > { %7619 = vmatprep.subr.bf16.mxu0 %v9951_v42  ;;  %v4107_v36 = vld [vmem:[%s11451_s2 + $0x418] sm:$0xff] }
 0x9ed   : > { %7659 = vmatpush2.bf16.msra.mxu1 %v10086_v34  ;;  %v9657_v34 = vcombine.high %v4019_v62, %v4023_v17  ;;  %v3979_v17 = vld [vmem:[%s11451_s2 + $0x18] sm:$0xff] }
 0x9ee   : > { %7660 = vmatprep.subr.bf16.mxu1 %v10079_v28  ;;  %v4111_v47 = vld [vmem:[%s11451_s2 + $0x438] sm:$0xff] }
 0x9ef   : > { %7620 = vmatpush2.bf16.msra.mxu0 %v9950_v23 }
 0x9f0   : > { %7621 = vmatprep.subr.bf16.mxu0 %v9943_v8  ;;  %v4143_v8 = vld [vmem:[%s11451_s2 + $0x538] sm:$0xff] }
 0x9f1   : > { %7661 = vmatpush2.bf16.msra.mxu1 %v10078_v6  ;;  %v4139_v6 = vld [vmem:[%s11451_s2 + $0x518] sm:$0xff] }
 0x9f2   : > { %7662 = vmatprep.subr.bf16.mxu1 %v10071_v27  ;;  %v9776_v58 = vcombine.low %v4139_v6, %v4143_v8 }
 0x9f3   : > { %7622 = vmatpush2.bf16.msra.mxu0 %v9942_v3  ;;  %v9649_v3 = vcombine.high %v4011_v10, %v4015_v43  ;;  %v9744_v10 = vcombine.low %v4107_v36, %v4111_v47 }
 0x9f4   : > { %7623 = vmatprep.subr.bf16.mxu0 %v9935_v63  ;;  %v4003_v63 = vld [vmem:[%s11451_s2 + $0xd8] sm:$0xff] }
 0x9f5   : > { %7663 = vmatpush2.bf16.msra.mxu1 %v10070_v35  ;;  %v9777_v35 = vcombine.high %v4139_v6, %v4143_v8  ;;  %v4091_v6 = vld [vmem:[%s11451_s2 + $0x398] sm:$0xff] }
 0x9f6   : > { %7664 = vmatprep.subr.bf16.mxu1 %v10063_v46  ;;  %v4131_v46 = vld [vmem:[%s11451_s2 + $0x4d8] sm:$0xff] }
 0x9f7   : > { %7624 = vmatpush2.bf16.msra.mxu0 %v9934_v4  ;;  %v9769_v4 = vcombine.high %v4131_v46, %v4135_v48  ;;  %v9768_v22 = vcombine.low %v4131_v46, %v4135_v48  ;;  %v4095_v8 = vld [vmem:[%s11451_s2 + $0x3b8] sm:$0xff] }
 0x9f8   : > { %7675 = vmatprep.subr.bf16.mxu0 %v9673_v5  ;;  %v4123_v5 = vld [vmem:[%s11451_s2 + $0x498] sm:$0xff]  ;;  %v9728_v48 = vcombine.low %v4091_v6, %v4095_v8 }
 0x9f9   : > { %7665 = vmatpush2.bf16.msra.mxu1 %v10062_v0  ;;  %v3999_v0 = vld [vmem:[%s11451_s2 + $0xb8] sm:$0xff] }
 0x9fa   : > { %7716 = vmatprep.subr.bf16.mxu1 %v9801_v55  ;;  %v7381_v39 = vpop.f32.mrf.mxu0  ;;  %7626 = vmatmul.mubr.bf16.vlgmr.msra.gmra.mxu0 %v13218_v52  ;;  %v4127_v55 = vld [vmem:[%s11451_s2 + $0x4b8] sm:$0xff]  ;;  %v9633_v29 = vcombine.high %v3995_v57, %v3999_v0 }
 0x9fb   : > { %v7382_v16 = vadd.f32 %v7381_v39, %v4544_v59  ;;  %7676 = vmatpush1.bf16.msra.mxu0 %v9672_v25  ;;  %7707 = vmatprep.mubr.bf16.mxu0 %v13084_v15  ;;  %v9761_v44 = vcombine.high %v4123_v5, %v4127_v55  ;;  %v3991_v59 = vld [vmem:[%s11451_s2 + $0x78] sm:$0xff] }
 0x9fc   : > { %v7422_v24 = vpop.f32.mrf.mxu1  ;;  %7667 = vmatmul.mubr.bf16.vlgmr.msra.gmra.mxu1 %v13226_v18  ;;  %v7383_v56 = vpop.f32.mrf.mxu0  ;;  %7677 = vmatprep.subr.bf16.mxu0 %v9665_v33  ;;  %v4115_v25 = vld [vmem:[%s11451_s2 + $0x458] sm:$0xff]  ;;  %v9632_v33 = vcombine.low %v3995_v57, %v3999_v0 }
 0x9fd   : > { %7717 = vmatpush1.bf16.msra.mxu1 %v9800_v49  ;;  %v13543_v42 = vadd.f32 %v7422_v24, %v7382_v16  ;;  %v7384_v28 = vadd.f32 %v7383_v56, %v4548_v32  ;;  %7748 = vmatprep.mubr.bf16.mxu1 %v13091_v60  ;;  %v4007_v60 = vld [vmem:[%s11451_s2 + $0xf8] sm:$0xff]  ;;  %v9760_v32 = vcombine.low %v4123_v5, %v4127_v55 }
 0x9fe   : > { %v7424_v1 = vpop.f32.mrf.mxu1  ;;  %7718 = vmatprep.subr.bf16.mxu1 %v9793_v40  ;;  %v7385_v23 = vpop.f32.mrf.mxu0  ;;  %v9641_v53 = vcombine.high %v4003_v63, %v4007_v60  ;;  %v9640_v38 = vcombine.low %v4003_v63, %v4007_v60  ;;  %v4119_v49 = vld [vmem:[%s11451_s2 + $0x478] sm:$0xff]  ;;  %v9625_v40 = vcombine.high %v3987_v21, %v3991_v59  ;;  %v9624_v16 = vcombine.low %v3987_v21, %v3991_v59 }
 0x9ff   : > { %v13551_v27 = vadd.f32 %v7424_v1, %v7384_v28  ;;  %7678 = vmatpush1.bf16.msra.mxu0 %v9664_v30  ;;  %v9753_v62 = vcombine.high %v4115_v25, %v4119_v49  ;;  %v3983_v39 = vld [vmem:[%s11451_s2 + $0x38] sm:$0xff]  ;;  %v9752_v24 = vcombine.low %v4115_v25, %v4119_v49  ;;  %v9745_v56 = vcombine.high %v4107_v36, %v4111_v47 }
 0xa00   : > { %v7426_v19 = vpop.f32.mrf.mxu1  ;;  %v7386_v9 = vpop.f32.mrf.mxu0  ;;  %7679 = vmatprep.subr.bf16.mxu0 %v9657_v34  ;;  %v9617_v30 = vcombine.high %v3979_v17, %v3983_v39  ;;  %v4103_v34 = vld [vmem:[%s11451_s2 + $0x3f8] sm:$0xff] }
 0xa01   : > { %7719 = vmatpush1.bf16.msra.mxu1 %v9792_v20  ;;  %v4099_v20 = vld [vmem:[%s11451_s2 + $0x3d8] sm:$0xff] }
 0xa02   : > { %v7427_v15 = vpop.f32.mrf.mxu1  ;;  %7720 = vmatprep.subr.bf16.mxu1 %v9785_v12  ;;  %v4227_v28 = vld [vmem:[%s11451_s2 + $0x7d8] sm:$0xff]  ;;  %v9616_v12 = vcombine.low %v3979_v17, %v3983_v39  ;;  %v9737_v43 = vcombine.high %v4099_v20, %v4103_v34  ;;  %v9736_v9 = vcombine.low %v4099_v20, %v4103_v34 }
 0xa03   : > { %7680 = vmatpush1.bf16.msra.mxu0 %v9656_v13  ;;  %v4231_v1 = vld [vmem:[%s11451_s2 + $0x7f8] sm:$0xff] }
 0xa04   : > { %7681 = vmatprep.subr.bf16.mxu0 %v9649_v3  ;;  %v9865_v23 = vcombine.high %v4227_v28, %v4231_v1  ;;  %v4219_v19 = vld [vmem:[%s11451_s2 + $0x798] sm:$0xff]  ;;  %v9729_v3 = vcombine.high %v4091_v6, %v4095_v8 }
 0xa05   : > { %7721 = vmatpush1.bf16.msra.mxu1 %v9784_v11  ;;  %v4223_v13 = vld [vmem:[%s11451_s2 + $0x7b8] sm:$0xff]  ;;  %v9864_v11 = vcombine.low %v4227_v28, %v4231_v1 }
 0xa06   : > { %7722 = vmatprep.subr.bf16.mxu1 %v9777_v35  ;;  %v9857_v15 = vcombine.high %v4219_v19, %v4223_v13  ;;  %v4083_v35 = vld [vmem:[%s11451_s2 + $0x358] sm:$0xff] }
 0xa07   : > { %7682 = vmatpush1.bf16.msra.mxu0 %v9648_v61  ;;  %v4087_v63 = vld [vmem:[%s11451_s2 + $0x378] sm:$0xff]  ;;  %v9856_v61 = vcombine.low %v4219_v19, %v4223_v13 }
 0xa08   : > { %7683 = vmatprep.subr.bf16.mxu0 %v9641_v53  ;;  %v4211_v60 = vld [vmem:[%s11451_s2 + $0x758] sm:$0xff]  ;;  %v9720_v55 = vcombine.low %v4083_v35, %v4087_v63 }
 0xa09   : > { %7723 = vmatpush1.bf16.msra.mxu1 %v9776_v58  ;;  %v4215_v46 = vld [vmem:[%s11451_s2 + $0x778] sm:$0xff]  ;;  %v9721_v58 = vcombine.high %v4083_v35, %v4087_v63 }
 0xa0a   : > { %7724 = vmatprep.subr.bf16.mxu1 %v9769_v4  ;;  %v9849_v53 = vcombine.high %v4211_v60, %v4215_v46  ;;  %v4075_v4 = vld [vmem:[%s11451_s2 + $0x318] sm:$0xff] }
 0xa0b   : > { %7684 = vmatpush1.bf16.msra.mxu0 %v9640_v38  ;;  %v4079_v57 = vld [vmem:[%s11451_s2 + $0x338] sm:$0xff]  ;;  %v9848_v38 = vcombine.low %v4211_v60, %v4215_v46 }
 0xa0c   : > { %7685 = vmatprep.subr.bf16.mxu0 %v9633_v29  ;;  %v4203_v0 = vld [vmem:[%s11451_s2 + $0x718] sm:$0xff]  ;;  %v9712_v49 = vcombine.low %v4075_v4, %v4079_v57 }
 0xa0d   : > { %7725 = vmatpush1.bf16.msra.mxu1 %v9768_v22  ;;  %v4207_v5 = vld [vmem:[%s11451_s2 + $0x738] sm:$0xff]  ;;  %v9713_v22 = vcombine.high %v4075_v4, %v4079_v57 }
 0xa0e   : > { %7726 = vmatprep.subr.bf16.mxu1 %v9761_v44  ;;  %v9841_v29 = vcombine.high %v4203_v0, %v4207_v5  ;;  %v4067_v44 = vld [vmem:[%s11451_s2 + $0x2d8] sm:$0xff] }
 0xa0f   : > { %7686 = vmatpush1.bf16.msra.mxu0 %v9632_v33  ;;  %v4071_v21 = vld [vmem:[%s11451_s2 + $0x2f8] sm:$0xff]  ;;  %v9840_v33 = vcombine.low %v4203_v0, %v4207_v5 }
 0xa10   : > { %7687 = vmatprep.subr.bf16.mxu0 %v9625_v40  ;;  %v4195_v59 = vld [vmem:[%s11451_s2 + $0x6d8] sm:$0xff]  ;;  %v9704_v47 = vcombine.low %v4067_v44, %v4071_v21 }
 0xa11   : > { %7727 = vmatpush1.bf16.msra.mxu1 %v9760_v32  ;;  %v4199_v25 = vld [vmem:[%s11451_s2 + $0x6f8] sm:$0xff]  ;;  %v9705_v32 = vcombine.high %v4067_v44, %v4071_v21 }
 0xa12   : > { %7728 = vmatprep.subr.bf16.mxu1 %v9753_v62  ;;  %v9833_v40 = vcombine.high %v4195_v59, %v4199_v25  ;;  %v4059_v62 = vld [vmem:[%s11451_s2 + $0x298] sm:$0xff] }
 0xa13   : > { %7688 = vmatpush1.bf16.msra.mxu0 %v9624_v16  ;;  %v4063_v17 = vld [vmem:[%s11451_s2 + $0x2b8] sm:$0xff]  ;;  %v9832_v16 = vcombine.low %v4195_v59, %v4199_v25 }
 0xa14   : > { %7689 = vmatprep.subr.bf16.mxu0 %v9617_v30  ;;  %v4187_v39 = vld [vmem:[%s11451_s2 + $0x698] sm:$0xff]  ;;  %v9696_v1 = vcombine.low %v4059_v62, %v4063_v17 }
 0xa15   : > { %7729 = vmatpush1.bf16.msra.mxu1 %v9752_v24  ;;  %v4191_v36 = vld [vmem:[%s11451_s2 + $0x6b8] sm:$0xff]  ;;  %v9697_v24 = vcombine.high %v4059_v62, %v4063_v17 }
 0xa16   : > { %7730 = vmatprep.subr.bf16.mxu1 %v9745_v56  ;;  %v9825_v30 = vcombine.high %v4187_v39, %v4191_v36  ;;  %v4051_v56 = vld [vmem:[%s11451_s2 + $0x258] sm:$0xff] }
 0xa17   : > { %7690 = vmatpush1.bf16.msra.mxu0 %v9616_v12  ;;  %v4055_v20 = vld [vmem:[%s11451_s2 + $0x278] sm:$0xff]  ;;  %v9824_v12 = vcombine.low %v4187_v39, %v4191_v36 }
 0xa18   : > { %7691 = vmatprep.subr.bf16.mxu0 %v9737_v43  ;;  %v4179_v34 = vld [vmem:[%s11451_s2 + $0x658] sm:$0xff]  ;;  %v9688_v13 = vcombine.low %v4051_v56, %v4055_v20 }
 0xa19   : > { %7731 = vmatpush1.bf16.msra.mxu1 %v9744_v10  ;;  %v4183_v28 = vld [vmem:[%s11451_s2 + $0x678] sm:$0xff]  ;;  %v9689_v10 = vcombine.high %v4051_v56, %v4055_v20 }
 0xa1a   : > { %7732 = vmatprep.subr.bf16.mxu1 %v9865_v23  ;;  %v9817_v43 = vcombine.high %v4179_v34, %v4183_v28  ;;  %v4043_v23 = vld [vmem:[%s11451_s2 + $0x218] sm:$0xff] }
 0xa1b   : > { %7692 = vmatpush2.bf16.msra.mxu0 %v9736_v9  ;;  %v4047_v6 = vld [vmem:[%s11451_s2 + $0x238] sm:$0xff]  ;;  %v9816_v9 = vcombine.low %v4179_v34, %v4183_v28 }
 0xa1c   : > { %7693 = vmatprep.subr.bf16.mxu0 %v9729_v3  ;;  %v4171_v8 = vld [vmem:[%s11451_s2 + $0x618] sm:$0xff]  ;;  %v9680_v46 = vcombine.low %v4043_v23, %v4047_v6 }
 0xa1d   : > { %7733 = vmatpush2.bf16.msra.mxu1 %v9864_v11  ;;  %v4175_v19 = vld [vmem:[%s11451_s2 + $0x638] sm:$0xff]  ;;  %v9681_v11 = vcombine.high %v4043_v23, %v4047_v6 }
 0xa1e   : > { %7734 = vmatprep.subr.bf16.mxu1 %v9857_v15  ;;  %v9809_v3 = vcombine.high %v4171_v8, %v4175_v19  ;;  %v4291_v15 = vld [vmem:[%s11451_s2 + $0x9d8] sm:$0xff] }
 0xa1f   : > { %7694 = vmatpush2.bf16.msra.mxu0 %v9728_v48  ;;  %v4295_v35 = vld [vmem:[%s11451_s2 + $0x9f8] sm:$0xff]  ;;  %v9808_v48 = vcombine.low %v4171_v8, %v4175_v19 }
 0xa20   : > { %7695 = vmatprep.subr.bf16.mxu0 %v9721_v58  ;;  %v4419_v63 = vld [vmem:[%s11451_s2 + $0xdd8] sm:$0xff]  ;;  %v9928_v5 = vcombine.low %v4291_v15, %v4295_v35 }
 0xa21   : > { %7735 = vmatpush2.bf16.msra.mxu1 %v9856_v61  ;;  %v4423_v60 = vld [vmem:[%s11451_s2 + $0xdf8] sm:$0xff]  ;;  %v9929_v61 = vcombine.high %v4291_v15, %v4295_v35 }
 0xa22   : > { %7736 = vmatprep.subr.bf16.mxu1 %v9849_v53  ;;  %v10057_v58 = vcombine.high %v4419_v63, %v4423_v60  ;;  %v4283_v53 = vld [vmem:[%s11451_s2 + $0x998] sm:$0xff] }
 0xa23   : > { %7696 = vmatpush2.bf16.msra.mxu0 %v9720_v55  ;;  %v4287_v4 = vld [vmem:[%s11451_s2 + $0x9b8] sm:$0xff]  ;;  %v10056_v55 = vcombine.low %v4419_v63, %v4423_v60 }
 0xa24   : > { %7697 = vmatprep.subr.bf16.mxu0 %v9713_v22  ;;  %v4411_v57 = vld [vmem:[%s11451_s2 + $0xd98] sm:$0xff] }
 0xa25   : > { %7737 = vmatpush2.bf16.msra.mxu1 %v9848_v38  ;;  %v4415_v0 = vld [vmem:[%s11451_s2 + $0xdb8] sm:$0xff]  ;;  %v9921_v38 = vcombine.high %v4283_v53, %v4287_v4 }
 0xa26   : > { %7738 = vmatprep.subr.bf16.mxu1 %v9841_v29  ;;  %v10049_v22 = vcombine.high %v4411_v57, %v4415_v0  ;;  %v4275_v29 = vld [vmem:[%s11451_s2 + $0x958] sm:$0xff]  ;;  %v10048_v62 = vcombine.low %v4411_v57, %v4415_v0 }
 0xa27   : > { %7698 = vmatpush2.bf16.msra.mxu0 %v9712_v49  ;;  %v4279_v44 = vld [vmem:[%s11451_s2 + $0x978] sm:$0xff] }
 0xa28   : > { %7699 = vmatprep.subr.bf16.mxu0 %v9705_v32  ;;  %v4403_v59 = vld [vmem:[%s11451_s2 + $0xd58] sm:$0xff]  ;;  %v9920_v32 = vcombine.low %v4283_v53, %v4287_v4  ;;  %v9913_v17 = vcombine.high %v4275_v29, %v4279_v44 }
 0xa29   : > { %7739 = vmatpush2.bf16.msra.mxu1 %v9840_v33  ;;  %v4407_v25 = vld [vmem:[%s11451_s2 + $0xd78] sm:$0xff] }
 0xa2a   : > { %7740 = vmatprep.subr.bf16.mxu1 %v9833_v40  ;;  %v10040_v28 = vcombine.low %v4403_v59, %v4407_v25  ;;  %v4391_v23 = vld [vmem:[%s11451_s2 + $0xcf8] sm:$0xff] }
 0xa2b   : > { %7700 = vmatpush2.bf16.msra.mxu0 %v9704_v47  ;;  %v4267_v47 = vld [vmem:[%s11451_s2 + $0x918] sm:$0xff] }
 0xa2c   : > { %7701 = vmatprep.subr.bf16.mxu0 %v9697_v24  ;;  %v4395_v24 = vld [vmem:[%s11451_s2 + $0xd18] sm:$0xff] }
 0xa2d   : > { %7741 = vmatpush2.bf16.msra.mxu1 %v9832_v16  ;;  %v4271_v16 = vld [vmem:[%s11451_s2 + $0x938] sm:$0xff] }
 0xa2e   : > { %7742 = vmatprep.subr.bf16.mxu1 %v9825_v30  ;;  %v4399_v30 = vld [vmem:[%s11451_s2 + $0xd38] sm:$0xff]  ;;  %v9904_v6 = vcombine.low %v4267_v47, %v4271_v16 }
 0xa2f   : > { %7702 = vmatpush2.bf16.msra.mxu0 %v9696_v1  ;;  %v9905_v1 = vcombine.high %v4267_v47, %v4271_v16  ;;  %v10032_v8 = vcombine.low %v4395_v24, %v4399_v30  ;;  %v4383_v15 = vld [vmem:[%s11451_s2 + $0xcb8] sm:$0xff] }
 0xa30   : > { %7703 = vmatprep.subr.bf16.mxu0 %v9689_v10  ;;  %v4259_v10 = vld [vmem:[%s11451_s2 + $0x8d8] sm:$0xff] }
 0xa31   : > { %7743 = vmatpush2.bf16.msra.mxu1 %v9824_v12  ;;  %v10033_v12 = vcombine.high %v4395_v24, %v4399_v30  ;;  %v4375_v53 = vld [vmem:[%s11451_s2 + $0xc78] sm:$0xff] }
 0xa32   : > { %7744 = vmatprep.subr.bf16.mxu1 %v9817_v43  ;;  %v4387_v43 = vld [vmem:[%s11451_s2 + $0xcd8] sm:$0xff] }
 0xa33   : > { %7704 = vmatpush2.bf16.msra.mxu0 %v9688_v13  ;;  %v10025_v13 = vcombine.high %v4387_v43, %v4391_v23  ;;  %v10024_v63 = vcombine.low %v4387_v43, %v4391_v23  ;;  %v4351_v47 = vld [vmem:[%s11451_s2 + $0xbb8] sm:$0xff] }
 0xa34   : > { %7705 = vmatprep.subr.bf16.mxu0 %v9681_v11  ;;  %v4255_v11 = vld [vmem:[%s11451_s2 + $0x8b8] sm:$0xff] }
 0xa35   : > { %7745 = vmatpush2.bf16.msra.mxu1 %v9816_v9  ;;  %v4251_v9 = vld [vmem:[%s11451_s2 + $0x898] sm:$0xff] }
 0xa36   : > { %7746 = vmatprep.subr.bf16.mxu1 %v9809_v3  ;;  %v4379_v3 = vld [vmem:[%s11451_s2 + $0xc98] sm:$0xff]  ;;  %v9889_v60 = vcombine.high %v4251_v9, %v4255_v11  ;;  %v9888_v4 = vcombine.low %v4251_v9, %v4255_v11 }
 0xa37   : > { %7706 = vmatpush2.bf16.msra.mxu0 %v9680_v46  ;;  %v10017_v46 = vcombine.high %v4379_v3, %v4383_v15  ;;  %v10016_v57 = vcombine.low %v4379_v3, %v4383_v15  ;;  %v4475_v16 = vld [vmem:[%s11451_s2 + $0xf98] sm:$0xff] }
 0xa38   : > { %7757 = vmatprep.subr.bf16.mxu0 %v9929_v61  ;;  %v4247_v61 = vld [vmem:[%s11451_s2 + $0x878] sm:$0xff] }
 0xa39   : > { %7747 = vmatpush2.bf16.msra.mxu1 %v9808_v48  ;;  %v4243_v48 = vld [vmem:[%s11451_s2 + $0x858] sm:$0xff] }
 0xa3a   : > { %7798 = vmatprep.subr.bf16.mxu1 %v10057_v58  ;;  %v7463_v21 = vpop.f32.mrf.mxu0  ;;  %7708 = vmatmul.mubr.bf16.vlgmr.msra.gmra.mxu0 %v13135_v14  ;;  %v4371_v58 = vld [vmem:[%s11451_s2 + $0xc58] sm:$0xff]  ;;  %v9881_v0 = vcombine.high %v4243_v48, %v4247_v61 }
 0xa3b   : > { %v7464_v49 = vadd.f32 %v7463_v21, %v13543_v42  ;;  %7758 = vmatpush1.bf16.msra.mxu0 %v9928_v5  ;;  %v10041_v42 = vcombine.high %v4403_v59, %v4407_v25  ;;  %7789 = vmatprep.mubr.bf16.mxu0 %v13142_v37  ;;  %v10009_v5 = vcombine.high %v4371_v58, %v4375_v53  ;;  %v4331_v23 = vld [vmem:[%s11451_s2 + $0xb18] sm:$0xff] }
 0xa3c   : > { %v7504_v33 = vpop.f32.mrf.mxu1  ;;  %7749 = vmatmul.mubr.bf16.vlgmr.msra.gmra.mxu1 %v13146_v26  ;;  %v7465_v40 = vpop.f32.mrf.mxu0  ;;  %7759 = vmatprep.subr.bf16.mxu0 %v9921_v38  ;;  %v4239_v38 = vld [vmem:[%s11451_s2 + $0x838] sm:$0xff]  ;;  %v10008_v21 = vcombine.low %v4371_v58, %v4375_v53 }
 0xa3d   : > { %7799 = vmatpush1.bf16.msra.mxu1 %v10056_v55  ;;  %v13616_v39 = vadd.f32 %v7504_v33, %v7464_v49  ;;  %v7466_v14 = vadd.f32 %v7465_v40, %v13551_v27  ;;  %7830 = vmatprep.mubr.bf16.mxu1 %v13155_v7  ;;  %v9912_v27 = vcombine.low %v4275_v29, %v4279_v44  ;;  %v4263_v7 = vld [vmem:[%s11451_s2 + $0x8f8] sm:$0xff] }
 0xa3e   : > { %v7506_v36 = vpop.f32.mrf.mxu1  ;;  %7800 = vmatprep.subr.bf16.mxu1 %v10049_v22  ;;  %v7467_v26 = vpop.f32.mrf.mxu0  ;;  %v9897_v19 = vcombine.high %v4259_v10, %v4263_v7  ;;  %v9896_v35 = vcombine.low %v4259_v10, %v4263_v7  ;;  %v4235_v55 = vld [vmem:[%s11451_s2 + $0x818] sm:$0xff]  ;;  %v9880_v44 = vcombine.low %v4243_v48, %v4247_v61 }
 0xa3f   : > { %v13625_v56 = vadd.f32 %v7506_v36, %v7466_v14  ;;  %7760 = vmatpush1.bf16.msra.mxu0 %v9920_v32  ;;  %v4363_v22 = vld [vmem:[%s11451_s2 + $0xc18] sm:$0xff]  ;;  %v9873_v59 = vcombine.high %v4235_v55, %v4239_v38 }
 0xa40   : > { %v7508_v20 = vpop.f32.mrf.mxu1  ;;  %v7468_v34 = vpop.f32.mrf.mxu0  ;;  %7761 = vmatprep.subr.bf16.mxu0 %v9913_v17  ;;  %v4367_v29 = vld [vmem:[%s11451_s2 + $0xc38] sm:$0xff] }
 0xa41   : > { %7801 = vmatpush1.bf16.msra.mxu1 %v10048_v62  ;;  %v10001_v25 = vcombine.high %v4363_v22, %v4367_v29  ;;  %v4355_v49 = vld [vmem:[%s11451_s2 + $0xbd8] sm:$0xff]  ;;  %v9872_v62 = vcombine.low %v4235_v55, %v4239_v38  ;;  %v10000_v17 = vcombine.low %v4363_v22, %v4367_v29 }
 0xa42   : > { %v7509_v37 = vpop.f32.mrf.mxu1  ;;  %7802 = vmatprep.subr.bf16.mxu1 %v10041_v42  ;;  %v4359_v33 = vld [vmem:[%s11451_s2 + $0xbf8] sm:$0xff] }
 0xa43   : > { %7762 = vmatpush1.bf16.msra.mxu0 %v9912_v27  ;;  %v4483_v32 = vld [vmem:[%s11451_s2 + $0xfd8] sm:$0xff]  ;;  %v9993_v14 = vcombine.high %v4355_v49, %v4359_v33  ;;  %v9992_v24 = vcombine.low %v4355_v49, %v4359_v33 }
 0xa44   : > { %7763 = vmatprep.subr.bf16.mxu0 %v9905_v1  ;;  %v4487_v40 = vld [vmem:[%s11451_s2 + $0xff8] sm:$0xff] }
 0xa45   : > { %7803 = vmatpush1.bf16.msra.mxu1 %v10040_v28  ;;  %v10121_v36 = vcombine.high %v4483_v32, %v4487_v40  ;;  %v4347_v42 = vld [vmem:[%s11451_s2 + $0xb98] sm:$0xff]  ;;  %v10120_v30 = vcombine.low %v4483_v32, %v4487_v40 }
 0xa46   : > { %7804 = vmatprep.subr.bf16.mxu1 %v10033_v12  ;;  %v4479_v26 = vld [vmem:[%s11451_s2 + $0xfb8] sm:$0xff]  ;;  %v9985_v20 = vcombine.high %v4347_v42, %v4351_v47  ;;  %v9984_v12 = vcombine.low %v4347_v42, %v4351_v47 }
 0xa47   : > { %7764 = vmatpush1.bf16.msra.mxu0 %v9904_v6  ;;  %v10113_v27 = vcombine.high %v4475_v16, %v4479_v26  ;;  %v4339_v34 = vld [vmem:[%s11451_s2 + $0xb58] sm:$0xff]  ;;  %v10112_v10 = vcombine.low %v4475_v16, %v4479_v26 }
 0xa48   : > { %7765 = vmatprep.subr.bf16.mxu0 %v9897_v19  ;;  %v4343_v28 = vld [vmem:[%s11451_s2 + $0xb78] sm:$0xff] }
 0xa49   : > { %7805 = vmatpush1.bf16.msra.mxu1 %v10032_v8  ;;  %v4467_v1 = vld [vmem:[%s11451_s2 + $0xf58] sm:$0xff]  ;;  %v9977_v7 = vcombine.high %v4339_v34, %v4343_v28 }
 0xa4a   : > { %7806 = vmatprep.subr.bf16.mxu1 %v10025_v13  ;;  %v4471_v37 = vld [vmem:[%s11451_s2 + $0xf78] sm:$0xff]  ;;  %v9976_v13 = vcombine.low %v4339_v34, %v4343_v28 }
 0xa4b   : > { %7766 = vmatpush1.bf16.msra.mxu0 %v9896_v35  ;;  %v10105_v43 = vcombine.high %v4467_v1, %v4471_v37  ;;  %v4335_v6 = vld [vmem:[%s11451_s2 + $0xb38] sm:$0xff]  ;;  %v10104_v9 = vcombine.low %v4467_v1, %v4471_v37 }
 0xa4c   : > { %7767 = vmatprep.subr.bf16.mxu0 %v9889_v60  ;;  %v4459_v8 = vld [vmem:[%s11451_s2 + $0xf18] sm:$0xff]  ;;  %v9969_v11 = vcombine.high %v4331_v23, %v4335_v6 }
 0xa4d   : > { %7807 = vmatpush1.bf16.msra.mxu1 %v10024_v63  ;;  %v4463_v19 = vld [vmem:[%s11451_s2 + $0xf38] sm:$0xff] }
 0xa4e   : > { %7808 = vmatprep.subr.bf16.mxu1 %v10017_v46  ;;  %v10097_v3 = vcombine.high %v4459_v8, %v4463_v19  ;;  %v4323_v15 = vld [vmem:[%s11451_s2 + $0xad8] sm:$0xff]  ;;  %v9968_v46 = vcombine.low %v4331_v23, %v4335_v6  ;;  %v10096_v48 = vcombine.low %v4459_v8, %v4463_v19 }
 0xa4f   : > { %7768 = vmatpush1.bf16.msra.mxu0 %v9888_v4  ;;  %v4327_v35 = vld [vmem:[%s11451_s2 + $0xaf8] sm:$0xff] }
 0xa50   : > { %7769 = vmatprep.subr.bf16.mxu0 %v9881_v0  ;;  %v4451_v63 = vld [vmem:[%s11451_s2 + $0xed8] sm:$0xff]  ;;  %v9961_v61 = vcombine.high %v4323_v15, %v4327_v35 }
 0xa51   : > { %7809 = vmatpush1.bf16.msra.mxu1 %v10016_v57  ;;  %v4455_v60 = vld [vmem:[%s11451_s2 + $0xef8] sm:$0xff] }
 0xa52   : > { %7810 = vmatprep.subr.bf16.mxu1 %v10009_v5  ;;  %v10089_v58 = vcombine.high %v4451_v63, %v4455_v60  ;;  %v4315_v53 = vld [vmem:[%s11451_s2 + $0xa98] sm:$0xff]  ;;  %v9960_v5 = vcombine.low %v4323_v15, %v4327_v35  ;;  %v10088_v55 = vcombine.low %v4451_v63, %v4455_v60 }
 0xa53   : > { %7770 = vmatpush1.bf16.msra.mxu0 %v9880_v44  ;;  %v4319_v4 = vld [vmem:[%s11451_s2 + $0xab8] sm:$0xff] }
 0xa54   : > { %7771 = vmatprep.subr.bf16.mxu0 %v9873_v59  ;;  %v4443_v57 = vld [vmem:[%s11451_s2 + $0xe98] sm:$0xff]  ;;  %v9953_v38 = vcombine.high %v4315_v53, %v4319_v4 }
 0xa55   : > { %7811 = vmatpush1.bf16.msra.mxu1 %v10008_v21  ;;  %v4447_v0 = vld [vmem:[%s11451_s2 + $0xeb8] sm:$0xff] }
 0xa56   : > { %7812 = vmatprep.subr.bf16.mxu1 %v10001_v25  ;;  %v10081_v22 = vcombine.high %v4443_v57, %v4447_v0  ;;  %v4307_v29 = vld [vmem:[%s11451_s2 + $0xa58] sm:$0xff]  ;;  %v9952_v25 = vcombine.low %v4315_v53, %v4319_v4  ;;  %v10080_v49 = vcombine.low %v4443_v57, %v4447_v0 }
 0xa57   : > { %7772 = vmatpush1.bf16.msra.mxu0 %v9872_v62  ;;  %v4311_v44 = vld [vmem:[%s11451_s2 + $0xa78] sm:$0xff] }
 0xa58   : > { %7773 = vmatprep.subr.bf16.mxu0 %v9993_v14  ;;  %v4435_v21 = vld [vmem:[%s11451_s2 + $0xe58] sm:$0xff]  ;;  %v9945_v33 = vcombine.high %v4307_v29, %v4311_v44 }
 0xa59   : > { %7813 = vmatpush1.bf16.msra.mxu1 %v10000_v17  ;;  %v4439_v59 = vld [vmem:[%s11451_s2 + $0xe78] sm:$0xff] }
 0xa5a   : > { %7814 = vmatprep.subr.bf16.mxu1 %v10121_v36  ;;  %v10073_v32 = vcombine.high %v4435_v21, %v4439_v59  ;;  %v4299_v40 = vld [vmem:[%s11451_s2 + $0xa18] sm:$0xff]  ;;  %v9944_v36 = vcombine.low %v4307_v29, %v4311_v44  ;;  %v10072_v16 = vcombine.low %v4435_v21, %v4439_v59  ;;  %v7842_v44 = vmax.f32 %v13467_v45, 0.0 }
 0xa5b   : > { %7774 = vmatpush2.bf16.msra.mxu0 %v9992_v24  ;;  %v4303_v62 = vld [vmem:[%s11451_s2 + $0xa38] sm:$0xff]  ;;  %v7841_v59 = vmax.f32 %v13458_v51, 0.0  ;;  %v7844_v45 = vmax.f32 %v13625_v56, 0.0 }
 0xa5c   : > { %7775 = vmatprep.subr.bf16.mxu0 %v9985_v20  ;;  %v4427_v17 = vld [vmem:[%s11451_s2 + $0xe18] sm:$0xff]  ;;  %v9937_v26 = vcombine.high %v4299_v40, %v4303_v62 }
 0xa5d   : > { %7815 = vmatpush2.bf16.msra.mxu1 %v10120_v30  ;;  %v4431_v14 = vld [vmem:[%s11451_s2 + $0xe38] sm:$0xff]  ;;  %v9936_v30 = vcombine.low %v4299_v40, %v4303_v62  ;;  %v7850_v40 = vsel %vm7849_vm5, %v7841_v59, 0.0 }
 0xa5e   : > { %7816 = vmatprep.subr.bf16.mxu1 %v10113_v27  ;;  %v10629_v42 = vld [vmem:[%s11477_s16] sm:$0xff]  ;;  %v10065_v24 = vcombine.high %v4427_v17, %v4431_v14  ;;  %v10064_v27 = vcombine.low %v4427_v17, %v4431_v14 }
 0xa5f   : > { %7776 = vmatpush2.bf16.msra.mxu0 %v9984_v12  ;;  %v13676_v47 = vunpack.c.h.bf16 %v10629_v42  ;;  %v7855_v42 = vsel %vm7849_vm5, %v7844_v45, 0.0 }
 0xa60   : > { %7777 = vmatprep.subr.bf16.mxu0 %v9977_v7 }
 0xa61   : > { %7817 = vmatpush2.bf16.msra.mxu1 %v10112_v10  ;;  %v4512_v20 = vrot.slane %v13676_v47, %v13360_v41  ;;  %v4516_v34 = vrot.slane %v13676_v47, %v13365_v2  ;;  %v4520_v21 = vrot.slane %v13676_v47, %v13518_v31 }
 0xa62   : > { %7818 = vmatprep.subr.bf16.mxu1 %v10105_v43 }
 0xa63   : > { %7778 = vmatpush2.bf16.msra.mxu0 %v9976_v13  ;;  %v4552_v28 = vrot.slane %v4512_v20, %v13360_v41  ;;  %v4556_v1 = vrot.slane %v4516_v34, %v13360_v41 }
 0xa64   : > { %7779 = vmatprep.subr.bf16.mxu0 %v9969_v11 }
 0xa65   : > { %7819 = vmatpush2.bf16.msra.mxu1 %v10104_v9 }
 0xa66   : > { %7820 = vmatprep.subr.bf16.mxu1 %v10097_v3 }
 0xa67   : > { %7780 = vmatpush2.bf16.msra.mxu0 %v9968_v46 }
 0xa68   : > { %7781 = vmatprep.subr.bf16.mxu0 %v9961_v61 }
 0xa69   : > { %7821 = vmatpush2.bf16.msra.mxu1 %v10096_v48 }
 0xa6a   : > { %7822 = vmatprep.subr.bf16.mxu1 %v10089_v58 }
 0xa6b   : > { %7782 = vmatpush2.bf16.msra.mxu0 %v9960_v5 }
 0xa6c   : > { %7783 = vmatprep.subr.bf16.mxu0 %v9953_v38 }
 0xa6d   : > { %7823 = vmatpush2.bf16.msra.mxu1 %v10088_v55 }
 0xa6e   : > { %7824 = vmatprep.subr.bf16.mxu1 %v10081_v22 }
 0xa6f   : > { %7784 = vmatpush2.bf16.msra.mxu0 %v9952_v25  ;;  %v7843_v25 = vmax.f32 %v13616_v39, 0.0 }
 0xa70   : > { %7785 = vmatprep.subr.bf16.mxu0 %v9945_v33  ;;  %v7851_v33 = vsel %vm7849_vm5, %v7842_v44, 0.0 }
 0xa71   : > { %7825 = vmatpush2.bf16.msra.mxu1 %v10080_v49  ;;  %v4524_v49 = vrot.slane %v13676_v47, %v13523_v54  ;;  %v7853_v62 = vsel %vm7849_vm5, %v7843_v25, 0.0  ;;  %v7852_v14 = vadd.f32 %v7851_v33, %v7850_v40 }
 0xa72   : > { %7826 = vmatprep.subr.bf16.mxu1 %v10073_v32  ;;  %v4560_v32 = vrot.slane %v4520_v21, %v13360_v41 }
 0xa73   : > { %7786 = vmatpush2.bf16.msra.mxu0 %v9944_v36  ;;  %v4564_v17 = vrot.slane %v4524_v49, %v13360_v41  ;;  %v7854_v36 = vadd.f32 %v7853_v62, %v7852_v14 }
 0xa74   : > { %7787 = vmatprep.subr.bf16.mxu0 %v9937_v26 }
 0xa75   : > { %7827 = vmatpush2.bf16.msra.mxu1 %v10072_v16 }
 0xa76   : > { %7828 = vmatprep.subr.bf16.mxu1 %v10065_v24 }
 0xa77   : > { %7788 = vmatpush2.bf16.msra.mxu0 %v9936_v30  ;;  %v7856_v30 = vadd.f32 %v7855_v42, %v7854_v36 }
 0xa79   : > { %7829 = vmatpush2.bf16.msra.mxu1 %v10064_v27 }
 0xa7a   : > { %v7545_v37 = vpop.f32.mrf.mxu0  ;;  %7790 = vmatmul.mubr.bf16.vlgmr.msra.gmra.mxu0 %v13218_v52 }
 0xa7b   : > { %v7546_v12 = vadd.f32 %v7545_v37, %v4552_v28 }
 0xa7c   : > { %v7586_v10 = vpop.f32.mrf.mxu1  ;;  %7831 = vmatmul.mubr.bf16.vlgmr.msra.gmra.mxu1 %v13226_v18  ;;  %v7547_v7 = vpop.f32.mrf.mxu0 }
 0xa7d   : > { %v7587_v43 = vadd.f32 %v7586_v10, %v7546_v12  ;;  %v7548_v23 = vadd.f32 %v7547_v7, %v4556_v1 }
 0xa7e   : > { %v7588_v6 = vpop.f32.mrf.mxu1  ;;  %v7549_v8 = vpop.f32.mrf.mxu0 }
 0xa7f   : > { %v7589_v19 = vadd.f32 %v7588_v6, %v7548_v23 }
 0xa80   : > { %v7590_v13 = vpop.f32.mrf.mxu1  ;;  %v7550_v9 = vpop.f32.mrf.mxu0 }
 0xa82   : > { %v7591_v11 = vpop.f32.mrf.mxu1 }
 0xaba   : > { %v7627_v3 = vpop.f32.mrf.mxu0 }
 0xabb   : > { %v7628_v15 = vadd.f32 %v7627_v3, %v7587_v43 }
 0xabc   : > { %v7668_v35 = vpop.f32.mrf.mxu1  ;;  %v7629_v63 = vpop.f32.mrf.mxu0 }
 0xabd   : > { %v13686_v60 = vadd.f32 %v7668_v35, %v7628_v15  ;;  %v7630_v52 = vadd.f32 %v7629_v63, %v7589_v19 }
 0xabe   : > { %v7670_v46 = vpop.f32.mrf.mxu1  ;;  %v7631_v48 = vpop.f32.mrf.mxu0 }
 0xabf   : > { %v13688_v61 = vadd.f32 %v7670_v46, %v7630_v52  ;;  %v7845_v51 = vmax.f32 %v13686_v60, 0.0 }
 0xac0   : > { %v7672_v18 = vpop.f32.mrf.mxu1  ;;  %v7632_v58 = vpop.f32.mrf.mxu0 }
 0xac1   : > { %v7857_v16 = vsel %vm7849_vm5, %v7845_v51, 0.0  ;;  %v7846_v26 = vmax.f32 %v13688_v61, 0.0 }
 0xac2   : > { %v7673_v53 = vpop.f32.mrf.mxu1  ;;  %v7858_v28 = vadd.f32 %v7857_v16, %v7856_v30  ;;  %v7839_v30 = vld [vmem:[%s13906_s0] sm:$0xff] }
 0xac3   : > { %v7859_v37 = vsel %vm7849_vm5, %v7846_v26, 0.0 }
 0xac4   : > { %v7860_v13 = vadd.f32 %v7859_v37, %v7858_v28 }
 0xafa   : > { %v7709_v4 = vpop.f32.mrf.mxu0 }
 0xafb   : > { %v7710_v39 = vadd.f32 %v7709_v4, %v4560_v32 }
 0xafc   : > { %v7750_v57 = vpop.f32.mrf.mxu1  ;;  %v7711_v0 = vpop.f32.mrf.mxu0 }
 0xafd   : > { %v7712_v47 = vadd.f32 %v7711_v0, %v4564_v17  ;;  %v7751_v24 = vadd.f32 %v7750_v57, %v7710_v39 }
 0xafe   : > { %v7752_v5 = vpop.f32.mrf.mxu1  ;;  %v7713_v55 = vpop.f32.mrf.mxu0 }
 0xaff   : > { %v7753_v27 = vadd.f32 %v7752_v5, %v7712_v47 }
 0xb00   : > { %v7754_v38 = vpop.f32.mrf.mxu1  ;;  %v7714_v22 = vpop.f32.mrf.mxu0 }
 0xb02   : > { %v7755_v29 = vpop.f32.mrf.mxu1 }
 0xb3a   : > { %v7791_v20 = vpop.f32.mrf.mxu0 }
 0xb3b   : > { %v7792_v34 = vadd.f32 %v7791_v20, %v7751_v24  ;;  %v7840_v20 = vld [vmem:[%s13907_s17] sm:$0xff] }
 0xb3c   : > { %v7832_v56 = vpop.f32.mrf.mxu1  ;;  %v7793_v1 = vpop.f32.mrf.mxu0  ;;  %v7998_v28 = vunpack.c.h.bf16 %v7840_v20 }
 0xb3d   : > { %v7833_v12 = vadd.f32 %v7832_v56, %v7792_v34  ;;  %v7794_v10 = vadd.f32 %v7793_v1, %v7753_v27  ;;  %v7913_v27 = vunpack.c.l.bf16 %v7839_v30  ;;  %v7914_v34 = vunpack.c.h.bf16 %v7839_v30 }
 0xb3e   : > { %v7834_v7 = vpop.f32.mrf.mxu1  ;;  %v7795_v43 = vpop.f32.mrf.mxu0  ;;  %v7997_v56 = vunpack.c.l.bf16 %v7840_v20 }
 0xb3f   : > { %v7847_v23 = vmax.f32 %v7833_v12, 0.0  ;;  %v7835_v6 = vadd.f32 %v7834_v7, %v7794_v10  ;;  %v7920_v1 = vrot.slane %v7913_v27, %v13360_v41  ;;  %v7924_v37 = vrot.slane %v7913_v27, %v13365_v2 }
 0xb40   : > { %v7836_v8 = vpop.f32.mrf.mxu1  ;;  %v7796_v19 = vpop.f32.mrf.mxu0  ;;  %v7936_v12 = vrot.slane %v7914_v34, %v13360_v41  ;;  %v7940_v10 = vrot.slane %v7914_v34, %v13365_v2  ;;  %v8004_v7 = vrot.slane %v7997_v56, %v13360_v41  ;;  %v8008_v43 = vrot.slane %v7997_v56, %v13365_v2 }
 0xb41   : > { %v7848_v9 = vmax.f32 %v7835_v6, 0.0  ;;  %v7861_v3 = vsel %vm7849_vm5, %v7847_v23, 0.0  ;;  %v8024_v6 = vrot.slane %v7998_v28, %v13365_v2  ;;  %v7928_v8 = vrot.slane %v7913_v27, %v13518_v31 }
 0xb42   : > { %v7837_v11 = vpop.f32.mrf.mxu1  ;;  %v7862_v15 = vadd.f32 %v7861_v3, %v7860_v13  ;;  %v7944_v19 = vrot.slane %v7914_v34, %v13518_v31  ;;  %v8012_v13 = vrot.slane %v7997_v56, %v13518_v31  ;;  %v7948_v3 = vrot.slane %v7914_v34, %v13523_v54 }
 0xb43   : > { %v7863_v35 = vsel %vm7849_vm5, %v7848_v9, 0.0  ;;  %v8028_v11 = vrot.slane %v7998_v28, %v13518_v31 }
 0xb44   : > { %v7864_v63 = vadd.f32 %v7863_v35, %v7862_v15  ;;  %v8016_v15 = vrot.slane %v7997_v56, %v13523_v54  ;;  %v8032_v35 = vrot.slane %v7998_v28, %v13523_v54 }
 0xb46   : > { %7865 = vadd.xlane.f32.xlu0 %v7864_v63  ;;  %v7960_v63 = vrot.slane %v7920_v1, %v13360_v41 }
 0xbcf   : > { %v7866_v60 = vpop.xlane.xlu0 %7865 }
 0xbd0   : > { %v7868_v52 = vmul.f32 0.0009765625, %v7866_v60  ;;  %v7964_v60 = vrot.slane %v7924_v37, %v13360_v41 }
 0xbd2   : > { %v13710_v46 = vsub.f32 %v7841_v59, %v7868_v52  ;;  %v13712_v48 = vsub.f32 %v7842_v44, %v7868_v52  ;;  %v13714_v61 = vsub.f32 %v7843_v25, %v7868_v52  ;;  %v13716_v18 = vsub.f32 %v7844_v45, %v7868_v52 }
 0xbd3   : > { %v13718_v58 = vsub.f32 %v7845_v51, %v7868_v52  ;;  %v13726_v0 = vsub.f32 %v7846_v26, %v7868_v52  ;;  %v13732_v29 = vsub.f32 %v7847_v23, %v7868_v52  ;;  %v13737_v25 = vsub.f32 %v7848_v9, %v7868_v52 }
 0xbd4   : > { %v7877_v53 = vmul.f32 %v13710_v46, %v13710_v46  ;;  %v7878_v4 = vmul.f32 %v13712_v48, %v13712_v48  ;;  %v7879_v57 = vmul.f32 %v13714_v61, %v13714_v61  ;;  %v7880_v5 = vmul.f32 %v13716_v18, %v13716_v18 }
 0xbd5   : > { %v7881_v44 = vmul.f32 %v13718_v58, %v13718_v58  ;;  %v7882_v49 = vmul.f32 %v13726_v0, %v13726_v0  ;;  %v7883_v40 = vmul.f32 %v13732_v29, %v13732_v29  ;;  %v7884_v17 = vmul.f32 %v13737_v25, %v13737_v25 }
 0xbd6   : > { %v7885_v55 = vsel %vm7849_vm5, %v7877_v53, 0.0  ;;  %v7886_v38 = vsel %vm7849_vm5, %v7878_v4, 0.0  ;;  %v7888_v21 = vsel %vm7849_vm5, %v7879_v57, 0.0  ;;  %v7890_v33 = vsel %vm7849_vm5, %v7880_v5, 0.0 }
 0xbd7   : > { %v7887_v22 = vadd.f32 %v7886_v38, %v7885_v55  ;;  %v7892_v62 = vsel %vm7849_vm5, %v7881_v44, 0.0  ;;  %v7894_v14 = vsel %vm7849_vm5, %v7882_v49, 0.0  ;;  %v7896_v39 = vsel %vm7849_vm5, %v7883_v40, 0.0 }
 0xbd8   : > { %v7898_v42 = vsel %vm7849_vm5, %v7884_v17, 0.0  ;;  %v8020_v23 = vrot.slane %v7998_v28, %v13360_v41  ;;  %v7932_v9 = vrot.slane %v7913_v27, %v13523_v54  ;;  %v7976_v52 = vrot.slane %v7936_v12, %v13360_v41 }
 0xbd9   : > { %v7889_v59 = vadd.f32 %v7888_v21, %v7887_v22  ;;  %v7980_v53 = vrot.slane %v7940_v10, %v13360_v41  ;;  %v8044_v4 = vrot.slane %v8004_v7, %v13360_v41  ;;  %v8048_v57 = vrot.slane %v8008_v43, %v13360_v41 }
 0xbda   : > { %v8060_v31 = vrot.slane %v8020_v23, %v13360_v41  ;;  %v8064_v5 = vrot.slane %v8024_v6, %v13360_v41  ;;  %v7968_v55 = vrot.slane %v7928_v8, %v13360_v41  ;;  %v7984_v54 = vrot.slane %v7944_v19, %v13360_v41 }
 0xbdb   : > { %v7891_v32 = vadd.f32 %v7890_v33, %v7889_v59  ;;  %v8052_v38 = vrot.slane %v8012_v13, %v13360_v41  ;;  %v7972_v22 = vrot.slane %v7932_v9, %v13360_v41  ;;  %v8068_v21 = vrot.slane %v8028_v11, %v13360_v41 }
 0xbdc   : > { %v7988_v59 = vrot.slane %v7948_v3, %v13360_v41  ;;  %v8056_v49 = vrot.slane %v8016_v15, %v13360_v41  ;;  %v8072_v33 = vrot.slane %v8032_v35, %v13360_v41 }
 0xbdd   : > { %v7893_v45 = vadd.f32 %v7892_v62, %v7891_v32 }
 0xbdf   : > { %v7895_v51 = vadd.f32 %v7894_v14, %v7893_v45 }
 0xbe1   : > { %v7897_v36 = vadd.f32 %v7896_v39, %v7895_v51 }
 0xbe3   : > { %v7899_v47 = vadd.f32 %v7898_v42, %v7897_v36 }
 0xbe5   : > { %7900 = vadd.xlane.f32.xlu0 %v7899_v47 }
 0xc6e   : > { %v7901_v16 = vpop.xlane.xlu0 %7900 }
 0xc6f   : > { %v7902_v26 = vmul.f32 0.0009765625, %v7901_v16 }
 0xc71   : > { %v7903_v24 = vadd.f32 1e-05, %v7902_v26 }
 0xc73   : > { %10627 = vrsqrt.f32 %v7903_v24 }
 0xc80   : > { %v10628_v44 = vpop.eup %10627 }
 0xc81   : > { %v7905_v32 = vmul.f32 %v10628_v44, %v13710_v46  ;;  %v7906_v40 = vmul.f32 %v10628_v44, %v13712_v48  ;;  %v7907_v62 = vmul.f32 %v10628_v44, %v13714_v61  ;;  %v7908_v45 = vmul.f32 %v10628_v44, %v13716_v18 }
 0xc82   : > { %v7909_v17 = vmul.f32 %v10628_v44, %v13718_v58  ;;  %v7910_v14 = vmul.f32 %v10628_v44, %v13726_v0  ;;  %v7911_v51 = vmul.f32 %v10628_v44, %v13732_v29  ;;  %v7912_v39 = vmul.f32 %v10628_v44, %v13737_v25 }
 0xc83   : > { %v7989_v36 = vmul.f32 %v7960_v63, %v7905_v32  ;;  %v7990_v42 = vmul.f32 %v7964_v60, %v7906_v40  ;;  %v7991_v47 = vmul.f32 %v7968_v55, %v7907_v62  ;;  %v7992_v16 = vmul.f32 %v7972_v22, %v7908_v45 }
 0xc84   : > { %v7993_v26 = vmul.f32 %v7976_v52, %v7909_v17  ;;  %v7994_v46 = vmul.f32 %v7980_v53, %v7910_v14  ;;  %v7995_v24 = vmul.f32 %v7984_v54, %v7911_v51  ;;  %v7996_v48 = vmul.f32 %v7988_v59, %v7912_v39 }
 0xc85   : > { %v8073_v30 = vadd.f32 %v8044_v4, %v7989_v36  ;;  %v8074_v61 = vadd.f32 %v8048_v57, %v7990_v42  ;;  %v8075_v20 = vadd.f32 %v8052_v38, %v7991_v47  ;;  %v8076_v18 = vadd.f32 %v8056_v49, %v7992_v16 }
 0xc86   : > { %v8077_v27 = vadd.f32 %v8060_v31, %v7993_v26  ;;  %v8078_v58 = vadd.f32 %v8064_v5, %v7994_v46  ;;  %v8079_v34 = vadd.f32 %v8068_v21, %v7995_v24  ;;  %v8080_v0 = vadd.f32 %v8072_v33, %v7996_v48 }
 0xc87   : > { %v10122_v56 = vpack.c.bf16 %v8074_v61, %v8073_v30  ;;  %v10123_v29 = vpack.c.bf16 %v8076_v18, %v8075_v20 }
 0xc88   : > { %v10124_v28 = vpack.c.bf16 %v8078_v58, %v8077_v27  ;;  %v10125_v25 = vpack.c.bf16 %v8080_v0, %v8079_v34 }
 0xc89   : > { %v8107_v1 = vrot.slane %v10122_v56, %v13065_v50  ;;  %v8114_v37 = vrot.slane %v10123_v29, %v13065_v50 }
 0xc8a   : > { %v8121_v12 = vrot.slane %v10124_v28, %v13065_v50  ;;  %v8128_v10 = vrot.slane %v10125_v25, %v13065_v50 }
 0xc8b   : > { %v8129_v7 = vcombine.low %v8107_v1, %v8114_v37 }
 0xc8c   : > { %v8130_v43 = vcombine.low %v8121_v12, %v8128_v10 }
 0xc8d   : > { %v8137_v23 = vrot.slane %v8129_v7, %v13065_v50 }
 0xc8e   : > { %v8144_v6 = vrot.slane %v8130_v43, %v13065_v50  ;;  %8151 = sbr.rel (%p10126_p5) target bundleno = 3552 (0xde0), region = 136 }
 0xc90   : > { %v8145_v8 = vcombine.low %v8137_v23, %v8144_v6 }
 0xc92   : > { %8147 = vst [vmem:[#allocation2] sm:$0xff] %v8145_v8 }
 0xc93   : > { %v10630_v19 = vld [vmem:[#allocation13 + $0x74] ss:$8 sps:$4 sm:$0xff]   ;;  %v10634_v9 = vld [vmem:[#allocation13 + $0x70] ss:$8 sps:$4 sm:$0xff]   ;;  %v10636_v3 = vld [vmem:[#allocation13 + $0x64] ss:$8 sps:$4 sm:$0xff]  }
 0xc94   : > { %v10632_v13 = vld [vmem:[#allocation13 + $0x174] ss:$8 sps:$4 sm:$0xff]   ;;  %9000 = vmatprep.subr.bf16.mxu0 %v10630_v19  ;;  %v10635_v11 = vld [vmem:[#allocation13 + $0x170] ss:$8 sps:$4 sm:$0xff]   ;;  %v10638_v15 = vld [vmem:[#allocation13 + $0x164] ss:$8 sps:$4 sm:$0xff]  }
 0xc95   : > { %9041 = vmatprep.subr.bf16.mxu1 %v10632_v13  ;;  %9001 = vmatpush1.bf16.msra.mxu0 %v10634_v9  ;;  %v10640_v35 = vld [vmem:[#allocation13 + $0x60] ss:$8 sps:$4 sm:$0xff]   ;;  %v10642_v60 = vld [vmem:[#allocation13 + $0x54] ss:$8 sps:$4 sm:$0xff]   ;;  %v10646_v53 = vld [vmem:[#allocation13 + $0x50] ss:$8 sps:$4 sm:$0xff]  }
 0xc96   : > { %9042 = vmatpush1.bf16.msra.mxu1 %v10635_v11  ;;  %9002 = vmatprep.subr.bf16.mxu0 %v10636_v3  ;;  %v10641_v63 = vld [vmem:[#allocation13 + $0x160] ss:$8 sps:$4 sm:$0xff]   ;;  %v10644_v52 = vld [vmem:[#allocation13 + $0x154] ss:$8 sps:$4 sm:$0xff]   ;;  %v10647_v4 = vld [vmem:[#allocation13 + $0x150] ss:$8 sps:$4 sm:$0xff]  }
 0xc97   : > { %9043 = vmatprep.subr.bf16.mxu1 %v10638_v15  ;;  %v10648_v57 = vld [vmem:[#allocation13 + $0x44] ss:$8 sps:$4 sm:$0xff]   ;;  %v10652_v5 = vld [vmem:[#allocation13 + $0x40] ss:$8 sps:$4 sm:$0xff]   ;;  %v10654_v54 = vld [vmem:[#allocation13 + $0x34] ss:$8 sps:$4 sm:$0xff]  }
 0xc98   : > { %v10650_v31 = vld [vmem:[#allocation13 + $0x144] ss:$8 sps:$4 sm:$0xff]   ;;  %v10653_v55 = vld [vmem:[#allocation13 + $0x140] ss:$8 sps:$4 sm:$0xff]   ;;  %v10656_v38 = vld [vmem:[#allocation13 + $0x134] ss:$8 sps:$4 sm:$0xff]  }
 0xc99   : > { %9003 = vmatpush1.bf16.msra.mxu0 %v10640_v35  ;;  %v10658_v22 = vld [vmem:[#allocation13 + $0x30] ss:$8 sps:$4 sm:$0xff]   ;;  %v10660_v21 = vld [vmem:[#allocation13 + $0x24] ss:$8 sps:$4 sm:$0xff]   ;;  %v10664_v49 = vld [vmem:[#allocation13 + $0x20] ss:$8 sps:$4 sm:$0xff]  }
 0xc9a   : > { %9044 = vmatpush1.bf16.msra.mxu1 %v10641_v63  ;;  %9004 = vmatprep.subr.bf16.mxu0 %v10642_v60  ;;  %v10659_v44 = vld [vmem:[#allocation13 + $0x130] ss:$8 sps:$4 sm:$0xff]   ;;  %v10662_v59 = vld [vmem:[#allocation13 + $0x124] ss:$8 sps:$4 sm:$0xff]   ;;  %v10665_v33 = vld [vmem:[#allocation13 + $0x120] ss:$8 sps:$4 sm:$0xff]  }
 0xc9b   : > { %9045 = vmatprep.subr.bf16.mxu1 %v10644_v52  ;;  %v10666_v32 = vld [vmem:[#allocation13 + $0x14] ss:$8 sps:$4 sm:$0xff]   ;;  %v10670_v62 = vld [vmem:[#allocation13 + $0x10] ss:$8 sps:$4 sm:$0xff]   ;;  %v10672_v17 = vld [vmem:[#allocation13 + $0x4] ss:$8 sps:$4 sm:$0xff]  }
 0xc9c   : > { %v10668_v40 = vld [vmem:[#allocation13 + $0x114] ss:$8 sps:$4 sm:$0xff]   ;;  %v10671_v45 = vld [vmem:[#allocation13 + $0x110] ss:$8 sps:$4 sm:$0xff]   ;;  %v10674_v14 = vld [vmem:[#allocation13 + $0x104] ss:$8 sps:$4 sm:$0xff]  }
 0xc9d   : > { %9005 = vmatpush1.bf16.msra.mxu0 %v10646_v53  ;;  %v10676_v51 = vld [vmem:[#allocation13] ss:$8 sps:$4 sm:$0xff]   ;;  %v10678_v36 = vld [vmem:[#allocation13 + $0xf4] ss:$8 sps:$4 sm:$0xff]   ;;  %v10682_v47 = vld [vmem:[#allocation13 + $0xf0] ss:$8 sps:$4 sm:$0xff]  }
 0xc9e   : > { %9046 = vmatpush1.bf16.msra.mxu1 %v10647_v4  ;;  %9006 = vmatprep.subr.bf16.mxu0 %v10648_v57  ;;  %v10677_v39 = vld [vmem:[#allocation13 + $0x100] ss:$8 sps:$4 sm:$0xff]   ;;  %v10680_v42 = vld [vmem:[#allocation13 + $0x1f4] ss:$8 sps:$4 sm:$0xff]   ;;  %v10683_v16 = vld [vmem:[#allocation13 + $0x1f0] ss:$8 sps:$4 sm:$0xff]  }
 0xc9f   : > { %9047 = vmatprep.subr.bf16.mxu1 %v10650_v31  ;;  %v10684_v26 = vld [vmem:[#allocation13 + $0xe4] ss:$8 sps:$4 sm:$0xff]   ;;  %v10688_v24 = vld [vmem:[#allocation13 + $0xe0] ss:$8 sps:$4 sm:$0xff]   ;;  %v10690_v30 = vld [vmem:[#allocation13 + $0xd4] ss:$8 sps:$4 sm:$0xff]  }
 0xca0   : > { %v10686_v46 = vld [vmem:[#allocation13 + $0x1e4] ss:$8 sps:$4 sm:$0xff]   ;;  %v10689_v48 = vld [vmem:[#allocation13 + $0x1e0] ss:$8 sps:$4 sm:$0xff]   ;;  %v10692_v61 = vld [vmem:[#allocation13 + $0x1d4] ss:$8 sps:$4 sm:$0xff]  }
 0xca1   : > { %9007 = vmatpush1.bf16.msra.mxu0 %v10652_v5  ;;  %v10694_v20 = vld [vmem:[#allocation13 + $0xd0] ss:$8 sps:$4 sm:$0xff]   ;;  %v10696_v27 = vld [vmem:[#allocation13 + $0xc4] ss:$8 sps:$4 sm:$0xff]   ;;  %v10700_v0 = vld [vmem:[#allocation13 + $0xc0] ss:$8 sps:$4 sm:$0xff]  }
 0xca2   : > { %9048 = vmatpush1.bf16.msra.mxu1 %v10653_v55  ;;  %9008 = vmatprep.subr.bf16.mxu0 %v10654_v54  ;;  %v10695_v18 = vld [vmem:[#allocation13 + $0x1d0] ss:$8 sps:$4 sm:$0xff]   ;;  %v10698_v58 = vld [vmem:[#allocation13 + $0x1c4] ss:$8 sps:$4 sm:$0xff]   ;;  %v10701_v29 = vld [vmem:[#allocation13 + $0x1c0] ss:$8 sps:$4 sm:$0xff]  }
 0xca3   : > { %9049 = vmatprep.subr.bf16.mxu1 %v10656_v38  ;;  %v8152_v34 = vld [vmem:[#allocation2] sm:$0xff]  ;;  %v10706_v37 = vld [vmem:[#allocation13 + $0xb0] ss:$8 sps:$4 sm:$0xff]  }
 0xca4   : > { %v8310_v56 = vrot.slane %v8152_v34, %v13065_v50  ;;  %v10702_v28 = vld [vmem:[#allocation13 + $0xb4] ss:$8 sps:$4 sm:$0xff]   ;;  %v10707_v10 = vld [vmem:[#allocation13 + $0x1b0] ss:$8 sps:$4 sm:$0xff]   ;;  %v10708_v7 = vld [vmem:[#allocation13 + $0xa4] ss:$8 sps:$4 sm:$0xff]   ;;  %v8303_v6 = vcombine.high %v8152_v34, %v8152_v34 }
 0xca5   : > { %9009 = vmatpush1.bf16.msra.mxu0 %v10658_v22  ;;  %v10704_v25 = vld [vmem:[#allocation13 + $0x1b4] ss:$8 sps:$4 sm:$0xff]   ;;  %v10710_v43 = vld [vmem:[#allocation13 + $0x1a4] ss:$8 sps:$4 sm:$0xff]   ;;  %v10712_v8 = vld [vmem:[#allocation13 + $0xa0] ss:$8 sps:$4 sm:$0xff]  }
 0xca6   : > { %9050 = vmatpush1.bf16.msra.mxu1 %v10659_v44  ;;  %9010 = vmatprep.subr.bf16.mxu0 %v10660_v21  ;;  %v8318_v1 = vcombine.high %v8310_v56, %v8310_v56  ;;  %v10713_v19 = vld [vmem:[#allocation13 + $0x1a0] ss:$8 sps:$4 sm:$0xff]   ;;  %v10714_v13 = vld [vmem:[#allocation13 + $0x94] ss:$8 sps:$4 sm:$0xff]   ;;  %v13810_v11 = vrot.slane %v8303_v6, %v13065_v50  ;;  %v10718_v3 = vld [vmem:[#allocation13 + $0x90] ss:$8 sps:$4 sm:$0xff]   ;;  %v8326_v53 = vrot.slane %v8310_v56, %v13065_v50 }
 0xca7   : > { %9051 = vmatprep.subr.bf16.mxu1 %v10662_v59  ;;  %v10716_v9 = vld [vmem:[#allocation13 + $0x194] ss:$8 sps:$4 sm:$0xff]   ;;  %v10719_v15 = vld [vmem:[#allocation13 + $0x190] ss:$8 sps:$4 sm:$0xff]   ;;  %v10720_v35 = vld [vmem:[#allocation13 + $0x84] ss:$8 sps:$4 sm:$0xff]  }
 0xca8   : > { %v8340_v12 = vrot.slane %v8318_v1, %v13065_v50  ;;  %v10722_v63 = vld [vmem:[#allocation13 + $0x184] ss:$8 sps:$4 sm:$0xff]   ;;  %v8319_v60 = vcombine.high %v13810_v11, %v13810_v11  ;;  %v10724_v52 = vld [vmem:[#allocation13 + $0x80] ss:$8 sps:$4 sm:$0xff]   ;;  %v10729_v57 = vld [vmem:[#allocation13 + $0x274] ss:$8 sps:$4 sm:$0xff]   ;;  %v8348_v55 = vcombine.high %v8326_v53, %v8326_v53 }
 0xca9   : > { %9011 = vmatpush1.bf16.msra.mxu0 %v10664_v49  ;;  %v10725_v4 = vld [vmem:[#allocation13 + $0x180] ss:$8 sps:$4 sm:$0xff]   ;;  %v10732_v31 = vld [vmem:[#allocation13 + $0x374] ss:$8 sps:$4 sm:$0xff]   ;;  %v10727_v54 = vld [vmem:[#allocation13 + $0x270] ss:$8 sps:$4 sm:$0xff]  }
 0xcaa   : > { %9052 = vmatpush1.bf16.msra.mxu1 %v10665_v33  ;;  %9012 = vmatprep.subr.bf16.mxu0 %v10666_v32  ;;  %v8350_v23 = vcombine.high %v8340_v12, %v8340_v12  ;;  %v8347_v5 = vrot.slane %v8319_v60, %v13065_v50  ;;  %v10730_v38 = vld [vmem:[#allocation13 + $0x370] ss:$8 sps:$4 sm:$0xff]   ;;  %v10735_v22 = vld [vmem:[#allocation13 + $0x264] ss:$8 sps:$4 sm:$0xff]   ;;  %v10733_v59 = vld [vmem:[#allocation13 + $0x260] ss:$8 sps:$4 sm:$0xff]  }
 0xcab   : > { %9053 = vmatprep.subr.bf16.mxu1 %v10668_v40  ;;  %9032 = vmatprep.mubr.bf16.mxu0 %v8340_v12  ;;  %v10738_v44 = vld [vmem:[#allocation13 + $0x364] ss:$8 sps:$4 sm:$0xff]   ;;  %v10736_v49 = vld [vmem:[#allocation13 + $0x360] ss:$8 sps:$4 sm:$0xff]   ;;  %v10741_v33 = vld [vmem:[#allocation13 + $0x254] ss:$8 sps:$4 sm:$0xff]  }
 0xcac   : > { %9073 = vmatprep.mubr.bf16.mxu1 %v8350_v23  ;;  %v8351_v21 = vcombine.high %v8347_v5, %v8347_v5  ;;  %v10744_v32 = vld [vmem:[#allocation13 + $0x354] ss:$8 sps:$4 sm:$0xff]   ;;  %v10739_v40 = vld [vmem:[#allocation13 + $0x250] ss:$8 sps:$4 sm:$0xff]   ;;  %v10772_v34 = vld [vmem:[#allocation13 + $0x300] ss:$8 sps:$4 sm:$0xff]  }
 0xcad   : > { %9013 = vmatpush1.bf16.msra.mxu0 %v10670_v62  ;;  %v10742_v62 = vld [vmem:[#allocation13 + $0x350] ss:$8 sps:$4 sm:$0xff]   ;;  %v10780_v56 = vld [vmem:[#allocation13 + $0x3f4] ss:$8 sps:$4 sm:$0xff]   ;;  %v10786_v1 = vld [vmem:[#allocation13 + $0x3e4] ss:$8 sps:$4 sm:$0xff]  }
 0xcae   : > { %9054 = vmatpush1.bf16.msra.mxu1 %v10671_v45  ;;  %9014 = vmatprep.subr.bf16.mxu0 %v10672_v17  ;;  %v10747_v45 = vld [vmem:[#allocation13 + $0x244] ss:$8 sps:$4 sm:$0xff]   ;;  %v10784_v12 = vld [vmem:[#allocation13 + $0x3e0] ss:$8 sps:$4 sm:$0xff]   ;;  %v10790_v23 = vld [vmem:[#allocation13 + $0x3d0] ss:$8 sps:$4 sm:$0xff]  }
 0xcaf   : > { %9055 = vmatprep.subr.bf16.mxu1 %v10674_v14  ;;  %v10750_v17 = vld [vmem:[#allocation13 + $0x344] ss:$8 sps:$4 sm:$0xff]   ;;  %v10745_v14 = vld [vmem:[#allocation13 + $0x240] ss:$8 sps:$4 sm:$0xff]  }
 0xcb0   : > { %v10795_v6 = vld [vmem:[#allocation13 + $0x2c4] ss:$8 sps:$4 sm:$0xff]  }
 0xcb1   : > { %9015 = vmatpush1.bf16.msra.mxu0 %v10676_v51  ;;  %v10748_v51 = vld [vmem:[#allocation13 + $0x340] ss:$8 sps:$4 sm:$0xff]   ;;  %v10810_v60 = vld [vmem:[#allocation13 + $0x3a4] ss:$8 sps:$4 sm:$0xff]  }
 0xcb2   : > { %9056 = vmatpush1.bf16.msra.mxu1 %v10677_v39  ;;  %9016 = vmatprep.subr.bf16.mxu0 %v10678_v36  ;;  %v10753_v39 = vld [vmem:[#allocation13 + $0x234] ss:$8 sps:$4 sm:$0xff]  }
 0xcb3   : > { %9057 = vmatprep.subr.bf16.mxu1 %v10680_v42  ;;  %v10756_v36 = vld [vmem:[#allocation13 + $0x334] ss:$8 sps:$4 sm:$0xff]   ;;  %v10751_v42 = vld [vmem:[#allocation13 + $0x230] ss:$8 sps:$4 sm:$0xff]  }
 0xcb5   : > { %9017 = vmatpush2.bf16.msra.mxu0 %v10682_v47  ;;  %v10754_v47 = vld [vmem:[#allocation13 + $0x330] ss:$8 sps:$4 sm:$0xff]  }
 0xcb6   : > { %9058 = vmatpush2.bf16.msra.mxu1 %v10683_v16  ;;  %9018 = vmatprep.subr.bf16.mxu0 %v10684_v26  ;;  %v10759_v16 = vld [vmem:[#allocation13 + $0x224] ss:$8 sps:$4 sm:$0xff]  }
 0xcb7   : > { %9059 = vmatprep.subr.bf16.mxu1 %v10686_v46  ;;  %v10762_v26 = vld [vmem:[#allocation13 + $0x324] ss:$8 sps:$4 sm:$0xff]   ;;  %v10757_v46 = vld [vmem:[#allocation13 + $0x220] ss:$8 sps:$4 sm:$0xff]  }
 0xcb9   : > { %9019 = vmatpush2.bf16.msra.mxu0 %v10688_v24  ;;  %v10760_v24 = vld [vmem:[#allocation13 + $0x320] ss:$8 sps:$4 sm:$0xff]  }
 0xcba   : > { %9060 = vmatpush2.bf16.msra.mxu1 %v10689_v48  ;;  %9020 = vmatprep.subr.bf16.mxu0 %v10690_v30  ;;  %v10765_v48 = vld [vmem:[#allocation13 + $0x214] ss:$8 sps:$4 sm:$0xff]  }
 0xcbb   : > { %9061 = vmatprep.subr.bf16.mxu1 %v10692_v61  ;;  %v10768_v30 = vld [vmem:[#allocation13 + $0x314] ss:$8 sps:$4 sm:$0xff]   ;;  %v10763_v61 = vld [vmem:[#allocation13 + $0x210] ss:$8 sps:$4 sm:$0xff]  }
 0xcbd   : > { %9021 = vmatpush2.bf16.msra.mxu0 %v10694_v20  ;;  %v10766_v20 = vld [vmem:[#allocation13 + $0x310] ss:$8 sps:$4 sm:$0xff]  }
 0xcbe   : > { %9062 = vmatpush2.bf16.msra.mxu1 %v10695_v18  ;;  %9022 = vmatprep.subr.bf16.mxu0 %v10696_v27  ;;  %v10771_v18 = vld [vmem:[#allocation13 + $0x204] ss:$8 sps:$4 sm:$0xff]  }
 0xcbf   : > { %9063 = vmatprep.subr.bf16.mxu1 %v10698_v58  ;;  %v10774_v27 = vld [vmem:[#allocation13 + $0x304] ss:$8 sps:$4 sm:$0xff]   ;;  %v10769_v58 = vld [vmem:[#allocation13 + $0x200] ss:$8 sps:$4 sm:$0xff]  }
 0xcc1   : > { %9023 = vmatpush2.bf16.msra.mxu0 %v10700_v0  ;;  %v10777_v0 = vld [vmem:[#allocation13 + $0x2f4] ss:$8 sps:$4 sm:$0xff]  }
 0xcc2   : > { %9064 = vmatpush2.bf16.msra.mxu1 %v10701_v29  ;;  %9024 = vmatprep.subr.bf16.mxu0 %v10702_v28  ;;  %v10775_v29 = vld [vmem:[#allocation13 + $0x2f0] ss:$8 sps:$4 sm:$0xff]  }
 0xcc3   : > { %9065 = vmatprep.subr.bf16.mxu1 %v10704_v25  ;;  %v10778_v28 = vld [vmem:[#allocation13 + $0x3f0] ss:$8 sps:$4 sm:$0xff]   ;;  %v10783_v25 = vld [vmem:[#allocation13 + $0x2e4] ss:$8 sps:$4 sm:$0xff]  }
 0xcc5   : > { %9025 = vmatpush2.bf16.msra.mxu0 %v10706_v37  ;;  %v10781_v37 = vld [vmem:[#allocation13 + $0x2e0] ss:$8 sps:$4 sm:$0xff]  }
 0xcc6   : > { %9066 = vmatpush2.bf16.msra.mxu1 %v10707_v10  ;;  %9026 = vmatprep.subr.bf16.mxu0 %v10708_v7  ;;  %v10789_v10 = vld [vmem:[#allocation13 + $0x2d4] ss:$8 sps:$4 sm:$0xff]  }
 0xcc7   : > { %9067 = vmatprep.subr.bf16.mxu1 %v10710_v43  ;;  %v10792_v7 = vld [vmem:[#allocation13 + $0x3d4] ss:$8 sps:$4 sm:$0xff]   ;;  %v10787_v43 = vld [vmem:[#allocation13 + $0x2d0] ss:$8 sps:$4 sm:$0xff]  }
 0xcc9   : > { %9027 = vmatpush2.bf16.msra.mxu0 %v10712_v8  ;;  %v10798_v8 = vld [vmem:[#allocation13 + $0x3c4] ss:$8 sps:$4 sm:$0xff]  }
 0xcca   : > { %9068 = vmatpush2.bf16.msra.mxu1 %v10713_v19  ;;  %9028 = vmatprep.subr.bf16.mxu0 %v10714_v13  ;;  %v10793_v19 = vld [vmem:[#allocation13 + $0x2c0] ss:$8 sps:$4 sm:$0xff]  }
 0xccb   : > { %9069 = vmatprep.subr.bf16.mxu1 %v10716_v9  ;;  %v10796_v13 = vld [vmem:[#allocation13 + $0x3c0] ss:$8 sps:$4 sm:$0xff]   ;;  %v10801_v9 = vld [vmem:[#allocation13 + $0x2b4] ss:$8 sps:$4 sm:$0xff]  }
 0xccd   : > { %9029 = vmatpush2.bf16.msra.mxu0 %v10718_v3  ;;  %v10804_v3 = vld [vmem:[#allocation13 + $0x3b4] ss:$8 sps:$4 sm:$0xff]  }
 0xcce   : > { %9070 = vmatpush2.bf16.msra.mxu1 %v10719_v15  ;;  %9030 = vmatprep.subr.bf16.mxu0 %v10720_v35  ;;  %v10799_v15 = vld [vmem:[#allocation13 + $0x2b0] ss:$8 sps:$4 sm:$0xff]  }
 0xccf   : > { %9071 = vmatprep.subr.bf16.mxu1 %v10722_v63  ;;  %v10802_v35 = vld [vmem:[#allocation13 + $0x3b0] ss:$8 sps:$4 sm:$0xff]   ;;  %v10807_v63 = vld [vmem:[#allocation13 + $0x2a4] ss:$8 sps:$4 sm:$0xff]  }
 0xcd1   : > { %9031 = vmatpush2.bf16.msra.mxu0 %v10724_v52  ;;  %v10805_v52 = vld [vmem:[#allocation13 + $0x2a0] ss:$8 sps:$4 sm:$0xff]  }
 0xcd2   : > { %9072 = vmatpush2.bf16.msra.mxu1 %v10725_v4  ;;  %9082 = vmatprep.subr.bf16.mxu0 %v10729_v57  ;;  %v10813_v4 = vld [vmem:[#allocation13 + $0x294] ss:$8 sps:$4 sm:$0xff]  }
 0xcd3   : > { %9123 = vmatprep.subr.bf16.mxu1 %v10732_v31  ;;  %v10816_v57 = vld [vmem:[#allocation13 + $0x394] ss:$8 sps:$4 sm:$0xff]   ;;  %v10811_v31 = vld [vmem:[#allocation13 + $0x290] ss:$8 sps:$4 sm:$0xff]  }
 0xcd4   : > { %9033 = vmatmul.mubr.bf16.vlgmr.msra.gmra.mxu0 %v8326_v53  ;;  %v10808_v53 = vld [vmem:[#allocation13 + $0x3a0] ss:$8 sps:$4 sm:$0xff]  }
 0xcd5   : > { %9074 = vmatmul.mubr.bf16.vlgmr.msra.gmra.mxu1 %v8348_v55  ;;  %9083 = vmatpush1.bf16.msra.mxu0 %v10727_v54  ;;  %v10819_v55 = vld [vmem:[#allocation13 + $0x284] ss:$8 sps:$4 sm:$0xff]  }
 0xcd6   : > { %9124 = vmatpush1.bf16.msra.mxu1 %v10730_v38  ;;  %9084 = vmatprep.subr.bf16.mxu0 %v10735_v22  ;;  %v10822_v54 = vld [vmem:[#allocation13 + $0x384] ss:$8 sps:$4 sm:$0xff]   ;;  %v8333_v38 = vrot.slane %v13810_v11, %v13065_v50  ;;  %v10817_v22 = vld [vmem:[#allocation13 + $0x280] ss:$8 sps:$4 sm:$0xff]  }
 0xcd7   : > { %9125 = vmatprep.subr.bf16.mxu1 %v10738_v44  ;;  %9114 = vmatprep.mubr.bf16.mxu0 %v8347_v5  ;;  %v10814_v5 = vld [vmem:[#allocation13 + $0x390] ss:$8 sps:$4 sm:$0xff]   ;;  %v10820_v44 = vld [vmem:[#allocation13 + $0x380] ss:$8 sps:$4 sm:$0xff]  }
 0xcd8   : > { %9155 = vmatprep.mubr.bf16.mxu1 %v8351_v21  ;;  %v8349_v21 = vcombine.high %v8333_v38, %v8333_v38  ;;  %v8281_v11 = vld [vmem:[#allocation14] sm:$0x3] }
 0xcd9   : > { %9085 = vmatpush1.bf16.msra.mxu0 %v10733_v59 }
 0xcda   : > { %9126 = vmatpush1.bf16.msra.mxu1 %v10736_v49  ;;  %9086 = vmatprep.subr.bf16.mxu0 %v10741_v33 }
 0xcdb   : > { %9127 = vmatprep.subr.bf16.mxu1 %v10744_v32 }
 0xcdd   : > { %9087 = vmatpush1.bf16.msra.mxu0 %v10739_v40 }
 0xcde   : > { %9128 = vmatpush1.bf16.msra.mxu1 %v10742_v62  ;;  %9088 = vmatprep.subr.bf16.mxu0 %v10747_v45 }
 0xcdf   : > { %9129 = vmatprep.subr.bf16.mxu1 %v10750_v17 }
 0xce1   : > { %9089 = vmatpush1.bf16.msra.mxu0 %v10745_v14  ;;  %v8282_v14 = vunpack.c.l.bf16 %v8281_v11 }
 0xce2   : > { %9130 = vmatpush1.bf16.msra.mxu1 %v10748_v51  ;;  %9090 = vmatprep.subr.bf16.mxu0 %v10753_v39 }
 0xce3   : > { %9131 = vmatprep.subr.bf16.mxu1 %v10756_v36  ;;  %v8287_v51 = vrot.slane %v8282_v14, %v13360_v41  ;;  %v8291_v39 = vrot.slane %v8282_v14, %v13365_v2 }
 0xce5   : > { %9091 = vmatpush1.bf16.msra.mxu0 %v10751_v42  ;;  %v8297_v36 = vrot.slane %v8287_v51, %v13360_v41  ;;  %v8301_v42 = vrot.slane %v8291_v39, %v13360_v41 }
 0xce6   : > { %9132 = vmatpush1.bf16.msra.mxu1 %v10754_v47  ;;  %9092 = vmatprep.subr.bf16.mxu0 %v10759_v16 }
 0xce7   : > { %9133 = vmatprep.subr.bf16.mxu1 %v10762_v26 }
 0xce9   : > { %9093 = vmatpush1.bf16.msra.mxu0 %v10757_v46 }
 0xcea   : > { %9134 = vmatpush1.bf16.msra.mxu1 %v10760_v24  ;;  %9094 = vmatprep.subr.bf16.mxu0 %v10765_v48 }
 0xceb   : > { %9135 = vmatprep.subr.bf16.mxu1 %v10768_v30 }
 0xced   : > { %9095 = vmatpush1.bf16.msra.mxu0 %v10763_v61 }
 0xcee   : > { %9136 = vmatpush1.bf16.msra.mxu1 %v10766_v20  ;;  %9096 = vmatprep.subr.bf16.mxu0 %v10771_v18 }
 0xcef   : > { %9137 = vmatprep.subr.bf16.mxu1 %v10774_v27 }
 0xcf1   : > { %9097 = vmatpush1.bf16.msra.mxu0 %v10769_v58 }
 0xcf2   : > { %9138 = vmatpush1.bf16.msra.mxu1 %v10772_v34  ;;  %9098 = vmatprep.subr.bf16.mxu0 %v10777_v0 }
 0xcf3   : > { %9139 = vmatprep.subr.bf16.mxu1 %v10780_v56 }
 0xcf5   : > { %9099 = vmatpush2.bf16.msra.mxu0 %v10775_v29 }
 0xcf6   : > { %9140 = vmatpush2.bf16.msra.mxu1 %v10778_v28  ;;  %9100 = vmatprep.subr.bf16.mxu0 %v10783_v25 }
 0xcf7   : > { %9141 = vmatprep.subr.bf16.mxu1 %v10786_v1 }
 0xcf9   : > { %9101 = vmatpush2.bf16.msra.mxu0 %v10781_v37 }
 0xcfa   : > { %9142 = vmatpush2.bf16.msra.mxu1 %v10784_v12  ;;  %9102 = vmatprep.subr.bf16.mxu0 %v10789_v10 }
 0xcfb   : > { %9143 = vmatprep.subr.bf16.mxu1 %v10792_v7 }
 0xcfd   : > { %9103 = vmatpush2.bf16.msra.mxu0 %v10787_v43 }
 0xcfe   : > { %9144 = vmatpush2.bf16.msra.mxu1 %v10790_v23  ;;  %9104 = vmatprep.subr.bf16.mxu0 %v10795_v6 }
 0xcff   : > { %9145 = vmatprep.subr.bf16.mxu1 %v10798_v8 }
 0xd01   : > { %9105 = vmatpush2.bf16.msra.mxu0 %v10793_v19 }
 0xd02   : > { %9146 = vmatpush2.bf16.msra.mxu1 %v10796_v13  ;;  %9106 = vmatprep.subr.bf16.mxu0 %v10801_v9 }
 0xd03   : > { %9147 = vmatprep.subr.bf16.mxu1 %v10804_v3 }
 0xd05   : > { %9107 = vmatpush2.bf16.msra.mxu0 %v10799_v15 }
 0xd06   : > { %9148 = vmatpush2.bf16.msra.mxu1 %v10802_v35  ;;  %9108 = vmatprep.subr.bf16.mxu0 %v10807_v63 }
 0xd07   : > { %9149 = vmatprep.subr.bf16.mxu1 %v10810_v60 }
 0xd09   : > { %9109 = vmatpush2.bf16.msra.mxu0 %v10805_v52 }
 0xd0a   : > { %9150 = vmatpush2.bf16.msra.mxu1 %v10808_v53  ;;  %9110 = vmatprep.subr.bf16.mxu0 %v10813_v4 }
 0xd0b   : > { %9151 = vmatprep.subr.bf16.mxu1 %v10816_v57 }
 0xd0d   : > { %9111 = vmatpush2.bf16.msra.mxu0 %v10811_v31 }
 0xd0e   : > { %9152 = vmatpush2.bf16.msra.mxu1 %v10814_v5  ;;  %9112 = vmatprep.subr.bf16.mxu0 %v10819_v55 }
 0xd0f   : > { %9153 = vmatprep.subr.bf16.mxu1 %v10822_v54 }
 0xd11   : > { %9113 = vmatpush2.bf16.msra.mxu0 %v10817_v22 }
 0xd12   : > { %9154 = vmatpush2.bf16.msra.mxu1 %v10820_v44 }
 0xd14   : > { %9115 = vmatmul.mubr.bf16.vlgmr.msra.gmra.mxu0 %v8333_v38 }
 0xd15   : > { %9156 = vmatmul.mubr.bf16.vlgmr.msra.gmra.mxu1 %v8349_v21 }
 0xd94   : > { %v9034_v59 = vpop.f32.mrf.mxu0 }
 0xd95   : > { %v9075_v49 = vpop.f32.mrf.mxu1  ;;  %v9035_v47 = vadd.f32 %v9034_v59, %v8297_v36 }
 0xd96   : > { %v9036_v33 = vpop.f32.mrf.mxu0 }
 0xd97   : > { %v9077_v32 = vpop.f32.mrf.mxu1  ;;  %v9037_v16 = vadd.f32 %v9036_v33, %v8301_v42  ;;  %v9076_v26 = vadd.f32 %v9075_v49, %v9035_v47 }
 0xd98   : > { %v9038_v40 = vpop.f32.mrf.mxu0 }
 0xd99   : > { %v9079_v62 = vpop.f32.mrf.mxu1  ;;  %v9078_v48 = vadd.f32 %v9077_v32, %v9037_v16 }
 0xd9a   : > { %v9039_v45 = vpop.f32.mrf.mxu0 }
 0xd9b   : > { %v9080_v17 = vpop.f32.mrf.mxu1 }
 0xdd4   : > { %v9116_v46 = vpop.f32.mrf.mxu0 }
 0xdd5   : > { %v9157_v24 = vpop.f32.mrf.mxu1  ;;  %v9117_v30 = vadd.f32 %v9116_v46, %v9076_v26 }
 0xdd6   : > { %v9118_v61 = vpop.f32.mrf.mxu0 }
 0xdd7   : > { %v9159_v20 = vpop.f32.mrf.mxu1  ;;  %v9119_v18 = vadd.f32 %v9118_v61, %v9078_v48  ;;  %v9158_v34 = vadd.f32 %v9157_v24, %v9117_v30 }
 0xdd8   : > { %v9120_v27 = vpop.f32.mrf.mxu0 }
 0xdd9   : > { %v9161_v58 = vpop.f32.mrf.mxu1  ;;  %v9160_v0 = vadd.f32 %v9159_v20, %v9119_v18 }
 0xdda   : > { %v9121_v56 = vpop.f32.mrf.mxu0 }
 0xddb   : > { %v9162_v2 = vpop.f32.mrf.mxu1  ;;  %v10255_v29 = vpack.c.bf16 %v9160_v0, %v9158_v34 }
 0xddd   : > { %v9175_v28 = vrot.slane %v10255_v29, %v13065_v50 }
 0xddf   : > { %10256 = vst.sshfl [vmem:[%s13908_s3] sm:$0x5 pattern:$0x73625140] %v9175_v28 }
 0xde0 PF: > { %p34_p10 = scmp.ge.s32.totalorder %s11377_s25, 7   ;;  %s13909_s27 = smov %s11135_s28 }
 0xde1   : > { %s13910_s28 = smov %s11139_s29  ;;  %s13911_s29 = smov %s11388_s23 }
 0xde2   : > { %s13912_s30 = smov %s11377_s25  ;;  %36 = sbr.rel (!%p34_p10) target bundleno = 18 (0x12), region = 201 }
 0xde7   :  { %9202 = vsyncpa [#allocation4], 1 }
 0xde8   :  { %9204 = vsyncpa [#allocation4 + $0x1], 1 }
 0xde9   :  { %9205 = vsyncpa [#allocation6], 1 }
 0xdea   :  { %9206 = vsyncpa [#allocation9], 1 }
 0xdeb   :  { %9207 = vsyncpa [#allocation12], 1 }
 0xdec   :  { %9209 = vsyncpa [#allocation12 + $0x1], 1 }
 0xded   :  { %9210 = vsyncpa [#allocation15], 1 }
 0xdee   :  { %9211 = vsyncpa [#allocation18], 1 }

</bundles_post_ra>
